<compile_context>
chip_gen: v7x
topology: tpu7x:2x2x1
jax: 0.10.0
libtpu: 0.0.40
codegen_flags: <defaults>
</compile_context>

<pallas_src>
import functools
import numpy as np
import jax
import jax.numpy as jnp
from jax.experimental import pallas as pl
from jax.experimental.pallas import tpu as pltpu

CPAD = 128  # lane-dense channel padding carried through the whole network


# ----------------------------------------------------------- activation prep -
def _prep_conv_input(a, stride):
    """Pad spatially by 1 and (for stride 2) phase-decompose so every 3x3 tap is a
    unit-stride slice inside the kernel.  Returns (N, PH, PW, Hq, Wq, C) bf16."""
    N, H, W, C = a.shape
    ap = jnp.pad(a, ((0, 0), (1, 1), (1, 1), (0, 0)))
    if stride == 1:
        out = ap[:, None, None]                              # (N,1,1,H+2,W+2,C)
    else:
        assert H % 2 == 0 and W % 2 == 0
        Hp, Wp = H + 2, W + 2
        out = ap.reshape(N, Hp // 2, 2, Wp // 2, 2, C).transpose(0, 2, 4, 1, 3, 5)
    return out.astype(jnp.bfloat16)


# ---------------------------------------------------------- fused conv kernel -
def _conv_kernel_factory(stride, Wout, mode, final_relu):
    """mode: 'bn_relu' (conv1 + bn2 + relu epilogue),
             'res_conv' (conv2 + 1x1-shortcut matmul residual),
             'res_id'   (conv2 + identity residual)."""
    def kernel(*refs):
        it = iter(refs)
        prep_ref = next(it)
        w_ref = next(it)
        b_ref = next(it)
        if mode == "bn_relu":
            s_ref = next(it); t_ref = next(it)
        elif mode == "res_conv":
            xsc_ref = next(it); wsc_ref = next(it); bsc_ref = next(it)
        elif mode == "res_id":
            res_ref = next(it)
        o_ref = next(it)

        oh = pl.program_id(1)
        cout = o_ref.shape[-1]
        acc = jnp.zeros((Wout, cout), jnp.float32)
        # 9-tap reduction, fully in-register (K = 9 * 128), MXU bf16 -> f32.
        for kh in range(3):
            for kw in range(3):
                if stride == 2:
                    ph, pw, dh, dw = kh % 2, kw % 2, kh // 2, kw // 2
                else:
                    ph, pw, dh, dw = 0, 0, kh, kw
                a_tap = prep_ref[0, ph, pw, oh + dh, pl.ds(dw, Wout), :]   # (Wout, Cin)
                acc = acc + jnp.dot(a_tap, w_ref[kh, kw],
                                    preferred_element_type=jnp.float32)
        # Epilogue (applied exactly once, in f32).
        acc = acc + b_ref[...]
        if mode == "bn_relu":
            acc = jnp.maximum(acc * s_ref[...] + t_ref[...], 0.0)
        elif mode == "res_conv":
            acc = acc + jnp.dot(xsc_ref[0, 0], wsc_ref[...],
                                preferred_element_type=jnp.float32) + bsc_ref[...]
        elif mode == "res_id":
            acc = acc + res_ref[0, 0].astype(jnp.float32)
        if final_relu:
            acc = jnp.maximum(acc, 0.0)
        o_ref[0, 0] = acc.astype(o_ref.dtype)
    return kernel


def fused_conv3x3(prep, w, b, *, stride, Hout, Wout, mode,
                  bn_scale=None, bn_shift=None,
                  xsc=None, wsc=None, bsc=None, res=None,
                  final_relu=False, out_dtype=jnp.bfloat16):
    N = prep.shape[0]
    Cin = w.shape[-2]
    Cout = w.shape[-1]

    args = [prep, w.astype(jnp.bfloat16), b.reshape(1, Cout)]
    in_specs = [
        pl.BlockSpec((1,) + tuple(prep.shape[1:]),
                     lambda n, oh: (n, 0, 0, 0, 0, 0)),
        pl.BlockSpec(tuple(w.shape), lambda n, oh: (0, 0, 0, 0)),
        pl.BlockSpec((1, Cout), lambda n, oh: (0, 0)),
    ]
    flops = 2 * N * Hout * Wout * 9 * Cin * Cout
    if mode == "bn_relu":
        args += [bn_scale.reshape(1, Cout), bn_shift.reshape(1, Cout)]
        in_specs += [pl.BlockSpec((1, Cout), lambda n, oh: (0, 0)),
                     pl.BlockSpec((1, Cout), lambda n, oh: (0, 0))]
    elif mode == "res_conv":
        args += [xsc.astype(jnp.bfloat16), wsc.astype(jnp.bfloat16),
                 bsc.reshape(1, Cout)]
        in_specs += [
            pl.BlockSpec((1, 1, Wout, xsc.shape[-1]), lambda n, oh: (n, oh, 0, 0)),
            pl.BlockSpec(tuple(wsc.shape), lambda n, oh: (0, 0)),
            pl.BlockSpec((1, Cout), lambda n, oh: (0, 0)),
        ]
        flops += 2 * N * Hout * Wout * wsc.shape[0] * Cout
    elif mode == "res_id":
        args += [res.astype(jnp.bfloat16)]
        in_specs += [pl.BlockSpec((1, 1, Wout, Cout), lambda n, oh: (n, oh, 0, 0))]
    else:
        raise ValueError(mode)

    out_shape = jax.ShapeDtypeStruct((N, Hout, Wout, Cout), out_dtype)
    bytes_accessed = int(sum(int(a.size) * a.dtype.itemsize for a in args)
                         + N * Hout * Wout * Cout * np.dtype(out_dtype).itemsize)

    return pl.pallas_call(
        _conv_kernel_factory(stride, Wout, mode, final_relu),
        grid=(N, Hout),
        out_shape=out_shape,
        in_specs=in_specs,
        out_specs=pl.BlockSpec((1, 1, Wout, Cout), lambda n, oh: (n, oh, 0, 0)),
        compiler_params=pltpu.CompilerParams(
            dimension_semantics=("parallel", "parallel"),
            vmem_limit_bytes=32 * 1024 * 1024),
        cost_estimate=pl.CostEstimate(flops=int(flops), transcendentals=0,
                                      bytes_accessed=bytes_accessed),
    )(*args)


# --------------------------------------------------------- global average pool -
def _pool_kernel(x_ref, o_ref):
    o_ref[0] = jnp.mean(x_ref[0].astype(jnp.float32), axis=0, keepdims=True)


def global_avg_pool(x):
    """x: (N, H, W, C) -> (N, C) f32 mean over spatial (relu is fused upstream)."""
    N, H, W, C = x.shape
    xf = x.reshape(N, H * W, C)
    out = pl.pallas_call(
        _pool_kernel,
        grid=(N,),
        out_shape=jax.ShapeDtypeStruct((N, 1, C), jnp.float32),
        in_specs=[pl.BlockSpec((1, H * W, C), lambda n: (n, 0, 0))],
        out_specs=pl.BlockSpec((1, 1, C), lambda n: (n, 0, 0)),
        compiler_params=pltpu.CompilerParams(
            dimension_semantics=("parallel",)),
    )(xf)
    return out.reshape(N, C)


# ------------------------------------------------------------------ res blocks -
def res_block(x, p, final_relu=False):
    """x: (N, H, W, CPAD) raw block input (bf16/f32)."""
    stride = p["stride"]
    N, H, W, _ = x.shape
    Hout, Wout = H // stride, W // stride

    # Pre-activation bn1+relu (skipped in the first block). This elementwise op is
    # fused by XLA into the unavoidable pad/phase-split layout transform — no extra
    # HBM roundtrip (replaces the old standalone bn_relu kernel).
    if p["first"]:
        a = x
    else:
        a = jnp.maximum(x.astype(jnp.float32) * p["bn1_scale"] + p["bn1_shift"], 0.0)

    prep1 = _prep_conv_input(a, stride)
    h = fused_conv3x3(prep1, p["w1"], p["b1"], stride=stride, Hout=Hout, Wout=Wout,
                      mode="bn_relu", bn_scale=p["bn2_scale"], bn_shift=p["bn2_shift"])

    prep2 = _prep_conv_input(h, 1)
    if p["wsc"] is not None:
        # 1x1 stride-s shortcut fused into the conv2 kernel as a second matmul.
        xsc = x[:, ::stride, ::stride, :]
        out = fused_conv3x3(prep2, p["w2"], p["b2"], stride=1, Hout=Hout, Wout=Wout,
                            mode="res_conv", xsc=xsc, wsc=p["wsc"], bsc=p["bsc"],
                            final_relu=final_relu)
    else:
        out = fused_conv3x3(prep2, p["w2"], p["b2"], stride=1, Hout=Hout, Wout=Wout,
                            mode="res_id", res=x,
                            final_relu=final_relu)
    return out


def resnet_base_embed(params, x_nchw, nf):
    x = jnp.transpose(x_nchw, (0, 2, 3, 1))                  # NCHW -> NHWC
    x = jnp.pad(x, ((0, 0), (0, 0), (0, 0), (0, CPAD - x.shape[-1])))
    n_blocks = len(params)
    for i, p in enumerate(params):
        # Final network-level relu is fused into rb5's conv2 epilogue.
        x = res_block(x, p, final_relu=(i == n_blocks - 1))
    pooled = global_avg_pool(x)                               # (N, CPAD) f32
    return pooled[:, : nf * 8]                                # unpad == x.view(-1, C)


# ------------------------------------------------------------------ parameters -
def init_resnet_base_params(key, nf, input_nc=3):
    def conv_p(k, ks, cin, cout):
        kw_, kb_ = jax.random.split(k)
        w = jax.random.normal(kw_, (ks, ks, cin, cout), jnp.float32) / np.sqrt(ks * ks * cin)
        b = 0.01 * jax.random.normal(kb_, (cout,), jnp.float32)
        wp = jnp.zeros((ks, ks, CPAD, CPAD), jnp.float32).at[:, :, :cin, :cout].set(w)
        bp = jnp.zeros((CPAD,), jnp.float32).at[:cout].set(b)
        return wp, bp

    def bn_p(k, c, eps=1e-5):
        k1, k2, k3, k4 = jax.random.split(k, 4)
        gamma = 1.0 + 0.1 * jax.random.normal(k1, (c,), jnp.float32)
        beta = 0.1 * jax.random.normal(k2, (c,), jnp.float32)
        mean = 0.1 * jax.random.normal(k3, (c,), jnp.float32)
        var = 1.0 + 0.1 * jax.random.uniform(k4, (c,), jnp.float32)
        scale = gamma / jnp.sqrt(var + eps)
        shift = beta - mean * scale
        # padded channels get scale=shift=0 so they stay exactly zero
        sp = jnp.zeros((CPAD,), jnp.float32).at[:c].set(scale)
        tp = jnp.zeros((CPAD,), jnp.float32).at[:c].set(shift)
        return sp, tp

    cfgs = [
        dict(cin=input_nc, cout=nf,     stride=2, first=True),   # rb1 (FirstResBlock)
        dict(cin=nf,       cout=nf * 2, stride=2, first=False),  # rb2
        dict(cin=nf * 2,   cout=nf * 4, stride=2, first=False),  # rb3
        dict(cin=nf * 4,   cout=nf * 8, stride=2, first=False),  # rb4
        dict(cin=nf * 8,   cout=nf * 8, stride=1, first=False),  # rb5
    ]
    params = []
    for cfg, bk in zip(cfgs, jax.random.split(key, len(cfgs))):
        ks = jax.random.split(bk, 6)
        p = dict(cfg)
        p["w1"], p["b1"] = conv_p(ks[0], 3, cfg["cin"], cfg["cout"])
        p["w2"], p["b2"] = conv_p(ks[1], 3, cfg["cout"], cfg["cout"])
        p["bn2_scale"], p["bn2_shift"] = bn_p(ks[2], cfg["cout"])
        if not cfg["first"]:
            p["bn1_scale"], p["bn1_shift"] = bn_p(ks[3], cfg["cin"])
        if cfg["stride"] != 1 or cfg["cin"] != cfg["cout"]:
            wsc, bsc = conv_p(ks[4], 1, cfg["cin"], cfg["cout"])
            p["wsc"] = wsc.reshape(CPAD, CPAD)   # 1x1 conv stored as a matmul weight
            p["bsc"] = bsc
        else:
            p["wsc"] = None
            p["bsc"] = None
        params.append(p)
    return params


# ------------------------------------------------------------------------ main -
if __name__ == "__main__":
    key = jax.random.PRNGKey(0)
    k_param, k_x = jax.random.split(key)
    nf, input_nc = 4, 3
    params = init_resnet_base_params(k_param, nf, input_nc)

    # Same axis convention as PyTorch: NCHW input.
    x = jax.random.normal(k_x, (2, input_nc, 16, 16), jnp.float32)

    emb = jax.jit(functools.partial(resnet_base_embed, params, nf=nf))(x)
    emb = jax.block_until_ready(emb)
    assert emb.shape == (2, nf * 8), emb.shape
    assert emb.dtype == jnp.float32
    assert bool(jnp.all(jnp.isfinite(emb)))
    print("KERNEL_OK")
</pallas_src>

<mosaic_0001>
module attributes {stable_mosaic.version = 11 : i64} {
  func.func @kernel(%arg0: i32, %arg1: i32, %arg2: memref<1x2x2x9x9x128xbf16, #tpu.memory_space<vmem>>, %arg3: memref<3x3x128x128xbf16, #tpu.memory_space<vmem>>, %arg4: memref<1x128xf32, #tpu.memory_space<vmem>>, %arg5: memref<1x128xf32, #tpu.memory_space<vmem>>, %arg6: memref<1x128xf32, #tpu.memory_space<vmem>>, %arg7: memref<1x1x8x128xbf16, #tpu.memory_space<vmem>>) attributes {dimension_semantics = [#tpu.dimension_semantics<parallel>, #tpu.dimension_semantics<parallel>], iteration_bounds = array<i64: 2, 8>, scalar_prefetch = 0 : i64, scratch_operands = 0 : i64, tpu.core_type = #tpu.core_type<tc>, window_params = [{transform_indices = @transform_0, window_bounds = array<i64: 1, 2, 2, 9, 9, 128>}, {pipeline_mode = #tpu.pipeline_mode<synchronous>, transform_indices = @transform_1, window_bounds = array<i64: 3, 3, 128, 128>}, {pipeline_mode = #tpu.pipeline_mode<synchronous>, transform_indices = @transform_2, window_bounds = array<i64: 1, 128>}, {pipeline_mode = #tpu.pipeline_mode<synchronous>, transform_indices = @transform_3, window_bounds = array<i64: 1, 128>}, {pipeline_mode = #tpu.pipeline_mode<synchronous>, transform_indices = @transform_4, window_bounds = array<i64: 1, 128>}, {transform_indices = @transform_5, window_bounds = array<i64: 1, 1, 8, 128>}]} {
    %cst = arith.constant 0.000000e+00 : f32
    %0 = vector.broadcast %cst : f32 to vector<8x128xf32>
    %c0_i32 = arith.constant 0 : i32
    %1 = arith.addi %arg1, %c0_i32 : i32
    %c0 = arith.constant 0 : index
    %c0_0 = arith.constant 0 : index
    %c0_1 = arith.constant 0 : index
    %2 = arith.index_cast %1 : i32 to index
    %c0_2 = arith.constant 0 : index
    %c0_3 = arith.constant 0 : index
    %3 = vector.load %arg2[%c0, %c0_0, %c0_1, %2, %c0_2, %c0_3] : memref<1x2x2x9x9x128xbf16, #tpu.memory_space<vmem>>, vector<1x1x1x1x8x128xbf16>
    %4 = vector.shape_cast %3 : vector<1x1x1x1x8x128xbf16> to vector<8x128xbf16>
    %c0_4 = arith.constant 0 : index
    %c0_5 = arith.constant 0 : index
    %c0_6 = arith.constant 0 : index
    %c0_7 = arith.constant 0 : index
    %5 = vector.load %arg3[%c0_4, %c0_5, %c0_6, %c0_7] : memref<3x3x128x128xbf16, #tpu.memory_space<vmem>>, vector<1x1x128x128xbf16>
    %6 = vector.shape_cast %5 : vector<1x1x128x128xbf16> to vector<128x128xbf16>
    %cst_8 = arith.constant dense<0.000000e+00> : vector<8x128xf32>
    %7 = tpu.matmul %4, %6, %cst_8 {dimension_numbers = #tpu.dot_dimension_numbers<[1], [0], [0], [1], [0, 0, 1, 1], [], []>} : vector<8x128xbf16>, vector<128x128xbf16>, vector<8x128xf32> -> vector<8x128xf32>
    %8 = arith.addf %0, %7 : vector<8x128xf32>
    %c0_i32_9 = arith.constant 0 : i32
    %9 = arith.addi %arg1, %c0_i32_9 : i32
    %c0_10 = arith.constant 0 : index
    %c0_11 = arith.constant 0 : index
    %c1 = arith.constant 1 : index
    %10 = arith.index_cast %9 : i32 to index
    %c0_12 = arith.constant 0 : index
    %c0_13 = arith.constant 0 : index
    %11 = vector.load %arg2[%c0_10, %c0_11, %c1, %10, %c0_12, %c0_13] : memref<1x2x2x9x9x128xbf16, #tpu.memory_space<vmem>>, vector<1x1x1x1x8x128xbf16>
    %12 = vector.shape_cast %11 : vector<1x1x1x1x8x128xbf16> to vector<8x128xbf16>
    %c0_14 = arith.constant 0 : index
    %c1_15 = arith.constant 1 : index
    %c0_16 = arith.constant 0 : index
    %c0_17 = arith.constant 0 : index
    %13 = vector.load %arg3[%c0_14, %c1_15, %c0_16, %c0_17] : memref<3x3x128x128xbf16, #tpu.memory_space<vmem>>, vector<1x1x128x128xbf16>
    %14 = vector.shape_cast %13 : vector<1x1x128x128xbf16> to vector<128x128xbf16>
    %cst_18 = arith.constant dense<0.000000e+00> : vector<8x128xf32>
    %15 = tpu.matmul %12, %14, %cst_18 {dimension_numbers = #tpu.dot_dimension_numbers<[1], [0], [0], [1], [0, 0, 1, 1], [], []>} : vector<8x128xbf16>, vector<128x128xbf16>, vector<8x128xf32> -> vector<8x128xf32>
    %16 = arith.addf %8, %15 : vector<8x128xf32>
    %c0_i32_19 = arith.constant 0 : i32
    %17 = arith.addi %arg1, %c0_i32_19 : i32
    %c0_20 = arith.constant 0 : index
    %c0_21 = arith.constant 0 : index
    %c0_22 = arith.constant 0 : index
    %18 = arith.index_cast %17 : i32 to index
    %c1_23 = arith.constant 1 : index
    %c0_24 = arith.constant 0 : index
    %19 = vector.load %arg2[%c0_20, %c0_21, %c0_22, %18, %c1_23, %c0_24] : memref<1x2x2x9x9x128xbf16, #tpu.memory_space<vmem>>, vector<1x1x1x1x8x128xbf16>
    %20 = vector.shape_cast %19 : vector<1x1x1x1x8x128xbf16> to vector<8x128xbf16>
    %c0_25 = arith.constant 0 : index
    %c2 = arith.constant 2 : index
    %c0_26 = arith.constant 0 : index
    %c0_27 = arith.constant 0 : index
    %21 = vector.load %arg3[%c0_25, %c2, %c0_26, %c0_27] : memref<3x3x128x128xbf16, #tpu.memory_space<vmem>>, vector<1x1x128x128xbf16>
    %22 = vector.shape_cast %21 : vector<1x1x128x128xbf16> to vector<128x128xbf16>
    %cst_28 = arith.constant dense<0.000000e+00> : vector<8x128xf32>
    %23 = tpu.matmul %20, %22, %cst_28 {dimension_numbers = #tpu.dot_dimension_numbers<[1], [0], [0], [1], [0, 0, 1, 1], [], []>} : vector<8x128xbf16>, vector<128x128xbf16>, vector<8x128xf32> -> vector<8x128xf32>
    %24 = arith.addf %16, %23 : vector<8x128xf32>
    %c0_i32_29 = arith.constant 0 : i32
    %25 = arith.addi %arg1, %c0_i32_29 : i32
    %c0_30 = arith.constant 0 : index
    %c1_31 = arith.constant 1 : index
    %c0_32 = arith.constant 0 : index
    %26 = arith.index_cast %25 : i32 to index
    %c0_33 = arith.constant 0 : index
    %c0_34 = arith.constant 0 : index
    %27 = vector.load %arg2[%c0_30, %c1_31, %c0_32, %26, %c0_33, %c0_34] : memref<1x2x2x9x9x128xbf16, #tpu.memory_space<vmem>>, vector<1x1x1x1x8x128xbf16>
    %28 = vector.shape_cast %27 : vector<1x1x1x1x8x128xbf16> to vector<8x128xbf16>
    %c1_35 = arith.constant 1 : index
    %c0_36 = arith.constant 0 : index
    %c0_37 = arith.constant 0 : index
    %c0_38 = arith.constant 0 : index
    %29 = vector.load %arg3[%c1_35, %c0_36, %c0_37, %c0_38] : memref<3x3x128x128xbf16, #tpu.memory_space<vmem>>, vector<1x1x128x128xbf16>
    %30 = vector.shape_cast %29 : vector<1x1x128x128xbf16> to vector<128x128xbf16>
    %cst_39 = arith.constant dense<0.000000e+00> : vector<8x128xf32>
    %31 = tpu.matmul %28, %30, %cst_39 {dimension_numbers = #tpu.dot_dimension_numbers<[1], [0], [0], [1], [0, 0, 1, 1], [], []>} : vector<8x128xbf16>, vector<128x128xbf16>, vector<8x128xf32> -> vector<8x128xf32>
    %32 = arith.addf %24, %31 : vector<8x128xf32>
    %c0_i32_40 = arith.constant 0 : i32
    %33 = arith.addi %arg1, %c0_i32_40 : i32
    %c0_41 = arith.constant 0 : index
    %c1_42 = arith.constant 1 : index
    %c1_43 = arith.constant 1 : index
    %34 = arith.index_cast %33 : i32 to index
    %c0_44 = arith.constant 0 : index
    %c0_45 = arith.constant 0 : index
    %35 = vector.load %arg2[%c0_41, %c1_42, %c1_43, %34, %c0_44, %c0_45] : memref<1x2x2x9x9x128xbf16, #tpu.memory_space<vmem>>, vector<1x1x1x1x8x128xbf16>
    %36 = vector.shape_cast %35 : vector<1x1x1x1x8x128xbf16> to vector<8x128xbf16>
    %c1_46 = arith.constant 1 : index
    %c1_47 = arith.constant 1 : index
    %c0_48 = arith.constant 0 : index
    %c0_49 = arith.constant 0 : index
    %37 = vector.load %arg3[%c1_46, %c1_47, %c0_48, %c0_49] : memref<3x3x128x128xbf16, #tpu.memory_space<vmem>>, vector<1x1x128x128xbf16>
    %38 = vector.shape_cast %37 : vector<1x1x128x128xbf16> to vector<128x128xbf16>
    %cst_50 = arith.constant dense<0.000000e+00> : vector<8x128xf32>
    %39 = tpu.matmul %36, %38, %cst_50 {dimension_numbers = #tpu.dot_dimension_numbers<[1], [0], [0], [1], [0, 0, 1, 1], [], []>} : vector<8x128xbf16>, vector<128x128xbf16>, vector<8x128xf32> -> vector<8x128xf32>
    %40 = arith.addf %32, %39 : vector<8x128xf32>
    %c0_i32_51 = arith.constant 0 : i32
    %41 = arith.addi %arg1, %c0_i32_51 : i32
    %c0_52 = arith.constant 0 : index
    %c1_53 = arith.constant 1 : index
    %c0_54 = arith.constant 0 : index
    %42 = arith.index_cast %41 : i32 to index
    %c1_55 = arith.constant 1 : index
    %c0_56 = arith.constant 0 : index
    %43 = vector.load %arg2[%c0_52, %c1_53, %c0_54, %42, %c1_55, %c0_56] : memref<1x2x2x9x9x128xbf16, #tpu.memory_space<vmem>>, vector<1x1x1x1x8x128xbf16>
    %44 = vector.shape_cast %43 : vector<1x1x1x1x8x128xbf16> to vector<8x128xbf16>
    %c1_57 = arith.constant 1 : index
    %c2_58 = arith.constant 2 : index
    %c0_59 = arith.constant 0 : index
    %c0_60 = arith.constant 0 : index
    %45 = vector.load %arg3[%c1_57, %c2_58, %c0_59, %c0_60] : memref<3x3x128x128xbf16, #tpu.memory_space<vmem>>, vector<1x1x128x128xbf16>
    %46 = vector.shape_cast %45 : vector<1x1x128x128xbf16> to vector<128x128xbf16>
    %cst_61 = arith.constant dense<0.000000e+00> : vector<8x128xf32>
    %47 = tpu.matmul %44, %46, %cst_61 {dimension_numbers = #tpu.dot_dimension_numbers<[1], [0], [0], [1], [0, 0, 1, 1], [], []>} : vector<8x128xbf16>, vector<128x128xbf16>, vector<8x128xf32> -> vector<8x128xf32>
    %48 = arith.addf %40, %47 : vector<8x128xf32>
    %c1_i32 = arith.constant 1 : i32
    %49 = arith.addi %arg1, %c1_i32 : i32
    %c0_62 = arith.constant 0 : index
    %c0_63 = arith.constant 0 : index
    %c0_64 = arith.constant 0 : index
    %50 = arith.index_cast %49 : i32 to index
    %c0_65 = arith.constant 0 : index
    %c0_66 = arith.constant 0 : index
    %51 = vector.load %arg2[%c0_62, %c0_63, %c0_64, %50, %c0_65, %c0_66] : memref<1x2x2x9x9x128xbf16, #tpu.memory_space<vmem>>, vector<1x1x1x1x8x128xbf16>
    %52 = vector.shape_cast %51 : vector<1x1x1x1x8x128xbf16> to vector<8x128xbf16>
    %c2_67 = arith.constant 2 : index
    %c0_68 = arith.constant 0 : index
    %c0_69 = arith.constant 0 : index
    %c0_70 = arith.constant 0 : index
    %53 = vector.load %arg3[%c2_67, %c0_68, %c0_69, %c0_70] : memref<3x3x128x128xbf16, #tpu.memory_space<vmem>>, vector<1x1x128x128xbf16>
    %54 = vector.shape_cast %53 : vector<1x1x128x128xbf16> to vector<128x128xbf16>
    %cst_71 = arith.constant dense<0.000000e+00> : vector<8x128xf32>
    %55 = tpu.matmul %52, %54, %cst_71 {dimension_numbers = #tpu.dot_dimension_numbers<[1], [0], [0], [1], [0, 0, 1, 1], [], []>} : vector<8x128xbf16>, vector<128x128xbf16>, vector<8x128xf32> -> vector<8x128xf32>
    %56 = arith.addf %48, %55 : vector<8x128xf32>
    %c1_i32_72 = arith.constant 1 : i32
    %57 = arith.addi %arg1, %c1_i32_72 : i32
    %c0_73 = arith.constant 0 : index
    %c0_74 = arith.constant 0 : index
    %c1_75 = arith.constant 1 : index
    %58 = arith.index_cast %57 : i32 to index
    %c0_76 = arith.constant 0 : index
    %c0_77 = arith.constant 0 : index
    %59 = vector.load %arg2[%c0_73, %c0_74, %c1_75, %58, %c0_76, %c0_77] : memref<1x2x2x9x9x128xbf16, #tpu.memory_space<vmem>>, vector<1x1x1x1x8x128xbf16>
    %60 = vector.shape_cast %59 : vector<1x1x1x1x8x128xbf16> to vector<8x128xbf16>
    %c2_78 = arith.constant 2 : index
    %c1_79 = arith.constant 1 : index
    %c0_80 = arith.constant 0 : index
    %c0_81 = arith.constant 0 : index
    %61 = vector.load %arg3[%c2_78, %c1_79, %c0_80, %c0_81] : memref<3x3x128x128xbf16, #tpu.memory_space<vmem>>, vector<1x1x128x128xbf16>
    %62 = vector.shape_cast %61 : vector<1x1x128x128xbf16> to vector<128x128xbf16>
    %cst_82 = arith.constant dense<0.000000e+00> : vector<8x128xf32>
    %63 = tpu.matmul %60, %62, %cst_82 {dimension_numbers = #tpu.dot_dimension_numbers<[1], [0], [0], [1], [0, 0, 1, 1], [], []>} : vector<8x128xbf16>, vector<128x128xbf16>, vector<8x128xf32> -> vector<8x128xf32>
    %64 = arith.addf %56, %63 : vector<8x128xf32>
    %c1_i32_83 = arith.constant 1 : i32
    %65 = arith.addi %arg1, %c1_i32_83 : i32
    %c0_84 = arith.constant 0 : index
    %c0_85 = arith.constant 0 : index
    %c0_86 = arith.constant 0 : index
    %66 = arith.index_cast %65 : i32 to index
    %c1_87 = arith.constant 1 : index
    %c0_88 = arith.constant 0 : index
    %67 = vector.load %arg2[%c0_84, %c0_85, %c0_86, %66, %c1_87, %c0_88] : memref<1x2x2x9x9x128xbf16, #tpu.memory_space<vmem>>, vector<1x1x1x1x8x128xbf16>
    %68 = vector.shape_cast %67 : vector<1x1x1x1x8x128xbf16> to vector<8x128xbf16>
    %c2_89 = arith.constant 2 : index
    %c2_90 = arith.constant 2 : index
    %c0_91 = arith.constant 0 : index
    %c0_92 = arith.constant 0 : index
    %69 = vector.load %arg3[%c2_89, %c2_90, %c0_91, %c0_92] : memref<3x3x128x128xbf16, #tpu.memory_space<vmem>>, vector<1x1x128x128xbf16>
    %70 = vector.shape_cast %69 : vector<1x1x128x128xbf16> to vector<128x128xbf16>
    %cst_93 = arith.constant dense<0.000000e+00> : vector<8x128xf32>
    %71 = tpu.matmul %68, %70, %cst_93 {dimension_numbers = #tpu.dot_dimension_numbers<[1], [0], [0], [1], [0, 0, 1, 1], [], []>} : vector<8x128xbf16>, vector<128x128xbf16>, vector<8x128xf32> -> vector<8x128xf32>
    %72 = arith.addf %64, %71 : vector<8x128xf32>
    %c0_94 = arith.constant 0 : index
    %c0_95 = arith.constant 0 : index
    %73 = vector.load %arg4[%c0_94, %c0_95] : memref<1x128xf32, #tpu.memory_space<vmem>>, vector<1x128xf32>
    %74 = vector.broadcast %73 : vector<1x128xf32> to vector<8x128xf32>
    %75 = arith.addf %72, %74 : vector<8x128xf32>
    %c0_96 = arith.constant 0 : index
    %c0_97 = arith.constant 0 : index
    %76 = vector.load %arg5[%c0_96, %c0_97] : memref<1x128xf32, #tpu.memory_space<vmem>>, vector<1x128xf32>
    %77 = vector.broadcast %76 : vector<1x128xf32> to vector<8x128xf32>
    %78 = arith.mulf %75, %77 : vector<8x128xf32>
    %c0_98 = arith.constant 0 : index
    %c0_99 = arith.constant 0 : index
    %79 = vector.load %arg6[%c0_98, %c0_99] : memref<1x128xf32, #tpu.memory_space<vmem>>, vector<1x128xf32>
    %80 = vector.broadcast %79 : vector<1x128xf32> to vector<8x128xf32>
    %81 = arith.addf %78, %80 : vector<8x128xf32>
    %cst_100 = arith.constant 0.000000e+00 : f32
    %82 = vector.broadcast %cst_100 : f32 to vector<8x128xf32>
    %83 = arith.maximumf %81, %82 : vector<8x128xf32>
    %84 = arith.truncf %83 : vector<8x128xf32> to vector<8x128xbf16>
    %c0_101 = arith.constant 0 : index
    %c0_102 = arith.constant 0 : index
    %c0_103 = arith.constant 0 : index
    %c0_104 = arith.constant 0 : index
    %85 = vector.load %arg7[%c0_101, %c0_102, %c0_103, %c0_104] : memref<1x1x8x128xbf16, #tpu.memory_space<vmem>>, vector<1x1x8x128xbf16>
    %86 = vector.shape_cast %85 : vector<1x1x8x128xbf16> to vector<8x128xbf16>
    %87 = vector.shape_cast %84 : vector<8x128xbf16> to vector<1x1x8x128xbf16>
    tpu.vector_store %arg7[%c0_101, %c0_102, %c0_103, %c0_104], %87 {strides = array<i32>} : memref<1x1x8x128xbf16, #tpu.memory_space<vmem>>, vector<1x1x8x128xbf16>,
    return
  }
  func.func @transform_0(%arg0: i32, %arg1: i32) -> (i32, i32, i32, i32, i32, i32) {
    %c0_i32 = arith.constant 0 : i32
    %c0_i32_0 = arith.constant 0 : i32
    %c0_i32_1 = arith.constant 0 : i32
    %c0_i32_2 = arith.constant 0 : i32
    %c0_i32_3 = arith.constant 0 : i32
    %c0_i32_4 = arith.constant 0 : i32
    return %arg0, %c0_i32, %c0_i32_0, %c0_i32_1, %c0_i32_2, %c0_i32_3 : i32, i32, i32, i32, i32, i32
  }
  func.func @transform_1(%arg0: i32, %arg1: i32) -> (i32, i32, i32, i32) {
    %c0_i32 = arith.constant 0 : i32
    %c0_i32_0 = arith.constant 0 : i32
    %c0_i32_1 = arith.constant 0 : i32
    %c0_i32_2 = arith.constant 0 : i32
    %c0_i32_3 = arith.constant 0 : i32
    return %c0_i32, %c0_i32_0, %c0_i32_1, %c0_i32_2 : i32, i32, i32, i32
  }
  func.func @transform_2(%arg0: i32, %arg1: i32) -> (i32, i32) {
    %c0_i32 = arith.constant 0 : i32
    %c0_i32_0 = arith.constant 0 : i32
    %c0_i32_1 = arith.constant 0 : i32
    return %c0_i32, %c0_i32_0 : i32, i32
  }
  func.func @transform_3(%arg0: i32, %arg1: i32) -> (i32, i32) {
    %c0_i32 = arith.constant 0 : i32
    %c0_i32_0 = arith.constant 0 : i32
    %c0_i32_1 = arith.constant 0 : i32
    return %c0_i32, %c0_i32_0 : i32, i32
  }
  func.func @transform_4(%arg0: i32, %arg1: i32) -> (i32, i32) {
    %c0_i32 = arith.constant 0 : i32
    %c0_i32_0 = arith.constant 0 : i32
    %c0_i32_1 = arith.constant 0 : i32
    return %c0_i32, %c0_i32_0 : i32, i32
  }
  func.func @transform_5(%arg0: i32, %arg1: i32) -> (i32, i32, i32, i32) {
    %c0_i32 = arith.constant 0 : i32
    %c0_i32_0 = arith.constant 0 : i32
    %c0_i32_1 = arith.constant 0 : i32
    return %arg0, %arg1, %c0_i32, %c0_i32_0 : i32, i32, i32, i32
  }
}

module attributes {stable_mosaic.version = 11 : i64} {
  func.func @kernel(%arg0: i32, %arg1: i32, %arg2: memref<1x1x1x10x10x128xbf16, #tpu.memory_space<vmem>>, %arg3: memref<3x3x128x128xbf16, #tpu.memory_space<vmem>>, %arg4: memref<1x128xf32, #tpu.memory_space<vmem>>, %arg5: memref<1x1x8x128xbf16, #tpu.memory_space<vmem>>, %arg6: memref<128x128xbf16, #tpu.memory_space<vmem>>, %arg7: memref<1x128xf32, #tpu.memory_space<vmem>>, %arg8: memref<1x1x8x128xbf16, #tpu.memory_space<vmem>>) attributes {dimension_semantics = [#tpu.dimension_semantics<parallel>, #tpu.dimension_semantics<parallel>], iteration_bounds = array<i64: 2, 8>, scalar_prefetch = 0 : i64, scratch_operands = 0 : i64, tpu.core_type = #tpu.core_type<tc>, window_params = [{transform_indices = @transform_0, window_bounds = array<i64: 1, 1, 1, 10, 10, 128>}, {pipeline_mode = #tpu.pipeline_mode<synchronous>, transform_indices = @transform_1, window_bounds = array<i64: 3, 3, 128, 128>}, {pipeline_mode = #tpu.pipeline_mode<synchronous>, transform_indices = @transform_2, window_bounds = array<i64: 1, 128>}, {transform_indices = @transform_3, window_bounds = array<i64: 1, 1, 8, 128>}, {pipeline_mode = #tpu.pipeline_mode<synchronous>, transform_indices = @transform_4, window_bounds = array<i64: 128, 128>}, {pipeline_mode = #tpu.pipeline_mode<synchronous>, transform_indices = @transform_5, window_bounds = array<i64: 1, 128>}, {transform_indices = @transform_6, window_bounds = array<i64: 1, 1, 8, 128>}]} {
    %cst = arith.constant 0.000000e+00 : f32
    %0 = vector.broadcast %cst : f32 to vector<8x128xf32>
    %c0_i32 = arith.constant 0 : i32
    %1 = arith.addi %arg1, %c0_i32 : i32
    %c0 = arith.constant 0 : index
    %c0_0 = arith.constant 0 : index
    %c0_1 = arith.constant 0 : index
    %2 = arith.index_cast %1 : i32 to index
    %c0_2 = arith.constant 0 : index
    %c0_3 = arith.constant 0 : index
    %3 = vector.load %arg2[%c0, %c0_0, %c0_1, %2, %c0_2, %c0_3] : memref<1x1x1x10x10x128xbf16, #tpu.memory_space<vmem>>, vector<1x1x1x1x8x128xbf16>
    %4 = vector.shape_cast %3 : vector<1x1x1x1x8x128xbf16> to vector<8x128xbf16>
    %c0_4 = arith.constant 0 : index
    %c0_5 = arith.constant 0 : index
    %c0_6 = arith.constant 0 : index
    %c0_7 = arith.constant 0 : index
    %5 = vector.load %arg3[%c0_4, %c0_5, %c0_6, %c0_7] : memref<3x3x128x128xbf16, #tpu.memory_space<vmem>>, vector<1x1x128x128xbf16>
    %6 = vector.shape_cast %5 : vector<1x1x128x128xbf16> to vector<128x128xbf16>
    %cst_8 = arith.constant dense<0.000000e+00> : vector<8x128xf32>
    %7 = tpu.matmul %4, %6, %cst_8 {dimension_numbers = #tpu.dot_dimension_numbers<[1], [0], [0], [1], [0, 0, 1, 1], [], []>} : vector<8x128xbf16>, vector<128x128xbf16>, vector<8x128xf32> -> vector<8x128xf32>
    %8 = arith.addf %0, %7 : vector<8x128xf32>
    %c0_i32_9 = arith.constant 0 : i32
    %9 = arith.addi %arg1, %c0_i32_9 : i32
    %c0_10 = arith.constant 0 : index
    %c0_11 = arith.constant 0 : index
    %c0_12 = arith.constant 0 : index
    %10 = arith.index_cast %9 : i32 to index
    %c1 = arith.constant 1 : index
    %c0_13 = arith.constant 0 : index
    %11 = vector.load %arg2[%c0_10, %c0_11, %c0_12, %10, %c1, %c0_13] : memref<1x1x1x10x10x128xbf16, #tpu.memory_space<vmem>>, vector<1x1x1x1x8x128xbf16>
    %12 = vector.shape_cast %11 : vector<1x1x1x1x8x128xbf16> to vector<8x128xbf16>
    %c0_14 = arith.constant 0 : index
    %c1_15 = arith.constant 1 : index
    %c0_16 = arith.constant 0 : index
    %c0_17 = arith.constant 0 : index
    %13 = vector.load %arg3[%c0_14, %c1_15, %c0_16, %c0_17] : memref<3x3x128x128xbf16, #tpu.memory_space<vmem>>, vector<1x1x128x128xbf16>
    %14 = vector.shape_cast %13 : vector<1x1x128x128xbf16> to vector<128x128xbf16>
    %cst_18 = arith.constant dense<0.000000e+00> : vector<8x128xf32>
    %15 = tpu.matmul %12, %14, %cst_18 {dimension_numbers = #tpu.dot_dimension_numbers<[1], [0], [0], [1], [0, 0, 1, 1], [], []>} : vector<8x128xbf16>, vector<128x128xbf16>, vector<8x128xf32> -> vector<8x128xf32>
    %16 = arith.addf %8, %15 : vector<8x128xf32>
    %c0_i32_19 = arith.constant 0 : i32
    %17 = arith.addi %arg1, %c0_i32_19 : i32
    %c0_20 = arith.constant 0 : index
    %c0_21 = arith.constant 0 : index
    %c0_22 = arith.constant 0 : index
    %18 = arith.index_cast %17 : i32 to index
    %c2 = arith.constant 2 : index
    %c0_23 = arith.constant 0 : index
    %19 = vector.load %arg2[%c0_20, %c0_21, %c0_22, %18, %c2, %c0_23] : memref<1x1x1x10x10x128xbf16, #tpu.memory_space<vmem>>, vector<1x1x1x1x8x128xbf16>
    %20 = vector.shape_cast %19 : vector<1x1x1x1x8x128xbf16> to vector<8x128xbf16>
    %c0_24 = arith.constant 0 : index
    %c2_25 = arith.constant 2 : index
    %c0_26 = arith.constant 0 : index
    %c0_27 = arith.constant 0 : index
    %21 = vector.load %arg3[%c0_24, %c2_25, %c0_26, %c0_27] : memref<3x3x128x128xbf16, #tpu.memory_space<vmem>>, vector<1x1x128x128xbf16>
    %22 = vector.shape_cast %21 : vector<1x1x128x128xbf16> to vector<128x128xbf16>
    %cst_28 = arith.constant dense<0.000000e+00> : vector<8x128xf32>
    %23 = tpu.matmul %20, %22, %cst_28 {dimension_numbers = #tpu.dot_dimension_numbers<[1], [0], [0], [1], [0, 0, 1, 1], [], []>} : vector<8x128xbf16>, vector<128x128xbf16>, vector<8x128xf32> -> vector<8x128xf32>
    %24 = arith.addf %16, %23 : vector<8x128xf32>
    %c1_i32 = arith.constant 1 : i32
    %25 = arith.addi %arg1, %c1_i32 : i32
    %c0_29 = arith.constant 0 : index
    %c0_30 = arith.constant 0 : index
    %c0_31 = arith.constant 0 : index
    %26 = arith.index_cast %25 : i32 to index
    %c0_32 = arith.constant 0 : index
    %c0_33 = arith.constant 0 : index
    %27 = vector.load %arg2[%c0_29, %c0_30, %c0_31, %26, %c0_32, %c0_33] : memref<1x1x1x10x10x128xbf16, #tpu.memory_space<vmem>>, vector<1x1x1x1x8x128xbf16>
    %28 = vector.shape_cast %27 : vector<1x1x1x1x8x128xbf16> to vector<8x128xbf16>
    %c1_34 = arith.constant 1 : index
    %c0_35 = arith.constant 0 : index
    %c0_36 = arith.constant 0 : index
    %c0_37 = arith.constant 0 : index
    %29 = vector.load %arg3[%c1_34, %c0_35, %c0_36, %c0_37] : memref<3x3x128x128xbf16, #tpu.memory_space<vmem>>, vector<1x1x128x128xbf16>
    %30 = vector.shape_cast %29 : vector<1x1x128x128xbf16> to vector<128x128xbf16>
    %cst_38 = arith.constant dense<0.000000e+00> : vector<8x128xf32>
    %31 = tpu.matmul %28, %30, %cst_38 {dimension_numbers = #tpu.dot_dimension_numbers<[1], [0], [0], [1], [0, 0, 1, 1], [], []>} : vector<8x128xbf16>, vector<128x128xbf16>, vector<8x128xf32> -> vector<8x128xf32>
    %32 = arith.addf %24, %31 : vector<8x128xf32>
    %c1_i32_39 = arith.constant 1 : i32
    %33 = arith.addi %arg1, %c1_i32_39 : i32
    %c0_40 = arith.constant 0 : index
    %c0_41 = arith.constant 0 : index
    %c0_42 = arith.constant 0 : index
    %34 = arith.index_cast %33 : i32 to index
    %c1_43 = arith.constant 1 : index
    %c0_44 = arith.constant 0 : index
    %35 = vector.load %arg2[%c0_40, %c0_41, %c0_42, %34, %c1_43, %c0_44] : memref<1x1x1x10x10x128xbf16, #tpu.memory_space<vmem>>, vector<1x1x1x1x8x128xbf16>
    %36 = vector.shape_cast %35 : vector<1x1x1x1x8x128xbf16> to vector<8x128xbf16>
    %c1_45 = arith.constant 1 : index
    %c1_46 = arith.constant 1 : index
    %c0_47 = arith.constant 0 : index
    %c0_48 = arith.constant 0 : index
    %37 = vector.load %arg3[%c1_45, %c1_46, %c0_47, %c0_48] : memref<3x3x128x128xbf16, #tpu.memory_space<vmem>>, vector<1x1x128x128xbf16>
    %38 = vector.shape_cast %37 : vector<1x1x128x128xbf16> to vector<128x128xbf16>
    %cst_49 = arith.constant dense<0.000000e+00> : vector<8x128xf32>
    %39 = tpu.matmul %36, %38, %cst_49 {dimension_numbers = #tpu.dot_dimension_numbers<[1], [0], [0], [1], [0, 0, 1, 1], [], []>} : vector<8x128xbf16>, vector<128x128xbf16>, vector<8x128xf32> -> vector<8x128xf32>
    %40 = arith.addf %32, %39 : vector<8x128xf32>
    %c1_i32_50 = arith.constant 1 : i32
    %41 = arith.addi %arg1, %c1_i32_50 : i32
    %c0_51 = arith.constant 0 : index
    %c0_52 = arith.constant 0 : index
    %c0_53 = arith.constant 0 : index
    %42 = arith.index_cast %41 : i32 to index
    %c2_54 = arith.constant 2 : index
    %c0_55 = arith.constant 0 : index
    %43 = vector.load %arg2[%c0_51, %c0_52, %c0_53, %42, %c2_54, %c0_55] : memref<1x1x1x10x10x128xbf16, #tpu.memory_space<vmem>>, vector<1x1x1x1x8x128xbf16>
    %44 = vector.shape_cast %43 : vector<1x1x1x1x8x128xbf16> to vector<8x128xbf16>
    %c1_56 = arith.constant 1 : index
    %c2_57 = arith.constant 2 : index
    %c0_58 = arith.constant 0 : index
    %c0_59 = arith.constant 0 : index
    %45 = vector.load %arg3[%c1_56, %c2_57, %c0_58, %c0_59] : memref<3x3x128x128xbf16, #tpu.memory_space<vmem>>, vector<1x1x128x128xbf16>
    %46 = vector.shape_cast %45 : vector<1x1x128x128xbf16> to vector<128x128xbf16>
    %cst_60 = arith.constant dense<0.000000e+00> : vector<8x128xf32>
    %47 = tpu.matmul %44, %46, %cst_60 {dimension_numbers = #tpu.dot_dimension_numbers<[1], [0], [0], [1], [0, 0, 1, 1], [], []>} : vector<8x128xbf16>, vector<128x128xbf16>, vector<8x128xf32> -> vector<8x128xf32>
    %48 = arith.addf %40, %47 : vector<8x128xf32>
    %c2_i32 = arith.constant 2 : i32
    %49 = arith.addi %arg1, %c2_i32 : i32
    %c0_61 = arith.constant 0 : index
    %c0_62 = arith.constant 0 : index
    %c0_63 = arith.constant 0 : index
    %50 = arith.index_cast %49 : i32 to index
    %c0_64 = arith.constant 0 : index
    %c0_65 = arith.constant 0 : index
    %51 = vector.load %arg2[%c0_61, %c0_62, %c0_63, %50, %c0_64, %c0_65] : memref<1x1x1x10x10x128xbf16, #tpu.memory_space<vmem>>, vector<1x1x1x1x8x128xbf16>
    %52 = vector.shape_cast %51 : vector<1x1x1x1x8x128xbf16> to vector<8x128xbf16>
    %c2_66 = arith.constant 2 : index
    %c0_67 = arith.constant 0 : index
    %c0_68 = arith.constant 0 : index
    %c0_69 = arith.constant 0 : index
    %53 = vector.load %arg3[%c2_66, %c0_67, %c0_68, %c0_69] : memref<3x3x128x128xbf16, #tpu.memory_space<vmem>>, vector<1x1x128x128xbf16>
    %54 = vector.shape_cast %53 : vector<1x1x128x128xbf16> to vector<128x128xbf16>
    %cst_70 = arith.constant dense<0.000000e+00> : vector<8x128xf32>
    %55 = tpu.matmul %52, %54, %cst_70 {dimension_numbers = #tpu.dot_dimension_numbers<[1], [0], [0], [1], [0, 0, 1, 1], [], []>} : vector<8x128xbf16>, vector<128x128xbf16>, vector<8x128xf32> -> vector<8x128xf32>
    %56 = arith.addf %48, %55 : vector<8x128xf32>
    %c2_i32_71 = arith.constant 2 : i32
    %57 = arith.addi %arg1, %c2_i32_71 : i32
    %c0_72 = arith.constant 0 : index
    %c0_73 = arith.constant 0 : index
    %c0_74 = arith.constant 0 : index
    %58 = arith.index_cast %57 : i32 to index
    %c1_75 = arith.constant 1 : index
    %c0_76 = arith.constant 0 : index
    %59 = vector.load %arg2[%c0_72, %c0_73, %c0_74, %58, %c1_75, %c0_76] : memref<1x1x1x10x10x128xbf16, #tpu.memory_space<vmem>>, vector<1x1x1x1x8x128xbf16>
    %60 = vector.shape_cast %59 : vector<1x1x1x1x8x128xbf16> to vector<8x128xbf16>
    %c2_77 = arith.constant 2 : index
    %c1_78 = arith.constant 1 : index
    %c0_79 = arith.constant 0 : index
    %c0_80 = arith.constant 0 : index
    %61 = vector.load %arg3[%c2_77, %c1_78, %c0_79, %c0_80] : memref<3x3x128x128xbf16, #tpu.memory_space<vmem>>, vector<1x1x128x128xbf16>
    %62 = vector.shape_cast %61 : vector<1x1x128x128xbf16> to vector<128x128xbf16>
    %cst_81 = arith.constant dense<0.000000e+00> : vector<8x128xf32>
    %63 = tpu.matmul %60, %62, %cst_81 {dimension_numbers = #tpu.dot_dimension_numbers<[1], [0], [0], [1], [0, 0, 1, 1], [], []>} : vector<8x128xbf16>, vector<128x128xbf16>, vector<8x128xf32> -> vector<8x128xf32>
    %64 = arith.addf %56, %63 : vector<8x128xf32>
    %c2_i32_82 = arith.constant 2 : i32
    %65 = arith.addi %arg1, %c2_i32_82 : i32
    %c0_83 = arith.constant 0 : index
    %c0_84 = arith.constant 0 : index
    %c0_85 = arith.constant 0 : index
    %66 = arith.index_cast %65 : i32 to index
    %c2_86 = arith.constant 2 : index
    %c0_87 = arith.constant 0 : index
    %67 = vector.load %arg2[%c0_83, %c0_84, %c0_85, %66, %c2_86, %c0_87] : memref<1x1x1x10x10x128xbf16, #tpu.memory_space<vmem>>, vector<1x1x1x1x8x128xbf16>
    %68 = vector.shape_cast %67 : vector<1x1x1x1x8x128xbf16> to vector<8x128xbf16>
    %c2_88 = arith.constant 2 : index
    %c2_89 = arith.constant 2 : index
    %c0_90 = arith.constant 0 : index
    %c0_91 = arith.constant 0 : index
    %69 = vector.load %arg3[%c2_88, %c2_89, %c0_90, %c0_91] : memref<3x3x128x128xbf16, #tpu.memory_space<vmem>>, vector<1x1x128x128xbf16>
    %70 = vector.shape_cast %69 : vector<1x1x128x128xbf16> to vector<128x128xbf16>
    %cst_92 = arith.constant dense<0.000000e+00> : vector<8x128xf32>
    %71 = tpu.matmul %68, %70, %cst_92 {dimension_numbers = #tpu.dot_dimension_numbers<[1], [0], [0], [1], [0, 0, 1, 1], [], []>} : vector<8x128xbf16>, vector<128x128xbf16>, vector<8x128xf32> -> vector<8x128xf32>
    %72 = arith.addf %64, %71 : vector<8x128xf32>
    %c0_93 = arith.constant 0 : index
    %c0_94 = arith.constant 0 : index
    %73 = vector.load %arg4[%c0_93, %c0_94] : memref<1x128xf32, #tpu.memory_space<vmem>>, vector<1x128xf32>
    %74 = vector.broadcast %73 : vector<1x128xf32> to vector<8x128xf32>
    %75 = arith.addf %72, %74 : vector<8x128xf32>
    %c0_95 = arith.constant 0 : index
    %c0_96 = arith.constant 0 : index
    %c0_97 = arith.constant 0 : index
    %c0_98 = arith.constant 0 : index
    %76 = vector.load %arg5[%c0_95, %c0_96, %c0_97, %c0_98] : memref<1x1x8x128xbf16, #tpu.memory_space<vmem>>, vector<1x1x8x128xbf16>
    %77 = vector.shape_cast %76 : vector<1x1x8x128xbf16> to vector<8x128xbf16>
    %c0_99 = arith.constant 0 : index
    %c0_100 = arith.constant 0 : index
    %78 = vector.load %arg6[%c0_99, %c0_100] : memref<128x128xbf16, #tpu.memory_space<vmem>>, vector<128x128xbf16>
    %cst_101 = arith.constant dense<0.000000e+00> : vector<8x128xf32>
    %79 = tpu.matmul %77, %78, %cst_101 {dimension_numbers = #tpu.dot_dimension_numbers<[1], [0], [0], [1], [0, 0, 1, 1], [], []>} : vector<8x128xbf16>, vector<128x128xbf16>, vector<8x128xf32> -> vector<8x128xf32>
    %80 = arith.addf %75, %79 : vector<8x128xf32>
    %c0_102 = arith.constant 0 : index
    %c0_103 = arith.constant 0 : index
    %81 = vector.load %arg7[%c0_102, %c0_103] : memref<1x128xf32, #tpu.memory_space<vmem>>, vector<1x128xf32>
    %82 = vector.broadcast %81 : vector<1x128xf32> to vector<8x128xf32>
    %83 = arith.addf %80, %82 : vector<8x128xf32>
    %84 = arith.truncf %83 : vector<8x128xf32> to vector<8x128xbf16>
    %c0_104 = arith.constant 0 : index
    %c0_105 = arith.constant 0 : index
    %c0_106 = arith.constant 0 : index
    %c0_107 = arith.constant 0 : index
    %85 = vector.load %arg8[%c0_104, %c0_105, %c0_106, %c0_107] : memref<1x1x8x128xbf16, #tpu.memory_space<vmem>>, vector<1x1x8x128xbf16>
    %86 = vector.shape_cast %85 : vector<1x1x8x128xbf16> to vector<8x128xbf16>
    %87 = vector.shape_cast %84 : vector<8x128xbf16> to vector<1x1x8x128xbf16>
    tpu.vector_store %arg8[%c0_104, %c0_105, %c0_106, %c0_107], %87 {strides = array<i32>} : memref<1x1x8x128xbf16, #tpu.memory_space<vmem>>, vector<1x1x8x128xbf16>,
    return
  }
  func.func @transform_0(%arg0: i32, %arg1: i32) -> (i32, i32, i32, i32, i32, i32) {
    %c0_i32 = arith.constant 0 : i32
    %c0_i32_0 = arith.constant 0 : i32
    %c0_i32_1 = arith.constant 0 : i32
    %c0_i32_2 = arith.constant 0 : i32
    %c0_i32_3 = arith.constant 0 : i32
    %c0_i32_4 = arith.constant 0 : i32
    return %arg0, %c0_i32, %c0_i32_0, %c0_i32_1, %c0_i32_2, %c0_i32_3 : i32, i32, i32, i32, i32, i32
  }
  func.func @transform_1(%arg0: i32, %arg1: i32) -> (i32, i32, i32, i32) {
    %c0_i32 = arith.constant 0 : i32
    %c0_i32_0 = arith.constant 0 : i32
    %c0_i32_1 = arith.constant 0 : i32
    %c0_i32_2 = arith.constant 0 : i32
    %c0_i32_3 = arith.constant 0 : i32
    return %c0_i32, %c0_i32_0, %c0_i32_1, %c0_i32_2 : i32, i32, i32, i32
  }
  func.func @transform_2(%arg0: i32, %arg1: i32) -> (i32, i32) {
    %c0_i32 = arith.constant 0 : i32
    %c0_i32_0 = arith.constant 0 : i32
    %c0_i32_1 = arith.constant 0 : i32
    return %c0_i32, %c0_i32_0 : i32, i32
  }
  func.func @transform_3(%arg0: i32, %arg1: i32) -> (i32, i32, i32, i32) {
    %c0_i32 = arith.constant 0 : i32
    %c0_i32_0 = arith.constant 0 : i32
    %c0_i32_1 = arith.constant 0 : i32
    return %arg0, %arg1, %c0_i32, %c0_i32_0 : i32, i32, i32, i32
  }
  func.func @transform_4(%arg0: i32, %arg1: i32) -> (i32, i32) {
    %c0_i32 = arith.constant 0 : i32
    %c0_i32_0 = arith.constant 0 : i32
    %c0_i32_1 = arith.constant 0 : i32
    return %c0_i32, %c0_i32_0 : i32, i32
  }
  func.func @transform_5(%arg0: i32, %arg1: i32) -> (i32, i32) {
    %c0_i32 = arith.constant 0 : i32
    %c0_i32_0 = arith.constant 0 : i32
    %c0_i32_1 = arith.constant 0 : i32
    return %c0_i32, %c0_i32_0 : i32, i32
  }
  func.func @transform_6(%arg0: i32, %arg1: i32) -> (i32, i32, i32, i32) {
    %c0_i32 = arith.constant 0 : i32
    %c0_i32_0 = arith.constant 0 : i32
    %c0_i32_1 = arith.constant 0 : i32
    return %arg0, %arg1, %c0_i32, %c0_i32_0 : i32, i32, i32, i32
  }
}

module attributes {stable_mosaic.version = 11 : i64} {
  func.func @kernel(%arg0: i32, %arg1: i32, %arg2: memref<1x2x2x5x5x128xbf16, #tpu.memory_space<vmem>>, %arg3: memref<3x3x128x128xbf16, #tpu.memory_space<vmem>>, %arg4: memref<1x128xf32, #tpu.memory_space<vmem>>, %arg5: memref<1x128xf32, #tpu.memory_space<vmem>>, %arg6: memref<1x128xf32, #tpu.memory_space<vmem>>, %arg7: memref<1x1x4x128xbf16, #tpu.memory_space<vmem>>) attributes {dimension_semantics = [#tpu.dimension_semantics<parallel>, #tpu.dimension_semantics<parallel>], iteration_bounds = array<i64: 2, 4>, scalar_prefetch = 0 : i64, scratch_operands = 0 : i64, tpu.core_type = #tpu.core_type<tc>, window_params = [{transform_indices = @transform_0, window_bounds = array<i64: 1, 2, 2, 5, 5, 128>}, {pipeline_mode = #tpu.pipeline_mode<synchronous>, transform_indices = @transform_1, window_bounds = array<i64: 3, 3, 128, 128>}, {pipeline_mode = #tpu.pipeline_mode<synchronous>, transform_indices = @transform_2, window_bounds = array<i64: 1, 128>}, {pipeline_mode = #tpu.pipeline_mode<synchronous>, transform_indices = @transform_3, window_bounds = array<i64: 1, 128>}, {pipeline_mode = #tpu.pipeline_mode<synchronous>, transform_indices = @transform_4, window_bounds = array<i64: 1, 128>}, {transform_indices = @transform_5, window_bounds = array<i64: 1, 1, 4, 128>}]} {
    %cst = arith.constant 0.000000e+00 : f32
    %0 = vector.broadcast %cst : f32 to vector<4x128xf32>
    %c0_i32 = arith.constant 0 : i32
    %1 = arith.addi %arg1, %c0_i32 : i32
    %c0 = arith.constant 0 : index
    %c0_0 = arith.constant 0 : index
    %c0_1 = arith.constant 0 : index
    %2 = arith.index_cast %1 : i32 to index
    %c0_2 = arith.constant 0 : index
    %c0_3 = arith.constant 0 : index
    %3 = vector.load %arg2[%c0, %c0_0, %c0_1, %2, %c0_2, %c0_3] : memref<1x2x2x5x5x128xbf16, #tpu.memory_space<vmem>>, vector<1x1x1x1x4x128xbf16>
    %4 = vector.shape_cast %3 : vector<1x1x1x1x4x128xbf16> to vector<4x128xbf16>
    %c0_4 = arith.constant 0 : index
    %c0_5 = arith.constant 0 : index
    %c0_6 = arith.constant 0 : index
    %c0_7 = arith.constant 0 : index
    %5 = vector.load %arg3[%c0_4, %c0_5, %c0_6, %c0_7] : memref<3x3x128x128xbf16, #tpu.memory_space<vmem>>, vector<1x1x128x128xbf16>
    %6 = vector.shape_cast %5 : vector<1x1x128x128xbf16> to vector<128x128xbf16>
    %cst_8 = arith.constant dense<0.000000e+00> : vector<4x128xf32>
    %7 = tpu.matmul %4, %6, %cst_8 {dimension_numbers = #tpu.dot_dimension_numbers<[1], [0], [0], [1], [0, 0, 1, 1], [], []>} : vector<4x128xbf16>, vector<128x128xbf16>, vector<4x128xf32> -> vector<4x128xf32>
    %8 = arith.addf %0, %7 : vector<4x128xf32>
    %c0_i32_9 = arith.constant 0 : i32
    %9 = arith.addi %arg1, %c0_i32_9 : i32
    %c0_10 = arith.constant 0 : index
    %c0_11 = arith.constant 0 : index
    %c1 = arith.constant 1 : index
    %10 = arith.index_cast %9 : i32 to index
    %c0_12 = arith.constant 0 : index
    %c0_13 = arith.constant 0 : index
    %11 = vector.load %arg2[%c0_10, %c0_11, %c1, %10, %c0_12, %c0_13] : memref<1x2x2x5x5x128xbf16, #tpu.memory_space<vmem>>, vector<1x1x1x1x4x128xbf16>
    %12 = vector.shape_cast %11 : vector<1x1x1x1x4x128xbf16> to vector<4x128xbf16>
    %c0_14 = arith.constant 0 : index
    %c1_15 = arith.constant 1 : index
    %c0_16 = arith.constant 0 : index
    %c0_17 = arith.constant 0 : index
    %13 = vector.load %arg3[%c0_14, %c1_15, %c0_16, %c0_17] : memref<3x3x128x128xbf16, #tpu.memory_space<vmem>>, vector<1x1x128x128xbf16>
    %14 = vector.shape_cast %13 : vector<1x1x128x128xbf16> to vector<128x128xbf16>
    %cst_18 = arith.constant dense<0.000000e+00> : vector<4x128xf32>
    %15 = tpu.matmul %12, %14, %cst_18 {dimension_numbers = #tpu.dot_dimension_numbers<[1], [0], [0], [1], [0, 0, 1, 1], [], []>} : vector<4x128xbf16>, vector<128x128xbf16>, vector<4x128xf32> -> vector<4x128xf32>
    %16 = arith.addf %8, %15 : vector<4x128xf32>
    %c0_i32_19 = arith.constant 0 : i32
    %17 = arith.addi %arg1, %c0_i32_19 : i32
    %c0_20 = arith.constant 0 : index
    %c0_21 = arith.constant 0 : index
    %c0_22 = arith.constant 0 : index
    %18 = arith.index_cast %17 : i32 to index
    %c1_23 = arith.constant 1 : index
    %c0_24 = arith.constant 0 : index
    %19 = vector.load %arg2[%c0_20, %c0_21, %c0_22, %18, %c1_23, %c0_24] : memref<1x2x2x5x5x128xbf16, #tpu.memory_space<vmem>>, vector<1x1x1x1x4x128xbf16>
    %20 = vector.shape_cast %19 : vector<1x1x1x1x4x128xbf16> to vector<4x128xbf16>
    %c0_25 = arith.constant 0 : index
    %c2 = arith.constant 2 : index
    %c0_26 = arith.constant 0 : index
    %c0_27 = arith.constant 0 : index
    %21 = vector.load %arg3[%c0_25, %c2, %c0_26, %c0_27] : memref<3x3x128x128xbf16, #tpu.memory_space<vmem>>, vector<1x1x128x128xbf16>
    %22 = vector.shape_cast %21 : vector<1x1x128x128xbf16> to vector<128x128xbf16>
    %cst_28 = arith.constant dense<0.000000e+00> : vector<4x128xf32>
    %23 = tpu.matmul %20, %22, %cst_28 {dimension_numbers = #tpu.dot_dimension_numbers<[1], [0], [0], [1], [0, 0, 1, 1], [], []>} : vector<4x128xbf16>, vector<128x128xbf16>, vector<4x128xf32> -> vector<4x128xf32>
    %24 = arith.addf %16, %23 : vector<4x128xf32>
    %c0_i32_29 = arith.constant 0 : i32
    %25 = arith.addi %arg1, %c0_i32_29 : i32
    %c0_30 = arith.constant 0 : index
    %c1_31 = arith.constant 1 : index
    %c0_32 = arith.constant 0 : index
    %26 = arith.index_cast %25 : i32 to index
    %c0_33 = arith.constant 0 : index
    %c0_34 = arith.constant 0 : index
    %27 = vector.load %arg2[%c0_30, %c1_31, %c0_32, %26, %c0_33, %c0_34] : memref<1x2x2x5x5x128xbf16, #tpu.memory_space<vmem>>, vector<1x1x1x1x4x128xbf16>
    %28 = vector.shape_cast %27 : vector<1x1x1x1x4x128xbf16> to vector<4x128xbf16>
    %c1_35 = arith.constant 1 : index
    %c0_36 = arith.constant 0 : index
    %c0_37 = arith.constant 0 : index
    %c0_38 = arith.constant 0 : index
    %29 = vector.load %arg3[%c1_35, %c0_36, %c0_37, %c0_38] : memref<3x3x128x128xbf16, #tpu.memory_space<vmem>>, vector<1x1x128x128xbf16>
    %30 = vector.shape_cast %29 : vector<1x1x128x128xbf16> to vector<128x128xbf16>
    %cst_39 = arith.constant dense<0.000000e+00> : vector<4x128xf32>
    %31 = tpu.matmul %28, %30, %cst_39 {dimension_numbers = #tpu.dot_dimension_numbers<[1], [0], [0], [1], [0, 0, 1, 1], [], []>} : vector<4x128xbf16>, vector<128x128xbf16>, vector<4x128xf32> -> vector<4x128xf32>
    %32 = arith.addf %24, %31 : vector<4x128xf32>
    %c0_i32_40 = arith.constant 0 : i32
    %33 = arith.addi %arg1, %c0_i32_40 : i32
    %c0_41 = arith.constant 0 : index
    %c1_42 = arith.constant 1 : index
    %c1_43 = arith.constant 1 : index
    %34 = arith.index_cast %33 : i32 to index
    %c0_44 = arith.constant 0 : index
    %c0_45 = arith.constant 0 : index
    %35 = vector.load %arg2[%c0_41, %c1_42, %c1_43, %34, %c0_44, %c0_45] : memref<1x2x2x5x5x128xbf16, #tpu.memory_space<vmem>>, vector<1x1x1x1x4x128xbf16>
    %36 = vector.shape_cast %35 : vector<1x1x1x1x4x128xbf16> to vector<4x128xbf16>
    %c1_46 = arith.constant 1 : index
    %c1_47 = arith.constant 1 : index
    %c0_48 = arith.constant 0 : index
    %c0_49 = arith.constant 0 : index
    %37 = vector.load %arg3[%c1_46, %c1_47, %c0_48, %c0_49] : memref<3x3x128x128xbf16, #tpu.memory_space<vmem>>, vector<1x1x128x128xbf16>
    %38 = vector.shape_cast %37 : vector<1x1x128x128xbf16> to vector<128x128xbf16>
    %cst_50 = arith.constant dense<0.000000e+00> : vector<4x128xf32>
    %39 = tpu.matmul %36, %38, %cst_50 {dimension_numbers = #tpu.dot_dimension_numbers<[1], [0], [0], [1], [0, 0, 1, 1], [], []>} : vector<4x128xbf16>, vector<128x128xbf16>, vector<4x128xf32> -> vector<4x128xf32>
    %40 = arith.addf %32, %39 : vector<4x128xf32>
    %c0_i32_51 = arith.constant 0 : i32
    %41 = arith.addi %arg1, %c0_i32_51 : i32
    %c0_52 = arith.constant 0 : index
    %c1_53 = arith.constant 1 : index
    %c0_54 = arith.constant 0 : index
    %42 = arith.index_cast %41 : i32 to index
    %c1_55 = arith.constant 1 : index
    %c0_56 = arith.constant 0 : index
    %43 = vector.load %arg2[%c0_52, %c1_53, %c0_54, %42, %c1_55, %c0_56] : memref<1x2x2x5x5x128xbf16, #tpu.memory_space<vmem>>, vector<1x1x1x1x4x128xbf16>
    %44 = vector.shape_cast %43 : vector<1x1x1x1x4x128xbf16> to vector<4x128xbf16>
    %c1_57 = arith.constant 1 : index
    %c2_58 = arith.constant 2 : index
    %c0_59 = arith.constant 0 : index
    %c0_60 = arith.constant 0 : index
    %45 = vector.load %arg3[%c1_57, %c2_58, %c0_59, %c0_60] : memref<3x3x128x128xbf16, #tpu.memory_space<vmem>>, vector<1x1x128x128xbf16>
    %46 = vector.shape_cast %45 : vector<1x1x128x128xbf16> to vector<128x128xbf16>
    %cst_61 = arith.constant dense<0.000000e+00> : vector<4x128xf32>
    %47 = tpu.matmul %44, %46, %cst_61 {dimension_numbers = #tpu.dot_dimension_numbers<[1], [0], [0], [1], [0, 0, 1, 1], [], []>} : vector<4x128xbf16>, vector<128x128xbf16>, vector<4x128xf32> -> vector<4x128xf32>
    %48 = arith.addf %40, %47 : vector<4x128xf32>
    %c1_i32 = arith.constant 1 : i32
    %49 = arith.addi %arg1, %c1_i32 : i32
    %c0_62 = arith.constant 0 : index
    %c0_63 = arith.constant 0 : index
    %c0_64 = arith.constant 0 : index
    %50 = arith.index_cast %49 : i32 to index
    %c0_65 = arith.constant 0 : index
    %c0_66 = arith.constant 0 : index
    %51 = vector.load %arg2[%c0_62, %c0_63, %c0_64, %50, %c0_65, %c0_66] : memref<1x2x2x5x5x128xbf16, #tpu.memory_space<vmem>>, vector<1x1x1x1x4x128xbf16>
    %52 = vector.shape_cast %51 : vector<1x1x1x1x4x128xbf16> to vector<4x128xbf16>
    %c2_67 = arith.constant 2 : index
    %c0_68 = arith.constant 0 : index
    %c0_69 = arith.constant 0 : index
    %c0_70 = arith.constant 0 : index
    %53 = vector.load %arg3[%c2_67, %c0_68, %c0_69, %c0_70] : memref<3x3x128x128xbf16, #tpu.memory_space<vmem>>, vector<1x1x128x128xbf16>
    %54 = vector.shape_cast %53 : vector<1x1x128x128xbf16> to vector<128x128xbf16>
    %cst_71 = arith.constant dense<0.000000e+00> : vector<4x128xf32>
    %55 = tpu.matmul %52, %54, %cst_71 {dimension_numbers = #tpu.dot_dimension_numbers<[1], [0], [0], [1], [0, 0, 1, 1], [], []>} : vector<4x128xbf16>, vector<128x128xbf16>, vector<4x128xf32> -> vector<4x128xf32>
    %56 = arith.addf %48, %55 : vector<4x128xf32>
    %c1_i32_72 = arith.constant 1 : i32
    %57 = arith.addi %arg1, %c1_i32_72 : i32
    %c0_73 = arith.constant 0 : index
    %c0_74 = arith.constant 0 : index
    %c1_75 = arith.constant 1 : index
    %58 = arith.index_cast %57 : i32 to index
    %c0_76 = arith.constant 0 : index
    %c0_77 = arith.constant 0 : index
    %59 = vector.load %arg2[%c0_73, %c0_74, %c1_75, %58, %c0_76, %c0_77] : memref<1x2x2x5x5x128xbf16, #tpu.memory_space<vmem>>, vector<1x1x1x1x4x128xbf16>
    %60 = vector.shape_cast %59 : vector<1x1x1x1x4x128xbf16> to vector<4x128xbf16>
    %c2_78 = arith.constant 2 : index
    %c1_79 = arith.constant 1 : index
    %c0_80 = arith.constant 0 : index
    %c0_81 = arith.constant 0 : index
    %61 = vector.load %arg3[%c2_78, %c1_79, %c0_80, %c0_81] : memref<3x3x128x128xbf16, #tpu.memory_space<vmem>>, vector<1x1x128x128xbf16>
    %62 = vector.shape_cast %61 : vector<1x1x128x128xbf16> to vector<128x128xbf16>
    %cst_82 = arith.constant dense<0.000000e+00> : vector<4x128xf32>
    %63 = tpu.matmul %60, %62, %cst_82 {dimension_numbers = #tpu.dot_dimension_numbers<[1], [0], [0], [1], [0, 0, 1, 1], [], []>} : vector<4x128xbf16>, vector<128x128xbf16>, vector<4x128xf32> -> vector<4x128xf32>
    %64 = arith.addf %56, %63 : vector<4x128xf32>
    %c1_i32_83 = arith.constant 1 : i32
    %65 = arith.addi %arg1, %c1_i32_83 : i32
    %c0_84 = arith.constant 0 : index
    %c0_85 = arith.constant 0 : index
    %c0_86 = arith.constant 0 : index
    %66 = arith.index_cast %65 : i32 to index
    %c1_87 = arith.constant 1 : index
    %c0_88 = arith.constant 0 : index
    %67 = vector.load %arg2[%c0_84, %c0_85, %c0_86, %66, %c1_87, %c0_88] : memref<1x2x2x5x5x128xbf16, #tpu.memory_space<vmem>>, vector<1x1x1x1x4x128xbf16>
    %68 = vector.shape_cast %67 : vector<1x1x1x1x4x128xbf16> to vector<4x128xbf16>
    %c2_89 = arith.constant 2 : index
    %c2_90 = arith.constant 2 : index
    %c0_91 = arith.constant 0 : index
    %c0_92 = arith.constant 0 : index
    %69 = vector.load %arg3[%c2_89, %c2_90, %c0_91, %c0_92] : memref<3x3x128x128xbf16, #tpu.memory_space<vmem>>, vector<1x1x128x128xbf16>
    %70 = vector.shape_cast %69 : vector<1x1x128x128xbf16> to vector<128x128xbf16>
    %cst_93 = arith.constant dense<0.000000e+00> : vector<4x128xf32>
    %71 = tpu.matmul %68, %70, %cst_93 {dimension_numbers = #tpu.dot_dimension_numbers<[1], [0], [0], [1], [0, 0, 1, 1], [], []>} : vector<4x128xbf16>, vector<128x128xbf16>, vector<4x128xf32> -> vector<4x128xf32>
    %72 = arith.addf %64, %71 : vector<4x128xf32>
    %c0_94 = arith.constant 0 : index
    %c0_95 = arith.constant 0 : index
    %73 = vector.load %arg4[%c0_94, %c0_95] : memref<1x128xf32, #tpu.memory_space<vmem>>, vector<1x128xf32>
    %74 = vector.broadcast %73 : vector<1x128xf32> to vector<4x128xf32>
    %75 = arith.addf %72, %74 : vector<4x128xf32>
    %c0_96 = arith.constant 0 : index
    %c0_97 = arith.constant 0 : index
    %76 = vector.load %arg5[%c0_96, %c0_97] : memref<1x128xf32, #tpu.memory_space<vmem>>, vector<1x128xf32>
    %77 = vector.broadcast %76 : vector<1x128xf32> to vector<4x128xf32>
    %78 = arith.mulf %75, %77 : vector<4x128xf32>
    %c0_98 = arith.constant 0 : index
    %c0_99 = arith.constant 0 : index
    %79 = vector.load %arg6[%c0_98, %c0_99] : memref<1x128xf32, #tpu.memory_space<vmem>>, vector<1x128xf32>
    %80 = vector.broadcast %79 : vector<1x128xf32> to vector<4x128xf32>
    %81 = arith.addf %78, %80 : vector<4x128xf32>
    %cst_100 = arith.constant 0.000000e+00 : f32
    %82 = vector.broadcast %cst_100 : f32 to vector<4x128xf32>
    %83 = arith.maximumf %81, %82 : vector<4x128xf32>
    %84 = arith.truncf %83 : vector<4x128xf32> to vector<4x128xbf16>
    %c0_101 = arith.constant 0 : index
    %c0_102 = arith.constant 0 : index
    %c0_103 = arith.constant 0 : index
    %c0_104 = arith.constant 0 : index
    %85 = vector.load %arg7[%c0_101, %c0_102, %c0_103, %c0_104] : memref<1x1x4x128xbf16, #tpu.memory_space<vmem>>, vector<1x1x4x128xbf16>
    %86 = vector.shape_cast %85 : vector<1x1x4x128xbf16> to vector<4x128xbf16>
    %87 = vector.shape_cast %84 : vector<4x128xbf16> to vector<1x1x4x128xbf16>
    tpu.vector_store %arg7[%c0_101, %c0_102, %c0_103, %c0_104], %87 {strides = array<i32>} : memref<1x1x4x128xbf16, #tpu.memory_space<vmem>>, vector<1x1x4x128xbf16>,
    return
  }
  func.func @transform_0(%arg0: i32, %arg1: i32) -> (i32, i32, i32, i32, i32, i32) {
    %c0_i32 = arith.constant 0 : i32
    %c0_i32_0 = arith.constant 0 : i32
    %c0_i32_1 = arith.constant 0 : i32
    %c0_i32_2 = arith.constant 0 : i32
    %c0_i32_3 = arith.constant 0 : i32
    %c0_i32_4 = arith.constant 0 : i32
    return %arg0, %c0_i32, %c0_i32_0, %c0_i32_1, %c0_i32_2, %c0_i32_3 : i32, i32, i32, i32, i32, i32
  }
  func.func @transform_1(%arg0: i32, %arg1: i32) -> (i32, i32, i32, i32) {
    %c0_i32 = arith.constant 0 : i32
    %c0_i32_0 = arith.constant 0 : i32
    %c0_i32_1 = arith.constant 0 : i32
    %c0_i32_2 = arith.constant 0 : i32
    %c0_i32_3 = arith.constant 0 : i32
    return %c0_i32, %c0_i32_0, %c0_i32_1, %c0_i32_2 : i32, i32, i32, i32
  }
  func.func @transform_2(%arg0: i32, %arg1: i32) -> (i32, i32) {
    %c0_i32 = arith.constant 0 : i32
    %c0_i32_0 = arith.constant 0 : i32
    %c0_i32_1 = arith.constant 0 : i32
    return %c0_i32, %c0_i32_0 : i32, i32
  }
  func.func @transform_3(%arg0: i32, %arg1: i32) -> (i32, i32) {
    %c0_i32 = arith.constant 0 : i32
    %c0_i32_0 = arith.constant 0 : i32
    %c0_i32_1 = arith.constant 0 : i32
    return %c0_i32, %c0_i32_0 : i32, i32
  }
  func.func @transform_4(%arg0: i32, %arg1: i32) -> (i32, i32) {
    %c0_i32 = arith.constant 0 : i32
    %c0_i32_0 = arith.constant 0 : i32
    %c0_i32_1 = arith.constant 0 : i32
    return %c0_i32, %c0_i32_0 : i32, i32
  }
  func.func @transform_5(%arg0: i32, %arg1: i32) -> (i32, i32, i32, i32) {
    %c0_i32 = arith.constant 0 : i32
    %c0_i32_0 = arith.constant 0 : i32
    %c0_i32_1 = arith.constant 0 : i32
    return %arg0, %arg1, %c0_i32, %c0_i32_0 : i32, i32, i32, i32
  }
}

module attributes {stable_mosaic.version = 11 : i64} {
  func.func @kernel(%arg0: i32, %arg1: i32, %arg2: memref<1x1x1x6x6x128xbf16, #tpu.memory_space<vmem>>, %arg3: memref<3x3x128x128xbf16, #tpu.memory_space<vmem>>, %arg4: memref<1x128xf32, #tpu.memory_space<vmem>>, %arg5: memref<1x1x4x128xbf16, #tpu.memory_space<vmem>>, %arg6: memref<128x128xbf16, #tpu.memory_space<vmem>>, %arg7: memref<1x128xf32, #tpu.memory_space<vmem>>, %arg8: memref<1x1x4x128xbf16, #tpu.memory_space<vmem>>) attributes {dimension_semantics = [#tpu.dimension_semantics<parallel>, #tpu.dimension_semantics<parallel>], iteration_bounds = array<i64: 2, 4>, scalar_prefetch = 0 : i64, scratch_operands = 0 : i64, tpu.core_type = #tpu.core_type<tc>, window_params = [{transform_indices = @transform_0, window_bounds = array<i64: 1, 1, 1, 6, 6, 128>}, {pipeline_mode = #tpu.pipeline_mode<synchronous>, transform_indices = @transform_1, window_bounds = array<i64: 3, 3, 128, 128>}, {pipeline_mode = #tpu.pipeline_mode<synchronous>, transform_indices = @transform_2, window_bounds = array<i64: 1, 128>}, {transform_indices = @transform_3, window_bounds = array<i64: 1, 1, 4, 128>}, {pipeline_mode = #tpu.pipeline_mode<synchronous>, transform_indices = @transform_4, window_bounds = array<i64: 128, 128>}, {pipeline_mode = #tpu.pipeline_mode<synchronous>, transform_indices = @transform_5, window_bounds = array<i64: 1, 128>}, {transform_indices = @transform_6, window_bounds = array<i64: 1, 1, 4, 128>}]} {
    %cst = arith.constant 0.000000e+00 : f32
    %0 = vector.broadcast %cst : f32 to vector<4x128xf32>
    %c0_i32 = arith.constant 0 : i32
    %1 = arith.addi %arg1, %c0_i32 : i32
    %c0 = arith.constant 0 : index
    %c0_0 = arith.constant 0 : index
    %c0_1 = arith.constant 0 : index
    %2 = arith.index_cast %1 : i32 to index
    %c0_2 = arith.constant 0 : index
    %c0_3 = arith.constant 0 : index
    %3 = vector.load %arg2[%c0, %c0_0, %c0_1, %2, %c0_2, %c0_3] : memref<1x1x1x6x6x128xbf16, #tpu.memory_space<vmem>>, vector<1x1x1x1x4x128xbf16>
    %4 = vector.shape_cast %3 : vector<1x1x1x1x4x128xbf16> to vector<4x128xbf16>
    %c0_4 = arith.constant 0 : index
    %c0_5 = arith.constant 0 : index
    %c0_6 = arith.constant 0 : index
    %c0_7 = arith.constant 0 : index
    %5 = vector.load %arg3[%c0_4, %c0_5, %c0_6, %c0_7] : memref<3x3x128x128xbf16, #tpu.memory_space<vmem>>, vector<1x1x128x128xbf16>
    %6 = vector.shape_cast %5 : vector<1x1x128x128xbf16> to vector<128x128xbf16>
    %cst_8 = arith.constant dense<0.000000e+00> : vector<4x128xf32>
    %7 = tpu.matmul %4, %6, %cst_8 {dimension_numbers = #tpu.dot_dimension_numbers<[1], [0], [0], [1], [0, 0, 1, 1], [], []>} : vector<4x128xbf16>, vector<128x128xbf16>, vector<4x128xf32> -> vector<4x128xf32>
    %8 = arith.addf %0, %7 : vector<4x128xf32>
    %c0_i32_9 = arith.constant 0 : i32
    %9 = arith.addi %arg1, %c0_i32_9 : i32
    %c0_10 = arith.constant 0 : index
    %c0_11 = arith.constant 0 : index
    %c0_12 = arith.constant 0 : index
    %10 = arith.index_cast %9 : i32 to index
    %c1 = arith.constant 1 : index
    %c0_13 = arith.constant 0 : index
    %11 = vector.load %arg2[%c0_10, %c0_11, %c0_12, %10, %c1, %c0_13] : memref<1x1x1x6x6x128xbf16, #tpu.memory_space<vmem>>, vector<1x1x1x1x4x128xbf16>
    %12 = vector.shape_cast %11 : vector<1x1x1x1x4x128xbf16> to vector<4x128xbf16>
    %c0_14 = arith.constant 0 : index
    %c1_15 = arith.constant 1 : index
    %c0_16 = arith.constant 0 : index
    %c0_17 = arith.constant 0 : index
    %13 = vector.load %arg3[%c0_14, %c1_15, %c0_16, %c0_17] : memref<3x3x128x128xbf16, #tpu.memory_space<vmem>>, vector<1x1x128x128xbf16>
    %14 = vector.shape_cast %13 : vector<1x1x128x128xbf16> to vector<128x128xbf16>
    %cst_18 = arith.constant dense<0.000000e+00> : vector<4x128xf32>
    %15 = tpu.matmul %12, %14, %cst_18 {dimension_numbers = #tpu.dot_dimension_numbers<[1], [0], [0], [1], [0, 0, 1, 1], [], []>} : vector<4x128xbf16>, vector<128x128xbf16>, vector<4x128xf32> -> vector<4x128xf32>
    %16 = arith.addf %8, %15 : vector<4x128xf32>
    %c0_i32_19 = arith.constant 0 : i32
    %17 = arith.addi %arg1, %c0_i32_19 : i32
    %c0_20 = arith.constant 0 : index
    %c0_21 = arith.constant 0 : index
    %c0_22 = arith.constant 0 : index
    %18 = arith.index_cast %17 : i32 to index
    %c2 = arith.constant 2 : index
    %c0_23 = arith.constant 0 : index
    %19 = vector.load %arg2[%c0_20, %c0_21, %c0_22, %18, %c2, %c0_23] : memref<1x1x1x6x6x128xbf16, #tpu.memory_space<vmem>>, vector<1x1x1x1x4x128xbf16>
    %20 = vector.shape_cast %19 : vector<1x1x1x1x4x128xbf16> to vector<4x128xbf16>
    %c0_24 = arith.constant 0 : index
    %c2_25 = arith.constant 2 : index
    %c0_26 = arith.constant 0 : index
    %c0_27 = arith.constant 0 : index
    %21 = vector.load %arg3[%c0_24, %c2_25, %c0_26, %c0_27] : memref<3x3x128x128xbf16, #tpu.memory_space<vmem>>, vector<1x1x128x128xbf16>
    %22 = vector.shape_cast %21 : vector<1x1x128x128xbf16> to vector<128x128xbf16>
    %cst_28 = arith.constant dense<0.000000e+00> : vector<4x128xf32>
    %23 = tpu.matmul %20, %22, %cst_28 {dimension_numbers = #tpu.dot_dimension_numbers<[1], [0], [0], [1], [0, 0, 1, 1], [], []>} : vector<4x128xbf16>, vector<128x128xbf16>, vector<4x128xf32> -> vector<4x128xf32>
    %24 = arith.addf %16, %23 : vector<4x128xf32>
    %c1_i32 = arith.constant 1 : i32
    %25 = arith.addi %arg1, %c1_i32 : i32
    %c0_29 = arith.constant 0 : index
    %c0_30 = arith.constant 0 : index
    %c0_31 = arith.constant 0 : index
    %26 = arith.index_cast %25 : i32 to index
    %c0_32 = arith.constant 0 : index
    %c0_33 = arith.constant 0 : index
    %27 = vector.load %arg2[%c0_29, %c0_30, %c0_31, %26, %c0_32, %c0_33] : memref<1x1x1x6x6x128xbf16, #tpu.memory_space<vmem>>, vector<1x1x1x1x4x128xbf16>
    %28 = vector.shape_cast %27 : vector<1x1x1x1x4x128xbf16> to vector<4x128xbf16>
    %c1_34 = arith.constant 1 : index
    %c0_35 = arith.constant 0 : index
    %c0_36 = arith.constant 0 : index
    %c0_37 = arith.constant 0 : index
    %29 = vector.load %arg3[%c1_34, %c0_35, %c0_36, %c0_37] : memref<3x3x128x128xbf16, #tpu.memory_space<vmem>>, vector<1x1x128x128xbf16>
    %30 = vector.shape_cast %29 : vector<1x1x128x128xbf16> to vector<128x128xbf16>
    %cst_38 = arith.constant dense<0.000000e+00> : vector<4x128xf32>
    %31 = tpu.matmul %28, %30, %cst_38 {dimension_numbers = #tpu.dot_dimension_numbers<[1], [0], [0], [1], [0, 0, 1, 1], [], []>} : vector<4x128xbf16>, vector<128x128xbf16>, vector<4x128xf32> -> vector<4x128xf32>
    %32 = arith.addf %24, %31 : vector<4x128xf32>
    %c1_i32_39 = arith.constant 1 : i32
    %33 = arith.addi %arg1, %c1_i32_39 : i32
    %c0_40 = arith.constant 0 : index
    %c0_41 = arith.constant 0 : index
    %c0_42 = arith.constant 0 : index
    %34 = arith.index_cast %33 : i32 to index
    %c1_43 = arith.constant 1 : index
    %c0_44 = arith.constant 0 : index
    %35 = vector.load %arg2[%c0_40, %c0_41, %c0_42, %34, %c1_43, %c0_44] : memref<1x1x1x6x6x128xbf16, #tpu.memory_space<vmem>>, vector<1x1x1x1x4x128xbf16>
    %36 = vector.shape_cast %35 : vector<1x1x1x1x4x128xbf16> to vector<4x128xbf16>
    %c1_45 = arith.constant 1 : index
    %c1_46 = arith.constant 1 : index
    %c0_47 = arith.constant 0 : index
    %c0_48 = arith.constant 0 : index
    %37 = vector.load %arg3[%c1_45, %c1_46, %c0_47, %c0_48] : memref<3x3x128x128xbf16, #tpu.memory_space<vmem>>, vector<1x1x128x128xbf16>
    %38 = vector.shape_cast %37 : vector<1x1x128x128xbf16> to vector<128x128xbf16>
    %cst_49 = arith.constant dense<0.000000e+00> : vector<4x128xf32>
    %39 = tpu.matmul %36, %38, %cst_49 {dimension_numbers = #tpu.dot_dimension_numbers<[1], [0], [0], [1], [0, 0, 1, 1], [], []>} : vector<4x128xbf16>, vector<128x128xbf16>, vector<4x128xf32> -> vector<4x128xf32>
    %40 = arith.addf %32, %39 : vector<4x128xf32>
    %c1_i32_50 = arith.constant 1 : i32
    %41 = arith.addi %arg1, %c1_i32_50 : i32
    %c0_51 = arith.constant 0 : index
    %c0_52 = arith.constant 0 : index
    %c0_53 = arith.constant 0 : index
    %42 = arith.index_cast %41 : i32 to index
    %c2_54 = arith.constant 2 : index
    %c0_55 = arith.constant 0 : index
    %43 = vector.load %arg2[%c0_51, %c0_52, %c0_53, %42, %c2_54, %c0_55] : memref<1x1x1x6x6x128xbf16, #tpu.memory_space<vmem>>, vector<1x1x1x1x4x128xbf16>
    %44 = vector.shape_cast %43 : vector<1x1x1x1x4x128xbf16> to vector<4x128xbf16>
    %c1_56 = arith.constant 1 : index
    %c2_57 = arith.constant 2 : index
    %c0_58 = arith.constant 0 : index
    %c0_59 = arith.constant 0 : index
    %45 = vector.load %arg3[%c1_56, %c2_57, %c0_58, %c0_59] : memref<3x3x128x128xbf16, #tpu.memory_space<vmem>>, vector<1x1x128x128xbf16>
    %46 = vector.shape_cast %45 : vector<1x1x128x128xbf16> to vector<128x128xbf16>
    %cst_60 = arith.constant dense<0.000000e+00> : vector<4x128xf32>
    %47 = tpu.matmul %44, %46, %cst_60 {dimension_numbers = #tpu.dot_dimension_numbers<[1], [0], [0], [1], [0, 0, 1, 1], [], []>} : vector<4x128xbf16>, vector<128x128xbf16>, vector<4x128xf32> -> vector<4x128xf32>
    %48 = arith.addf %40, %47 : vector<4x128xf32>
    %c2_i32 = arith.constant 2 : i32
    %49 = arith.addi %arg1, %c2_i32 : i32
    %c0_61 = arith.constant 0 : index
    %c0_62 = arith.constant 0 : index
    %c0_63 = arith.constant 0 : index
    %50 = arith.index_cast %49 : i32 to index
    %c0_64 = arith.constant 0 : index
    %c0_65 = arith.constant 0 : index
    %51 = vector.load %arg2[%c0_61, %c0_62, %c0_63, %50, %c0_64, %c0_65] : memref<1x1x1x6x6x128xbf16, #tpu.memory_space<vmem>>, vector<1x1x1x1x4x128xbf16>
    %52 = vector.shape_cast %51 : vector<1x1x1x1x4x128xbf16> to vector<4x128xbf16>
    %c2_66 = arith.constant 2 : index
    %c0_67 = arith.constant 0 : index
    %c0_68 = arith.constant 0 : index
    %c0_69 = arith.constant 0 : index
    %53 = vector.load %arg3[%c2_66, %c0_67, %c0_68, %c0_69] : memref<3x3x128x128xbf16, #tpu.memory_space<vmem>>, vector<1x1x128x128xbf16>
    %54 = vector.shape_cast %53 : vector<1x1x128x128xbf16> to vector<128x128xbf16>
    %cst_70 = arith.constant dense<0.000000e+00> : vector<4x128xf32>
    %55 = tpu.matmul %52, %54, %cst_70 {dimension_numbers = #tpu.dot_dimension_numbers<[1], [0], [0], [1], [0, 0, 1, 1], [], []>} : vector<4x128xbf16>, vector<128x128xbf16>, vector<4x128xf32> -> vector<4x128xf32>
    %56 = arith.addf %48, %55 : vector<4x128xf32>
    %c2_i32_71 = arith.constant 2 : i32
    %57 = arith.addi %arg1, %c2_i32_71 : i32
    %c0_72 = arith.constant 0 : index
    %c0_73 = arith.constant 0 : index
    %c0_74 = arith.constant 0 : index
    %58 = arith.index_cast %57 : i32 to index
    %c1_75 = arith.constant 1 : index
    %c0_76 = arith.constant 0 : index
    %59 = vector.load %arg2[%c0_72, %c0_73, %c0_74, %58, %c1_75, %c0_76] : memref<1x1x1x6x6x128xbf16, #tpu.memory_space<vmem>>, vector<1x1x1x1x4x128xbf16>
    %60 = vector.shape_cast %59 : vector<1x1x1x1x4x128xbf16> to vector<4x128xbf16>
    %c2_77 = arith.constant 2 : index
    %c1_78 = arith.constant 1 : index
    %c0_79 = arith.constant 0 : index
    %c0_80 = arith.constant 0 : index
    %61 = vector.load %arg3[%c2_77, %c1_78, %c0_79, %c0_80] : memref<3x3x128x128xbf16, #tpu.memory_space<vmem>>, vector<1x1x128x128xbf16>
    %62 = vector.shape_cast %61 : vector<1x1x128x128xbf16> to vector<128x128xbf16>
    %cst_81 = arith.constant dense<0.000000e+00> : vector<4x128xf32>
    %63 = tpu.matmul %60, %62, %cst_81 {dimension_numbers = #tpu.dot_dimension_numbers<[1], [0], [0], [1], [0, 0, 1, 1], [], []>} : vector<4x128xbf16>, vector<128x128xbf16>, vector<4x128xf32> -> vector<4x128xf32>
    %64 = arith.addf %56, %63 : vector<4x128xf32>
    %c2_i32_82 = arith.constant 2 : i32
    %65 = arith.addi %arg1, %c2_i32_82 : i32
    %c0_83 = arith.constant 0 : index
    %c0_84 = arith.constant 0 : index
    %c0_85 = arith.constant 0 : index
    %66 = arith.index_cast %65 : i32 to index
    %c2_86 = arith.constant 2 : index
    %c0_87 = arith.constant 0 : index
    %67 = vector.load %arg2[%c0_83, %c0_84, %c0_85, %66, %c2_86, %c0_87] : memref<1x1x1x6x6x128xbf16, #tpu.memory_space<vmem>>, vector<1x1x1x1x4x128xbf16>
    %68 = vector.shape_cast %67 : vector<1x1x1x1x4x128xbf16> to vector<4x128xbf16>
    %c2_88 = arith.constant 2 : index
    %c2_89 = arith.constant 2 : index
    %c0_90 = arith.constant 0 : index
    %c0_91 = arith.constant 0 : index
    %69 = vector.load %arg3[%c2_88, %c2_89, %c0_90, %c0_91] : memref<3x3x128x128xbf16, #tpu.memory_space<vmem>>, vector<1x1x128x128xbf16>
    %70 = vector.shape_cast %69 : vector<1x1x128x128xbf16> to vector<128x128xbf16>
    %cst_92 = arith.constant dense<0.000000e+00> : vector<4x128xf32>
    %71 = tpu.matmul %68, %70, %cst_92 {dimension_numbers = #tpu.dot_dimension_numbers<[1], [0], [0], [1], [0, 0, 1, 1], [], []>} : vector<4x128xbf16>, vector<128x128xbf16>, vector<4x128xf32> -> vector<4x128xf32>
    %72 = arith.addf %64, %71 : vector<4x128xf32>
    %c0_93 = arith.constant 0 : index
    %c0_94 = arith.constant 0 : index
    %73 = vector.load %arg4[%c0_93, %c0_94] : memref<1x128xf32, #tpu.memory_space<vmem>>, vector<1x128xf32>
    %74 = vector.broadcast %73 : vector<1x128xf32> to vector<4x128xf32>
    %75 = arith.addf %72, %74 : vector<4x128xf32>
    %c0_95 = arith.constant 0 : index
    %c0_96 = arith.constant 0 : index
    %c0_97 = arith.constant 0 : index
    %c0_98 = arith.constant 0 : index
    %76 = vector.load %arg5[%c0_95, %c0_96, %c0_97, %c0_98] : memref<1x1x4x128xbf16, #tpu.memory_space<vmem>>, vector<1x1x4x128xbf16>
    %77 = vector.shape_cast %76 : vector<1x1x4x128xbf16> to vector<4x128xbf16>
    %c0_99 = arith.constant 0 : index
    %c0_100 = arith.constant 0 : index
    %78 = vector.load %arg6[%c0_99, %c0_100] : memref<128x128xbf16, #tpu.memory_space<vmem>>, vector<128x128xbf16>
    %cst_101 = arith.constant dense<0.000000e+00> : vector<4x128xf32>
    %79 = tpu.matmul %77, %78, %cst_101 {dimension_numbers = #tpu.dot_dimension_numbers<[1], [0], [0], [1], [0, 0, 1, 1], [], []>} : vector<4x128xbf16>, vector<128x128xbf16>, vector<4x128xf32> -> vector<4x128xf32>
    %80 = arith.addf %75, %79 : vector<4x128xf32>
    %c0_102 = arith.constant 0 : index
    %c0_103 = arith.constant 0 : index
    %81 = vector.load %arg7[%c0_102, %c0_103] : memref<1x128xf32, #tpu.memory_space<vmem>>, vector<1x128xf32>
    %82 = vector.broadcast %81 : vector<1x128xf32> to vector<4x128xf32>
    %83 = arith.addf %80, %82 : vector<4x128xf32>
    %84 = arith.truncf %83 : vector<4x128xf32> to vector<4x128xbf16>
    %c0_104 = arith.constant 0 : index
    %c0_105 = arith.constant 0 : index
    %c0_106 = arith.constant 0 : index
    %c0_107 = arith.constant 0 : index
    %85 = vector.load %arg8[%c0_104, %c0_105, %c0_106, %c0_107] : memref<1x1x4x128xbf16, #tpu.memory_space<vmem>>, vector<1x1x4x128xbf16>
    %86 = vector.shape_cast %85 : vector<1x1x4x128xbf16> to vector<4x128xbf16>
    %87 = vector.shape_cast %84 : vector<4x128xbf16> to vector<1x1x4x128xbf16>
    tpu.vector_store %arg8[%c0_104, %c0_105, %c0_106, %c0_107], %87 {strides = array<i32>} : memref<1x1x4x128xbf16, #tpu.memory_space<vmem>>, vector<1x1x4x128xbf16>,
    return
  }
  func.func @transform_0(%arg0: i32, %arg1: i32) -> (i32, i32, i32, i32, i32, i32) {
    %c0_i32 = arith.constant 0 : i32
    %c0_i32_0 = arith.constant 0 : i32
    %c0_i32_1 = arith.constant 0 : i32
    %c0_i32_2 = arith.constant 0 : i32
    %c0_i32_3 = arith.constant 0 : i32
    %c0_i32_4 = arith.constant 0 : i32
    return %arg0, %c0_i32, %c0_i32_0, %c0_i32_1, %c0_i32_2, %c0_i32_3 : i32, i32, i32, i32, i32, i32
  }
  func.func @transform_1(%arg0: i32, %arg1: i32) -> (i32, i32, i32, i32) {
    %c0_i32 = arith.constant 0 : i32
    %c0_i32_0 = arith.constant 0 : i32
    %c0_i32_1 = arith.constant 0 : i32
    %c0_i32_2 = arith.constant 0 : i32
    %c0_i32_3 = arith.constant 0 : i32
    return %c0_i32, %c0_i32_0, %c0_i32_1, %c0_i32_2 : i32, i32, i32, i32
  }
  func.func @transform_2(%arg0: i32, %arg1: i32) -> (i32, i32) {
    %c0_i32 = arith.constant 0 : i32
    %c0_i32_0 = arith.constant 0 : i32
    %c0_i32_1 = arith.constant 0 : i32
    return %c0_i32, %c0_i32_0 : i32, i32
  }
  func.func @transform_3(%arg0: i32, %arg1: i32) -> (i32, i32, i32, i32) {
    %c0_i32 = arith.constant 0 : i32
    %c0_i32_0 = arith.constant 0 : i32
    %c0_i32_1 = arith.constant 0 : i32
    return %arg0, %arg1, %c0_i32, %c0_i32_0 : i32, i32, i32, i32
  }
  func.func @transform_4(%arg0: i32, %arg1: i32) -> (i32, i32) {
    %c0_i32 = arith.constant 0 : i32
    %c0_i32_0 = arith.constant 0 : i32
    %c0_i32_1 = arith.constant 0 : i32
    return %c0_i32, %c0_i32_0 : i32, i32
  }
  func.func @transform_5(%arg0: i32, %arg1: i32) -> (i32, i32) {
    %c0_i32 = arith.constant 0 : i32
    %c0_i32_0 = arith.constant 0 : i32
    %c0_i32_1 = arith.constant 0 : i32
    return %c0_i32, %c0_i32_0 : i32, i32
  }
  func.func @transform_6(%arg0: i32, %arg1: i32) -> (i32, i32, i32, i32) {
    %c0_i32 = arith.constant 0 : i32
    %c0_i32_0 = arith.constant 0 : i32
    %c0_i32_1 = arith.constant 0 : i32
    return %arg0, %arg1, %c0_i32, %c0_i32_0 : i32, i32, i32, i32
  }
}

module attributes {stable_mosaic.version = 11 : i64} {
  func.func @kernel(%arg0: i32, %arg1: i32, %arg2: memref<1x2x2x3x3x128xbf16, #tpu.memory_space<vmem>>, %arg3: memref<3x3x128x128xbf16, #tpu.memory_space<vmem>>, %arg4: memref<1x128xf32, #tpu.memory_space<vmem>>, %arg5: memref<1x128xf32, #tpu.memory_space<vmem>>, %arg6: memref<1x128xf32, #tpu.memory_space<vmem>>, %arg7: memref<1x1x2x128xbf16, #tpu.memory_space<vmem>>) attributes {dimension_semantics = [#tpu.dimension_semantics<parallel>, #tpu.dimension_semantics<parallel>], iteration_bounds = array<i64: 2, 2>, scalar_prefetch = 0 : i64, scratch_operands = 0 : i64, tpu.core_type = #tpu.core_type<tc>, window_params = [{transform_indices = @transform_0, window_bounds = array<i64: 1, 2, 2, 3, 3, 128>}, {pipeline_mode = #tpu.pipeline_mode<synchronous>, transform_indices = @transform_1, window_bounds = array<i64: 3, 3, 128, 128>}, {pipeline_mode = #tpu.pipeline_mode<synchronous>, transform_indices = @transform_2, window_bounds = array<i64: 1, 128>}, {pipeline_mode = #tpu.pipeline_mode<synchronous>, transform_indices = @transform_3, window_bounds = array<i64: 1, 128>}, {pipeline_mode = #tpu.pipeline_mode<synchronous>, transform_indices = @transform_4, window_bounds = array<i64: 1, 128>}, {transform_indices = @transform_5, window_bounds = array<i64: 1, 1, 2, 128>}]} {
    %cst = arith.constant 0.000000e+00 : f32
    %0 = vector.broadcast %cst : f32 to vector<2x128xf32>
    %c0_i32 = arith.constant 0 : i32
    %1 = arith.addi %arg1, %c0_i32 : i32
    %c0 = arith.constant 0 : index
    %c0_0 = arith.constant 0 : index
    %c0_1 = arith.constant 0 : index
    %2 = arith.index_cast %1 : i32 to index
    %c0_2 = arith.constant 0 : index
    %c0_3 = arith.constant 0 : index
    %3 = vector.load %arg2[%c0, %c0_0, %c0_1, %2, %c0_2, %c0_3] : memref<1x2x2x3x3x128xbf16, #tpu.memory_space<vmem>>, vector<1x1x1x1x2x128xbf16>
    %4 = vector.shape_cast %3 : vector<1x1x1x1x2x128xbf16> to vector<2x128xbf16>
    %c0_4 = arith.constant 0 : index
    %c0_5 = arith.constant 0 : index
    %c0_6 = arith.constant 0 : index
    %c0_7 = arith.constant 0 : index
    %5 = vector.load %arg3[%c0_4, %c0_5, %c0_6, %c0_7] : memref<3x3x128x128xbf16, #tpu.memory_space<vmem>>, vector<1x1x128x128xbf16>
    %6 = vector.shape_cast %5 : vector<1x1x128x128xbf16> to vector<128x128xbf16>
    %cst_8 = arith.constant dense<0.000000e+00> : vector<2x128xf32>
    %7 = tpu.matmul %4, %6, %cst_8 {dimension_numbers = #tpu.dot_dimension_numbers<[1], [0], [0], [1], [0, 0, 1, 1], [], []>} : vector<2x128xbf16>, vector<128x128xbf16>, vector<2x128xf32> -> vector<2x128xf32>
    %8 = arith.addf %0, %7 : vector<2x128xf32>
    %c0_i32_9 = arith.constant 0 : i32
    %9 = arith.addi %arg1, %c0_i32_9 : i32
    %c0_10 = arith.constant 0 : index
    %c0_11 = arith.constant 0 : index
    %c1 = arith.constant 1 : index
    %10 = arith.index_cast %9 : i32 to index
    %c0_12 = arith.constant 0 : index
    %c0_13 = arith.constant 0 : index
    %11 = vector.load %arg2[%c0_10, %c0_11, %c1, %10, %c0_12, %c0_13] : memref<1x2x2x3x3x128xbf16, #tpu.memory_space<vmem>>, vector<1x1x1x1x2x128xbf16>
    %12 = vector.shape_cast %11 : vector<1x1x1x1x2x128xbf16> to vector<2x128xbf16>
    %c0_14 = arith.constant 0 : index
    %c1_15 = arith.constant 1 : index
    %c0_16 = arith.constant 0 : index
    %c0_17 = arith.constant 0 : index
    %13 = vector.load %arg3[%c0_14, %c1_15, %c0_16, %c0_17] : memref<3x3x128x128xbf16, #tpu.memory_space<vmem>>, vector<1x1x128x128xbf16>
    %14 = vector.shape_cast %13 : vector<1x1x128x128xbf16> to vector<128x128xbf16>
    %cst_18 = arith.constant dense<0.000000e+00> : vector<2x128xf32>
    %15 = tpu.matmul %12, %14, %cst_18 {dimension_numbers = #tpu.dot_dimension_numbers<[1], [0], [0], [1], [0, 0, 1, 1], [], []>} : vector<2x128xbf16>, vector<128x128xbf16>, vector<2x128xf32> -> vector<2x128xf32>
    %16 = arith.addf %8, %15 : vector<2x128xf32>
    %c0_i32_19 = arith.constant 0 : i32
    %17 = arith.addi %arg1, %c0_i32_19 : i32
    %c0_20 = arith.constant 0 : index
    %c0_21 = arith.constant 0 : index
    %c0_22 = arith.constant 0 : index
    %18 = arith.index_cast %17 : i32 to index
    %c1_23 = arith.constant 1 : index
    %c0_24 = arith.constant 0 : index
    %19 = vector.load %arg2[%c0_20, %c0_21, %c0_22, %18, %c1_23, %c0_24] : memref<1x2x2x3x3x128xbf16, #tpu.memory_space<vmem>>, vector<1x1x1x1x2x128xbf16>
    %20 = vector.shape_cast %19 : vector<1x1x1x1x2x128xbf16> to vector<2x128xbf16>
    %c0_25 = arith.constant 0 : index
    %c2 = arith.constant 2 : index
    %c0_26 = arith.constant 0 : index
    %c0_27 = arith.constant 0 : index
    %21 = vector.load %arg3[%c0_25, %c2, %c0_26, %c0_27] : memref<3x3x128x128xbf16, #tpu.memory_space<vmem>>, vector<1x1x128x128xbf16>
    %22 = vector.shape_cast %21 : vector<1x1x128x128xbf16> to vector<128x128xbf16>
    %cst_28 = arith.constant dense<0.000000e+00> : vector<2x128xf32>
    %23 = tpu.matmul %20, %22, %cst_28 {dimension_numbers = #tpu.dot_dimension_numbers<[1], [0], [0], [1], [0, 0, 1, 1], [], []>} : vector<2x128xbf16>, vector<128x128xbf16>, vector<2x128xf32> -> vector<2x128xf32>
    %24 = arith.addf %16, %23 : vector<2x128xf32>
    %c0_i32_29 = arith.constant 0 : i32
    %25 = arith.addi %arg1, %c0_i32_29 : i32
    %c0_30 = arith.constant 0 : index
    %c1_31 = arith.constant 1 : index
    %c0_32 = arith.constant 0 : index
    %26 = arith.index_cast %25 : i32 to index
    %c0_33 = arith.constant 0 : index
    %c0_34 = arith.constant 0 : index
    %27 = vector.load %arg2[%c0_30, %c1_31, %c0_32, %26, %c0_33, %c0_34] : memref<1x2x2x3x3x128xbf16, #tpu.memory_space<vmem>>, vector<1x1x1x1x2x128xbf16>
    %28 = vector.shape_cast %27 : vector<1x1x1x1x2x128xbf16> to vector<2x128xbf16>
    %c1_35 = arith.constant 1 : index
    %c0_36 = arith.constant 0 : index
    %c0_37 = arith.constant 0 : index
    %c0_38 = arith.constant 0 : index
    %29 = vector.load %arg3[%c1_35, %c0_36, %c0_37, %c0_38] : memref<3x3x128x128xbf16, #tpu.memory_space<vmem>>, vector<1x1x128x128xbf16>
    %30 = vector.shape_cast %29 : vector<1x1x128x128xbf16> to vector<128x128xbf16>
    %cst_39 = arith.constant dense<0.000000e+00> : vector<2x128xf32>
    %31 = tpu.matmul %28, %30, %cst_39 {dimension_numbers = #tpu.dot_dimension_numbers<[1], [0], [0], [1], [0, 0, 1, 1], [], []>} : vector<2x128xbf16>, vector<128x128xbf16>, vector<2x128xf32> -> vector<2x128xf32>
    %32 = arith.addf %24, %31 : vector<2x128xf32>
    %c0_i32_40 = arith.constant 0 : i32
    %33 = arith.addi %arg1, %c0_i32_40 : i32
    %c0_41 = arith.constant 0 : index
    %c1_42 = arith.constant 1 : index
    %c1_43 = arith.constant 1 : index
    %34 = arith.index_cast %33 : i32 to index
    %c0_44 = arith.constant 0 : index
    %c0_45 = arith.constant 0 : index
    %35 = vector.load %arg2[%c0_41, %c1_42, %c1_43, %34, %c0_44, %c0_45] : memref<1x2x2x3x3x128xbf16, #tpu.memory_space<vmem>>, vector<1x1x1x1x2x128xbf16>
    %36 = vector.shape_cast %35 : vector<1x1x1x1x2x128xbf16> to vector<2x128xbf16>
    %c1_46 = arith.constant 1 : index
    %c1_47 = arith.constant 1 : index
    %c0_48 = arith.constant 0 : index
    %c0_49 = arith.constant 0 : index
    %37 = vector.load %arg3[%c1_46, %c1_47, %c0_48, %c0_49] : memref<3x3x128x128xbf16, #tpu.memory_space<vmem>>, vector<1x1x128x128xbf16>
    %38 = vector.shape_cast %37 : vector<1x1x128x128xbf16> to vector<128x128xbf16>
    %cst_50 = arith.constant dense<0.000000e+00> : vector<2x128xf32>
    %39 = tpu.matmul %36, %38, %cst_50 {dimension_numbers = #tpu.dot_dimension_numbers<[1], [0], [0], [1], [0, 0, 1, 1], [], []>} : vector<2x128xbf16>, vector<128x128xbf16>, vector<2x128xf32> -> vector<2x128xf32>
    %40 = arith.addf %32, %39 : vector<2x128xf32>
    %c0_i32_51 = arith.constant 0 : i32
    %41 = arith.addi %arg1, %c0_i32_51 : i32
    %c0_52 = arith.constant 0 : index
    %c1_53 = arith.constant 1 : index
    %c0_54 = arith.constant 0 : index
    %42 = arith.index_cast %41 : i32 to index
    %c1_55 = arith.constant 1 : index
    %c0_56 = arith.constant 0 : index
    %43 = vector.load %arg2[%c0_52, %c1_53, %c0_54, %42, %c1_55, %c0_56] : memref<1x2x2x3x3x128xbf16, #tpu.memory_space<vmem>>, vector<1x1x1x1x2x128xbf16>
    %44 = vector.shape_cast %43 : vector<1x1x1x1x2x128xbf16> to vector<2x128xbf16>
    %c1_57 = arith.constant 1 : index
    %c2_58 = arith.constant 2 : index
    %c0_59 = arith.constant 0 : index
    %c0_60 = arith.constant 0 : index
    %45 = vector.load %arg3[%c1_57, %c2_58, %c0_59, %c0_60] : memref<3x3x128x128xbf16, #tpu.memory_space<vmem>>, vector<1x1x128x128xbf16>
    %46 = vector.shape_cast %45 : vector<1x1x128x128xbf16> to vector<128x128xbf16>
    %cst_61 = arith.constant dense<0.000000e+00> : vector<2x128xf32>
    %47 = tpu.matmul %44, %46, %cst_61 {dimension_numbers = #tpu.dot_dimension_numbers<[1], [0], [0], [1], [0, 0, 1, 1], [], []>} : vector<2x128xbf16>, vector<128x128xbf16>, vector<2x128xf32> -> vector<2x128xf32>
    %48 = arith.addf %40, %47 : vector<2x128xf32>
    %c1_i32 = arith.constant 1 : i32
    %49 = arith.addi %arg1, %c1_i32 : i32
    %c0_62 = arith.constant 0 : index
    %c0_63 = arith.constant 0 : index
    %c0_64 = arith.constant 0 : index
    %50 = arith.index_cast %49 : i32 to index
    %c0_65 = arith.constant 0 : index
    %c0_66 = arith.constant 0 : index
    %51 = vector.load %arg2[%c0_62, %c0_63, %c0_64, %50, %c0_65, %c0_66] : memref<1x2x2x3x3x128xbf16, #tpu.memory_space<vmem>>, vector<1x1x1x1x2x128xbf16>
    %52 = vector.shape_cast %51 : vector<1x1x1x1x2x128xbf16> to vector<2x128xbf16>
    %c2_67 = arith.constant 2 : index
    %c0_68 = arith.constant 0 : index
    %c0_69 = arith.constant 0 : index
    %c0_70 = arith.constant 0 : index
    %53 = vector.load %arg3[%c2_67, %c0_68, %c0_69, %c0_70] : memref<3x3x128x128xbf16, #tpu.memory_space<vmem>>, vector<1x1x128x128xbf16>
    %54 = vector.shape_cast %53 : vector<1x1x128x128xbf16> to vector<128x128xbf16>
    %cst_71 = arith.constant dense<0.000000e+00> : vector<2x128xf32>
    %55 = tpu.matmul %52, %54, %cst_71 {dimension_numbers = #tpu.dot_dimension_numbers<[1], [0], [0], [1], [0, 0, 1, 1], [], []>} : vector<2x128xbf16>, vector<128x128xbf16>, vector<2x128xf32> -> vector<2x128xf32>
    %56 = arith.addf %48, %55 : vector<2x128xf32>
    %c1_i32_72 = arith.constant 1 : i32
    %57 = arith.addi %arg1, %c1_i32_72 : i32
    %c0_73 = arith.constant 0 : index
    %c0_74 = arith.constant 0 : index
    %c1_75 = arith.constant 1 : index
    %58 = arith.index_cast %57 : i32 to index
    %c0_76 = arith.constant 0 : index
    %c0_77 = arith.constant 0 : index
    %59 = vector.load %arg2[%c0_73, %c0_74, %c1_75, %58, %c0_76, %c0_77] : memref<1x2x2x3x3x128xbf16, #tpu.memory_space<vmem>>, vector<1x1x1x1x2x128xbf16>
    %60 = vector.shape_cast %59 : vector<1x1x1x1x2x128xbf16> to vector<2x128xbf16>
    %c2_78 = arith.constant 2 : index
    %c1_79 = arith.constant 1 : index
    %c0_80 = arith.constant 0 : index
    %c0_81 = arith.constant 0 : index
    %61 = vector.load %arg3[%c2_78, %c1_79, %c0_80, %c0_81] : memref<3x3x128x128xbf16, #tpu.memory_space<vmem>>, vector<1x1x128x128xbf16>
    %62 = vector.shape_cast %61 : vector<1x1x128x128xbf16> to vector<128x128xbf16>
    %cst_82 = arith.constant dense<0.000000e+00> : vector<2x128xf32>
    %63 = tpu.matmul %60, %62, %cst_82 {dimension_numbers = #tpu.dot_dimension_numbers<[1], [0], [0], [1], [0, 0, 1, 1], [], []>} : vector<2x128xbf16>, vector<128x128xbf16>, vector<2x128xf32> -> vector<2x128xf32>
    %64 = arith.addf %56, %63 : vector<2x128xf32>
    %c1_i32_83 = arith.constant 1 : i32
    %65 = arith.addi %arg1, %c1_i32_83 : i32
    %c0_84 = arith.constant 0 : index
    %c0_85 = arith.constant 0 : index
    %c0_86 = arith.constant 0 : index
    %66 = arith.index_cast %65 : i32 to index
    %c1_87 = arith.constant 1 : index
    %c0_88 = arith.constant 0 : index
    %67 = vector.load %arg2[%c0_84, %c0_85, %c0_86, %66, %c1_87, %c0_88] : memref<1x2x2x3x3x128xbf16, #tpu.memory_space<vmem>>, vector<1x1x1x1x2x128xbf16>
    %68 = vector.shape_cast %67 : vector<1x1x1x1x2x128xbf16> to vector<2x128xbf16>
    %c2_89 = arith.constant 2 : index
    %c2_90 = arith.constant 2 : index
    %c0_91 = arith.constant 0 : index
    %c0_92 = arith.constant 0 : index
    %69 = vector.load %arg3[%c2_89, %c2_90, %c0_91, %c0_92] : memref<3x3x128x128xbf16, #tpu.memory_space<vmem>>, vector<1x1x128x128xbf16>
    %70 = vector.shape_cast %69 : vector<1x1x128x128xbf16> to vector<128x128xbf16>
    %cst_93 = arith.constant dense<0.000000e+00> : vector<2x128xf32>
    %71 = tpu.matmul %68, %70, %cst_93 {dimension_numbers = #tpu.dot_dimension_numbers<[1], [0], [0], [1], [0, 0, 1, 1], [], []>} : vector<2x128xbf16>, vector<128x128xbf16>, vector<2x128xf32> -> vector<2x128xf32>
    %72 = arith.addf %64, %71 : vector<2x128xf32>
    %c0_94 = arith.constant 0 : index
    %c0_95 = arith.constant 0 : index
    %73 = vector.load %arg4[%c0_94, %c0_95] : memref<1x128xf32, #tpu.memory_space<vmem>>, vector<1x128xf32>
    %74 = vector.broadcast %73 : vector<1x128xf32> to vector<2x128xf32>
    %75 = arith.addf %72, %74 : vector<2x128xf32>
    %c0_96 = arith.constant 0 : index
    %c0_97 = arith.constant 0 : index
    %76 = vector.load %arg5[%c0_96, %c0_97] : memref<1x128xf32, #tpu.memory_space<vmem>>, vector<1x128xf32>
    %77 = vector.broadcast %76 : vector<1x128xf32> to vector<2x128xf32>
    %78 = arith.mulf %75, %77 : vector<2x128xf32>
    %c0_98 = arith.constant 0 : index
    %c0_99 = arith.constant 0 : index
    %79 = vector.load %arg6[%c0_98, %c0_99] : memref<1x128xf32, #tpu.memory_space<vmem>>, vector<1x128xf32>
    %80 = vector.broadcast %79 : vector<1x128xf32> to vector<2x128xf32>
    %81 = arith.addf %78, %80 : vector<2x128xf32>
    %cst_100 = arith.constant 0.000000e+00 : f32
    %82 = vector.broadcast %cst_100 : f32 to vector<2x128xf32>
    %83 = arith.maximumf %81, %82 : vector<2x128xf32>
    %84 = arith.truncf %83 : vector<2x128xf32> to vector<2x128xbf16>
    %c0_101 = arith.constant 0 : index
    %c0_102 = arith.constant 0 : index
    %c0_103 = arith.constant 0 : index
    %c0_104 = arith.constant 0 : index
    %85 = vector.load %arg7[%c0_101, %c0_102, %c0_103, %c0_104] : memref<1x1x2x128xbf16, #tpu.memory_space<vmem>>, vector<1x1x2x128xbf16>
    %86 = vector.shape_cast %85 : vector<1x1x2x128xbf16> to vector<2x128xbf16>
    %87 = vector.shape_cast %84 : vector<2x128xbf16> to vector<1x1x2x128xbf16>
    tpu.vector_store %arg7[%c0_101, %c0_102, %c0_103, %c0_104], %87 {strides = array<i32>} : memref<1x1x2x128xbf16, #tpu.memory_space<vmem>>, vector<1x1x2x128xbf16>,
    return
  }
  func.func @transform_0(%arg0: i32, %arg1: i32) -> (i32, i32, i32, i32, i32, i32) {
    %c0_i32 = arith.constant 0 : i32
    %c0_i32_0 = arith.constant 0 : i32
    %c0_i32_1 = arith.constant 0 : i32
    %c0_i32_2 = arith.constant 0 : i32
    %c0_i32_3 = arith.constant 0 : i32
    %c0_i32_4 = arith.constant 0 : i32
    return %arg0, %c0_i32, %c0_i32_0, %c0_i32_1, %c0_i32_2, %c0_i32_3 : i32, i32, i32, i32, i32, i32
  }
  func.func @transform_1(%arg0: i32, %arg1: i32) -> (i32, i32, i32, i32) {
    %c0_i32 = arith.constant 0 : i32
    %c0_i32_0 = arith.constant 0 : i32
    %c0_i32_1 = arith.constant 0 : i32
    %c0_i32_2 = arith.constant 0 : i32
    %c0_i32_3 = arith.constant 0 : i32
    return %c0_i32, %c0_i32_0, %c0_i32_1, %c0_i32_2 : i32, i32, i32, i32
  }
  func.func @transform_2(%arg0: i32, %arg1: i32) -> (i32, i32) {
    %c0_i32 = arith.constant 0 : i32
    %c0_i32_0 = arith.constant 0 : i32
    %c0_i32_1 = arith.constant 0 : i32
    return %c0_i32, %c0_i32_0 : i32, i32
  }
  func.func @transform_3(%arg0: i32, %arg1: i32) -> (i32, i32) {
    %c0_i32 = arith.constant 0 : i32
    %c0_i32_0 = arith.constant 0 : i32
    %c0_i32_1 = arith.constant 0 : i32
    return %c0_i32, %c0_i32_0 : i32, i32
  }
  func.func @transform_4(%arg0: i32, %arg1: i32) -> (i32, i32) {
    %c0_i32 = arith.constant 0 : i32
    %c0_i32_0 = arith.constant 0 : i32
    %c0_i32_1 = arith.constant 0 : i32
    return %c0_i32, %c0_i32_0 : i32, i32
  }
  func.func @transform_5(%arg0: i32, %arg1: i32) -> (i32, i32, i32, i32) {
    %c0_i32 = arith.constant 0 : i32
    %c0_i32_0 = arith.constant 0 : i32
    %c0_i32_1 = arith.constant 0 : i32
    return %arg0, %arg1, %c0_i32, %c0_i32_0 : i32, i32, i32, i32
  }
}

module attributes {stable_mosaic.version = 11 : i64} {
  func.func @kernel(%arg0: i32, %arg1: i32, %arg2: memref<1x1x1x4x4x128xbf16, #tpu.memory_space<vmem>>, %arg3: memref<3x3x128x128xbf16, #tpu.memory_space<vmem>>, %arg4: memref<1x128xf32, #tpu.memory_space<vmem>>, %arg5: memref<1x1x2x128xbf16, #tpu.memory_space<vmem>>, %arg6: memref<128x128xbf16, #tpu.memory_space<vmem>>, %arg7: memref<1x128xf32, #tpu.memory_space<vmem>>, %arg8: memref<1x1x2x128xbf16, #tpu.memory_space<vmem>>) attributes {dimension_semantics = [#tpu.dimension_semantics<parallel>, #tpu.dimension_semantics<parallel>], iteration_bounds = array<i64: 2, 2>, scalar_prefetch = 0 : i64, scratch_operands = 0 : i64, tpu.core_type = #tpu.core_type<tc>, window_params = [{transform_indices = @transform_0, window_bounds = array<i64: 1, 1, 1, 4, 4, 128>}, {pipeline_mode = #tpu.pipeline_mode<synchronous>, transform_indices = @transform_1, window_bounds = array<i64: 3, 3, 128, 128>}, {pipeline_mode = #tpu.pipeline_mode<synchronous>, transform_indices = @transform_2, window_bounds = array<i64: 1, 128>}, {transform_indices = @transform_3, window_bounds = array<i64: 1, 1, 2, 128>}, {pipeline_mode = #tpu.pipeline_mode<synchronous>, transform_indices = @transform_4, window_bounds = array<i64: 128, 128>}, {pipeline_mode = #tpu.pipeline_mode<synchronous>, transform_indices = @transform_5, window_bounds = array<i64: 1, 128>}, {transform_indices = @transform_6, window_bounds = array<i64: 1, 1, 2, 128>}]} {
    %cst = arith.constant 0.000000e+00 : f32
    %0 = vector.broadcast %cst : f32 to vector<2x128xf32>
    %c0_i32 = arith.constant 0 : i32
    %1 = arith.addi %arg1, %c0_i32 : i32
    %c0 = arith.constant 0 : index
    %c0_0 = arith.constant 0 : index
    %c0_1 = arith.constant 0 : index
    %2 = arith.index_cast %1 : i32 to index
    %c0_2 = arith.constant 0 : index
    %c0_3 = arith.constant 0 : index
    %3 = vector.load %arg2[%c0, %c0_0, %c0_1, %2, %c0_2, %c0_3] : memref<1x1x1x4x4x128xbf16, #tpu.memory_space<vmem>>, vector<1x1x1x1x2x128xbf16>
    %4 = vector.shape_cast %3 : vector<1x1x1x1x2x128xbf16> to vector<2x128xbf16>
    %c0_4 = arith.constant 0 : index
    %c0_5 = arith.constant 0 : index
    %c0_6 = arith.constant 0 : index
    %c0_7 = arith.constant 0 : index
    %5 = vector.load %arg3[%c0_4, %c0_5, %c0_6, %c0_7] : memref<3x3x128x128xbf16, #tpu.memory_space<vmem>>, vector<1x1x128x128xbf16>
    %6 = vector.shape_cast %5 : vector<1x1x128x128xbf16> to vector<128x128xbf16>
    %cst_8 = arith.constant dense<0.000000e+00> : vector<2x128xf32>
    %7 = tpu.matmul %4, %6, %cst_8 {dimension_numbers = #tpu.dot_dimension_numbers<[1], [0], [0], [1], [0, 0, 1, 1], [], []>} : vector<2x128xbf16>, vector<128x128xbf16>, vector<2x128xf32> -> vector<2x128xf32>
    %8 = arith.addf %0, %7 : vector<2x128xf32>
    %c0_i32_9 = arith.constant 0 : i32
    %9 = arith.addi %arg1, %c0_i32_9 : i32
    %c0_10 = arith.constant 0 : index
    %c0_11 = arith.constant 0 : index
    %c0_12 = arith.constant 0 : index
    %10 = arith.index_cast %9 : i32 to index
    %c1 = arith.constant 1 : index
    %c0_13 = arith.constant 0 : index
    %11 = vector.load %arg2[%c0_10, %c0_11, %c0_12, %10, %c1, %c0_13] : memref<1x1x1x4x4x128xbf16, #tpu.memory_space<vmem>>, vector<1x1x1x1x2x128xbf16>
    %12 = vector.shape_cast %11 : vector<1x1x1x1x2x128xbf16> to vector<2x128xbf16>
    %c0_14 = arith.constant 0 : index
    %c1_15 = arith.constant 1 : index
    %c0_16 = arith.constant 0 : index
    %c0_17 = arith.constant 0 : index
    %13 = vector.load %arg3[%c0_14, %c1_15, %c0_16, %c0_17] : memref<3x3x128x128xbf16, #tpu.memory_space<vmem>>, vector<1x1x128x128xbf16>
    %14 = vector.shape_cast %13 : vector<1x1x128x128xbf16> to vector<128x128xbf16>
    %cst_18 = arith.constant dense<0.000000e+00> : vector<2x128xf32>
    %15 = tpu.matmul %12, %14, %cst_18 {dimension_numbers = #tpu.dot_dimension_numbers<[1], [0], [0], [1], [0, 0, 1, 1], [], []>} : vector<2x128xbf16>, vector<128x128xbf16>, vector<2x128xf32> -> vector<2x128xf32>
    %16 = arith.addf %8, %15 : vector<2x128xf32>
    %c0_i32_19 = arith.constant 0 : i32
    %17 = arith.addi %arg1, %c0_i32_19 : i32
    %c0_20 = arith.constant 0 : index
    %c0_21 = arith.constant 0 : index
    %c0_22 = arith.constant 0 : index
    %18 = arith.index_cast %17 : i32 to index
    %c2 = arith.constant 2 : index
    %c0_23 = arith.constant 0 : index
    %19 = vector.load %arg2[%c0_20, %c0_21, %c0_22, %18, %c2, %c0_23] : memref<1x1x1x4x4x128xbf16, #tpu.memory_space<vmem>>, vector<1x1x1x1x2x128xbf16>
    %20 = vector.shape_cast %19 : vector<1x1x1x1x2x128xbf16> to vector<2x128xbf16>
    %c0_24 = arith.constant 0 : index
    %c2_25 = arith.constant 2 : index
    %c0_26 = arith.constant 0 : index
    %c0_27 = arith.constant 0 : index
    %21 = vector.load %arg3[%c0_24, %c2_25, %c0_26, %c0_27] : memref<3x3x128x128xbf16, #tpu.memory_space<vmem>>, vector<1x1x128x128xbf16>
    %22 = vector.shape_cast %21 : vector<1x1x128x128xbf16> to vector<128x128xbf16>
    %cst_28 = arith.constant dense<0.000000e+00> : vector<2x128xf32>
    %23 = tpu.matmul %20, %22, %cst_28 {dimension_numbers = #tpu.dot_dimension_numbers<[1], [0], [0], [1], [0, 0, 1, 1], [], []>} : vector<2x128xbf16>, vector<128x128xbf16>, vector<2x128xf32> -> vector<2x128xf32>
    %24 = arith.addf %16, %23 : vector<2x128xf32>
    %c1_i32 = arith.constant 1 : i32
    %25 = arith.addi %arg1, %c1_i32 : i32
    %c0_29 = arith.constant 0 : index
    %c0_30 = arith.constant 0 : index
    %c0_31 = arith.constant 0 : index
    %26 = arith.index_cast %25 : i32 to index
    %c0_32 = arith.constant 0 : index
    %c0_33 = arith.constant 0 : index
    %27 = vector.load %arg2[%c0_29, %c0_30, %c0_31, %26, %c0_32, %c0_33] : memref<1x1x1x4x4x128xbf16, #tpu.memory_space<vmem>>, vector<1x1x1x1x2x128xbf16>
    %28 = vector.shape_cast %27 : vector<1x1x1x1x2x128xbf16> to vector<2x128xbf16>
    %c1_34 = arith.constant 1 : index
    %c0_35 = arith.constant 0 : index
    %c0_36 = arith.constant 0 : index
    %c0_37 = arith.constant 0 : index
    %29 = vector.load %arg3[%c1_34, %c0_35, %c0_36, %c0_37] : memref<3x3x128x128xbf16, #tpu.memory_space<vmem>>, vector<1x1x128x128xbf16>
    %30 = vector.shape_cast %29 : vector<1x1x128x128xbf16> to vector<128x128xbf16>
    %cst_38 = arith.constant dense<0.000000e+00> : vector<2x128xf32>
    %31 = tpu.matmul %28, %30, %cst_38 {dimension_numbers = #tpu.dot_dimension_numbers<[1], [0], [0], [1], [0, 0, 1, 1], [], []>} : vector<2x128xbf16>, vector<128x128xbf16>, vector<2x128xf32> -> vector<2x128xf32>
    %32 = arith.addf %24, %31 : vector<2x128xf32>
    %c1_i32_39 = arith.constant 1 : i32
    %33 = arith.addi %arg1, %c1_i32_39 : i32
    %c0_40 = arith.constant 0 : index
    %c0_41 = arith.constant 0 : index
    %c0_42 = arith.constant 0 : index
    %34 = arith.index_cast %33 : i32 to index
    %c1_43 = arith.constant 1 : index
    %c0_44 = arith.constant 0 : index
    %35 = vector.load %arg2[%c0_40, %c0_41, %c0_42, %34, %c1_43, %c0_44] : memref<1x1x1x4x4x128xbf16, #tpu.memory_space<vmem>>, vector<1x1x1x1x2x128xbf16>
    %36 = vector.shape_cast %35 : vector<1x1x1x1x2x128xbf16> to vector<2x128xbf16>
    %c1_45 = arith.constant 1 : index
    %c1_46 = arith.constant 1 : index
    %c0_47 = arith.constant 0 : index
    %c0_48 = arith.constant 0 : index
    %37 = vector.load %arg3[%c1_45, %c1_46, %c0_47, %c0_48] : memref<3x3x128x128xbf16, #tpu.memory_space<vmem>>, vector<1x1x128x128xbf16>
    %38 = vector.shape_cast %37 : vector<1x1x128x128xbf16> to vector<128x128xbf16>
    %cst_49 = arith.constant dense<0.000000e+00> : vector<2x128xf32>
    %39 = tpu.matmul %36, %38, %cst_49 {dimension_numbers = #tpu.dot_dimension_numbers<[1], [0], [0], [1], [0, 0, 1, 1], [], []>} : vector<2x128xbf16>, vector<128x128xbf16>, vector<2x128xf32> -> vector<2x128xf32>
    %40 = arith.addf %32, %39 : vector<2x128xf32>
    %c1_i32_50 = arith.constant 1 : i32
    %41 = arith.addi %arg1, %c1_i32_50 : i32
    %c0_51 = arith.constant 0 : index
    %c0_52 = arith.constant 0 : index
    %c0_53 = arith.constant 0 : index
    %42 = arith.index_cast %41 : i32 to index
    %c2_54 = arith.constant 2 : index
    %c0_55 = arith.constant 0 : index
    %43 = vector.load %arg2[%c0_51, %c0_52, %c0_53, %42, %c2_54, %c0_55] : memref<1x1x1x4x4x128xbf16, #tpu.memory_space<vmem>>, vector<1x1x1x1x2x128xbf16>
    %44 = vector.shape_cast %43 : vector<1x1x1x1x2x128xbf16> to vector<2x128xbf16>
    %c1_56 = arith.constant 1 : index
    %c2_57 = arith.constant 2 : index
    %c0_58 = arith.constant 0 : index
    %c0_59 = arith.constant 0 : index
    %45 = vector.load %arg3[%c1_56, %c2_57, %c0_58, %c0_59] : memref<3x3x128x128xbf16, #tpu.memory_space<vmem>>, vector<1x1x128x128xbf16>
    %46 = vector.shape_cast %45 : vector<1x1x128x128xbf16> to vector<128x128xbf16>
    %cst_60 = arith.constant dense<0.000000e+00> : vector<2x128xf32>
    %47 = tpu.matmul %44, %46, %cst_60 {dimension_numbers = #tpu.dot_dimension_numbers<[1], [0], [0], [1], [0, 0, 1, 1], [], []>} : vector<2x128xbf16>, vector<128x128xbf16>, vector<2x128xf32> -> vector<2x128xf32>
    %48 = arith.addf %40, %47 : vector<2x128xf32>
    %c2_i32 = arith.constant 2 : i32
    %49 = arith.addi %arg1, %c2_i32 : i32
    %c0_61 = arith.constant 0 : index
    %c0_62 = arith.constant 0 : index
    %c0_63 = arith.constant 0 : index
    %50 = arith.index_cast %49 : i32 to index
    %c0_64 = arith.constant 0 : index
    %c0_65 = arith.constant 0 : index
    %51 = vector.load %arg2[%c0_61, %c0_62, %c0_63, %50, %c0_64, %c0_65] : memref<1x1x1x4x4x128xbf16, #tpu.memory_space<vmem>>, vector<1x1x1x1x2x128xbf16>
    %52 = vector.shape_cast %51 : vector<1x1x1x1x2x128xbf16> to vector<2x128xbf16>
    %c2_66 = arith.constant 2 : index
    %c0_67 = arith.constant 0 : index
    %c0_68 = arith.constant 0 : index
    %c0_69 = arith.constant 0 : index
    %53 = vector.load %arg3[%c2_66, %c0_67, %c0_68, %c0_69] : memref<3x3x128x128xbf16, #tpu.memory_space<vmem>>, vector<1x1x128x128xbf16>
    %54 = vector.shape_cast %53 : vector<1x1x128x128xbf16> to vector<128x128xbf16>
    %cst_70 = arith.constant dense<0.000000e+00> : vector<2x128xf32>
    %55 = tpu.matmul %52, %54, %cst_70 {dimension_numbers = #tpu.dot_dimension_numbers<[1], [0], [0], [1], [0, 0, 1, 1], [], []>} : vector<2x128xbf16>, vector<128x128xbf16>, vector<2x128xf32> -> vector<2x128xf32>
    %56 = arith.addf %48, %55 : vector<2x128xf32>
    %c2_i32_71 = arith.constant 2 : i32
    %57 = arith.addi %arg1, %c2_i32_71 : i32
    %c0_72 = arith.constant 0 : index
    %c0_73 = arith.constant 0 : index
    %c0_74 = arith.constant 0 : index
    %58 = arith.index_cast %57 : i32 to index
    %c1_75 = arith.constant 1 : index
    %c0_76 = arith.constant 0 : index
    %59 = vector.load %arg2[%c0_72, %c0_73, %c0_74, %58, %c1_75, %c0_76] : memref<1x1x1x4x4x128xbf16, #tpu.memory_space<vmem>>, vector<1x1x1x1x2x128xbf16>
    %60 = vector.shape_cast %59 : vector<1x1x1x1x2x128xbf16> to vector<2x128xbf16>
    %c2_77 = arith.constant 2 : index
    %c1_78 = arith.constant 1 : index
    %c0_79 = arith.constant 0 : index
    %c0_80 = arith.constant 0 : index
    %61 = vector.load %arg3[%c2_77, %c1_78, %c0_79, %c0_80] : memref<3x3x128x128xbf16, #tpu.memory_space<vmem>>, vector<1x1x128x128xbf16>
    %62 = vector.shape_cast %61 : vector<1x1x128x128xbf16> to vector<128x128xbf16>
    %cst_81 = arith.constant dense<0.000000e+00> : vector<2x128xf32>
    %63 = tpu.matmul %60, %62, %cst_81 {dimension_numbers = #tpu.dot_dimension_numbers<[1], [0], [0], [1], [0, 0, 1, 1], [], []>} : vector<2x128xbf16>, vector<128x128xbf16>, vector<2x128xf32> -> vector<2x128xf32>
    %64 = arith.addf %56, %63 : vector<2x128xf32>
    %c2_i32_82 = arith.constant 2 : i32
    %65 = arith.addi %arg1, %c2_i32_82 : i32
    %c0_83 = arith.constant 0 : index
    %c0_84 = arith.constant 0 : index
    %c0_85 = arith.constant 0 : index
    %66 = arith.index_cast %65 : i32 to index
    %c2_86 = arith.constant 2 : index
    %c0_87 = arith.constant 0 : index
    %67 = vector.load %arg2[%c0_83, %c0_84, %c0_85, %66, %c2_86, %c0_87] : memref<1x1x1x4x4x128xbf16, #tpu.memory_space<vmem>>, vector<1x1x1x1x2x128xbf16>
    %68 = vector.shape_cast %67 : vector<1x1x1x1x2x128xbf16> to vector<2x128xbf16>
    %c2_88 = arith.constant 2 : index
    %c2_89 = arith.constant 2 : index
    %c0_90 = arith.constant 0 : index
    %c0_91 = arith.constant 0 : index
    %69 = vector.load %arg3[%c2_88, %c2_89, %c0_90, %c0_91] : memref<3x3x128x128xbf16, #tpu.memory_space<vmem>>, vector<1x1x128x128xbf16>
    %70 = vector.shape_cast %69 : vector<1x1x128x128xbf16> to vector<128x128xbf16>
    %cst_92 = arith.constant dense<0.000000e+00> : vector<2x128xf32>
    %71 = tpu.matmul %68, %70, %cst_92 {dimension_numbers = #tpu.dot_dimension_numbers<[1], [0], [0], [1], [0, 0, 1, 1], [], []>} : vector<2x128xbf16>, vector<128x128xbf16>, vector<2x128xf32> -> vector<2x128xf32>
    %72 = arith.addf %64, %71 : vector<2x128xf32>
    %c0_93 = arith.constant 0 : index
    %c0_94 = arith.constant 0 : index
    %73 = vector.load %arg4[%c0_93, %c0_94] : memref<1x128xf32, #tpu.memory_space<vmem>>, vector<1x128xf32>
    %74 = vector.broadcast %73 : vector<1x128xf32> to vector<2x128xf32>
    %75 = arith.addf %72, %74 : vector<2x128xf32>
    %c0_95 = arith.constant 0 : index
    %c0_96 = arith.constant 0 : index
    %c0_97 = arith.constant 0 : index
    %c0_98 = arith.constant 0 : index
    %76 = vector.load %arg5[%c0_95, %c0_96, %c0_97, %c0_98] : memref<1x1x2x128xbf16, #tpu.memory_space<vmem>>, vector<1x1x2x128xbf16>
    %77 = vector.shape_cast %76 : vector<1x1x2x128xbf16> to vector<2x128xbf16>
    %c0_99 = arith.constant 0 : index
    %c0_100 = arith.constant 0 : index
    %78 = vector.load %arg6[%c0_99, %c0_100] : memref<128x128xbf16, #tpu.memory_space<vmem>>, vector<128x128xbf16>
    %cst_101 = arith.constant dense<0.000000e+00> : vector<2x128xf32>
    %79 = tpu.matmul %77, %78, %cst_101 {dimension_numbers = #tpu.dot_dimension_numbers<[1], [0], [0], [1], [0, 0, 1, 1], [], []>} : vector<2x128xbf16>, vector<128x128xbf16>, vector<2x128xf32> -> vector<2x128xf32>
    %80 = arith.addf %75, %79 : vector<2x128xf32>
    %c0_102 = arith.constant 0 : index
    %c0_103 = arith.constant 0 : index
    %81 = vector.load %arg7[%c0_102, %c0_103] : memref<1x128xf32, #tpu.memory_space<vmem>>, vector<1x128xf32>
    %82 = vector.broadcast %81 : vector<1x128xf32> to vector<2x128xf32>
    %83 = arith.addf %80, %82 : vector<2x128xf32>
    %84 = arith.truncf %83 : vector<2x128xf32> to vector<2x128xbf16>
    %c0_104 = arith.constant 0 : index
    %c0_105 = arith.constant 0 : index
    %c0_106 = arith.constant 0 : index
    %c0_107 = arith.constant 0 : index
    %85 = vector.load %arg8[%c0_104, %c0_105, %c0_106, %c0_107] : memref<1x1x2x128xbf16, #tpu.memory_space<vmem>>, vector<1x1x2x128xbf16>
    %86 = vector.shape_cast %85 : vector<1x1x2x128xbf16> to vector<2x128xbf16>
    %87 = vector.shape_cast %84 : vector<2x128xbf16> to vector<1x1x2x128xbf16>
    tpu.vector_store %arg8[%c0_104, %c0_105, %c0_106, %c0_107], %87 {strides = array<i32>} : memref<1x1x2x128xbf16, #tpu.memory_space<vmem>>, vector<1x1x2x128xbf16>,
    return
  }
  func.func @transform_0(%arg0: i32, %arg1: i32) -> (i32, i32, i32, i32, i32, i32) {
    %c0_i32 = arith.constant 0 : i32
    %c0_i32_0 = arith.constant 0 : i32
    %c0_i32_1 = arith.constant 0 : i32
    %c0_i32_2 = arith.constant 0 : i32
    %c0_i32_3 = arith.constant 0 : i32
    %c0_i32_4 = arith.constant 0 : i32
    return %arg0, %c0_i32, %c0_i32_0, %c0_i32_1, %c0_i32_2, %c0_i32_3 : i32, i32, i32, i32, i32, i32
  }
  func.func @transform_1(%arg0: i32, %arg1: i32) -> (i32, i32, i32, i32) {
    %c0_i32 = arith.constant 0 : i32
    %c0_i32_0 = arith.constant 0 : i32
    %c0_i32_1 = arith.constant 0 : i32
    %c0_i32_2 = arith.constant 0 : i32
    %c0_i32_3 = arith.constant 0 : i32
    return %c0_i32, %c0_i32_0, %c0_i32_1, %c0_i32_2 : i32, i32, i32, i32
  }
  func.func @transform_2(%arg0: i32, %arg1: i32) -> (i32, i32) {
    %c0_i32 = arith.constant 0 : i32
    %c0_i32_0 = arith.constant 0 : i32
    %c0_i32_1 = arith.constant 0 : i32
    return %c0_i32, %c0_i32_0 : i32, i32
  }
  func.func @transform_3(%arg0: i32, %arg1: i32) -> (i32, i32, i32, i32) {
    %c0_i32 = arith.constant 0 : i32
    %c0_i32_0 = arith.constant 0 : i32
    %c0_i32_1 = arith.constant 0 : i32
    return %arg0, %arg1, %c0_i32, %c0_i32_0 : i32, i32, i32, i32
  }
  func.func @transform_4(%arg0: i32, %arg1: i32) -> (i32, i32) {
    %c0_i32 = arith.constant 0 : i32
    %c0_i32_0 = arith.constant 0 : i32
    %c0_i32_1 = arith.constant 0 : i32
    return %c0_i32, %c0_i32_0 : i32, i32
  }
  func.func @transform_5(%arg0: i32, %arg1: i32) -> (i32, i32) {
    %c0_i32 = arith.constant 0 : i32
    %c0_i32_0 = arith.constant 0 : i32
    %c0_i32_1 = arith.constant 0 : i32
    return %c0_i32, %c0_i32_0 : i32, i32
  }
  func.func @transform_6(%arg0: i32, %arg1: i32) -> (i32, i32, i32, i32) {
    %c0_i32 = arith.constant 0 : i32
    %c0_i32_0 = arith.constant 0 : i32
    %c0_i32_1 = arith.constant 0 : i32
    return %arg0, %arg1, %c0_i32, %c0_i32_0 : i32, i32, i32, i32
  }
}

module attributes {stable_mosaic.version = 11 : i64} {
  func.func @kernel(%arg0: i32, %arg1: i32, %arg2: memref<1x2x2x2x2x128xbf16, #tpu.memory_space<vmem>>, %arg3: memref<3x3x128x128xbf16, #tpu.memory_space<vmem>>, %arg4: memref<1x128xf32, #tpu.memory_space<vmem>>, %arg5: memref<1x128xf32, #tpu.memory_space<vmem>>, %arg6: memref<1x128xf32, #tpu.memory_space<vmem>>, %arg7: memref<1x1x1x128xbf16, #tpu.memory_space<vmem>>) attributes {dimension_semantics = [#tpu.dimension_semantics<parallel>, #tpu.dimension_semantics<parallel>], iteration_bounds = array<i64: 2, 1>, scalar_prefetch = 0 : i64, scratch_operands = 0 : i64, tpu.core_type = #tpu.core_type<tc>, window_params = [{transform_indices = @transform_0, window_bounds = array<i64: 1, 2, 2, 2, 2, 128>}, {pipeline_mode = #tpu.pipeline_mode<synchronous>, transform_indices = @transform_1, window_bounds = array<i64: 3, 3, 128, 128>}, {pipeline_mode = #tpu.pipeline_mode<synchronous>, transform_indices = @transform_2, window_bounds = array<i64: 1, 128>}, {pipeline_mode = #tpu.pipeline_mode<synchronous>, transform_indices = @transform_3, window_bounds = array<i64: 1, 128>}, {pipeline_mode = #tpu.pipeline_mode<synchronous>, transform_indices = @transform_4, window_bounds = array<i64: 1, 128>}, {transform_indices = @transform_5, window_bounds = array<i64: 1, 1, 1, 128>}]} {
    %cst = arith.constant 0.000000e+00 : f32
    %0 = vector.broadcast %cst : f32 to vector<1x128xf32>
    %c0_i32 = arith.constant 0 : i32
    %1 = arith.addi %arg1, %c0_i32 : i32
    %c0 = arith.constant 0 : index
    %c0_0 = arith.constant 0 : index
    %c0_1 = arith.constant 0 : index
    %2 = arith.index_cast %1 : i32 to index
    %c0_2 = arith.constant 0 : index
    %c0_3 = arith.constant 0 : index
    %3 = vector.load %arg2[%c0, %c0_0, %c0_1, %2, %c0_2, %c0_3] : memref<1x2x2x2x2x128xbf16, #tpu.memory_space<vmem>>, vector<1x1x1x1x1x128xbf16>
    %4 = vector.shape_cast %3 : vector<1x1x1x1x1x128xbf16> to vector<1x128xbf16>
    %c0_4 = arith.constant 0 : index
    %c0_5 = arith.constant 0 : index
    %c0_6 = arith.constant 0 : index
    %c0_7 = arith.constant 0 : index
    %5 = vector.load %arg3[%c0_4, %c0_5, %c0_6, %c0_7] : memref<3x3x128x128xbf16, #tpu.memory_space<vmem>>, vector<1x1x128x128xbf16>
    %6 = vector.shape_cast %5 : vector<1x1x128x128xbf16> to vector<128x128xbf16>
    %cst_8 = arith.constant dense<0.000000e+00> : vector<1x128xf32>
    %7 = tpu.matmul %4, %6, %cst_8 {dimension_numbers = #tpu.dot_dimension_numbers<[1], [0], [0], [1], [0, 0, 1, 1], [], []>} : vector<1x128xbf16>, vector<128x128xbf16>, vector<1x128xf32> -> vector<1x128xf32>
    %8 = arith.addf %0, %7 : vector<1x128xf32>
    %c0_i32_9 = arith.constant 0 : i32
    %9 = arith.addi %arg1, %c0_i32_9 : i32
    %c0_10 = arith.constant 0 : index
    %c0_11 = arith.constant 0 : index
    %c1 = arith.constant 1 : index
    %10 = arith.index_cast %9 : i32 to index
    %c0_12 = arith.constant 0 : index
    %c0_13 = arith.constant 0 : index
    %11 = vector.load %arg2[%c0_10, %c0_11, %c1, %10, %c0_12, %c0_13] : memref<1x2x2x2x2x128xbf16, #tpu.memory_space<vmem>>, vector<1x1x1x1x1x128xbf16>
    %12 = vector.shape_cast %11 : vector<1x1x1x1x1x128xbf16> to vector<1x128xbf16>
    %c0_14 = arith.constant 0 : index
    %c1_15 = arith.constant 1 : index
    %c0_16 = arith.constant 0 : index
    %c0_17 = arith.constant 0 : index
    %13 = vector.load %arg3[%c0_14, %c1_15, %c0_16, %c0_17] : memref<3x3x128x128xbf16, #tpu.memory_space<vmem>>, vector<1x1x128x128xbf16>
    %14 = vector.shape_cast %13 : vector<1x1x128x128xbf16> to vector<128x128xbf16>
    %cst_18 = arith.constant dense<0.000000e+00> : vector<1x128xf32>
    %15 = tpu.matmul %12, %14, %cst_18 {dimension_numbers = #tpu.dot_dimension_numbers<[1], [0], [0], [1], [0, 0, 1, 1], [], []>} : vector<1x128xbf16>, vector<128x128xbf16>, vector<1x128xf32> -> vector<1x128xf32>
    %16 = arith.addf %8, %15 : vector<1x128xf32>
    %c0_i32_19 = arith.constant 0 : i32
    %17 = arith.addi %arg1, %c0_i32_19 : i32
    %c0_20 = arith.constant 0 : index
    %c0_21 = arith.constant 0 : index
    %c0_22 = arith.constant 0 : index
    %18 = arith.index_cast %17 : i32 to index
    %c1_23 = arith.constant 1 : index
    %c0_24 = arith.constant 0 : index
    %19 = vector.load %arg2[%c0_20, %c0_21, %c0_22, %18, %c1_23, %c0_24] : memref<1x2x2x2x2x128xbf16, #tpu.memory_space<vmem>>, vector<1x1x1x1x1x128xbf16>
    %20 = vector.shape_cast %19 : vector<1x1x1x1x1x128xbf16> to vector<1x128xbf16>
    %c0_25 = arith.constant 0 : index
    %c2 = arith.constant 2 : index
    %c0_26 = arith.constant 0 : index
    %c0_27 = arith.constant 0 : index
    %21 = vector.load %arg3[%c0_25, %c2, %c0_26, %c0_27] : memref<3x3x128x128xbf16, #tpu.memory_space<vmem>>, vector<1x1x128x128xbf16>
    %22 = vector.shape_cast %21 : vector<1x1x128x128xbf16> to vector<128x128xbf16>
    %cst_28 = arith.constant dense<0.000000e+00> : vector<1x128xf32>
    %23 = tpu.matmul %20, %22, %cst_28 {dimension_numbers = #tpu.dot_dimension_numbers<[1], [0], [0], [1], [0, 0, 1, 1], [], []>} : vector<1x128xbf16>, vector<128x128xbf16>, vector<1x128xf32> -> vector<1x128xf32>
    %24 = arith.addf %16, %23 : vector<1x128xf32>
    %c0_i32_29 = arith.constant 0 : i32
    %25 = arith.addi %arg1, %c0_i32_29 : i32
    %c0_30 = arith.constant 0 : index
    %c1_31 = arith.constant 1 : index
    %c0_32 = arith.constant 0 : index
    %26 = arith.index_cast %25 : i32 to index
    %c0_33 = arith.constant 0 : index
    %c0_34 = arith.constant 0 : index
    %27 = vector.load %arg2[%c0_30, %c1_31, %c0_32, %26, %c0_33, %c0_34] : memref<1x2x2x2x2x128xbf16, #tpu.memory_space<vmem>>, vector<1x1x1x1x1x128xbf16>
    %28 = vector.shape_cast %27 : vector<1x1x1x1x1x128xbf16> to vector<1x128xbf16>
    %c1_35 = arith.constant 1 : index
    %c0_36 = arith.constant 0 : index
    %c0_37 = arith.constant 0 : index
    %c0_38 = arith.constant 0 : index
    %29 = vector.load %arg3[%c1_35, %c0_36, %c0_37, %c0_38] : memref<3x3x128x128xbf16, #tpu.memory_space<vmem>>, vector<1x1x128x128xbf16>
    %30 = vector.shape_cast %29 : vector<1x1x128x128xbf16> to vector<128x128xbf16>
    %cst_39 = arith.constant dense<0.000000e+00> : vector<1x128xf32>
    %31 = tpu.matmul %28, %30, %cst_39 {dimension_numbers = #tpu.dot_dimension_numbers<[1], [0], [0], [1], [0, 0, 1, 1], [], []>} : vector<1x128xbf16>, vector<128x128xbf16>, vector<1x128xf32> -> vector<1x128xf32>
    %32 = arith.addf %24, %31 : vector<1x128xf32>
    %c0_i32_40 = arith.constant 0 : i32
    %33 = arith.addi %arg1, %c0_i32_40 : i32
    %c0_41 = arith.constant 0 : index
    %c1_42 = arith.constant 1 : index
    %c1_43 = arith.constant 1 : index
    %34 = arith.index_cast %33 : i32 to index
    %c0_44 = arith.constant 0 : index
    %c0_45 = arith.constant 0 : index
    %35 = vector.load %arg2[%c0_41, %c1_42, %c1_43, %34, %c0_44, %c0_45] : memref<1x2x2x2x2x128xbf16, #tpu.memory_space<vmem>>, vector<1x1x1x1x1x128xbf16>
    %36 = vector.shape_cast %35 : vector<1x1x1x1x1x128xbf16> to vector<1x128xbf16>
    %c1_46 = arith.constant 1 : index
    %c1_47 = arith.constant 1 : index
    %c0_48 = arith.constant 0 : index
    %c0_49 = arith.constant 0 : index
    %37 = vector.load %arg3[%c1_46, %c1_47, %c0_48, %c0_49] : memref<3x3x128x128xbf16, #tpu.memory_space<vmem>>, vector<1x1x128x128xbf16>
    %38 = vector.shape_cast %37 : vector<1x1x128x128xbf16> to vector<128x128xbf16>
    %cst_50 = arith.constant dense<0.000000e+00> : vector<1x128xf32>
    %39 = tpu.matmul %36, %38, %cst_50 {dimension_numbers = #tpu.dot_dimension_numbers<[1], [0], [0], [1], [0, 0, 1, 1], [], []>} : vector<1x128xbf16>, vector<128x128xbf16>, vector<1x128xf32> -> vector<1x128xf32>
    %40 = arith.addf %32, %39 : vector<1x128xf32>
    %c0_i32_51 = arith.constant 0 : i32
    %41 = arith.addi %arg1, %c0_i32_51 : i32
    %c0_52 = arith.constant 0 : index
    %c1_53 = arith.constant 1 : index
    %c0_54 = arith.constant 0 : index
    %42 = arith.index_cast %41 : i32 to index
    %c1_55 = arith.constant 1 : index
    %c0_56 = arith.constant 0 : index
    %43 = vector.load %arg2[%c0_52, %c1_53, %c0_54, %42, %c1_55, %c0_56] : memref<1x2x2x2x2x128xbf16, #tpu.memory_space<vmem>>, vector<1x1x1x1x1x128xbf16>
    %44 = vector.shape_cast %43 : vector<1x1x1x1x1x128xbf16> to vector<1x128xbf16>
    %c1_57 = arith.constant 1 : index
    %c2_58 = arith.constant 2 : index
    %c0_59 = arith.constant 0 : index
    %c0_60 = arith.constant 0 : index
    %45 = vector.load %arg3[%c1_57, %c2_58, %c0_59, %c0_60] : memref<3x3x128x128xbf16, #tpu.memory_space<vmem>>, vector<1x1x128x128xbf16>
    %46 = vector.shape_cast %45 : vector<1x1x128x128xbf16> to vector<128x128xbf16>
    %cst_61 = arith.constant dense<0.000000e+00> : vector<1x128xf32>
    %47 = tpu.matmul %44, %46, %cst_61 {dimension_numbers = #tpu.dot_dimension_numbers<[1], [0], [0], [1], [0, 0, 1, 1], [], []>} : vector<1x128xbf16>, vector<128x128xbf16>, vector<1x128xf32> -> vector<1x128xf32>
    %48 = arith.addf %40, %47 : vector<1x128xf32>
    %c1_i32 = arith.constant 1 : i32
    %49 = arith.addi %arg1, %c1_i32 : i32
    %c0_62 = arith.constant 0 : index
    %c0_63 = arith.constant 0 : index
    %c0_64 = arith.constant 0 : index
    %50 = arith.index_cast %49 : i32 to index
    %c0_65 = arith.constant 0 : index
    %c0_66 = arith.constant 0 : index
    %51 = vector.load %arg2[%c0_62, %c0_63, %c0_64, %50, %c0_65, %c0_66] : memref<1x2x2x2x2x128xbf16, #tpu.memory_space<vmem>>, vector<1x1x1x1x1x128xbf16>
    %52 = vector.shape_cast %51 : vector<1x1x1x1x1x128xbf16> to vector<1x128xbf16>
    %c2_67 = arith.constant 2 : index
    %c0_68 = arith.constant 0 : index
    %c0_69 = arith.constant 0 : index
    %c0_70 = arith.constant 0 : index
    %53 = vector.load %arg3[%c2_67, %c0_68, %c0_69, %c0_70] : memref<3x3x128x128xbf16, #tpu.memory_space<vmem>>, vector<1x1x128x128xbf16>
    %54 = vector.shape_cast %53 : vector<1x1x128x128xbf16> to vector<128x128xbf16>
    %cst_71 = arith.constant dense<0.000000e+00> : vector<1x128xf32>
    %55 = tpu.matmul %52, %54, %cst_71 {dimension_numbers = #tpu.dot_dimension_numbers<[1], [0], [0], [1], [0, 0, 1, 1], [], []>} : vector<1x128xbf16>, vector<128x128xbf16>, vector<1x128xf32> -> vector<1x128xf32>
    %56 = arith.addf %48, %55 : vector<1x128xf32>
    %c1_i32_72 = arith.constant 1 : i32
    %57 = arith.addi %arg1, %c1_i32_72 : i32
    %c0_73 = arith.constant 0 : index
    %c0_74 = arith.constant 0 : index
    %c1_75 = arith.constant 1 : index
    %58 = arith.index_cast %57 : i32 to index
    %c0_76 = arith.constant 0 : index
    %c0_77 = arith.constant 0 : index
    %59 = vector.load %arg2[%c0_73, %c0_74, %c1_75, %58, %c0_76, %c0_77] : memref<1x2x2x2x2x128xbf16, #tpu.memory_space<vmem>>, vector<1x1x1x1x1x128xbf16>
    %60 = vector.shape_cast %59 : vector<1x1x1x1x1x128xbf16> to vector<1x128xbf16>
    %c2_78 = arith.constant 2 : index
    %c1_79 = arith.constant 1 : index
    %c0_80 = arith.constant 0 : index
    %c0_81 = arith.constant 0 : index
    %61 = vector.load %arg3[%c2_78, %c1_79, %c0_80, %c0_81] : memref<3x3x128x128xbf16, #tpu.memory_space<vmem>>, vector<1x1x128x128xbf16>
    %62 = vector.shape_cast %61 : vector<1x1x128x128xbf16> to vector<128x128xbf16>
    %cst_82 = arith.constant dense<0.000000e+00> : vector<1x128xf32>
    %63 = tpu.matmul %60, %62, %cst_82 {dimension_numbers = #tpu.dot_dimension_numbers<[1], [0], [0], [1], [0, 0, 1, 1], [], []>} : vector<1x128xbf16>, vector<128x128xbf16>, vector<1x128xf32> -> vector<1x128xf32>
    %64 = arith.addf %56, %63 : vector<1x128xf32>
    %c1_i32_83 = arith.constant 1 : i32
    %65 = arith.addi %arg1, %c1_i32_83 : i32
    %c0_84 = arith.constant 0 : index
    %c0_85 = arith.constant 0 : index
    %c0_86 = arith.constant 0 : index
    %66 = arith.index_cast %65 : i32 to index
    %c1_87 = arith.constant 1 : index
    %c0_88 = arith.constant 0 : index
    %67 = vector.load %arg2[%c0_84, %c0_85, %c0_86, %66, %c1_87, %c0_88] : memref<1x2x2x2x2x128xbf16, #tpu.memory_space<vmem>>, vector<1x1x1x1x1x128xbf16>
    %68 = vector.shape_cast %67 : vector<1x1x1x1x1x128xbf16> to vector<1x128xbf16>
    %c2_89 = arith.constant 2 : index
    %c2_90 = arith.constant 2 : index
    %c0_91 = arith.constant 0 : index
    %c0_92 = arith.constant 0 : index
    %69 = vector.load %arg3[%c2_89, %c2_90, %c0_91, %c0_92] : memref<3x3x128x128xbf16, #tpu.memory_space<vmem>>, vector<1x1x128x128xbf16>
    %70 = vector.shape_cast %69 : vector<1x1x128x128xbf16> to vector<128x128xbf16>
    %cst_93 = arith.constant dense<0.000000e+00> : vector<1x128xf32>
    %71 = tpu.matmul %68, %70, %cst_93 {dimension_numbers = #tpu.dot_dimension_numbers<[1], [0], [0], [1], [0, 0, 1, 1], [], []>} : vector<1x128xbf16>, vector<128x128xbf16>, vector<1x128xf32> -> vector<1x128xf32>
    %72 = arith.addf %64, %71 : vector<1x128xf32>
    %c0_94 = arith.constant 0 : index
    %c0_95 = arith.constant 0 : index
    %73 = vector.load %arg4[%c0_94, %c0_95] : memref<1x128xf32, #tpu.memory_space<vmem>>, vector<1x128xf32>
    %74 = arith.addf %72, %73 : vector<1x128xf32>
    %c0_96 = arith.constant 0 : index
    %c0_97 = arith.constant 0 : index
    %75 = vector.load %arg5[%c0_96, %c0_97] : memref<1x128xf32, #tpu.memory_space<vmem>>, vector<1x128xf32>
    %76 = arith.mulf %74, %75 : vector<1x128xf32>
    %c0_98 = arith.constant 0 : index
    %c0_99 = arith.constant 0 : index
    %77 = vector.load %arg6[%c0_98, %c0_99] : memref<1x128xf32, #tpu.memory_space<vmem>>, vector<1x128xf32>
    %78 = arith.addf %76, %77 : vector<1x128xf32>
    %cst_100 = arith.constant 0.000000e+00 : f32
    %79 = vector.broadcast %cst_100 : f32 to vector<1x128xf32>
    %80 = arith.maximumf %78, %79 : vector<1x128xf32>
    %81 = arith.truncf %80 : vector<1x128xf32> to vector<1x128xbf16>
    %c0_101 = arith.constant 0 : index
    %c0_102 = arith.constant 0 : index
    %c0_103 = arith.constant 0 : index
    %c0_104 = arith.constant 0 : index
    %82 = vector.load %arg7[%c0_101, %c0_102, %c0_103, %c0_104] : memref<1x1x1x128xbf16, #tpu.memory_space<vmem>>, vector<1x1x1x128xbf16>
    %83 = vector.shape_cast %82 : vector<1x1x1x128xbf16> to vector<1x128xbf16>
    %84 = vector.shape_cast %81 : vector<1x128xbf16> to vector<1x1x1x128xbf16>
    tpu.vector_store %arg7[%c0_101, %c0_102, %c0_103, %c0_104], %84 {strides = array<i32>} : memref<1x1x1x128xbf16, #tpu.memory_space<vmem>>, vector<1x1x1x128xbf16>,
    return
  }
  func.func @transform_0(%arg0: i32, %arg1: i32) -> (i32, i32, i32, i32, i32, i32) {
    %c0_i32 = arith.constant 0 : i32
    %c0_i32_0 = arith.constant 0 : i32
    %c0_i32_1 = arith.constant 0 : i32
    %c0_i32_2 = arith.constant 0 : i32
    %c0_i32_3 = arith.constant 0 : i32
    %c0_i32_4 = arith.constant 0 : i32
    return %arg0, %c0_i32, %c0_i32_0, %c0_i32_1, %c0_i32_2, %c0_i32_3 : i32, i32, i32, i32, i32, i32
  }
  func.func @transform_1(%arg0: i32, %arg1: i32) -> (i32, i32, i32, i32) {
    %c0_i32 = arith.constant 0 : i32
    %c0_i32_0 = arith.constant 0 : i32
    %c0_i32_1 = arith.constant 0 : i32
    %c0_i32_2 = arith.constant 0 : i32
    %c0_i32_3 = arith.constant 0 : i32
    return %c0_i32, %c0_i32_0, %c0_i32_1, %c0_i32_2 : i32, i32, i32, i32
  }
  func.func @transform_2(%arg0: i32, %arg1: i32) -> (i32, i32) {
    %c0_i32 = arith.constant 0 : i32
    %c0_i32_0 = arith.constant 0 : i32
    %c0_i32_1 = arith.constant 0 : i32
    return %c0_i32, %c0_i32_0 : i32, i32
  }
  func.func @transform_3(%arg0: i32, %arg1: i32) -> (i32, i32) {
    %c0_i32 = arith.constant 0 : i32
    %c0_i32_0 = arith.constant 0 : i32
    %c0_i32_1 = arith.constant 0 : i32
    return %c0_i32, %c0_i32_0 : i32, i32
  }
  func.func @transform_4(%arg0: i32, %arg1: i32) -> (i32, i32) {
    %c0_i32 = arith.constant 0 : i32
    %c0_i32_0 = arith.constant 0 : i32
    %c0_i32_1 = arith.constant 0 : i32
    return %c0_i32, %c0_i32_0 : i32, i32
  }
  func.func @transform_5(%arg0: i32, %arg1: i32) -> (i32, i32, i32, i32) {
    %c0_i32 = arith.constant 0 : i32
    %c0_i32_0 = arith.constant 0 : i32
    %c0_i32_1 = arith.constant 0 : i32
    return %arg0, %arg1, %c0_i32, %c0_i32_0 : i32, i32, i32, i32
  }
}

module attributes {stable_mosaic.version = 11 : i64} {
  func.func @kernel(%arg0: i32, %arg1: i32, %arg2: memref<1x1x1x3x3x128xbf16, #tpu.memory_space<vmem>>, %arg3: memref<3x3x128x128xbf16, #tpu.memory_space<vmem>>, %arg4: memref<1x128xf32, #tpu.memory_space<vmem>>, %arg5: memref<1x1x1x128xbf16, #tpu.memory_space<vmem>>, %arg6: memref<128x128xbf16, #tpu.memory_space<vmem>>, %arg7: memref<1x128xf32, #tpu.memory_space<vmem>>, %arg8: memref<1x1x1x128xbf16, #tpu.memory_space<vmem>>) attributes {dimension_semantics = [#tpu.dimension_semantics<parallel>, #tpu.dimension_semantics<parallel>], iteration_bounds = array<i64: 2, 1>, scalar_prefetch = 0 : i64, scratch_operands = 0 : i64, tpu.core_type = #tpu.core_type<tc>, window_params = [{transform_indices = @transform_0, window_bounds = array<i64: 1, 1, 1, 3, 3, 128>}, {pipeline_mode = #tpu.pipeline_mode<synchronous>, transform_indices = @transform_1, window_bounds = array<i64: 3, 3, 128, 128>}, {pipeline_mode = #tpu.pipeline_mode<synchronous>, transform_indices = @transform_2, window_bounds = array<i64: 1, 128>}, {transform_indices = @transform_3, window_bounds = array<i64: 1, 1, 1, 128>}, {pipeline_mode = #tpu.pipeline_mode<synchronous>, transform_indices = @transform_4, window_bounds = array<i64: 128, 128>}, {pipeline_mode = #tpu.pipeline_mode<synchronous>, transform_indices = @transform_5, window_bounds = array<i64: 1, 128>}, {transform_indices = @transform_6, window_bounds = array<i64: 1, 1, 1, 128>}]} {
    %cst = arith.constant 0.000000e+00 : f32
    %0 = vector.broadcast %cst : f32 to vector<1x128xf32>
    %c0_i32 = arith.constant 0 : i32
    %1 = arith.addi %arg1, %c0_i32 : i32
    %c0 = arith.constant 0 : index
    %c0_0 = arith.constant 0 : index
    %c0_1 = arith.constant 0 : index
    %2 = arith.index_cast %1 : i32 to index
    %c0_2 = arith.constant 0 : index
    %c0_3 = arith.constant 0 : index
    %3 = vector.load %arg2[%c0, %c0_0, %c0_1, %2, %c0_2, %c0_3] : memref<1x1x1x3x3x128xbf16, #tpu.memory_space<vmem>>, vector<1x1x1x1x1x128xbf16>
    %4 = vector.shape_cast %3 : vector<1x1x1x1x1x128xbf16> to vector<1x128xbf16>
    %c0_4 = arith.constant 0 : index
    %c0_5 = arith.constant 0 : index
    %c0_6 = arith.constant 0 : index
    %c0_7 = arith.constant 0 : index
    %5 = vector.load %arg3[%c0_4, %c0_5, %c0_6, %c0_7] : memref<3x3x128x128xbf16, #tpu.memory_space<vmem>>, vector<1x1x128x128xbf16>
    %6 = vector.shape_cast %5 : vector<1x1x128x128xbf16> to vector<128x128xbf16>
    %cst_8 = arith.constant dense<0.000000e+00> : vector<1x128xf32>
    %7 = tpu.matmul %4, %6, %cst_8 {dimension_numbers = #tpu.dot_dimension_numbers<[1], [0], [0], [1], [0, 0, 1, 1], [], []>} : vector<1x128xbf16>, vector<128x128xbf16>, vector<1x128xf32> -> vector<1x128xf32>
    %8 = arith.addf %0, %7 : vector<1x128xf32>
    %c0_i32_9 = arith.constant 0 : i32
    %9 = arith.addi %arg1, %c0_i32_9 : i32
    %c0_10 = arith.constant 0 : index
    %c0_11 = arith.constant 0 : index
    %c0_12 = arith.constant 0 : index
    %10 = arith.index_cast %9 : i32 to index
    %c1 = arith.constant 1 : index
    %c0_13 = arith.constant 0 : index
    %11 = vector.load %arg2[%c0_10, %c0_11, %c0_12, %10, %c1, %c0_13] : memref<1x1x1x3x3x128xbf16, #tpu.memory_space<vmem>>, vector<1x1x1x1x1x128xbf16>
    %12 = vector.shape_cast %11 : vector<1x1x1x1x1x128xbf16> to vector<1x128xbf16>
    %c0_14 = arith.constant 0 : index
    %c1_15 = arith.constant 1 : index
    %c0_16 = arith.constant 0 : index
    %c0_17 = arith.constant 0 : index
    %13 = vector.load %arg3[%c0_14, %c1_15, %c0_16, %c0_17] : memref<3x3x128x128xbf16, #tpu.memory_space<vmem>>, vector<1x1x128x128xbf16>
    %14 = vector.shape_cast %13 : vector<1x1x128x128xbf16> to vector<128x128xbf16>
    %cst_18 = arith.constant dense<0.000000e+00> : vector<1x128xf32>
    %15 = tpu.matmul %12, %14, %cst_18 {dimension_numbers = #tpu.dot_dimension_numbers<[1], [0], [0], [1], [0, 0, 1, 1], [], []>} : vector<1x128xbf16>, vector<128x128xbf16>, vector<1x128xf32> -> vector<1x128xf32>
    %16 = arith.addf %8, %15 : vector<1x128xf32>
    %c0_i32_19 = arith.constant 0 : i32
    %17 = arith.addi %arg1, %c0_i32_19 : i32
    %c0_20 = arith.constant 0 : index
    %c0_21 = arith.constant 0 : index
    %c0_22 = arith.constant 0 : index
    %18 = arith.index_cast %17 : i32 to index
    %c2 = arith.constant 2 : index
    %c0_23 = arith.constant 0 : index
    %19 = vector.load %arg2[%c0_20, %c0_21, %c0_22, %18, %c2, %c0_23] : memref<1x1x1x3x3x128xbf16, #tpu.memory_space<vmem>>, vector<1x1x1x1x1x128xbf16>
    %20 = vector.shape_cast %19 : vector<1x1x1x1x1x128xbf16> to vector<1x128xbf16>
    %c0_24 = arith.constant 0 : index
    %c2_25 = arith.constant 2 : index
    %c0_26 = arith.constant 0 : index
    %c0_27 = arith.constant 0 : index
    %21 = vector.load %arg3[%c0_24, %c2_25, %c0_26, %c0_27] : memref<3x3x128x128xbf16, #tpu.memory_space<vmem>>, vector<1x1x128x128xbf16>
    %22 = vector.shape_cast %21 : vector<1x1x128x128xbf16> to vector<128x128xbf16>
    %cst_28 = arith.constant dense<0.000000e+00> : vector<1x128xf32>
    %23 = tpu.matmul %20, %22, %cst_28 {dimension_numbers = #tpu.dot_dimension_numbers<[1], [0], [0], [1], [0, 0, 1, 1], [], []>} : vector<1x128xbf16>, vector<128x128xbf16>, vector<1x128xf32> -> vector<1x128xf32>
    %24 = arith.addf %16, %23 : vector<1x128xf32>
    %c1_i32 = arith.constant 1 : i32
    %25 = arith.addi %arg1, %c1_i32 : i32
    %c0_29 = arith.constant 0 : index
    %c0_30 = arith.constant 0 : index
    %c0_31 = arith.constant 0 : index
    %26 = arith.index_cast %25 : i32 to index
    %c0_32 = arith.constant 0 : index
    %c0_33 = arith.constant 0 : index
    %27 = vector.load %arg2[%c0_29, %c0_30, %c0_31, %26, %c0_32, %c0_33] : memref<1x1x1x3x3x128xbf16, #tpu.memory_space<vmem>>, vector<1x1x1x1x1x128xbf16>
    %28 = vector.shape_cast %27 : vector<1x1x1x1x1x128xbf16> to vector<1x128xbf16>
    %c1_34 = arith.constant 1 : index
    %c0_35 = arith.constant 0 : index
    %c0_36 = arith.constant 0 : index
    %c0_37 = arith.constant 0 : index
    %29 = vector.load %arg3[%c1_34, %c0_35, %c0_36, %c0_37] : memref<3x3x128x128xbf16, #tpu.memory_space<vmem>>, vector<1x1x128x128xbf16>
    %30 = vector.shape_cast %29 : vector<1x1x128x128xbf16> to vector<128x128xbf16>
    %cst_38 = arith.constant dense<0.000000e+00> : vector<1x128xf32>
    %31 = tpu.matmul %28, %30, %cst_38 {dimension_numbers = #tpu.dot_dimension_numbers<[1], [0], [0], [1], [0, 0, 1, 1], [], []>} : vector<1x128xbf16>, vector<128x128xbf16>, vector<1x128xf32> -> vector<1x128xf32>
    %32 = arith.addf %24, %31 : vector<1x128xf32>
    %c1_i32_39 = arith.constant 1 : i32
    %33 = arith.addi %arg1, %c1_i32_39 : i32
    %c0_40 = arith.constant 0 : index
    %c0_41 = arith.constant 0 : index
    %c0_42 = arith.constant 0 : index
    %34 = arith.index_cast %33 : i32 to index
    %c1_43 = arith.constant 1 : index
    %c0_44 = arith.constant 0 : index
    %35 = vector.load %arg2[%c0_40, %c0_41, %c0_42, %34, %c1_43, %c0_44] : memref<1x1x1x3x3x128xbf16, #tpu.memory_space<vmem>>, vector<1x1x1x1x1x128xbf16>
    %36 = vector.shape_cast %35 : vector<1x1x1x1x1x128xbf16> to vector<1x128xbf16>
    %c1_45 = arith.constant 1 : index
    %c1_46 = arith.constant 1 : index
    %c0_47 = arith.constant 0 : index
    %c0_48 = arith.constant 0 : index
    %37 = vector.load %arg3[%c1_45, %c1_46, %c0_47, %c0_48] : memref<3x3x128x128xbf16, #tpu.memory_space<vmem>>, vector<1x1x128x128xbf16>
    %38 = vector.shape_cast %37 : vector<1x1x128x128xbf16> to vector<128x128xbf16>
    %cst_49 = arith.constant dense<0.000000e+00> : vector<1x128xf32>
    %39 = tpu.matmul %36, %38, %cst_49 {dimension_numbers = #tpu.dot_dimension_numbers<[1], [0], [0], [1], [0, 0, 1, 1], [], []>} : vector<1x128xbf16>, vector<128x128xbf16>, vector<1x128xf32> -> vector<1x128xf32>
    %40 = arith.addf %32, %39 : vector<1x128xf32>
    %c1_i32_50 = arith.constant 1 : i32
    %41 = arith.addi %arg1, %c1_i32_50 : i32
    %c0_51 = arith.constant 0 : index
    %c0_52 = arith.constant 0 : index
    %c0_53 = arith.constant 0 : index
    %42 = arith.index_cast %41 : i32 to index
    %c2_54 = arith.constant 2 : index
    %c0_55 = arith.constant 0 : index
    %43 = vector.load %arg2[%c0_51, %c0_52, %c0_53, %42, %c2_54, %c0_55] : memref<1x1x1x3x3x128xbf16, #tpu.memory_space<vmem>>, vector<1x1x1x1x1x128xbf16>
    %44 = vector.shape_cast %43 : vector<1x1x1x1x1x128xbf16> to vector<1x128xbf16>
    %c1_56 = arith.constant 1 : index
    %c2_57 = arith.constant 2 : index
    %c0_58 = arith.constant 0 : index
    %c0_59 = arith.constant 0 : index
    %45 = vector.load %arg3[%c1_56, %c2_57, %c0_58, %c0_59] : memref<3x3x128x128xbf16, #tpu.memory_space<vmem>>, vector<1x1x128x128xbf16>
    %46 = vector.shape_cast %45 : vector<1x1x128x128xbf16> to vector<128x128xbf16>
    %cst_60 = arith.constant dense<0.000000e+00> : vector<1x128xf32>
    %47 = tpu.matmul %44, %46, %cst_60 {dimension_numbers = #tpu.dot_dimension_numbers<[1], [0], [0], [1], [0, 0, 1, 1], [], []>} : vector<1x128xbf16>, vector<128x128xbf16>, vector<1x128xf32> -> vector<1x128xf32>
    %48 = arith.addf %40, %47 : vector<1x128xf32>
    %c2_i32 = arith.constant 2 : i32
    %49 = arith.addi %arg1, %c2_i32 : i32
    %c0_61 = arith.constant 0 : index
    %c0_62 = arith.constant 0 : index
    %c0_63 = arith.constant 0 : index
    %50 = arith.index_cast %49 : i32 to index
    %c0_64 = arith.constant 0 : index
    %c0_65 = arith.constant 0 : index
    %51 = vector.load %arg2[%c0_61, %c0_62, %c0_63, %50, %c0_64, %c0_65] : memref<1x1x1x3x3x128xbf16, #tpu.memory_space<vmem>>, vector<1x1x1x1x1x128xbf16>
    %52 = vector.shape_cast %51 : vector<1x1x1x1x1x128xbf16> to vector<1x128xbf16>
    %c2_66 = arith.constant 2 : index
    %c0_67 = arith.constant 0 : index
    %c0_68 = arith.constant 0 : index
    %c0_69 = arith.constant 0 : index
    %53 = vector.load %arg3[%c2_66, %c0_67, %c0_68, %c0_69] : memref<3x3x128x128xbf16, #tpu.memory_space<vmem>>, vector<1x1x128x128xbf16>
    %54 = vector.shape_cast %53 : vector<1x1x128x128xbf16> to vector<128x128xbf16>
    %cst_70 = arith.constant dense<0.000000e+00> : vector<1x128xf32>
    %55 = tpu.matmul %52, %54, %cst_70 {dimension_numbers = #tpu.dot_dimension_numbers<[1], [0], [0], [1], [0, 0, 1, 1], [], []>} : vector<1x128xbf16>, vector<128x128xbf16>, vector<1x128xf32> -> vector<1x128xf32>
    %56 = arith.addf %48, %55 : vector<1x128xf32>
    %c2_i32_71 = arith.constant 2 : i32
    %57 = arith.addi %arg1, %c2_i32_71 : i32
    %c0_72 = arith.constant 0 : index
    %c0_73 = arith.constant 0 : index
    %c0_74 = arith.constant 0 : index
    %58 = arith.index_cast %57 : i32 to index
    %c1_75 = arith.constant 1 : index
    %c0_76 = arith.constant 0 : index
    %59 = vector.load %arg2[%c0_72, %c0_73, %c0_74, %58, %c1_75, %c0_76] : memref<1x1x1x3x3x128xbf16, #tpu.memory_space<vmem>>, vector<1x1x1x1x1x128xbf16>
    %60 = vector.shape_cast %59 : vector<1x1x1x1x1x128xbf16> to vector<1x128xbf16>
    %c2_77 = arith.constant 2 : index
    %c1_78 = arith.constant 1 : index
    %c0_79 = arith.constant 0 : index
    %c0_80 = arith.constant 0 : index
    %61 = vector.load %arg3[%c2_77, %c1_78, %c0_79, %c0_80] : memref<3x3x128x128xbf16, #tpu.memory_space<vmem>>, vector<1x1x128x128xbf16>
    %62 = vector.shape_cast %61 : vector<1x1x128x128xbf16> to vector<128x128xbf16>
    %cst_81 = arith.constant dense<0.000000e+00> : vector<1x128xf32>
    %63 = tpu.matmul %60, %62, %cst_81 {dimension_numbers = #tpu.dot_dimension_numbers<[1], [0], [0], [1], [0, 0, 1, 1], [], []>} : vector<1x128xbf16>, vector<128x128xbf16>, vector<1x128xf32> -> vector<1x128xf32>
    %64 = arith.addf %56, %63 : vector<1x128xf32>
    %c2_i32_82 = arith.constant 2 : i32
    %65 = arith.addi %arg1, %c2_i32_82 : i32
    %c0_83 = arith.constant 0 : index
    %c0_84 = arith.constant 0 : index
    %c0_85 = arith.constant 0 : index
    %66 = arith.index_cast %65 : i32 to index
    %c2_86 = arith.constant 2 : index
    %c0_87 = arith.constant 0 : index
    %67 = vector.load %arg2[%c0_83, %c0_84, %c0_85, %66, %c2_86, %c0_87] : memref<1x1x1x3x3x128xbf16, #tpu.memory_space<vmem>>, vector<1x1x1x1x1x128xbf16>
    %68 = vector.shape_cast %67 : vector<1x1x1x1x1x128xbf16> to vector<1x128xbf16>
    %c2_88 = arith.constant 2 : index
    %c2_89 = arith.constant 2 : index
    %c0_90 = arith.constant 0 : index
    %c0_91 = arith.constant 0 : index
    %69 = vector.load %arg3[%c2_88, %c2_89, %c0_90, %c0_91] : memref<3x3x128x128xbf16, #tpu.memory_space<vmem>>, vector<1x1x128x128xbf16>
    %70 = vector.shape_cast %69 : vector<1x1x128x128xbf16> to vector<128x128xbf16>
    %cst_92 = arith.constant dense<0.000000e+00> : vector<1x128xf32>
    %71 = tpu.matmul %68, %70, %cst_92 {dimension_numbers = #tpu.dot_dimension_numbers<[1], [0], [0], [1], [0, 0, 1, 1], [], []>} : vector<1x128xbf16>, vector<128x128xbf16>, vector<1x128xf32> -> vector<1x128xf32>
    %72 = arith.addf %64, %71 : vector<1x128xf32>
    %c0_93 = arith.constant 0 : index
    %c0_94 = arith.constant 0 : index
    %73 = vector.load %arg4[%c0_93, %c0_94] : memref<1x128xf32, #tpu.memory_space<vmem>>, vector<1x128xf32>
    %74 = arith.addf %72, %73 : vector<1x128xf32>
    %c0_95 = arith.constant 0 : index
    %c0_96 = arith.constant 0 : index
    %c0_97 = arith.constant 0 : index
    %c0_98 = arith.constant 0 : index
    %75 = vector.load %arg5[%c0_95, %c0_96, %c0_97, %c0_98] : memref<1x1x1x128xbf16, #tpu.memory_space<vmem>>, vector<1x1x1x128xbf16>
    %76 = vector.shape_cast %75 : vector<1x1x1x128xbf16> to vector<1x128xbf16>
    %c0_99 = arith.constant 0 : index
    %c0_100 = arith.constant 0 : index
    %77 = vector.load %arg6[%c0_99, %c0_100] : memref<128x128xbf16, #tpu.memory_space<vmem>>, vector<128x128xbf16>
    %cst_101 = arith.constant dense<0.000000e+00> : vector<1x128xf32>
    %78 = tpu.matmul %76, %77, %cst_101 {dimension_numbers = #tpu.dot_dimension_numbers<[1], [0], [0], [1], [0, 0, 1, 1], [], []>} : vector<1x128xbf16>, vector<128x128xbf16>, vector<1x128xf32> -> vector<1x128xf32>
    %79 = arith.addf %74, %78 : vector<1x128xf32>
    %c0_102 = arith.constant 0 : index
    %c0_103 = arith.constant 0 : index
    %80 = vector.load %arg7[%c0_102, %c0_103] : memref<1x128xf32, #tpu.memory_space<vmem>>, vector<1x128xf32>
    %81 = arith.addf %79, %80 : vector<1x128xf32>
    %82 = arith.truncf %81 : vector<1x128xf32> to vector<1x128xbf16>
    %c0_104 = arith.constant 0 : index
    %c0_105 = arith.constant 0 : index
    %c0_106 = arith.constant 0 : index
    %c0_107 = arith.constant 0 : index
    %83 = vector.load %arg8[%c0_104, %c0_105, %c0_106, %c0_107] : memref<1x1x1x128xbf16, #tpu.memory_space<vmem>>, vector<1x1x1x128xbf16>
    %84 = vector.shape_cast %83 : vector<1x1x1x128xbf16> to vector<1x128xbf16>
    %85 = vector.shape_cast %82 : vector<1x128xbf16> to vector<1x1x1x128xbf16>
    tpu.vector_store %arg8[%c0_104, %c0_105, %c0_106, %c0_107], %85 {strides = array<i32>} : memref<1x1x1x128xbf16, #tpu.memory_space<vmem>>, vector<1x1x1x128xbf16>,
    return
  }
  func.func @transform_0(%arg0: i32, %arg1: i32) -> (i32, i32, i32, i32, i32, i32) {
    %c0_i32 = arith.constant 0 : i32
    %c0_i32_0 = arith.constant 0 : i32
    %c0_i32_1 = arith.constant 0 : i32
    %c0_i32_2 = arith.constant 0 : i32
    %c0_i32_3 = arith.constant 0 : i32
    %c0_i32_4 = arith.constant 0 : i32
    return %arg0, %c0_i32, %c0_i32_0, %c0_i32_1, %c0_i32_2, %c0_i32_3 : i32, i32, i32, i32, i32, i32
  }
  func.func @transform_1(%arg0: i32, %arg1: i32) -> (i32, i32, i32, i32) {
    %c0_i32 = arith.constant 0 : i32
    %c0_i32_0 = arith.constant 0 : i32
    %c0_i32_1 = arith.constant 0 : i32
    %c0_i32_2 = arith.constant 0 : i32
    %c0_i32_3 = arith.constant 0 : i32
    return %c0_i32, %c0_i32_0, %c0_i32_1, %c0_i32_2 : i32, i32, i32, i32
  }
  func.func @transform_2(%arg0: i32, %arg1: i32) -> (i32, i32) {
    %c0_i32 = arith.constant 0 : i32
    %c0_i32_0 = arith.constant 0 : i32
    %c0_i32_1 = arith.constant 0 : i32
    return %c0_i32, %c0_i32_0 : i32, i32
  }
  func.func @transform_3(%arg0: i32, %arg1: i32) -> (i32, i32, i32, i32) {
    %c0_i32 = arith.constant 0 : i32
    %c0_i32_0 = arith.constant 0 : i32
    %c0_i32_1 = arith.constant 0 : i32
    return %arg0, %arg1, %c0_i32, %c0_i32_0 : i32, i32, i32, i32
  }
  func.func @transform_4(%arg0: i32, %arg1: i32) -> (i32, i32) {
    %c0_i32 = arith.constant 0 : i32
    %c0_i32_0 = arith.constant 0 : i32
    %c0_i32_1 = arith.constant 0 : i32
    return %c0_i32, %c0_i32_0 : i32, i32
  }
  func.func @transform_5(%arg0: i32, %arg1: i32) -> (i32, i32) {
    %c0_i32 = arith.constant 0 : i32
    %c0_i32_0 = arith.constant 0 : i32
    %c0_i32_1 = arith.constant 0 : i32
    return %c0_i32, %c0_i32_0 : i32, i32
  }
  func.func @transform_6(%arg0: i32, %arg1: i32) -> (i32, i32, i32, i32) {
    %c0_i32 = arith.constant 0 : i32
    %c0_i32_0 = arith.constant 0 : i32
    %c0_i32_1 = arith.constant 0 : i32
    return %arg0, %arg1, %c0_i32, %c0_i32_0 : i32, i32, i32, i32
  }
}

module attributes {stable_mosaic.version = 11 : i64} {
  func.func @kernel(%arg0: i32, %arg1: i32, %arg2: memref<1x1x1x3x3x128xbf16, #tpu.memory_space<vmem>>, %arg3: memref<3x3x128x128xbf16, #tpu.memory_space<vmem>>, %arg4: memref<1x128xf32, #tpu.memory_space<vmem>>, %arg5: memref<1x128xf32, #tpu.memory_space<vmem>>, %arg6: memref<1x128xf32, #tpu.memory_space<vmem>>, %arg7: memref<1x1x1x128xbf16, #tpu.memory_space<vmem>>) attributes {dimension_semantics = [#tpu.dimension_semantics<parallel>, #tpu.dimension_semantics<parallel>], iteration_bounds = array<i64: 2, 1>, scalar_prefetch = 0 : i64, scratch_operands = 0 : i64, tpu.core_type = #tpu.core_type<tc>, window_params = [{transform_indices = @transform_0, window_bounds = array<i64: 1, 1, 1, 3, 3, 128>}, {pipeline_mode = #tpu.pipeline_mode<synchronous>, transform_indices = @transform_1, window_bounds = array<i64: 3, 3, 128, 128>}, {pipeline_mode = #tpu.pipeline_mode<synchronous>, transform_indices = @transform_2, window_bounds = array<i64: 1, 128>}, {pipeline_mode = #tpu.pipeline_mode<synchronous>, transform_indices = @transform_3, window_bounds = array<i64: 1, 128>}, {pipeline_mode = #tpu.pipeline_mode<synchronous>, transform_indices = @transform_4, window_bounds = array<i64: 1, 128>}, {transform_indices = @transform_5, window_bounds = array<i64: 1, 1, 1, 128>}]} {
    %cst = arith.constant 0.000000e+00 : f32
    %0 = vector.broadcast %cst : f32 to vector<1x128xf32>
    %c0_i32 = arith.constant 0 : i32
    %1 = arith.addi %arg1, %c0_i32 : i32
    %c0 = arith.constant 0 : index
    %c0_0 = arith.constant 0 : index
    %c0_1 = arith.constant 0 : index
    %2 = arith.index_cast %1 : i32 to index
    %c0_2 = arith.constant 0 : index
    %c0_3 = arith.constant 0 : index
    %3 = vector.load %arg2[%c0, %c0_0, %c0_1, %2, %c0_2, %c0_3] : memref<1x1x1x3x3x128xbf16, #tpu.memory_space<vmem>>, vector<1x1x1x1x1x128xbf16>
    %4 = vector.shape_cast %3 : vector<1x1x1x1x1x128xbf16> to vector<1x128xbf16>
    %c0_4 = arith.constant 0 : index
    %c0_5 = arith.constant 0 : index
    %c0_6 = arith.constant 0 : index
    %c0_7 = arith.constant 0 : index
    %5 = vector.load %arg3[%c0_4, %c0_5, %c0_6, %c0_7] : memref<3x3x128x128xbf16, #tpu.memory_space<vmem>>, vector<1x1x128x128xbf16>
    %6 = vector.shape_cast %5 : vector<1x1x128x128xbf16> to vector<128x128xbf16>
    %cst_8 = arith.constant dense<0.000000e+00> : vector<1x128xf32>
    %7 = tpu.matmul %4, %6, %cst_8 {dimension_numbers = #tpu.dot_dimension_numbers<[1], [0], [0], [1], [0, 0, 1, 1], [], []>} : vector<1x128xbf16>, vector<128x128xbf16>, vector<1x128xf32> -> vector<1x128xf32>
    %8 = arith.addf %0, %7 : vector<1x128xf32>
    %c0_i32_9 = arith.constant 0 : i32
    %9 = arith.addi %arg1, %c0_i32_9 : i32
    %c0_10 = arith.constant 0 : index
    %c0_11 = arith.constant 0 : index
    %c0_12 = arith.constant 0 : index
    %10 = arith.index_cast %9 : i32 to index
    %c1 = arith.constant 1 : index
    %c0_13 = arith.constant 0 : index
    %11 = vector.load %arg2[%c0_10, %c0_11, %c0_12, %10, %c1, %c0_13] : memref<1x1x1x3x3x128xbf16, #tpu.memory_space<vmem>>, vector<1x1x1x1x1x128xbf16>
    %12 = vector.shape_cast %11 : vector<1x1x1x1x1x128xbf16> to vector<1x128xbf16>
    %c0_14 = arith.constant 0 : index
    %c1_15 = arith.constant 1 : index
    %c0_16 = arith.constant 0 : index
    %c0_17 = arith.constant 0 : index
    %13 = vector.load %arg3[%c0_14, %c1_15, %c0_16, %c0_17] : memref<3x3x128x128xbf16, #tpu.memory_space<vmem>>, vector<1x1x128x128xbf16>
    %14 = vector.shape_cast %13 : vector<1x1x128x128xbf16> to vector<128x128xbf16>
    %cst_18 = arith.constant dense<0.000000e+00> : vector<1x128xf32>
    %15 = tpu.matmul %12, %14, %cst_18 {dimension_numbers = #tpu.dot_dimension_numbers<[1], [0], [0], [1], [0, 0, 1, 1], [], []>} : vector<1x128xbf16>, vector<128x128xbf16>, vector<1x128xf32> -> vector<1x128xf32>
    %16 = arith.addf %8, %15 : vector<1x128xf32>
    %c0_i32_19 = arith.constant 0 : i32
    %17 = arith.addi %arg1, %c0_i32_19 : i32
    %c0_20 = arith.constant 0 : index
    %c0_21 = arith.constant 0 : index
    %c0_22 = arith.constant 0 : index
    %18 = arith.index_cast %17 : i32 to index
    %c2 = arith.constant 2 : index
    %c0_23 = arith.constant 0 : index
    %19 = vector.load %arg2[%c0_20, %c0_21, %c0_22, %18, %c2, %c0_23] : memref<1x1x1x3x3x128xbf16, #tpu.memory_space<vmem>>, vector<1x1x1x1x1x128xbf16>
    %20 = vector.shape_cast %19 : vector<1x1x1x1x1x128xbf16> to vector<1x128xbf16>
    %c0_24 = arith.constant 0 : index
    %c2_25 = arith.constant 2 : index
    %c0_26 = arith.constant 0 : index
    %c0_27 = arith.constant 0 : index
    %21 = vector.load %arg3[%c0_24, %c2_25, %c0_26, %c0_27] : memref<3x3x128x128xbf16, #tpu.memory_space<vmem>>, vector<1x1x128x128xbf16>
    %22 = vector.shape_cast %21 : vector<1x1x128x128xbf16> to vector<128x128xbf16>
    %cst_28 = arith.constant dense<0.000000e+00> : vector<1x128xf32>
    %23 = tpu.matmul %20, %22, %cst_28 {dimension_numbers = #tpu.dot_dimension_numbers<[1], [0], [0], [1], [0, 0, 1, 1], [], []>} : vector<1x128xbf16>, vector<128x128xbf16>, vector<1x128xf32> -> vector<1x128xf32>
    %24 = arith.addf %16, %23 : vector<1x128xf32>
    %c1_i32 = arith.constant 1 : i32
    %25 = arith.addi %arg1, %c1_i32 : i32
    %c0_29 = arith.constant 0 : index
    %c0_30 = arith.constant 0 : index
    %c0_31 = arith.constant 0 : index
    %26 = arith.index_cast %25 : i32 to index
    %c0_32 = arith.constant 0 : index
    %c0_33 = arith.constant 0 : index
    %27 = vector.load %arg2[%c0_29, %c0_30, %c0_31, %26, %c0_32, %c0_33] : memref<1x1x1x3x3x128xbf16, #tpu.memory_space<vmem>>, vector<1x1x1x1x1x128xbf16>
    %28 = vector.shape_cast %27 : vector<1x1x1x1x1x128xbf16> to vector<1x128xbf16>
    %c1_34 = arith.constant 1 : index
    %c0_35 = arith.constant 0 : index
    %c0_36 = arith.constant 0 : index
    %c0_37 = arith.constant 0 : index
    %29 = vector.load %arg3[%c1_34, %c0_35, %c0_36, %c0_37] : memref<3x3x128x128xbf16, #tpu.memory_space<vmem>>, vector<1x1x128x128xbf16>
    %30 = vector.shape_cast %29 : vector<1x1x128x128xbf16> to vector<128x128xbf16>
    %cst_38 = arith.constant dense<0.000000e+00> : vector<1x128xf32>
    %31 = tpu.matmul %28, %30, %cst_38 {dimension_numbers = #tpu.dot_dimension_numbers<[1], [0], [0], [1], [0, 0, 1, 1], [], []>} : vector<1x128xbf16>, vector<128x128xbf16>, vector<1x128xf32> -> vector<1x128xf32>
    %32 = arith.addf %24, %31 : vector<1x128xf32>
    %c1_i32_39 = arith.constant 1 : i32
    %33 = arith.addi %arg1, %c1_i32_39 : i32
    %c0_40 = arith.constant 0 : index
    %c0_41 = arith.constant 0 : index
    %c0_42 = arith.constant 0 : index
    %34 = arith.index_cast %33 : i32 to index
    %c1_43 = arith.constant 1 : index
    %c0_44 = arith.constant 0 : index
    %35 = vector.load %arg2[%c0_40, %c0_41, %c0_42, %34, %c1_43, %c0_44] : memref<1x1x1x3x3x128xbf16, #tpu.memory_space<vmem>>, vector<1x1x1x1x1x128xbf16>
    %36 = vector.shape_cast %35 : vector<1x1x1x1x1x128xbf16> to vector<1x128xbf16>
    %c1_45 = arith.constant 1 : index
    %c1_46 = arith.constant 1 : index
    %c0_47 = arith.constant 0 : index
    %c0_48 = arith.constant 0 : index
    %37 = vector.load %arg3[%c1_45, %c1_46, %c0_47, %c0_48] : memref<3x3x128x128xbf16, #tpu.memory_space<vmem>>, vector<1x1x128x128xbf16>
    %38 = vector.shape_cast %37 : vector<1x1x128x128xbf16> to vector<128x128xbf16>
    %cst_49 = arith.constant dense<0.000000e+00> : vector<1x128xf32>
    %39 = tpu.matmul %36, %38, %cst_49 {dimension_numbers = #tpu.dot_dimension_numbers<[1], [0], [0], [1], [0, 0, 1, 1], [], []>} : vector<1x128xbf16>, vector<128x128xbf16>, vector<1x128xf32> -> vector<1x128xf32>
    %40 = arith.addf %32, %39 : vector<1x128xf32>
    %c1_i32_50 = arith.constant 1 : i32
    %41 = arith.addi %arg1, %c1_i32_50 : i32
    %c0_51 = arith.constant 0 : index
    %c0_52 = arith.constant 0 : index
    %c0_53 = arith.constant 0 : index
    %42 = arith.index_cast %41 : i32 to index
    %c2_54 = arith.constant 2 : index
    %c0_55 = arith.constant 0 : index
    %43 = vector.load %arg2[%c0_51, %c0_52, %c0_53, %42, %c2_54, %c0_55] : memref<1x1x1x3x3x128xbf16, #tpu.memory_space<vmem>>, vector<1x1x1x1x1x128xbf16>
    %44 = vector.shape_cast %43 : vector<1x1x1x1x1x128xbf16> to vector<1x128xbf16>
    %c1_56 = arith.constant 1 : index
    %c2_57 = arith.constant 2 : index
    %c0_58 = arith.constant 0 : index
    %c0_59 = arith.constant 0 : index
    %45 = vector.load %arg3[%c1_56, %c2_57, %c0_58, %c0_59] : memref<3x3x128x128xbf16, #tpu.memory_space<vmem>>, vector<1x1x128x128xbf16>
    %46 = vector.shape_cast %45 : vector<1x1x128x128xbf16> to vector<128x128xbf16>
    %cst_60 = arith.constant dense<0.000000e+00> : vector<1x128xf32>
    %47 = tpu.matmul %44, %46, %cst_60 {dimension_numbers = #tpu.dot_dimension_numbers<[1], [0], [0], [1], [0, 0, 1, 1], [], []>} : vector<1x128xbf16>, vector<128x128xbf16>, vector<1x128xf32> -> vector<1x128xf32>
    %48 = arith.addf %40, %47 : vector<1x128xf32>
    %c2_i32 = arith.constant 2 : i32
    %49 = arith.addi %arg1, %c2_i32 : i32
    %c0_61 = arith.constant 0 : index
    %c0_62 = arith.constant 0 : index
    %c0_63 = arith.constant 0 : index
    %50 = arith.index_cast %49 : i32 to index
    %c0_64 = arith.constant 0 : index
    %c0_65 = arith.constant 0 : index
    %51 = vector.load %arg2[%c0_61, %c0_62, %c0_63, %50, %c0_64, %c0_65] : memref<1x1x1x3x3x128xbf16, #tpu.memory_space<vmem>>, vector<1x1x1x1x1x128xbf16>
    %52 = vector.shape_cast %51 : vector<1x1x1x1x1x128xbf16> to vector<1x128xbf16>
    %c2_66 = arith.constant 2 : index
    %c0_67 = arith.constant 0 : index
    %c0_68 = arith.constant 0 : index
    %c0_69 = arith.constant 0 : index
    %53 = vector.load %arg3[%c2_66, %c0_67, %c0_68, %c0_69] : memref<3x3x128x128xbf16, #tpu.memory_space<vmem>>, vector<1x1x128x128xbf16>
    %54 = vector.shape_cast %53 : vector<1x1x128x128xbf16> to vector<128x128xbf16>
    %cst_70 = arith.constant dense<0.000000e+00> : vector<1x128xf32>
    %55 = tpu.matmul %52, %54, %cst_70 {dimension_numbers = #tpu.dot_dimension_numbers<[1], [0], [0], [1], [0, 0, 1, 1], [], []>} : vector<1x128xbf16>, vector<128x128xbf16>, vector<1x128xf32> -> vector<1x128xf32>
    %56 = arith.addf %48, %55 : vector<1x128xf32>
    %c2_i32_71 = arith.constant 2 : i32
    %57 = arith.addi %arg1, %c2_i32_71 : i32
    %c0_72 = arith.constant 0 : index
    %c0_73 = arith.constant 0 : index
    %c0_74 = arith.constant 0 : index
    %58 = arith.index_cast %57 : i32 to index
    %c1_75 = arith.constant 1 : index
    %c0_76 = arith.constant 0 : index
    %59 = vector.load %arg2[%c0_72, %c0_73, %c0_74, %58, %c1_75, %c0_76] : memref<1x1x1x3x3x128xbf16, #tpu.memory_space<vmem>>, vector<1x1x1x1x1x128xbf16>
    %60 = vector.shape_cast %59 : vector<1x1x1x1x1x128xbf16> to vector<1x128xbf16>
    %c2_77 = arith.constant 2 : index
    %c1_78 = arith.constant 1 : index
    %c0_79 = arith.constant 0 : index
    %c0_80 = arith.constant 0 : index
    %61 = vector.load %arg3[%c2_77, %c1_78, %c0_79, %c0_80] : memref<3x3x128x128xbf16, #tpu.memory_space<vmem>>, vector<1x1x128x128xbf16>
    %62 = vector.shape_cast %61 : vector<1x1x128x128xbf16> to vector<128x128xbf16>
    %cst_81 = arith.constant dense<0.000000e+00> : vector<1x128xf32>
    %63 = tpu.matmul %60, %62, %cst_81 {dimension_numbers = #tpu.dot_dimension_numbers<[1], [0], [0], [1], [0, 0, 1, 1], [], []>} : vector<1x128xbf16>, vector<128x128xbf16>, vector<1x128xf32> -> vector<1x128xf32>
    %64 = arith.addf %56, %63 : vector<1x128xf32>
    %c2_i32_82 = arith.constant 2 : i32
    %65 = arith.addi %arg1, %c2_i32_82 : i32
    %c0_83 = arith.constant 0 : index
    %c0_84 = arith.constant 0 : index
    %c0_85 = arith.constant 0 : index
    %66 = arith.index_cast %65 : i32 to index
    %c2_86 = arith.constant 2 : index
    %c0_87 = arith.constant 0 : index
    %67 = vector.load %arg2[%c0_83, %c0_84, %c0_85, %66, %c2_86, %c0_87] : memref<1x1x1x3x3x128xbf16, #tpu.memory_space<vmem>>, vector<1x1x1x1x1x128xbf16>
    %68 = vector.shape_cast %67 : vector<1x1x1x1x1x128xbf16> to vector<1x128xbf16>
    %c2_88 = arith.constant 2 : index
    %c2_89 = arith.constant 2 : index
    %c0_90 = arith.constant 0 : index
    %c0_91 = arith.constant 0 : index
    %69 = vector.load %arg3[%c2_88, %c2_89, %c0_90, %c0_91] : memref<3x3x128x128xbf16, #tpu.memory_space<vmem>>, vector<1x1x128x128xbf16>
    %70 = vector.shape_cast %69 : vector<1x1x128x128xbf16> to vector<128x128xbf16>
    %cst_92 = arith.constant dense<0.000000e+00> : vector<1x128xf32>
    %71 = tpu.matmul %68, %70, %cst_92 {dimension_numbers = #tpu.dot_dimension_numbers<[1], [0], [0], [1], [0, 0, 1, 1], [], []>} : vector<1x128xbf16>, vector<128x128xbf16>, vector<1x128xf32> -> vector<1x128xf32>
    %72 = arith.addf %64, %71 : vector<1x128xf32>
    %c0_93 = arith.constant 0 : index
    %c0_94 = arith.constant 0 : index
    %73 = vector.load %arg4[%c0_93, %c0_94] : memref<1x128xf32, #tpu.memory_space<vmem>>, vector<1x128xf32>
    %74 = arith.addf %72, %73 : vector<1x128xf32>
    %c0_95 = arith.constant 0 : index
    %c0_96 = arith.constant 0 : index
    %75 = vector.load %arg5[%c0_95, %c0_96] : memref<1x128xf32, #tpu.memory_space<vmem>>, vector<1x128xf32>
    %76 = arith.mulf %74, %75 : vector<1x128xf32>
    %c0_97 = arith.constant 0 : index
    %c0_98 = arith.constant 0 : index
    %77 = vector.load %arg6[%c0_97, %c0_98] : memref<1x128xf32, #tpu.memory_space<vmem>>, vector<1x128xf32>
    %78 = arith.addf %76, %77 : vector<1x128xf32>
    %cst_99 = arith.constant 0.000000e+00 : f32
    %79 = vector.broadcast %cst_99 : f32 to vector<1x128xf32>
    %80 = arith.maximumf %78, %79 : vector<1x128xf32>
    %81 = arith.truncf %80 : vector<1x128xf32> to vector<1x128xbf16>
    %c0_100 = arith.constant 0 : index
    %c0_101 = arith.constant 0 : index
    %c0_102 = arith.constant 0 : index
    %c0_103 = arith.constant 0 : index
    %82 = vector.load %arg7[%c0_100, %c0_101, %c0_102, %c0_103] : memref<1x1x1x128xbf16, #tpu.memory_space<vmem>>, vector<1x1x1x128xbf16>
    %83 = vector.shape_cast %82 : vector<1x1x1x128xbf16> to vector<1x128xbf16>
    %84 = vector.shape_cast %81 : vector<1x128xbf16> to vector<1x1x1x128xbf16>
    tpu.vector_store %arg7[%c0_100, %c0_101, %c0_102, %c0_103], %84 {strides = array<i32>} : memref<1x1x1x128xbf16, #tpu.memory_space<vmem>>, vector<1x1x1x128xbf16>,
    return
  }
  func.func @transform_0(%arg0: i32, %arg1: i32) -> (i32, i32, i32, i32, i32, i32) {
    %c0_i32 = arith.constant 0 : i32
    %c0_i32_0 = arith.constant 0 : i32
    %c0_i32_1 = arith.constant 0 : i32
    %c0_i32_2 = arith.constant 0 : i32
    %c0_i32_3 = arith.constant 0 : i32
    %c0_i32_4 = arith.constant 0 : i32
    return %arg0, %c0_i32, %c0_i32_0, %c0_i32_1, %c0_i32_2, %c0_i32_3 : i32, i32, i32, i32, i32, i32
  }
  func.func @transform_1(%arg0: i32, %arg1: i32) -> (i32, i32, i32, i32) {
    %c0_i32 = arith.constant 0 : i32
    %c0_i32_0 = arith.constant 0 : i32
    %c0_i32_1 = arith.constant 0 : i32
    %c0_i32_2 = arith.constant 0 : i32
    %c0_i32_3 = arith.constant 0 : i32
    return %c0_i32, %c0_i32_0, %c0_i32_1, %c0_i32_2 : i32, i32, i32, i32
  }
  func.func @transform_2(%arg0: i32, %arg1: i32) -> (i32, i32) {
    %c0_i32 = arith.constant 0 : i32
    %c0_i32_0 = arith.constant 0 : i32
    %c0_i32_1 = arith.constant 0 : i32
    return %c0_i32, %c0_i32_0 : i32, i32
  }
  func.func @transform_3(%arg0: i32, %arg1: i32) -> (i32, i32) {
    %c0_i32 = arith.constant 0 : i32
    %c0_i32_0 = arith.constant 0 : i32
    %c0_i32_1 = arith.constant 0 : i32
    return %c0_i32, %c0_i32_0 : i32, i32
  }
  func.func @transform_4(%arg0: i32, %arg1: i32) -> (i32, i32) {
    %c0_i32 = arith.constant 0 : i32
    %c0_i32_0 = arith.constant 0 : i32
    %c0_i32_1 = arith.constant 0 : i32
    return %c0_i32, %c0_i32_0 : i32, i32
  }
  func.func @transform_5(%arg0: i32, %arg1: i32) -> (i32, i32, i32, i32) {
    %c0_i32 = arith.constant 0 : i32
    %c0_i32_0 = arith.constant 0 : i32
    %c0_i32_1 = arith.constant 0 : i32
    return %arg0, %arg1, %c0_i32, %c0_i32_0 : i32, i32, i32, i32
  }
}

module attributes {stable_mosaic.version = 11 : i64} {
  func.func @kernel(%arg0: i32, %arg1: i32, %arg2: memref<1x1x1x3x3x128xbf16, #tpu.memory_space<vmem>>, %arg3: memref<3x3x128x128xbf16, #tpu.memory_space<vmem>>, %arg4: memref<1x128xf32, #tpu.memory_space<vmem>>, %arg5: memref<1x1x1x128xbf16, #tpu.memory_space<vmem>>, %arg6: memref<1x1x1x128xbf16, #tpu.memory_space<vmem>>) attributes {dimension_semantics = [#tpu.dimension_semantics<parallel>, #tpu.dimension_semantics<parallel>], iteration_bounds = array<i64: 2, 1>, scalar_prefetch = 0 : i64, scratch_operands = 0 : i64, tpu.core_type = #tpu.core_type<tc>, window_params = [{transform_indices = @transform_0, window_bounds = array<i64: 1, 1, 1, 3, 3, 128>}, {pipeline_mode = #tpu.pipeline_mode<synchronous>, transform_indices = @transform_1, window_bounds = array<i64: 3, 3, 128, 128>}, {pipeline_mode = #tpu.pipeline_mode<synchronous>, transform_indices = @transform_2, window_bounds = array<i64: 1, 128>}, {transform_indices = @transform_3, window_bounds = array<i64: 1, 1, 1, 128>}, {transform_indices = @transform_4, window_bounds = array<i64: 1, 1, 1, 128>}]} {
    %cst = arith.constant 0.000000e+00 : f32
    %0 = vector.broadcast %cst : f32 to vector<1x128xf32>
    %c0_i32 = arith.constant 0 : i32
    %1 = arith.addi %arg1, %c0_i32 : i32
    %c0 = arith.constant 0 : index
    %c0_0 = arith.constant 0 : index
    %c0_1 = arith.constant 0 : index
    %2 = arith.index_cast %1 : i32 to index
    %c0_2 = arith.constant 0 : index
    %c0_3 = arith.constant 0 : index
    %3 = vector.load %arg2[%c0, %c0_0, %c0_1, %2, %c0_2, %c0_3] : memref<1x1x1x3x3x128xbf16, #tpu.memory_space<vmem>>, vector<1x1x1x1x1x128xbf16>
    %4 = vector.shape_cast %3 : vector<1x1x1x1x1x128xbf16> to vector<1x128xbf16>
    %c0_4 = arith.constant 0 : index
    %c0_5 = arith.constant 0 : index
    %c0_6 = arith.constant 0 : index
    %c0_7 = arith.constant 0 : index
    %5 = vector.load %arg3[%c0_4, %c0_5, %c0_6, %c0_7] : memref<3x3x128x128xbf16, #tpu.memory_space<vmem>>, vector<1x1x128x128xbf16>
    %6 = vector.shape_cast %5 : vector<1x1x128x128xbf16> to vector<128x128xbf16>
    %cst_8 = arith.constant dense<0.000000e+00> : vector<1x128xf32>
    %7 = tpu.matmul %4, %6, %cst_8 {dimension_numbers = #tpu.dot_dimension_numbers<[1], [0], [0], [1], [0, 0, 1, 1], [], []>} : vector<1x128xbf16>, vector<128x128xbf16>, vector<1x128xf32> -> vector<1x128xf32>
    %8 = arith.addf %0, %7 : vector<1x128xf32>
    %c0_i32_9 = arith.constant 0 : i32
    %9 = arith.addi %arg1, %c0_i32_9 : i32
    %c0_10 = arith.constant 0 : index
    %c0_11 = arith.constant 0 : index
    %c0_12 = arith.constant 0 : index
    %10 = arith.index_cast %9 : i32 to index
    %c1 = arith.constant 1 : index
    %c0_13 = arith.constant 0 : index
    %11 = vector.load %arg2[%c0_10, %c0_11, %c0_12, %10, %c1, %c0_13] : memref<1x1x1x3x3x128xbf16, #tpu.memory_space<vmem>>, vector<1x1x1x1x1x128xbf16>
    %12 = vector.shape_cast %11 : vector<1x1x1x1x1x128xbf16> to vector<1x128xbf16>
    %c0_14 = arith.constant 0 : index
    %c1_15 = arith.constant 1 : index
    %c0_16 = arith.constant 0 : index
    %c0_17 = arith.constant 0 : index
    %13 = vector.load %arg3[%c0_14, %c1_15, %c0_16, %c0_17] : memref<3x3x128x128xbf16, #tpu.memory_space<vmem>>, vector<1x1x128x128xbf16>
    %14 = vector.shape_cast %13 : vector<1x1x128x128xbf16> to vector<128x128xbf16>
    %cst_18 = arith.constant dense<0.000000e+00> : vector<1x128xf32>
    %15 = tpu.matmul %12, %14, %cst_18 {dimension_numbers = #tpu.dot_dimension_numbers<[1], [0], [0], [1], [0, 0, 1, 1], [], []>} : vector<1x128xbf16>, vector<128x128xbf16>, vector<1x128xf32> -> vector<1x128xf32>
    %16 = arith.addf %8, %15 : vector<1x128xf32>
    %c0_i32_19 = arith.constant 0 : i32
    %17 = arith.addi %arg1, %c0_i32_19 : i32
    %c0_20 = arith.constant 0 : index
    %c0_21 = arith.constant 0 : index
    %c0_22 = arith.constant 0 : index
    %18 = arith.index_cast %17 : i32 to index
    %c2 = arith.constant 2 : index
    %c0_23 = arith.constant 0 : index
    %19 = vector.load %arg2[%c0_20, %c0_21, %c0_22, %18, %c2, %c0_23] : memref<1x1x1x3x3x128xbf16, #tpu.memory_space<vmem>>, vector<1x1x1x1x1x128xbf16>
    %20 = vector.shape_cast %19 : vector<1x1x1x1x1x128xbf16> to vector<1x128xbf16>
    %c0_24 = arith.constant 0 : index
    %c2_25 = arith.constant 2 : index
    %c0_26 = arith.constant 0 : index
    %c0_27 = arith.constant 0 : index
    %21 = vector.load %arg3[%c0_24, %c2_25, %c0_26, %c0_27] : memref<3x3x128x128xbf16, #tpu.memory_space<vmem>>, vector<1x1x128x128xbf16>
    %22 = vector.shape_cast %21 : vector<1x1x128x128xbf16> to vector<128x128xbf16>
    %cst_28 = arith.constant dense<0.000000e+00> : vector<1x128xf32>
    %23 = tpu.matmul %20, %22, %cst_28 {dimension_numbers = #tpu.dot_dimension_numbers<[1], [0], [0], [1], [0, 0, 1, 1], [], []>} : vector<1x128xbf16>, vector<128x128xbf16>, vector<1x128xf32> -> vector<1x128xf32>
    %24 = arith.addf %16, %23 : vector<1x128xf32>
    %c1_i32 = arith.constant 1 : i32
    %25 = arith.addi %arg1, %c1_i32 : i32
    %c0_29 = arith.constant 0 : index
    %c0_30 = arith.constant 0 : index
    %c0_31 = arith.constant 0 : index
    %26 = arith.index_cast %25 : i32 to index
    %c0_32 = arith.constant 0 : index
    %c0_33 = arith.constant 0 : index
    %27 = vector.load %arg2[%c0_29, %c0_30, %c0_31, %26, %c0_32, %c0_33] : memref<1x1x1x3x3x128xbf16, #tpu.memory_space<vmem>>, vector<1x1x1x1x1x128xbf16>
    %28 = vector.shape_cast %27 : vector<1x1x1x1x1x128xbf16> to vector<1x128xbf16>
    %c1_34 = arith.constant 1 : index
    %c0_35 = arith.constant 0 : index
    %c0_36 = arith.constant 0 : index
    %c0_37 = arith.constant 0 : index
    %29 = vector.load %arg3[%c1_34, %c0_35, %c0_36, %c0_37] : memref<3x3x128x128xbf16, #tpu.memory_space<vmem>>, vector<1x1x128x128xbf16>
    %30 = vector.shape_cast %29 : vector<1x1x128x128xbf16> to vector<128x128xbf16>
    %cst_38 = arith.constant dense<0.000000e+00> : vector<1x128xf32>
    %31 = tpu.matmul %28, %30, %cst_38 {dimension_numbers = #tpu.dot_dimension_numbers<[1], [0], [0], [1], [0, 0, 1, 1], [], []>} : vector<1x128xbf16>, vector<128x128xbf16>, vector<1x128xf32> -> vector<1x128xf32>
    %32 = arith.addf %24, %31 : vector<1x128xf32>
    %c1_i32_39 = arith.constant 1 : i32
    %33 = arith.addi %arg1, %c1_i32_39 : i32
    %c0_40 = arith.constant 0 : index
    %c0_41 = arith.constant 0 : index
    %c0_42 = arith.constant 0 : index
    %34 = arith.index_cast %33 : i32 to index
    %c1_43 = arith.constant 1 : index
    %c0_44 = arith.constant 0 : index
    %35 = vector.load %arg2[%c0_40, %c0_41, %c0_42, %34, %c1_43, %c0_44] : memref<1x1x1x3x3x128xbf16, #tpu.memory_space<vmem>>, vector<1x1x1x1x1x128xbf16>
    %36 = vector.shape_cast %35 : vector<1x1x1x1x1x128xbf16> to vector<1x128xbf16>
    %c1_45 = arith.constant 1 : index
    %c1_46 = arith.constant 1 : index
    %c0_47 = arith.constant 0 : index
    %c0_48 = arith.constant 0 : index
    %37 = vector.load %arg3[%c1_45, %c1_46, %c0_47, %c0_48] : memref<3x3x128x128xbf16, #tpu.memory_space<vmem>>, vector<1x1x128x128xbf16>
    %38 = vector.shape_cast %37 : vector<1x1x128x128xbf16> to vector<128x128xbf16>
    %cst_49 = arith.constant dense<0.000000e+00> : vector<1x128xf32>
    %39 = tpu.matmul %36, %38, %cst_49 {dimension_numbers = #tpu.dot_dimension_numbers<[1], [0], [0], [1], [0, 0, 1, 1], [], []>} : vector<1x128xbf16>, vector<128x128xbf16>, vector<1x128xf32> -> vector<1x128xf32>
    %40 = arith.addf %32, %39 : vector<1x128xf32>
    %c1_i32_50 = arith.constant 1 : i32
    %41 = arith.addi %arg1, %c1_i32_50 : i32
    %c0_51 = arith.constant 0 : index
    %c0_52 = arith.constant 0 : index
    %c0_53 = arith.constant 0 : index
    %42 = arith.index_cast %41 : i32 to index
    %c2_54 = arith.constant 2 : index
    %c0_55 = arith.constant 0 : index
    %43 = vector.load %arg2[%c0_51, %c0_52, %c0_53, %42, %c2_54, %c0_55] : memref<1x1x1x3x3x128xbf16, #tpu.memory_space<vmem>>, vector<1x1x1x1x1x128xbf16>
    %44 = vector.shape_cast %43 : vector<1x1x1x1x1x128xbf16> to vector<1x128xbf16>
    %c1_56 = arith.constant 1 : index
    %c2_57 = arith.constant 2 : index
    %c0_58 = arith.constant 0 : index
    %c0_59 = arith.constant 0 : index
    %45 = vector.load %arg3[%c1_56, %c2_57, %c0_58, %c0_59] : memref<3x3x128x128xbf16, #tpu.memory_space<vmem>>, vector<1x1x128x128xbf16>
    %46 = vector.shape_cast %45 : vector<1x1x128x128xbf16> to vector<128x128xbf16>
    %cst_60 = arith.constant dense<0.000000e+00> : vector<1x128xf32>
    %47 = tpu.matmul %44, %46, %cst_60 {dimension_numbers = #tpu.dot_dimension_numbers<[1], [0], [0], [1], [0, 0, 1, 1], [], []>} : vector<1x128xbf16>, vector<128x128xbf16>, vector<1x128xf32> -> vector<1x128xf32>
    %48 = arith.addf %40, %47 : vector<1x128xf32>
    %c2_i32 = arith.constant 2 : i32
    %49 = arith.addi %arg1, %c2_i32 : i32
    %c0_61 = arith.constant 0 : index
    %c0_62 = arith.constant 0 : index
    %c0_63 = arith.constant 0 : index
    %50 = arith.index_cast %49 : i32 to index
    %c0_64 = arith.constant 0 : index
    %c0_65 = arith.constant 0 : index
    %51 = vector.load %arg2[%c0_61, %c0_62, %c0_63, %50, %c0_64, %c0_65] : memref<1x1x1x3x3x128xbf16, #tpu.memory_space<vmem>>, vector<1x1x1x1x1x128xbf16>
    %52 = vector.shape_cast %51 : vector<1x1x1x1x1x128xbf16> to vector<1x128xbf16>
    %c2_66 = arith.constant 2 : index
    %c0_67 = arith.constant 0 : index
    %c0_68 = arith.constant 0 : index
    %c0_69 = arith.constant 0 : index
    %53 = vector.load %arg3[%c2_66, %c0_67, %c0_68, %c0_69] : memref<3x3x128x128xbf16, #tpu.memory_space<vmem>>, vector<1x1x128x128xbf16>
    %54 = vector.shape_cast %53 : vector<1x1x128x128xbf16> to vector<128x128xbf16>
    %cst_70 = arith.constant dense<0.000000e+00> : vector<1x128xf32>
    %55 = tpu.matmul %52, %54, %cst_70 {dimension_numbers = #tpu.dot_dimension_numbers<[1], [0], [0], [1], [0, 0, 1, 1], [], []>} : vector<1x128xbf16>, vector<128x128xbf16>, vector<1x128xf32> -> vector<1x128xf32>
    %56 = arith.addf %48, %55 : vector<1x128xf32>
    %c2_i32_71 = arith.constant 2 : i32
    %57 = arith.addi %arg1, %c2_i32_71 : i32
    %c0_72 = arith.constant 0 : index
    %c0_73 = arith.constant 0 : index
    %c0_74 = arith.constant 0 : index
    %58 = arith.index_cast %57 : i32 to index
    %c1_75 = arith.constant 1 : index
    %c0_76 = arith.constant 0 : index
    %59 = vector.load %arg2[%c0_72, %c0_73, %c0_74, %58, %c1_75, %c0_76] : memref<1x1x1x3x3x128xbf16, #tpu.memory_space<vmem>>, vector<1x1x1x1x1x128xbf16>
    %60 = vector.shape_cast %59 : vector<1x1x1x1x1x128xbf16> to vector<1x128xbf16>
    %c2_77 = arith.constant 2 : index
    %c1_78 = arith.constant 1 : index
    %c0_79 = arith.constant 0 : index
    %c0_80 = arith.constant 0 : index
    %61 = vector.load %arg3[%c2_77, %c1_78, %c0_79, %c0_80] : memref<3x3x128x128xbf16, #tpu.memory_space<vmem>>, vector<1x1x128x128xbf16>
    %62 = vector.shape_cast %61 : vector<1x1x128x128xbf16> to vector<128x128xbf16>
    %cst_81 = arith.constant dense<0.000000e+00> : vector<1x128xf32>
    %63 = tpu.matmul %60, %62, %cst_81 {dimension_numbers = #tpu.dot_dimension_numbers<[1], [0], [0], [1], [0, 0, 1, 1], [], []>} : vector<1x128xbf16>, vector<128x128xbf16>, vector<1x128xf32> -> vector<1x128xf32>
    %64 = arith.addf %56, %63 : vector<1x128xf32>
    %c2_i32_82 = arith.constant 2 : i32
    %65 = arith.addi %arg1, %c2_i32_82 : i32
    %c0_83 = arith.constant 0 : index
    %c0_84 = arith.constant 0 : index
    %c0_85 = arith.constant 0 : index
    %66 = arith.index_cast %65 : i32 to index
    %c2_86 = arith.constant 2 : index
    %c0_87 = arith.constant 0 : index
    %67 = vector.load %arg2[%c0_83, %c0_84, %c0_85, %66, %c2_86, %c0_87] : memref<1x1x1x3x3x128xbf16, #tpu.memory_space<vmem>>, vector<1x1x1x1x1x128xbf16>
    %68 = vector.shape_cast %67 : vector<1x1x1x1x1x128xbf16> to vector<1x128xbf16>
    %c2_88 = arith.constant 2 : index
    %c2_89 = arith.constant 2 : index
    %c0_90 = arith.constant 0 : index
    %c0_91 = arith.constant 0 : index
    %69 = vector.load %arg3[%c2_88, %c2_89, %c0_90, %c0_91] : memref<3x3x128x128xbf16, #tpu.memory_space<vmem>>, vector<1x1x128x128xbf16>
    %70 = vector.shape_cast %69 : vector<1x1x128x128xbf16> to vector<128x128xbf16>
    %cst_92 = arith.constant dense<0.000000e+00> : vector<1x128xf32>
    %71 = tpu.matmul %68, %70, %cst_92 {dimension_numbers = #tpu.dot_dimension_numbers<[1], [0], [0], [1], [0, 0, 1, 1], [], []>} : vector<1x128xbf16>, vector<128x128xbf16>, vector<1x128xf32> -> vector<1x128xf32>
    %72 = arith.addf %64, %71 : vector<1x128xf32>
    %c0_93 = arith.constant 0 : index
    %c0_94 = arith.constant 0 : index
    %73 = vector.load %arg4[%c0_93, %c0_94] : memref<1x128xf32, #tpu.memory_space<vmem>>, vector<1x128xf32>
    %74 = arith.addf %72, %73 : vector<1x128xf32>
    %c0_95 = arith.constant 0 : index
    %c0_96 = arith.constant 0 : index
    %c0_97 = arith.constant 0 : index
    %c0_98 = arith.constant 0 : index
    %75 = vector.load %arg5[%c0_95, %c0_96, %c0_97, %c0_98] : memref<1x1x1x128xbf16, #tpu.memory_space<vmem>>, vector<1x1x1x128xbf16>
    %76 = vector.shape_cast %75 : vector<1x1x1x128xbf16> to vector<1x128xbf16>
    %77 = arith.extf %76 : vector<1x128xbf16> to vector<1x128xf32>
    %78 = arith.addf %74, %77 : vector<1x128xf32>
    %cst_99 = arith.constant 0.000000e+00 : f32
    %79 = vector.broadcast %cst_99 : f32 to vector<1x128xf32>
    %80 = arith.maximumf %78, %79 : vector<1x128xf32>
    %81 = arith.truncf %80 : vector<1x128xf32> to vector<1x128xbf16>
    %c0_100 = arith.constant 0 : index
    %c0_101 = arith.constant 0 : index
    %c0_102 = arith.constant 0 : index
    %c0_103 = arith.constant 0 : index
    %82 = vector.load %arg6[%c0_100, %c0_101, %c0_102, %c0_103] : memref<1x1x1x128xbf16, #tpu.memory_space<vmem>>, vector<1x1x1x128xbf16>
    %83 = vector.shape_cast %82 : vector<1x1x1x128xbf16> to vector<1x128xbf16>
    %84 = vector.shape_cast %81 : vector<1x128xbf16> to vector<1x1x1x128xbf16>
    tpu.vector_store %arg6[%c0_100, %c0_101, %c0_102, %c0_103], %84 {strides = array<i32>} : memref<1x1x1x128xbf16, #tpu.memory_space<vmem>>, vector<1x1x1x128xbf16>,
    return
  }
  func.func @transform_0(%arg0: i32, %arg1: i32) -> (i32, i32, i32, i32, i32, i32) {
    %c0_i32 = arith.constant 0 : i32
    %c0_i32_0 = arith.constant 0 : i32
    %c0_i32_1 = arith.constant 0 : i32
    %c0_i32_2 = arith.constant 0 : i32
    %c0_i32_3 = arith.constant 0 : i32
    %c0_i32_4 = arith.constant 0 : i32
    return %arg0, %c0_i32, %c0_i32_0, %c0_i32_1, %c0_i32_2, %c0_i32_3 : i32, i32, i32, i32, i32, i32
  }
  func.func @transform_1(%arg0: i32, %arg1: i32) -> (i32, i32, i32, i32) {
    %c0_i32 = arith.constant 0 : i32
    %c0_i32_0 = arith.constant 0 : i32
    %c0_i32_1 = arith.constant 0 : i32
    %c0_i32_2 = arith.constant 0 : i32
    %c0_i32_3 = arith.constant 0 : i32
    return %c0_i32, %c0_i32_0, %c0_i32_1, %c0_i32_2 : i32, i32, i32, i32
  }
  func.func @transform_2(%arg0: i32, %arg1: i32) -> (i32, i32) {
    %c0_i32 = arith.constant 0 : i32
    %c0_i32_0 = arith.constant 0 : i32
    %c0_i32_1 = arith.constant 0 : i32
    return %c0_i32, %c0_i32_0 : i32, i32
  }
  func.func @transform_3(%arg0: i32, %arg1: i32) -> (i32, i32, i32, i32) {
    %c0_i32 = arith.constant 0 : i32
    %c0_i32_0 = arith.constant 0 : i32
    %c0_i32_1 = arith.constant 0 : i32
    return %arg0, %arg1, %c0_i32, %c0_i32_0 : i32, i32, i32, i32
  }
  func.func @transform_4(%arg0: i32, %arg1: i32) -> (i32, i32, i32, i32) {
    %c0_i32 = arith.constant 0 : i32
    %c0_i32_0 = arith.constant 0 : i32
    %c0_i32_1 = arith.constant 0 : i32
    return %arg0, %arg1, %c0_i32, %c0_i32_0 : i32, i32, i32, i32
  }
}

module attributes {stable_mosaic.version = 11 : i64} {
  func.func @_pool_kernel(%arg0: i32, %arg1: memref<1x1x128xbf16, #tpu.memory_space<vmem>>, %arg2: memref<1x1x128xf32, #tpu.memory_space<vmem>>) attributes {dimension_semantics = [#tpu.dimension_semantics<parallel>], iteration_bounds = array<i64: 2>, scalar_prefetch = 0 : i64, scratch_operands = 0 : i64, tpu.core_type = #tpu.core_type<tc>, window_params = [{transform_indices = @transform_0, window_bounds = array<i64: 1, 1, 128>}, {transform_indices = @transform_1, window_bounds = array<i64: 1, 1, 128>}]} {
    %c0 = arith.constant 0 : index
    %c0_0 = arith.constant 0 : index
    %c0_1 = arith.constant 0 : index
    %0 = vector.load %arg1[%c0, %c0_0, %c0_1] : memref<1x1x128xbf16, #tpu.memory_space<vmem>>, vector<1x1x128xbf16>
    %1 = vector.shape_cast %0 : vector<1x1x128xbf16> to vector<1x128xbf16>
    %2 = arith.extf %1 : vector<1x128xbf16> to vector<1x128xf32>
    %cst = arith.constant dense<0.000000e+00> : vector<128xf32>
    %3 = vector.multi_reduction <add>, %2, %cst [0] : vector<1x128xf32> to vector<128xf32>
    %4 = vector.shape_cast %3 : vector<128xf32> to vector<1x128xf32>
    %cst_2 = arith.constant 1.000000e+00 : f32
    %5 = vector.broadcast %cst_2 : f32 to vector<1x128xf32>
    %6 = arith.divf %4, %5 : vector<1x128xf32>
    %c0_3 = arith.constant 0 : index
    %c0_4 = arith.constant 0 : index
    %c0_5 = arith.constant 0 : index
    %7 = vector.load %arg2[%c0_3, %c0_4, %c0_5] : memref<1x1x128xf32, #tpu.memory_space<vmem>>, vector<1x1x128xf32>
    %8 = vector.shape_cast %7 : vector<1x1x128xf32> to vector<1x128xf32>
    %9 = vector.shape_cast %6 : vector<1x128xf32> to vector<1x1x128xf32>
    tpu.vector_store %arg2[%c0_3, %c0_4, %c0_5], %9 {strides = array<i32>} : memref<1x1x128xf32, #tpu.memory_space<vmem>>, vector<1x1x128xf32>,
    return
  }
  func.func @transform_0(%arg0: i32) -> (i32, i32, i32) {
    %c0_i32 = arith.constant 0 : i32
    %c0_i32_0 = arith.constant 0 : i32
    %c0_i32_1 = arith.constant 0 : i32
    return %arg0, %c0_i32, %c0_i32_0 : i32, i32, i32
  }
  func.func @transform_1(%arg0: i32) -> (i32, i32, i32) {
    %c0_i32 = arith.constant 0 : i32
    %c0_i32_0 = arith.constant 0 : i32
    %c0_i32_1 = arith.constant 0 : i32
    return %arg0, %c0_i32, %c0_i32_0 : i32, i32, i32
  }
}

</mosaic_0001>

<bundles_post_ra>
// kernel: resnet_base_embed.11
= control target key start
LH: loop header
LB: loop body
LE: loop exit
PB: predicated region body
PF: predicated region fallthrough
CT: control target
= control target key end

     0   :  { %s2087_s18 = smov 0   ;;  %s2089_s19 = smov 0   ;;  %s2477_s0 = inlined_call_operand.vmem [shape: bf16[2,2,2,9,9,128], index: 0, kind: input, shape index: {}]   ;;  %s2478_s1 = inlined_call_operand.vmem [shape: bf16[3,3,128,128], index: 1, kind: input, shape index: {}]   ;;  %s2479_s2 = inlined_call_operand.vmem [shape: f32[1,128], index: 2, kind: input, shape index: {}]   ;;  %s2480_s3 = inlined_call_operand.vmem [shape: f32[1,128], index: 3, kind: input, shape index: {}]   ;;  %s2481_s4 = inlined_call_operand.vmem [shape: f32[1,128], index: 4, kind: input, shape index: {}]   ;;  %s2482_s5 = inlined_call_operand.vmem [shape: bf16[2,8,8,128], index: 5, kind: output, shape index: {}]  }
   0x1   :  { %s2091_s20 = smov 0   ;;  %s2093_s21 = smov 0  }
   0x2   :  { %s2095_s22 = smov 0  }
   0x3 LB: > { %s24_s23 = sadd.s32 1, %s2045_s20  ;;  %s27_s24 = sadd.s32 1, %s2049_s21  ;;  %s2053_s22 = sphi %s2095_s22, %s15_s22   ;;  %s2049_s21 = sphi %s2093_s21, %s2486_s21   ;;  %s2045_s20 = sphi %s2091_s20, %s2485_s20   ;;  %s2041_s19 = sphi %s2089_s19, %s2484_s19   ;;  %s2037_s18 = sphi %s2087_s18, %s2483_s18  }
   0x4   : > { %p25_p0 = scmp.ge.s32.totalorder %s24_s23, 8  ;;  %p1399_p1 = scmp.ge.s32.totalorder %s2053_s22, 1 }
   0x5   : > { %p201_p2 = scmp.lt.s32.totalorder %s2053_s22, 17 }
   0x6   : > { %s2488_s23 = smov (%p25_p0, %s24_s23), 0  ;;  %s2490_s24 = smov (!%p25_p0, %s27_s24), %s2049_s21 }
   0x7   : > { %p202_p3 = pnand %p1399_p1, %p201_p2  ;;  %p29_p4 = scmp.ge.s32.totalorder %s2490_s24, 2 }
   0x8   : > { %v1940_v0 = vld [vmem:[%s2478_s1 + $0x40] sm:$0xff] (!%p202_p3)   ;;  %v2055_v1 = vmov (!%p202_p3), 0.0   ;;  %v1942_v3 = vld [vmem:[%s2478_s1 + $0x48] sm:$0xff] (!%p202_p3)   ;;  %vm2056_vm0 = vmmov (!%p202_p3), 0   ;;  %v1944_v5 = vld [vmem:[%s2478_s1 + $0x50] sm:$0xff] (!%p202_p3)   ;;  %p232_p5 = scmp.lt.s32.totalorder (!%p202_p3), %s2041_s19, 1 }
   0x9   : > { %s2492_s24 = smov (%p29_p4, %s2490_s24), 0  ;;  %205 = sbr.rel (%p202_p3) target bundleno = 395 (0x18b), region = 40 }
   0xa   : > { %1717 = vmatprep.subr.bf16.mxu0 (!%p202_p3), %v2055_v1  ;;  %1737 = vmatprep.subr.bf16.mxu1 (!%p202_p3), %v2055_v1  ;;  %v1941_v2 = vld [vmem:[%s2478_s1] sm:$0xff] (!%p202_p3)   ;;  %v1943_v4 = vld [vmem:[%s2478_s1 + $0x8] sm:$0xff] (!%p202_p3)   ;;  %v1945_v6 = vld [vmem:[%s2478_s1 + $0x10] sm:$0xff] (!%p202_p3)   ;;  %s1631_s12 = sshll.u32 (!%p202_p3), %s2037_s18, 3  ;;  %p239_p6 = scmp.lt.s32.totalorder (!%p202_p3), %s2037_s18, 7 }
   0xb   : > { %1718 = vmatpush3.bf16.msra.mxu0 (!%p202_p3), %v1940_v0  ;;  %1733 = vmatprep.mubr.msk.bf16.mxu0 (!%p202_p3), %vm2056_vm0, %v2055_v1  ;;  %v1946_v7 = vld [vmem:[%s2478_s1 + $0x58] sm:$0xff] (!%p202_p3)   ;;  %v1948_v9 = vld [vmem:[%s2478_s1 + $0x60] sm:$0xff] (!%p202_p3)   ;;  %v1950_v11 = vld [vmem:[%s2478_s1 + $0x68] sm:$0xff] (!%p202_p3)  }
   0xc   : > { %1738 = vmatpush3.bf16.msra.mxu1 (!%p202_p3), %v1941_v2  ;;  %1719 = vmatprep.subr.bf16.mxu0 (!%p202_p3), %v2055_v1  ;;  %v1947_v8 = vld [vmem:[%s2478_s1 + $0x18] sm:$0xff] (!%p202_p3)   ;;  %v1949_v10 = vld [vmem:[%s2478_s1 + $0x20] sm:$0xff] (!%p202_p3)   ;;  %v1951_v12 = vld [vmem:[%s2478_s1 + $0x28] sm:$0xff] (!%p202_p3)  }
   0xd   : > { %1739 = vmatprep.subr.bf16.mxu1 (!%p202_p3), %v2055_v1  ;;  %1753 = vmatprep.mubr.msk.bf16.mxu1 (!%p202_p3), %vm2056_vm0, %v2055_v1  ;;  %v1952_v13 = vld [vmem:[%s2478_s1 + $0x70] sm:$0xff] (!%p202_p3)   ;;  %v1954_v15 = vld [vmem:[%s2478_s1 + $0x78] sm:$0xff] (!%p202_p3)   ;;  %v1956_v19 = vld [vmem:[%s2478_s1 + $0x80] sm:$0xff] (!%p202_p3)  }
   0xe   : > { %v1953_v14 = vld [vmem:[%s2478_s1 + $0x30] sm:$0xff] (!%p202_p3)   ;;  %v1955_v16 = vld [vmem:[%s2478_s1 + $0x38] sm:$0xff] (!%p202_p3)   ;;  %v1957_v20 = vld [vmem:[%s2478_s1 + $0xc0] sm:$0xff] (!%p202_p3)  }
   0xf   : > { %1720 = vmatpush3.bf16.msra.mxu0 (!%p202_p3), %v1942_v3  ;;  %v1958_v21 = vld [vmem:[%s2478_s1 + $0x88] sm:$0xff] (!%p202_p3)   ;;  %v1960_v23 = vld [vmem:[%s2478_s1 + $0x90] sm:$0xff] (!%p202_p3)   ;;  %v1962_v25 = vld [vmem:[%s2478_s1 + $0x98] sm:$0xff] (!%p202_p3)  }
  0x10   : > { %1740 = vmatpush3.bf16.msra.mxu1 %v1943_v4  ;;  %1721 = vmatprep.subr.bf16.mxu0 %v2055_v1  ;;  %s2494_s19 = smov (!%p232_p5, %s2041_s19), 1  ;;  %v1959_v22 = vld [vmem:[%s2478_s1 + $0xc8] sm:$0xff]   ;;  %v1961_v24 = vld [vmem:[%s2478_s1 + $0xd0] sm:$0xff]   ;;  %v1963_v26 = vld [vmem:[%s2478_s1 + $0xd8] sm:$0xff]   ;;  %s2496_s18 = smov (!%p239_p6, %s2037_s18), 7 }
  0x11   : > { %1741 = vmatprep.subr.bf16.mxu1 %v2055_v1  ;;  %s1897_s29 = smul.u32 288, %s2494_s19  ;;  %v1964_v27 = vld [vmem:[%s2478_s1 + $0xa0] sm:$0xff]   ;;  %v1966_v30 = vld [vmem:[%s2478_s1 + $0xa8] sm:$0xff]   ;;  %v1968_v33 = vld [vmem:[%s2478_s1 + $0xb0] sm:$0xff]   ;;  %s1401_s13 = sshll.u32 %s2494_s19, 3 }
  0x12   : > { %v1965_v28 = vld [vmem:[%s2478_s1 + $0xe0] sm:$0xff]   ;;  %v1967_v31 = vld [vmem:[%s2478_s1 + $0xe8] sm:$0xff]   ;;  %v1969_v34 = vld [vmem:[%s2478_s1 + $0xf0] sm:$0xff]   ;;  %s242_s17 = sadd.s32 %s1401_s13, %s2496_s18 }
  0x13   : > { %1722 = vmatpush3.bf16.msra.mxu0 %v1944_v5  ;;  %s236_s11 = scalar_lea.vmem %s2477_s0, %s1897_s29  ;;  %v1970_v37 = vld [vmem:[%s2478_s1 + $0xb8] sm:$0xff]   ;;  %v1973_v40 = vld [vmem:[%s2478_s1 + $0x100] sm:$0xff]   ;;  %v1975_v43 = vld [vmem:[%s2478_s1 + $0x108] sm:$0xff]   ;;  %s1402_s27 = sshll.u32 %s242_s17, 2 }
  0x14   : > { %1742 = vmatpush3.bf16.msra.mxu1 %v1945_v6  ;;  %1723 = vmatprep.subr.bf16.mxu0 %v2055_v1  ;;  %s2190_s15 = scalar_lea.vmem %s236_s11, %s1631_s12  ;;  %v1971_v38 = vld [vmem:[%s2478_s1 + $0xf8] sm:$0xff]   ;;  %v1974_v42 = vld [vmem:[%s2478_s1 + $0x140] sm:$0xff]   ;;  %v1976_v44 = vld [vmem:[%s2478_s1 + $0x148] sm:$0xff]   ;;  %s244_s29 = scalar_lea.vmem %s2482_s5, %s1402_s27 }
  0x15   : > { %1743 = vmatprep.subr.bf16.mxu1 %v2055_v1  ;;  %v1407_v17 = vld [vmem:[%s2190_s15 + $0x48] sm:$0xf]  ;;  %v249_v18 = vld [vmem:[%s2190_s15] sm:$0xf]  ;;  %v1467_v41 = vld [vmem:[%s2190_s15 + $0x90] sm:$0xf] }
  0x16   : > { %v1972_v29 = vld [vmem:[%s2190_s15] sm:$0x1f]   ;;  %v1977_v45 = vld [vmem:[%s2478_s1 + $0x110] sm:$0xff]   ;;  %v1979_v47 = vld [vmem:[%s2478_s1 + $0x118] sm:$0xff]  }
  0x17   : > { %1724 = vmatpush3.bf16.msra.mxu0 %v1946_v7  ;;  %v490_v32 = vshll.u32 %v1972_v29, 16  ;;  %v488_v35 = vshrl.u32 %v1972_v29, 16  ;;  %v1978_v46 = vld [vmem:[%s2478_s1 + $0x150] sm:$0xff]   ;;  %v1980_v48 = vld [vmem:[%s2478_s1 + $0x158] sm:$0xff]   ;;  %v1981_v49 = vld [vmem:[%s2478_s1 + $0x120] sm:$0xff]  }
  0x18   : > { %1744 = vmatpush3.bf16.msra.mxu1 %v1947_v8  ;;  %1725 = vmatprep.subr.bf16.mxu0 %v2055_v1  ;;  %v1982_v50 = vld [vmem:[%s2478_s1 + $0x160] sm:$0xff]   ;;  %v1983_v51 = vld [vmem:[%s2478_s1 + $0x128] sm:$0xff]   ;;  %v1990_v52 = vld [vmem:[%s2190_s15 + $0x90] sm:$0x1f]  }
  0x19   : > { %1745 = vmatprep.subr.bf16.mxu1 %v2055_v1  ;;  %v492_v36 = vrot.slane %v490_v32, 1  ;;  %v1984_v53 = vld [vmem:[%s2478_s1 + $0x168] sm:$0xff]   ;;  %v1985_v54 = vld [vmem:[%s2478_s1 + $0x130] sm:$0xff]   ;;  %v831_v55 = vshll.u32 %v1990_v52, 16  ;;  %v1987_v57 = vld [vmem:[%s2478_s1 + $0x138] sm:$0xff]   ;;  %v829_v58 = vshrl.u32 %v1990_v52, 16 }
  0x1a   : > { %v1986_v56 = vld [vmem:[%s2478_s1 + $0x170] sm:$0xff]   ;;  %v1988_v60 = vld [vmem:[%s2478_s1 + $0x178] sm:$0xff]   ;;  %v1989_v62 = vld [vmem:[%s2478_s1 + $0x180] sm:$0xff]  }
  0x1b   : > { %1726 = vmatpush3.bf16.msra.mxu0 %v1948_v9  ;;  %v493_v39 = vor.u32 %v492_v36, %v488_v35  ;;  %v833_v59 = vrot.slane %v831_v55, 1  ;;  %v1494_v61 = vld [vmem:[%s2190_s15 + $0xd8] sm:$0xf]  ;;  %v1991_v0 = vld [vmem:[%s2478_s1 + $0x1c0] sm:$0xff]   ;;  %v1992_v2 = vld [vmem:[%s2478_s1 + $0x188] sm:$0xff]  }
  0x1c   : > { %1746 = vmatpush3.bf16.msra.mxu1 %v1949_v10  ;;  %1727 = vmatprep.subr.bf16.mxu0 %v2055_v1  ;;  %v1993_v3 = vld [vmem:[%s2478_s1 + $0x1c8] sm:$0xff]   ;;  %v1994_v4 = vld [vmem:[%s2478_s1 + $0x190] sm:$0xff]   ;;  %v1996_v6 = vld [vmem:[%s2478_s1 + $0x198] sm:$0xff]  }
  0x1d   : > { %1747 = vmatprep.subr.bf16.mxu1 %v2055_v1  ;;  %v834_v63 = vor.u32 %v833_v59, %v829_v58  ;;  %v1995_v5 = vld [vmem:[%s2478_s1 + $0x1d0] sm:$0xff]   ;;  %v1997_v7 = vld [vmem:[%s2478_s1 + $0x1d8] sm:$0xff]   ;;  %v1998_v8 = vld [vmem:[%s2478_s1 + $0x1a0] sm:$0xff]  }
  0x1e   : > { %v1999_v9 = vld [vmem:[%s2478_s1 + $0x1e0] sm:$0xff]   ;;  %v2000_v10 = vld [vmem:[%s2478_s1 + $0x1a8] sm:$0xff]   ;;  %v2013_v29 = vld [vmem:[%s2478_s1 + $0x238] sm:$0xff]  }
  0x1f   : > { %1728 = vmatpush3.bf16.msra.mxu0 %v1950_v11  ;;  %v2001_v11 = vld [vmem:[%s2478_s1 + $0x1e8] sm:$0xff]  }
  0x20   : > { %1748 = vmatpush3.bf16.msra.mxu1 %v1951_v12  ;;  %1729 = vmatprep.subr.bf16.mxu0 %v2055_v1  ;;  %v2002_v12 = vld [vmem:[%s2478_s1 + $0x1b0] sm:$0xff]  }
  0x21   : > { %1749 = vmatprep.subr.bf16.mxu1 %v2055_v1 }
  0x23   : > { %1730 = vmatpush3.bf16.msra.mxu0 %v1952_v13  ;;  %v2003_v13 = vld [vmem:[%s2478_s1 + $0x1f0] sm:$0xff]  }
  0x24   : > { %1750 = vmatpush3.bf16.msra.mxu1 %v1953_v14  ;;  %1731 = vmatprep.subr.bf16.mxu0 %v2055_v1  ;;  %v2004_v14 = vld [vmem:[%s2478_s1 + $0x1b8] sm:$0xff]  }
  0x25   : > { %1751 = vmatprep.subr.bf16.mxu1 %v2055_v1 }
  0x27   : > { %1732 = vmatpush3.bf16.msra.mxu0 %v1954_v15  ;;  %v2005_v15 = vld [vmem:[%s2478_s1 + $0x1f8] sm:$0xff]  }
  0x28   : > { %1752 = vmatpush3.bf16.msra.mxu1 %v1955_v16  ;;  %1757 = vmatprep.subr.bf16.mxu0 %v2055_v1  ;;  %v1547_v16 = vld [vmem:[%s2190_s15 + $0x8] sm:$0xf] }
  0x29   : > { %1777 = vmatprep.subr.bf16.mxu1 %v2055_v1 }
  0x2a   : > { %1734 = vmatmul.mubr.bf16.vlgmr.msra.gmra.mrb[0].mxu0 %v1407_v17  ;;  %v2006_v17 = vld [vmem:[%s2478_s1 + $0x200] sm:$0xff]  }
  0x2b   : > { %1754 = vmatmul.mubr.bf16.vlgmr.msra.gmra.mrb[0].mxu1 %v249_v18  ;;  %1758 = vmatpush3.bf16.msra.mxu0 %v1956_v19  ;;  %v1574_v18 = vld [vmem:[%s2190_s15 + $0x50] sm:$0xf]  ;;  %v2007_v19 = vld [vmem:[%s2478_s1 + $0x208] sm:$0xff]  }
  0x2c   : > { %1778 = vmatpush3.bf16.msra.mxu1 %v1957_v20  ;;  %1759 = vmatprep.subr.bf16.mxu0 %v2055_v1  ;;  %v2008_v20 = vld [vmem:[%s2478_s1 + $0x210] sm:$0xff]  }
  0x2d   : > { %1779 = vmatprep.subr.bf16.mxu1 %v2055_v1  ;;  %1773 = vmatprep.mubr.msk.bf16.mxu0 %vm2056_vm0, %v2055_v1 }
  0x2e   : > { %1793 = vmatprep.mubr.msk.bf16.mxu1 %vm2056_vm0, %v2055_v1 }
  0x2f   : > { %1760 = vmatpush3.bf16.msra.mxu0 %v1958_v21  ;;  %v2009_v21 = vld [vmem:[%s2478_s1 + $0x218] sm:$0xff]  }
  0x30   : > { %1780 = vmatpush3.bf16.msra.mxu1 %v1959_v22  ;;  %1761 = vmatprep.subr.bf16.mxu0 %v2055_v1  ;;  %v2010_v22 = vld [vmem:[%s2478_s1 + $0x220] sm:$0xff]  }
  0x31   : > { %1781 = vmatprep.subr.bf16.mxu1 %v2055_v1 }
  0x33   : > { %1762 = vmatpush3.bf16.msra.mxu0 %v1960_v23  ;;  %v2014_v23 = vld [vmem:[%s2190_s15 + $0x8] sm:$0x1f]  }
  0x34   : > { %1782 = vmatpush3.bf16.msra.mxu1 %v1961_v24  ;;  %1763 = vmatprep.subr.bf16.mxu0 %v2055_v1  ;;  %v2011_v24 = vld [vmem:[%s2478_s1 + $0x228] sm:$0xff]  }
  0x35   : > { %1783 = vmatprep.subr.bf16.mxu1 %v2055_v1 }
  0x37   : > { %1764 = vmatpush3.bf16.msra.mxu0 %v1962_v25  ;;  %v1173_v25 = vshll.u32 %v2014_v23, 16 }
  0x38   : > { %1784 = vmatpush3.bf16.msra.mxu1 %v1963_v26  ;;  %1765 = vmatprep.subr.bf16.mxu0 %v2055_v1  ;;  %v2012_v26 = vld [vmem:[%s2478_s1 + $0x230] sm:$0xff]  }
  0x39   : > { %1785 = vmatprep.subr.bf16.mxu1 %v2055_v1 }
  0x3b   : > { %1766 = vmatpush3.bf16.msra.mxu0 %v1964_v27  ;;  %v1171_v27 = vshrl.u32 %v2014_v23, 16 }
  0x3c   : > { %1786 = vmatpush3.bf16.msra.mxu1 %v1965_v28  ;;  %1767 = vmatprep.subr.bf16.mxu0 %v2055_v1  ;;  %v1175_v28 = vrot.slane %v1173_v25, 1 }
  0x3d   : > { %1787 = vmatprep.subr.bf16.mxu1 %v2055_v1 }
  0x3f   : > { %1768 = vmatpush3.bf16.msra.mxu0 %v1966_v30  ;;  %v1176_v30 = vor.u32 %v1175_v28, %v1171_v27 }
  0x40   : > { %1788 = vmatpush3.bf16.msra.mxu1 %v1967_v31  ;;  %1769 = vmatprep.subr.bf16.mxu0 %v2055_v1 }
  0x41   : > { %1789 = vmatprep.subr.bf16.mxu1 %v2055_v1 }
  0x43   : > { %1770 = vmatpush3.bf16.msra.mxu0 %v1968_v33 }
  0x44   : > { %1790 = vmatpush3.bf16.msra.mxu1 %v1969_v34  ;;  %1771 = vmatprep.subr.bf16.mxu0 %v2055_v1 }
  0x45   : > { %1791 = vmatprep.subr.bf16.mxu1 %v2055_v1 }
  0x47   : > { %1772 = vmatpush3.bf16.msra.mxu0 %v1970_v37 }
  0x48   : > { %1792 = vmatpush3.bf16.msra.mxu1 %v1971_v38  ;;  %1797 = vmatprep.subr.bf16.mxu0 %v2055_v1 }
  0x49   : > { %1817 = vmatprep.subr.bf16.mxu1 %v2055_v1 }
  0x4a   : > { %1774 = vmatmul.mubr.bf16.vlgmr.msra.gmra.mrb[4].mxu0 %v493_v39 }
  0x4b   : > { %1798 = vmatpush3.bf16.msra.mxu0 %v1973_v40  ;;  %1794 = vmatmul.mubr.bf16.vlgmr.msra.gmra.mrb[4].mxu1 %v1467_v41 }
  0x4c   : > { %1818 = vmatpush3.bf16.msra.mxu1 %v1974_v42  ;;  %1799 = vmatprep.subr.bf16.mxu0 %v2055_v1 }
  0x4d   : > { %1819 = vmatprep.subr.bf16.mxu1 %v2055_v1  ;;  %1813 = vmatprep.mubr.msk.bf16.mxu0 %vm2056_vm0, %v2055_v1 }
  0x4e   : > { %1833 = vmatprep.mubr.msk.bf16.mxu1 %vm2056_vm0, %v2055_v1 }
  0x4f   : > { %1800 = vmatpush3.bf16.msra.mxu0 %v1975_v43 }
  0x50   : > { %1820 = vmatpush3.bf16.msra.mxu1 %v1976_v44  ;;  %1801 = vmatprep.subr.bf16.mxu0 %v2055_v1 }
  0x51   : > { %1821 = vmatprep.subr.bf16.mxu1 %v2055_v1 }
  0x53   : > { %1802 = vmatpush3.bf16.msra.mxu0 %v1977_v45 }
  0x54   : > { %1822 = vmatpush3.bf16.msra.mxu1 %v1978_v46  ;;  %1803 = vmatprep.subr.bf16.mxu0 %v2055_v1 }
  0x55   : > { %1823 = vmatprep.subr.bf16.mxu1 %v2055_v1 }
  0x57   : > { %1804 = vmatpush3.bf16.msra.mxu0 %v1979_v47 }
  0x58   : > { %1824 = vmatpush3.bf16.msra.mxu1 %v1980_v48  ;;  %1805 = vmatprep.subr.bf16.mxu0 %v2055_v1 }
  0x59   : > { %1825 = vmatprep.subr.bf16.mxu1 %v2055_v1 }
  0x5b   : > { %1806 = vmatpush3.bf16.msra.mxu0 %v1981_v49 }
  0x5c   : > { %1826 = vmatpush3.bf16.msra.mxu1 %v1982_v50  ;;  %1807 = vmatprep.subr.bf16.mxu0 %v2055_v1 }
  0x5d   : > { %1827 = vmatprep.subr.bf16.mxu1 %v2055_v1 }
  0x5f   : > { %1808 = vmatpush3.bf16.msra.mxu0 %v1983_v51 }
  0x60   : > { %1828 = vmatpush3.bf16.msra.mxu1 %v1984_v53  ;;  %1809 = vmatprep.subr.bf16.mxu0 %v2055_v1 }
  0x61   : > { %1829 = vmatprep.subr.bf16.mxu1 %v2055_v1 }
  0x63   : > { %1810 = vmatpush3.bf16.msra.mxu0 %v1985_v54 }
  0x64   : > { %1830 = vmatpush3.bf16.msra.mxu1 %v1986_v56  ;;  %1811 = vmatprep.subr.bf16.mxu0 %v2055_v1 }
  0x65   : > { %1831 = vmatprep.subr.bf16.mxu1 %v2055_v1 }
  0x67   : > { %1812 = vmatpush3.bf16.msra.mxu0 %v1987_v57 }
  0x68   : > { %1832 = vmatpush3.bf16.msra.mxu1 %v1988_v60  ;;  %1837 = vmatprep.subr.bf16.mxu0 %v2055_v1 }
  0x69   : > { %1857 = vmatprep.subr.bf16.mxu1 %v2055_v1 }
  0x6a   : > { %1814 = vmatmul.mubr.bf16.vlgmr.msra.gmra.mrb[8].mxu0 %v1494_v61 }
  0x6b   : > { %1838 = vmatpush3.bf16.msra.mxu0 %v1989_v62  ;;  %1834 = vmatmul.mubr.bf16.vlgmr.msra.gmra.mrb[8].mxu1 %v834_v63 }
  0x6c   : > { %1858 = vmatpush3.bf16.msra.mxu1 %v1991_v0  ;;  %1839 = vmatprep.subr.bf16.mxu0 %v2055_v1 }
  0x6d   : > { %1859 = vmatprep.subr.bf16.mxu1 %v2055_v1  ;;  %1853 = vmatprep.mubr.msk.bf16.mxu0 %vm2056_vm0, %v2055_v1 }
  0x6e   : > { %1873 = vmatprep.mubr.msk.bf16.mxu1 %vm2056_vm0, %v2055_v1 }
  0x6f   : > { %1840 = vmatpush3.bf16.msra.mxu0 %v1992_v2 }
  0x70   : > { %1860 = vmatpush3.bf16.msra.mxu1 %v1993_v3  ;;  %1841 = vmatprep.subr.bf16.mxu0 %v2055_v1 }
  0x71   : > { %1861 = vmatprep.subr.bf16.mxu1 %v2055_v1 }
  0x73   : > { %1842 = vmatpush3.bf16.msra.mxu0 %v1994_v4 }
  0x74   : > { %1862 = vmatpush3.bf16.msra.mxu1 %v1995_v5  ;;  %1843 = vmatprep.subr.bf16.mxu0 %v2055_v1 }
  0x75   : > { %1863 = vmatprep.subr.bf16.mxu1 %v2055_v1 }
  0x77   : > { %1844 = vmatpush3.bf16.msra.mxu0 %v1996_v6 }
  0x78   : > { %1864 = vmatpush3.bf16.msra.mxu1 %v1997_v7  ;;  %1845 = vmatprep.subr.bf16.mxu0 %v2055_v1  ;;  %v1626_v7 = vld [vmem:[%s2479_s2] ss:$0 sm:$0xff] }
  0x79   : > { %1865 = vmatprep.subr.bf16.mxu1 %v2055_v1 }
  0x7b   : > { %1846 = vmatpush3.bf16.msra.mxu0 %v1998_v8 }
  0x7c   : > { %1866 = vmatpush3.bf16.msra.mxu1 %v1999_v9  ;;  %1847 = vmatprep.subr.bf16.mxu0 %v2055_v1 }
  0x7d   : > { %1867 = vmatprep.subr.bf16.mxu1 %v2055_v1 }
  0x7f   : > { %1848 = vmatpush3.bf16.msra.mxu0 %v2000_v10  ;;  %v1627_v10 = vld [vmem:[%s2480_s3] ss:$0 sm:$0xff] }
  0x80   : > { %1868 = vmatpush3.bf16.msra.mxu1 %v2001_v11  ;;  %1849 = vmatprep.subr.bf16.mxu0 %v2055_v1 }
  0x81   : > { %1869 = vmatprep.subr.bf16.mxu1 %v2055_v1 }
  0x83   : > { %1850 = vmatpush3.bf16.msra.mxu0 %v2002_v12 }
  0x84   : > { %1870 = vmatpush3.bf16.msra.mxu1 %v2003_v13  ;;  %1851 = vmatprep.subr.bf16.mxu0 %v2055_v1 }
  0x85   : > { %1871 = vmatprep.subr.bf16.mxu1 %v2055_v1 }
  0x87   : > { %1852 = vmatpush3.bf16.msra.mxu0 %v2004_v14  ;;  %v1628_v14 = vld [vmem:[%s2481_s4] ss:$0 sm:$0xff] }
  0x88   : > { %1872 = vmatpush3.bf16.msra.mxu1 %v2005_v15  ;;  %1877 = vmatprep.subr.bf16.mxu0 %v2055_v1 }
  0x8a   : > { %1854 = vmatmul.mubr.bf16.vlgmr.msra.gmra.mrb[12].mxu0 %v1547_v16 }
  0x8b   : > { %1878 = vmatpush3.bf16.msra.mxu0 %v2006_v17  ;;  %1874 = vmatmul.mubr.bf16.vlgmr.msra.gmra.mrb[12].mxu1 %v1574_v18 }
  0x8c   : > { %1879 = vmatprep.subr.bf16.mxu0 %v2055_v1  ;;  %1893 = vmatprep.mubr.msk.bf16.mxu0 %vm2056_vm0, %v2055_v1 }
  0x8f   : > { %1880 = vmatpush3.bf16.msra.mxu0 %v2007_v19 }
  0x90   : > { %1881 = vmatprep.subr.bf16.mxu0 %v2055_v1 }
  0x93   : > { %1882 = vmatpush3.bf16.msra.mxu0 %v2008_v20 }
  0x94   : > { %1883 = vmatprep.subr.bf16.mxu0 %v2055_v1 }
  0x97   : > { %1884 = vmatpush3.bf16.msra.mxu0 %v2009_v21 }
  0x98   : > { %1885 = vmatprep.subr.bf16.mxu0 %v2055_v1 }
  0x9b   : > { %1886 = vmatpush3.bf16.msra.mxu0 %v2010_v22 }
  0x9c   : > { %1887 = vmatprep.subr.bf16.mxu0 %v2055_v1 }
  0x9f   : > { %1888 = vmatpush3.bf16.msra.mxu0 %v2011_v24 }
  0xa0   : > { %1889 = vmatprep.subr.bf16.mxu0 %v2055_v1 }
  0xa3   : > { %1890 = vmatpush3.bf16.msra.mxu0 %v2012_v26 }
  0xa4   : > { %1891 = vmatprep.subr.bf16.mxu0 %v2055_v1 }
  0xa7   : > { %1892 = vmatpush3.bf16.msra.mxu0 %v2013_v29 }
  0xaa   : > { %1894 = vmatmul.mubr.bf16.vlgmr.msra.gmra.mrb[16].mxu0 %v1176_v30 }
  0xfd   : > { %v369_v31 = vpop.f32.mrb[0].mxu0 }
  0xfe   : > { %v1735_v32 = vpop.f32.mrb[1].mxu0  ;;  %v457_v33 = vpop.f32.mrb[0].mxu1 }
  0xff   : > { %v458_v34 = vadd.f32 %v457_v33, %v369_v31  ;;  %v372_v35 = vpop.f32.mrb[2].mxu0  ;;  %v1755_v36 = vpop.f32.mrb[1].mxu1 }
 0x100   : > { %v1736_v37 = vpop.f32.mrb[3].mxu0  ;;  %v460_v38 = vpop.f32.mrb[2].mxu1 }
 0x101   : > { %v1756_v39 = vpop.f32.mrb[3].mxu1 }
 0x11d   : > { %v577_v40 = vpop.f32.mrb[4].mxu0 }
 0x11e   : > { %v583_v41 = vadd.f32 %v577_v40, %v458_v34  ;;  %v1775_v42 = vpop.f32.mrb[5].mxu0  ;;  %v687_v43 = vpop.f32.mrb[4].mxu1 }
 0x11f   : > { %v580_v44 = vpop.f32.mrb[6].mxu0  ;;  %v1795_v45 = vpop.f32.mrb[5].mxu1 }
 0x120   : > { %v693_v46 = vadd.f32 %v687_v43, %v583_v41  ;;  %v1776_v1 = vpop.f32.mrb[7].mxu0  ;;  %v690_v47 = vpop.f32.mrb[6].mxu1 }
 0x121   : > { %v1796_v48 = vpop.f32.mrb[7].mxu1 }
 0x13d   : > { %v797_v49 = vpop.f32.mrb[8].mxu0 }
 0x13e   : > { %v803_v50 = vadd.f32 %v797_v49, %v693_v46  ;;  %v1815_v51 = vpop.f32.mrb[9].mxu0  ;;  %v918_v52 = vpop.f32.mrb[8].mxu1 }
 0x13f   : > { %v800_v53 = vpop.f32.mrb[10].mxu0  ;;  %v1835_v54 = vpop.f32.mrb[9].mxu1 }
 0x140   : > { %v924_v55 = vadd.f32 %v918_v52, %v803_v50  ;;  %v1816_v56 = vpop.f32.mrb[11].mxu0  ;;  %v921_v57 = vpop.f32.mrb[10].mxu1 }
 0x141   : > { %v1836_v58 = vpop.f32.mrb[11].mxu1 }
 0x15d   : > { %v1029_v59 = vpop.f32.mrb[12].mxu0 }
 0x15e   : > { %v1035_v60 = vadd.f32 %v1029_v59, %v924_v55  ;;  %v1855_v61 = vpop.f32.mrb[13].mxu0  ;;  %v1139_v62 = vpop.f32.mrb[12].mxu1 }
 0x15f   : > { %v1032_v63 = vpop.f32.mrb[14].mxu0  ;;  %v1875_v0 = vpop.f32.mrb[13].mxu1 }
 0x160   : > { %v1145_v2 = vadd.f32 %v1139_v62, %v1035_v60  ;;  %v1856_v3 = vpop.f32.mrb[15].mxu0  ;;  %v1142_v4 = vpop.f32.mrb[14].mxu1 }
 0x161   : > { %v1876_v5 = vpop.f32.mrb[15].mxu1 }
 0x17d   : > { %v1260_v6 = vpop.f32.mrb[16].mxu0 }
 0x17e   : > { %v1266_v8 = vadd.f32 %v1260_v6, %v1145_v2  ;;  %v1895_v9 = vpop.f32.mrb[17].mxu0 }
 0x17f   : > { %v1263_v11 = vpop.f32.mrb[18].mxu0 }
 0x180   : > { %v1274_v12 = vadd.f32 %v1626_v7, %v1266_v8  ;;  %v1896_v13 = vpop.f32.mrb[19].mxu0 }
 0x182   : > { %v1282_v15 = vmul.f32 %v1627_v10, %v1274_v12 }
 0x184   : > { %v1290_v16 = vadd.f32 %v1628_v14, %v1282_v15 }
 0x186   : > { %v1291_v17 = vmax.f32 %v1290_v16, 0.0 }
 0x188   : > { %v1292_v18 = vpack.c.bf16 %v1291_v17, %v1291_v17 }
 0x18a   : > { %1293 = vst [vmem:[%s244_s29] sm:$0xf] %v1292_v18 }
 0x18b PF: > { %s15_s22 = sadd.s32 1, %s2053_s22   ;;  %s2483_s18 = smov %s2045_s20 }
 0x18c   : > { %p12_p7 = scmp.ge.s32.totalorder %s15_s22, 18   ;;  %s2484_s19 = smov %s2049_s21 }
 0x18d   : > { %s2485_s20 = smov %s2488_s23  ;;  %s2486_s21 = smov %s2492_s24 }
 0x18e   :  { %14 = sbr.rel (!%p12_p7) target bundleno = 3 (0x3), region = 84 }

// kernel: resnet_base_embed.12
= control target key start
LH: loop header
LB: loop body
LE: loop exit
PB: predicated region body
PF: predicated region fallthrough
CT: control target
= control target key end

     0   :  { %s2298_s21 = smov 0   ;;  %s2300_s22 = smov 0   ;;  %s2735_s0 = inlined_call_operand.vmem [shape: bf16[2,1,1,10,10,128], index: 0, kind: input, shape index: {}]   ;;  %s2736_s1 = inlined_call_operand.vmem [shape: bf16[3,3,128,128], index: 1, kind: input, shape index: {}]   ;;  %s2737_s2 = inlined_call_operand.vmem [shape: f32[1,128], index: 2, kind: input, shape index: {}]   ;;  %s2738_s3 = inlined_call_operand.vmem [shape: bf16[2,8,8,128], index: 3, kind: input, shape index: {}]   ;;  %s2739_s4 = inlined_call_operand.vmem [shape: bf16[128,128], index: 4, kind: input, shape index: {}]   ;;  %s2740_s5 = inlined_call_operand.vmem [shape: f32[1,128], index: 5, kind: input, shape index: {}]   ;;  %s2741_s6 = inlined_call_operand.vmem [shape: bf16[2,8,8,128], index: 6, kind: output, shape index: {}]  }
   0x1   :  { %s2302_s23 = smov 0   ;;  %s2304_s24 = smov 0  }
   0x2   :  { %s2306_s25 = smov 0  }
   0x3 LB: > { %s25_s26 = sadd.s32 1, %s2251_s23  ;;  %s28_s27 = sadd.s32 1, %s2255_s24  ;;  %s2259_s25 = sphi %s2306_s25, %s16_s25   ;;  %s2255_s24 = sphi %s2304_s24, %s2745_s24   ;;  %s2251_s23 = sphi %s2302_s23, %s2744_s23   ;;  %s2247_s22 = sphi %s2300_s22, %s2743_s22   ;;  %s2243_s21 = sphi %s2298_s21, %s2742_s21  }
   0x4   : > { %p26_p0 = scmp.ge.s32.totalorder %s25_s26, 8  ;;  %p1565_p1 = scmp.ge.s32.totalorder %s2259_s25, 1 }
   0x5   : > { %p241_p2 = scmp.lt.s32.totalorder %s2259_s25, 17 }
   0x6   : > { %s2747_s26 = smov (%p26_p0, %s25_s26), 0  ;;  %s2749_s27 = smov (!%p26_p0, %s28_s27), %s2255_s24 }
   0x7   : > { %p242_p3 = pnand %p1565_p1, %p241_p2  ;;  %p30_p4 = scmp.ge.s32.totalorder %s2749_s27, 2 }
   0x8   : > { %v2135_v0 = vld [vmem:[%s2736_s1 + $0x40] sm:$0xff] (!%p242_p3)   ;;  %v2261_v1 = vmov (!%p242_p3), 0.0   ;;  %v2137_v3 = vld [vmem:[%s2736_s1 + $0x48] sm:$0xff] (!%p242_p3)   ;;  %vm2262_vm0 = vmmov (!%p242_p3), 0   ;;  %p282_p5 = scmp.lt.s32.totalorder (!%p242_p3), %s2247_s22, 1  ;;  %v2139_v5 = vld [vmem:[%s2736_s1 + $0x50] sm:$0xff] (!%p242_p3)  }
   0x9   : > { %s2751_s27 = smov (%p30_p4, %s2749_s27), 0  ;;  %245 = sbr.rel (%p242_p3) target bundleno = 393 (0x189), region = 44 }
   0xa   : > { %1892 = vmatprep.subr.bf16.mxu0 (!%p242_p3), %v2261_v1  ;;  %1912 = vmatprep.subr.bf16.mxu1 (!%p242_p3), %v2261_v1  ;;  %v2136_v2 = vld [vmem:[%s2736_s1] sm:$0xff] (!%p242_p3)   ;;  %v2138_v4 = vld [vmem:[%s2736_s1 + $0x8] sm:$0xff] (!%p242_p3)   ;;  %v2140_v6 = vld [vmem:[%s2736_s1 + $0x10] sm:$0xff] (!%p242_p3)   ;;  %s1801_s29 = sshll.u32 (!%p242_p3), %s2243_s21, 3  ;;  %p289_p6 = scmp.lt.s32.totalorder (!%p242_p3), %s2243_s21, 7 }
   0xb   : > { %1893 = vmatpush3.bf16.msra.mxu0 (!%p242_p3), %v2135_v0  ;;  %1908 = vmatprep.mubr.msk.bf16.mxu0 (!%p242_p3), %vm2262_vm0, %v2261_v1  ;;  %v2141_v7 = vld [vmem:[%s2736_s1 + $0x58] sm:$0xff] (!%p242_p3)   ;;  %v2143_v9 = vld [vmem:[%s2736_s1 + $0x60] sm:$0xff] (!%p242_p3)   ;;  %v2145_v14 = vld [vmem:[%s2736_s1 + $0x68] sm:$0xff] (!%p242_p3)  }
   0xc   : > { %1913 = vmatpush3.bf16.msra.mxu1 (!%p242_p3), %v2136_v2  ;;  %1894 = vmatprep.subr.bf16.mxu0 (!%p242_p3), %v2261_v1  ;;  %v2142_v8 = vld [vmem:[%s2736_s1 + $0x18] sm:$0xff] (!%p242_p3)   ;;  %v2144_v10 = vld [vmem:[%s2736_s1 + $0x20] sm:$0xff] (!%p242_p3)   ;;  %v2146_v15 = vld [vmem:[%s2736_s1 + $0x28] sm:$0xff] (!%p242_p3)  }
   0xd   : > { %1914 = vmatprep.subr.bf16.mxu1 (!%p242_p3), %v2261_v1  ;;  %1928 = vmatprep.mubr.msk.bf16.mxu1 (!%p242_p3), %vm2262_vm0, %v2261_v1  ;;  %v2147_v17 = vld [vmem:[%s2736_s1 + $0x70] sm:$0xff] (!%p242_p3)   ;;  %v2149_v21 = vld [vmem:[%s2736_s1 + $0x78] sm:$0xff] (!%p242_p3)   ;;  %v2152_v24 = vld [vmem:[%s2736_s1 + $0x80] sm:$0xff] (!%p242_p3)  }
   0xe   : > { %v2148_v18 = vld [vmem:[%s2736_s1 + $0x30] sm:$0xff] (!%p242_p3)   ;;  %v2150_v22 = vld [vmem:[%s2736_s1 + $0x38] sm:$0xff] (!%p242_p3)   ;;  %v2153_v25 = vld [vmem:[%s2736_s1 + $0xc0] sm:$0xff] (!%p242_p3)  }
   0xf   : > { %1895 = vmatpush3.bf16.msra.mxu0 (!%p242_p3), %v2137_v3  ;;  %v2154_v26 = vld [vmem:[%s2736_s1 + $0x88] sm:$0xff] (!%p242_p3)   ;;  %v2156_v28 = vld [vmem:[%s2736_s1 + $0x90] sm:$0xff] (!%p242_p3)   ;;  %v2158_v30 = vld [vmem:[%s2736_s1 + $0x98] sm:$0xff] (!%p242_p3)  }
  0x10   : > { %s2753_s22 = smov (!%p282_p5, %s2247_s22), 1  ;;  %1915 = vmatpush3.bf16.msra.mxu1 %v2138_v4  ;;  %1896 = vmatprep.subr.bf16.mxu0 %v2261_v1  ;;  %v2155_v27 = vld [vmem:[%s2736_s1 + $0xc8] sm:$0xff]   ;;  %v2157_v29 = vld [vmem:[%s2736_s1 + $0xd0] sm:$0xff]   ;;  %v2159_v31 = vld [vmem:[%s2736_s1 + $0xd8] sm:$0xff]   ;;  %s2755_s21 = smov (!%p289_p6, %s2243_s21), 7 }
  0x11   : > { %s2092_s14 = smul.u32 80, %s2753_s22  ;;  %1916 = vmatprep.subr.bf16.mxu1 %v2261_v1  ;;  %v2160_v32 = vld [vmem:[%s2736_s1 + $0xa0] sm:$0xff]   ;;  %v2162_v34 = vld [vmem:[%s2736_s1 + $0xa8] sm:$0xff]   ;;  %v2164_v36 = vld [vmem:[%s2736_s1 + $0xb0] sm:$0xff]   ;;  %s1567_s17 = sshll.u32 %s2753_s22, 3 }
  0x12   : > { %v2161_v33 = vld [vmem:[%s2736_s1 + $0xe0] sm:$0xff]   ;;  %v2163_v35 = vld [vmem:[%s2736_s1 + $0xe8] sm:$0xff]   ;;  %v2165_v37 = vld [vmem:[%s2736_s1 + $0xf0] sm:$0xff]   ;;  %s2687_s20 = sadd.s32 %s1567_s17, %s2755_s21 }
  0x13   : > { %1897 = vmatpush3.bf16.msra.mxu0 %v2139_v5  ;;  %s286_s28 = scalar_lea.vmem %s2735_s0, %s2092_s14  ;;  %v2166_v40 = vld [vmem:[%s2736_s1 + $0xb8] sm:$0xff]   ;;  %v2169_v43 = vld [vmem:[%s2736_s1 + $0x100] sm:$0xff]   ;;  %v2171_v46 = vld [vmem:[%s2736_s1 + $0x108] sm:$0xff]   ;;  %s1568_s22 = sshll.u32 %s2687_s20, 2 }
  0x14   : > { %1917 = vmatpush3.bf16.msra.mxu1 %v2140_v6  ;;  %1898 = vmatprep.subr.bf16.mxu0 %v2261_v1  ;;  %s2373_s8 = scalar_lea.vmem %s286_s28, %s1801_s29  ;;  %v2167_v41 = vld [vmem:[%s2736_s1 + $0xf8] sm:$0xff]   ;;  %v2170_v45 = vld [vmem:[%s2736_s1 + $0x140] sm:$0xff]   ;;  %v2172_v47 = vld [vmem:[%s2736_s1 + $0x148] sm:$0xff]   ;;  %s294_s11 = scalar_lea.vmem %s2738_s3, %s1568_s22 }
  0x15   : > { %1918 = vmatprep.subr.bf16.mxu1 %v2261_v1  ;;  %v307_v11 = vld [vmem:[%s2373_s8] sm:$0xf]  ;;  %v2385_v12 = vld [vmem:[%s2373_s8 + $0x4] sm:$0x1]  ;;  %v1632_v44 = vld [vmem:[%s2373_s8 + $0x8] sm:$0xf]  ;;  %s302_s18 = scalar_lea.vmem %s2741_s6, %s1568_s22 }
  0x16   : > { %v1589_v13 = vcombine.low %v307_v11, %v2385_v12  ;;  %v531_v38 = vld [vmem:[%s2373_s8] sm:$0xe]  ;;  %v2173_v48 = vld [vmem:[%s2736_s1 + $0x110] sm:$0xff]   ;;  %v2175_v50 = vld [vmem:[%s2736_s1 + $0x118] sm:$0xff]  }
  0x17   : > { %1899 = vmatpush3.bf16.msra.mxu0 %v2141_v7  ;;  %v1622_v39 = vcombine.low %v531_v38, %v2385_v12  ;;  %v2174_v49 = vld [vmem:[%s2736_s1 + $0x150] sm:$0xff]   ;;  %v2176_v51 = vld [vmem:[%s2736_s1 + $0x158] sm:$0xff]   ;;  %v2177_v52 = vld [vmem:[%s2736_s1 + $0x120] sm:$0xff]  }
  0x18   : > { %1919 = vmatpush3.bf16.msra.mxu1 %v2142_v8  ;;  %1900 = vmatprep.subr.bf16.mxu0 %v2261_v1  ;;  %v350_v16 = vshll.u32 %v1589_v13, 16  ;;  %v348_v19 = vshrl.u32 %v1589_v13, 16  ;;  %v1657_v53 = vld [vmem:[%s2373_s8 + $0x8] sm:$0xf]  ;;  %v1658_v54 = vld [vmem:[%s2373_s8 + $0xc] sm:$0x1] }
  0x19   : > { %1920 = vmatprep.subr.bf16.mxu1 %v2261_v1  ;;  %v552_v42 = vrot.slane %v1622_v39, 1  ;;  %v2178_v55 = vld [vmem:[%s2736_s1 + $0x160] sm:$0xff]   ;;  %v1675_v56 = vcombine.low %v1657_v53, %v1658_v54  ;;  %v2179_v57 = vld [vmem:[%s2736_s1 + $0x128] sm:$0xff]   ;;  %v2181_v60 = vld [vmem:[%s2736_s1 + $0x130] sm:$0xff]  }
  0x1a   : > { %v352_v20 = vrot.slane %v350_v16, 1  ;;  %v2180_v58 = vld [vmem:[%s2736_s1 + $0x168] sm:$0xff]   ;;  %v2182_v61 = vld [vmem:[%s2736_s1 + $0x170] sm:$0xff]   ;;  %v2183_v2 = vld [vmem:[%s2736_s1 + $0x138] sm:$0xff]  }
  0x1b   : > { %1901 = vmatpush3.bf16.msra.mxu0 %v2143_v9  ;;  %v781_v59 = vshll.u32 %v1675_v56, 16  ;;  %v1684_v62 = vld [vmem:[%s2373_s8 + $0x8] sm:$0xe]  ;;  %v779_v63 = vshrl.u32 %v1675_v56, 16  ;;  %v2184_v4 = vld [vmem:[%s2736_s1 + $0x178] sm:$0xff]   ;;  %v2186_v6 = vld [vmem:[%s2736_s1 + $0x180] sm:$0xff]  }
  0x1c   : > { %1921 = vmatpush3.bf16.msra.mxu1 %v2144_v10  ;;  %1902 = vmatprep.subr.bf16.mxu0 %v2261_v1  ;;  %v353_v23 = vor.u32 %v352_v20, %v348_v19  ;;  %v1701_v3 = vcombine.low %v1684_v62, %v1658_v54  ;;  %v2188_v8 = vld [vmem:[%s2736_s1 + $0x1c0] sm:$0xff]   ;;  %v2189_v9 = vld [vmem:[%s2736_s1 + $0x188] sm:$0xff]   ;;  %v2192_v12 = vld [vmem:[%s2736_s1 + $0x1d0] sm:$0xff]  }
  0x1d   : > { %1922 = vmatprep.subr.bf16.mxu1 %v2261_v1  ;;  %v783_v0 = vrot.slane %v781_v59, 1  ;;  %v2190_v10 = vld [vmem:[%s2736_s1 + $0x1c8] sm:$0xff]   ;;  %v2193_v13 = vld [vmem:[%s2736_s1 + $0x198] sm:$0xff]   ;;  %v2196_v16 = vld [vmem:[%s2736_s1 + $0x1e0] sm:$0xff]  }
  0x1e   : > { %v896_v7 = vrot.slane %v1701_v3, 1  ;;  %v2197_v19 = vld [vmem:[%s2736_s1 + $0x1a8] sm:$0xff]   ;;  %v2211_v38 = vld [vmem:[%s2739_s4 + $0x18] sm:$0xff]   ;;  %v2212_v39 = vld [vmem:[%s2736_s1 + $0x220] sm:$0xff]  }
  0x1f   : > { %1903 = vmatpush3.bf16.msra.mxu0 %v2145_v14  ;;  %v784_v5 = vor.u32 %v783_v0, %v779_v63  ;;  %v2194_v14 = vld [vmem:[%s2736_s1 + $0x1d8] sm:$0xff]  }
  0x20   : > { %1923 = vmatpush3.bf16.msra.mxu1 %v2146_v15  ;;  %1904 = vmatprep.subr.bf16.mxu0 %v2261_v1  ;;  %v2195_v15 = vld [vmem:[%s2736_s1 + $0x1a0] sm:$0xff]  }
  0x21   : > { %1924 = vmatprep.subr.bf16.mxu1 %v2261_v1 }
  0x23   : > { %1905 = vmatpush3.bf16.msra.mxu0 %v2147_v17  ;;  %v1736_v17 = vld [vmem:[%s2373_s8 + $0x10] sm:$0xf] }
  0x24   : > { %1925 = vmatpush3.bf16.msra.mxu1 %v2148_v18  ;;  %1906 = vmatprep.subr.bf16.mxu0 %v2261_v1  ;;  %v2599_v18 = vld [vmem:[%s2373_s8 + $0x14] sm:$0x1] }
  0x25   : > { %1926 = vmatprep.subr.bf16.mxu1 %v2261_v1  ;;  %v1754_v20 = vcombine.low %v1736_v17, %v2599_v18 }
  0x27   : > { %1907 = vmatpush3.bf16.msra.mxu0 %v2149_v21  ;;  %v2198_v21 = vld [vmem:[%s2736_s1 + $0x1e8] sm:$0xff]  }
  0x28   : > { %1927 = vmatpush3.bf16.msra.mxu1 %v2150_v22  ;;  %1932 = vmatprep.subr.bf16.mxu0 %v2261_v1  ;;  %v2199_v22 = vld [vmem:[%s2736_s1 + $0x1b0] sm:$0xff]  }
  0x29   : > { %1952 = vmatprep.subr.bf16.mxu1 %v2261_v1 }
  0x2a   : > { %1909 = vmatmul.mubr.bf16.vlgmr.msra.gmra.mrb[0].mxu0 %v353_v23  ;;  %v1125_v23 = vshll.u32 %v1754_v20, 16 }
  0x2b   : > { %1929 = vmatmul.mubr.bf16.vlgmr.msra.gmra.mrb[0].mxu1 %v307_v11  ;;  %1933 = vmatpush3.bf16.msra.mxu0 %v2152_v24  ;;  %v2191_v11 = vld [vmem:[%s2736_s1 + $0x190] sm:$0xff]  }
  0x2c   : > { %1953 = vmatpush3.bf16.msra.mxu1 %v2153_v25  ;;  %1934 = vmatprep.subr.bf16.mxu0 %v2261_v1  ;;  %v2200_v24 = vld [vmem:[%s2736_s1 + $0x1f0] sm:$0xff]   ;;  %v2201_v25 = vld [vmem:[%s2736_s1 + $0x1b8] sm:$0xff]  }
  0x2d   : > { %1954 = vmatprep.subr.bf16.mxu1 %v2261_v1  ;;  %1948 = vmatprep.mubr.msk.bf16.mxu0 %vm2262_vm0, %v2261_v1 }
  0x2e   : > { %1968 = vmatprep.mubr.msk.bf16.mxu1 %vm2262_vm0, %v2261_v1 }
  0x2f   : > { %1935 = vmatpush3.bf16.msra.mxu0 %v2154_v26  ;;  %v1123_v26 = vshrl.u32 %v1754_v20, 16 }
  0x30   : > { %1955 = vmatpush3.bf16.msra.mxu1 %v2155_v27  ;;  %1936 = vmatprep.subr.bf16.mxu0 %v2261_v1  ;;  %v1127_v27 = vrot.slane %v1125_v23, 1 }
  0x31   : > { %1956 = vmatprep.subr.bf16.mxu1 %v2261_v1 }
  0x33   : > { %1937 = vmatpush3.bf16.msra.mxu0 %v2156_v28  ;;  %v2202_v28 = vld [vmem:[%s2736_s1 + $0x1f8] sm:$0xff]  }
  0x34   : > { %1957 = vmatpush3.bf16.msra.mxu1 %v2157_v29  ;;  %1938 = vmatprep.subr.bf16.mxu0 %v2261_v1  ;;  %v1711_v29 = vld [vmem:[%s2373_s8 + $0x10] sm:$0xf] }
  0x35   : > { %1958 = vmatprep.subr.bf16.mxu1 %v2261_v1 }
  0x37   : > { %1939 = vmatpush3.bf16.msra.mxu0 %v2158_v30  ;;  %v2203_v30 = vld [vmem:[%s2736_s1 + $0x200] sm:$0xff]  }
  0x38   : > { %1959 = vmatpush3.bf16.msra.mxu1 %v2159_v31  ;;  %1940 = vmatprep.subr.bf16.mxu0 %v2261_v1  ;;  %v1128_v31 = vor.u32 %v1127_v27, %v1123_v26  ;;  %v1789_v27 = vld [vmem:[%s2737_s2] ss:$0 sm:$0xff] }
  0x39   : > { %1960 = vmatprep.subr.bf16.mxu1 %v2261_v1 }
  0x3b   : > { %1941 = vmatpush3.bf16.msra.mxu0 %v2160_v32  ;;  %v2205_v32 = vld [vmem:[%s2739_s4] sm:$0xff]  }
  0x3c   : > { %1961 = vmatpush3.bf16.msra.mxu1 %v2161_v33  ;;  %1942 = vmatprep.subr.bf16.mxu0 %v2261_v1  ;;  %v2206_v33 = vld [vmem:[%s2736_s1 + $0x208] sm:$0xff]  }
  0x3d   : > { %1962 = vmatprep.subr.bf16.mxu1 %v2261_v1 }
  0x3f   : > { %1943 = vmatpush3.bf16.msra.mxu0 %v2162_v34  ;;  %v2207_v34 = vld [vmem:[%s2739_s4 + $0x8] sm:$0xff]  }
  0x40   : > { %1963 = vmatpush3.bf16.msra.mxu1 %v2163_v35  ;;  %1944 = vmatprep.subr.bf16.mxu0 %v2261_v1  ;;  %v2208_v35 = vld [vmem:[%s2736_s1 + $0x210] sm:$0xff]  }
  0x41   : > { %1964 = vmatprep.subr.bf16.mxu1 %v2261_v1 }
  0x43   : > { %1945 = vmatpush3.bf16.msra.mxu0 %v2164_v36  ;;  %v2209_v36 = vld [vmem:[%s2739_s4 + $0x10] sm:$0xff]  }
  0x44   : > { %1965 = vmatpush3.bf16.msra.mxu1 %v2165_v37  ;;  %1946 = vmatprep.subr.bf16.mxu0 %v2261_v1  ;;  %v2210_v37 = vld [vmem:[%s2736_s1 + $0x218] sm:$0xff]  }
  0x45   : > { %1966 = vmatprep.subr.bf16.mxu1 %v2261_v1 }
  0x47   : > { %1947 = vmatpush3.bf16.msra.mxu0 %v2166_v40  ;;  %v2213_v40 = vld [vmem:[%s2739_s4 + $0x20] sm:$0xff]  }
  0x48   : > { %1967 = vmatpush3.bf16.msra.mxu1 %v2167_v41  ;;  %1972 = vmatprep.subr.bf16.mxu0 %v2261_v1  ;;  %v2214_v41 = vld [vmem:[%s2736_s1 + $0x228] sm:$0xff]  }
  0x49   : > { %1992 = vmatprep.subr.bf16.mxu1 %v2261_v1 }
  0x4a   : > { %1949 = vmatmul.mubr.bf16.vlgmr.msra.gmra.mrb[4].mxu0 %v552_v42  ;;  %v2215_v42 = vld [vmem:[%s2739_s4 + $0x28] sm:$0xff]  }
  0x4b   : > { %1973 = vmatpush3.bf16.msra.mxu0 %v2169_v43  ;;  %1969 = vmatmul.mubr.bf16.vlgmr.msra.gmra.mrb[4].mxu1 %v1632_v44  ;;  %v2216_v43 = vld [vmem:[%s2736_s1 + $0x230] sm:$0xff]  }
  0x4c   : > { %1993 = vmatpush3.bf16.msra.mxu1 %v2170_v45  ;;  %1974 = vmatprep.subr.bf16.mxu0 %v2261_v1  ;;  %v1763_v44 = vld [vmem:[%s2373_s8 + $0x10] sm:$0xe] }
  0x4d   : > { %1994 = vmatprep.subr.bf16.mxu1 %v2261_v1  ;;  %1988 = vmatprep.mubr.msk.bf16.mxu0 %vm2262_vm0, %v2261_v1  ;;  %v2217_v45 = vld [vmem:[%s2739_s4 + $0x30] sm:$0xff]  }
  0x4e   : > { %2008 = vmatprep.mubr.msk.bf16.mxu1 %vm2262_vm0, %v2261_v1 }
  0x4f   : > { %1975 = vmatpush3.bf16.msra.mxu0 %v2171_v46  ;;  %v1780_v46 = vcombine.low %v1763_v44, %v2599_v18 }
  0x50   : > { %1995 = vmatpush3.bf16.msra.mxu1 %v2172_v47  ;;  %1976 = vmatprep.subr.bf16.mxu0 %v2261_v1  ;;  %v2218_v47 = vld [vmem:[%s2736_s1 + $0x238] sm:$0xff]  }
  0x51   : > { %1996 = vmatprep.subr.bf16.mxu1 %v2261_v1 }
  0x53   : > { %1977 = vmatpush3.bf16.msra.mxu0 %v2173_v48  ;;  %v2219_v48 = vld [vmem:[%s2739_s4 + $0x38] sm:$0xff]  }
  0x54   : > { %1997 = vmatpush3.bf16.msra.mxu1 %v2174_v49  ;;  %1978 = vmatprep.subr.bf16.mxu0 %v2261_v1  ;;  %v1240_v49 = vrot.slane %v1780_v46, 1 }
  0x55   : > { %1998 = vmatprep.subr.bf16.mxu1 %v2261_v1 }
  0x57   : > { %1979 = vmatpush3.bf16.msra.mxu0 %v2175_v50  ;;  %v1339_v50 = vld [vmem:[%s294_s11] sm:$0xf] }
  0x58   : > { %1999 = vmatpush3.bf16.msra.mxu1 %v2176_v51  ;;  %1980 = vmatprep.subr.bf16.mxu0 %v2261_v1 }
  0x59   : > { %2000 = vmatprep.subr.bf16.mxu1 %v2261_v1 }
  0x5b   : > { %1981 = vmatpush3.bf16.msra.mxu0 %v2177_v52 }
  0x5c   : > { %2001 = vmatpush3.bf16.msra.mxu1 %v2178_v55  ;;  %1982 = vmatprep.subr.bf16.mxu0 %v2261_v1 }
  0x5d   : > { %2002 = vmatprep.subr.bf16.mxu1 %v2261_v1 }
  0x5f   : > { %1983 = vmatpush3.bf16.msra.mxu0 %v2179_v57 }
  0x60   : > { %2003 = vmatpush3.bf16.msra.mxu1 %v2180_v58  ;;  %1984 = vmatprep.subr.bf16.mxu0 %v2261_v1 }
  0x61   : > { %2004 = vmatprep.subr.bf16.mxu1 %v2261_v1 }
  0x63   : > { %1985 = vmatpush3.bf16.msra.mxu0 %v2181_v60 }
  0x64   : > { %2005 = vmatpush3.bf16.msra.mxu1 %v2182_v61  ;;  %1986 = vmatprep.subr.bf16.mxu0 %v2261_v1 }
  0x65   : > { %2006 = vmatprep.subr.bf16.mxu1 %v2261_v1 }
  0x67   : > { %1987 = vmatpush3.bf16.msra.mxu0 %v2183_v2 }
  0x68   : > { %2007 = vmatpush3.bf16.msra.mxu1 %v2184_v4  ;;  %2012 = vmatprep.subr.bf16.mxu0 %v2261_v1 }
  0x69   : > { %2032 = vmatprep.subr.bf16.mxu1 %v2261_v1 }
  0x6a   : > { %1989 = vmatmul.mubr.bf16.vlgmr.msra.gmra.mrb[8].mxu0 %v784_v5 }
  0x6b   : > { %2013 = vmatpush3.bf16.msra.mxu0 %v2186_v6  ;;  %2009 = vmatmul.mubr.bf16.vlgmr.msra.gmra.mrb[8].mxu1 %v896_v7 }
  0x6c   : > { %2033 = vmatpush3.bf16.msra.mxu1 %v2188_v8  ;;  %2014 = vmatprep.subr.bf16.mxu0 %v2261_v1 }
  0x6d   : > { %2034 = vmatprep.subr.bf16.mxu1 %v2261_v1  ;;  %2028 = vmatprep.mubr.msk.bf16.mxu0 %vm2262_vm0, %v2261_v1 }
  0x6e   : > { %2048 = vmatprep.mubr.msk.bf16.mxu1 %vm2262_vm0, %v2261_v1 }
  0x6f   : > { %2015 = vmatpush3.bf16.msra.mxu0 %v2189_v9 }
  0x70   : > { %2035 = vmatpush3.bf16.msra.mxu1 %v2190_v10  ;;  %2016 = vmatprep.subr.bf16.mxu0 %v2261_v1 }
  0x71   : > { %2036 = vmatprep.subr.bf16.mxu1 %v2261_v1 }
  0x73   : > { %2017 = vmatpush3.bf16.msra.mxu0 %v2191_v11 }
  0x74   : > { %2037 = vmatpush3.bf16.msra.mxu1 %v2192_v12  ;;  %2018 = vmatprep.subr.bf16.mxu0 %v2261_v1 }
  0x75   : > { %2038 = vmatprep.subr.bf16.mxu1 %v2261_v1 }
  0x77   : > { %2019 = vmatpush3.bf16.msra.mxu0 %v2193_v13 }
  0x78   : > { %2039 = vmatpush3.bf16.msra.mxu1 %v2194_v14  ;;  %2020 = vmatprep.subr.bf16.mxu0 %v2261_v1 }
  0x79   : > { %2040 = vmatprep.subr.bf16.mxu1 %v2261_v1 }
  0x7b   : > { %2021 = vmatpush3.bf16.msra.mxu0 %v2195_v15 }
  0x7c   : > { %2041 = vmatpush3.bf16.msra.mxu1 %v2196_v16  ;;  %2022 = vmatprep.subr.bf16.mxu0 %v2261_v1 }
  0x7d   : > { %2042 = vmatprep.subr.bf16.mxu1 %v2261_v1 }
  0x7f   : > { %2023 = vmatpush3.bf16.msra.mxu0 %v2197_v19 }
  0x80   : > { %2043 = vmatpush3.bf16.msra.mxu1 %v2198_v21  ;;  %2024 = vmatprep.subr.bf16.mxu0 %v2261_v1 }
  0x81   : > { %2044 = vmatprep.subr.bf16.mxu1 %v2261_v1 }
  0x83   : > { %2025 = vmatpush3.bf16.msra.mxu0 %v2199_v22 }
  0x84   : > { %2045 = vmatpush3.bf16.msra.mxu1 %v2200_v24  ;;  %2026 = vmatprep.subr.bf16.mxu0 %v2261_v1 }
  0x85   : > { %2046 = vmatprep.subr.bf16.mxu1 %v2261_v1 }
  0x87   : > { %2027 = vmatpush3.bf16.msra.mxu0 %v2201_v25 }
  0x88   : > { %2047 = vmatpush3.bf16.msra.mxu1 %v2202_v28  ;;  %2052 = vmatprep.subr.bf16.mxu0 %v2261_v1 }
  0x89   : > { %2072 = vmatprep.subr.bf16.mxu1 %v2261_v1 }
  0x8a   : > { %2029 = vmatmul.mubr.bf16.vlgmr.msra.gmra.mrb[12].mxu0 %v1711_v29 }
  0x8b   : > { %2053 = vmatpush3.bf16.msra.mxu0 %v2203_v30  ;;  %2049 = vmatmul.mubr.bf16.vlgmr.msra.gmra.mrb[12].mxu1 %v1128_v31 }
  0x8c   : > { %2073 = vmatpush3.bf16.msra.mxu1 %v2205_v32  ;;  %2054 = vmatprep.subr.bf16.mxu0 %v2261_v1 }
  0x8d   : > { %2074 = vmatprep.subr.bf16.mxu1 %v2261_v1  ;;  %2068 = vmatprep.mubr.msk.bf16.mxu0 %vm2262_vm0, %v2261_v1 }
  0x8e   : > { %2088 = vmatprep.mubr.msk.bf16.mxu1 %vm2262_vm0, %v2261_v1 }
  0x8f   : > { %2055 = vmatpush3.bf16.msra.mxu0 %v2206_v33 }
  0x90   : > { %2075 = vmatpush3.bf16.msra.mxu1 %v2207_v34  ;;  %2056 = vmatprep.subr.bf16.mxu0 %v2261_v1 }
  0x91   : > { %2076 = vmatprep.subr.bf16.mxu1 %v2261_v1 }
  0x93   : > { %2057 = vmatpush3.bf16.msra.mxu0 %v2208_v35 }
  0x94   : > { %2077 = vmatpush3.bf16.msra.mxu1 %v2209_v36  ;;  %2058 = vmatprep.subr.bf16.mxu0 %v2261_v1  ;;  %v1798_v36 = vld [vmem:[%s2740_s5] ss:$0 sm:$0xff] }
  0x95   : > { %2078 = vmatprep.subr.bf16.mxu1 %v2261_v1 }
  0x97   : > { %2059 = vmatpush3.bf16.msra.mxu0 %v2210_v37 }
  0x98   : > { %2079 = vmatpush3.bf16.msra.mxu1 %v2211_v38  ;;  %2060 = vmatprep.subr.bf16.mxu0 %v2261_v1 }
  0x99   : > { %2080 = vmatprep.subr.bf16.mxu1 %v2261_v1 }
  0x9b   : > { %2061 = vmatpush3.bf16.msra.mxu0 %v2212_v39 }
  0x9c   : > { %2081 = vmatpush3.bf16.msra.mxu1 %v2213_v40  ;;  %2062 = vmatprep.subr.bf16.mxu0 %v2261_v1 }
  0x9d   : > { %2082 = vmatprep.subr.bf16.mxu1 %v2261_v1 }
  0x9f   : > { %2063 = vmatpush3.bf16.msra.mxu0 %v2214_v41 }
  0xa0   : > { %2083 = vmatpush3.bf16.msra.mxu1 %v2215_v42  ;;  %2064 = vmatprep.subr.bf16.mxu0 %v2261_v1 }
  0xa1   : > { %2084 = vmatprep.subr.bf16.mxu1 %v2261_v1 }
  0xa3   : > { %2065 = vmatpush3.bf16.msra.mxu0 %v2216_v43 }
  0xa4   : > { %2085 = vmatpush3.bf16.msra.mxu1 %v2217_v45  ;;  %2066 = vmatprep.subr.bf16.mxu0 %v2261_v1 }
  0xa5   : > { %2086 = vmatprep.subr.bf16.mxu1 %v2261_v1 }
  0xa7   : > { %2067 = vmatpush3.bf16.msra.mxu0 %v2218_v47 }
  0xa8   : > { %2087 = vmatpush3.bf16.msra.mxu1 %v2219_v48 }
  0xaa   : > { %2069 = vmatmul.mubr.bf16.vlgmr.msra.gmra.mrb[16].mxu0 %v1240_v49 }
  0xab   : > { %2089 = vmatmul.mubr.bf16.vlgmr.msra.gmra.mrb[16].mxu1 %v1339_v50 }
  0xfd   : > { %v437_v51 = vpop.f32.mrb[0].mxu0 }
  0xfe   : > { %v1910_v52 = vpop.f32.mrb[1].mxu0  ;;  %v525_v53 = vpop.f32.mrb[0].mxu1 }
  0xff   : > { %v526_v54 = vadd.f32 %v525_v53, %v437_v51  ;;  %v440_v55 = vpop.f32.mrb[2].mxu0  ;;  %v1930_v56 = vpop.f32.mrb[1].mxu1 }
 0x100   : > { %v1911_v57 = vpop.f32.mrb[3].mxu0  ;;  %v528_v58 = vpop.f32.mrb[2].mxu1 }
 0x101   : > { %v1931_v1 = vpop.f32.mrb[3].mxu1 }
 0x11d   : > { %v636_v59 = vpop.f32.mrb[4].mxu0 }
 0x11e   : > { %v642_v60 = vadd.f32 %v636_v59, %v526_v54  ;;  %v1950_v61 = vpop.f32.mrb[5].mxu0  ;;  %v747_v62 = vpop.f32.mrb[4].mxu1 }
 0x11f   : > { %v639_v63 = vpop.f32.mrb[6].mxu0  ;;  %v1970_v0 = vpop.f32.mrb[5].mxu1 }
 0x120   : > { %v753_v2 = vadd.f32 %v747_v62, %v642_v60  ;;  %v1951_v3 = vpop.f32.mrb[7].mxu0  ;;  %v750_v4 = vpop.f32.mrb[6].mxu1 }
 0x121   : > { %v1971_v5 = vpop.f32.mrb[7].mxu1 }
 0x13d   : > { %v868_v6 = vpop.f32.mrb[8].mxu0 }
 0x13e   : > { %v874_v7 = vadd.f32 %v868_v6, %v753_v2  ;;  %v1990_v8 = vpop.f32.mrb[9].mxu0  ;;  %v980_v9 = vpop.f32.mrb[8].mxu1 }
 0x13f   : > { %v871_v10 = vpop.f32.mrb[10].mxu0  ;;  %v2010_v11 = vpop.f32.mrb[9].mxu1 }
 0x140   : > { %v986_v12 = vadd.f32 %v980_v9, %v874_v7  ;;  %v1991_v13 = vpop.f32.mrb[11].mxu0  ;;  %v983_v14 = vpop.f32.mrb[10].mxu1 }
 0x141   : > { %v2011_v15 = vpop.f32.mrb[11].mxu1 }
 0x15d   : > { %v1091_v16 = vpop.f32.mrb[12].mxu0 }
 0x15e   : > { %v1097_v17 = vadd.f32 %v1091_v16, %v986_v12  ;;  %v2030_v18 = vpop.f32.mrb[13].mxu0  ;;  %v1212_v19 = vpop.f32.mrb[12].mxu1 }
 0x15f   : > { %v1094_v20 = vpop.f32.mrb[14].mxu0  ;;  %v2050_v21 = vpop.f32.mrb[13].mxu1 }
 0x160   : > { %v1218_v22 = vadd.f32 %v1212_v19, %v1097_v17  ;;  %v2031_v23 = vpop.f32.mrb[15].mxu0  ;;  %v1215_v24 = vpop.f32.mrb[14].mxu1 }
 0x161   : > { %v2051_v25 = vpop.f32.mrb[15].mxu1 }
 0x17d   : > { %v1324_v26 = vpop.f32.mrb[16].mxu0 }
 0x17e   : > { %v1330_v28 = vadd.f32 %v1324_v26, %v1218_v22  ;;  %v2070_v29 = vpop.f32.mrb[17].mxu0  ;;  %v1438_v30 = vpop.f32.mrb[16].mxu1 }
 0x17f   : > { %v1327_v31 = vpop.f32.mrb[18].mxu0  ;;  %v2090_v32 = vpop.f32.mrb[17].mxu1 }
 0x180   : > { %v1338_v33 = vadd.f32 %v1789_v27, %v1330_v28  ;;  %v2071_v34 = vpop.f32.mrb[19].mxu0  ;;  %v1441_v35 = vpop.f32.mrb[18].mxu1 }
 0x181   : > { %v2091_v37 = vpop.f32.mrb[19].mxu1 }
 0x182   : > { %v1444_v38 = vadd.f32 %v1438_v30, %v1338_v33 }
 0x184   : > { %v1452_v39 = vadd.f32 %v1798_v36, %v1444_v38 }
 0x186   : > { %v1453_v40 = vpack.c.bf16 %v1452_v39, %v1452_v39 }
 0x188   : > { %1454 = vst [vmem:[%s302_s18] sm:$0xf] %v1453_v40 }
 0x189 PF: > { %s16_s25 = sadd.s32 1, %s2259_s25   ;;  %s2742_s21 = smov %s2251_s23 }
 0x18a   : > { %p13_p7 = scmp.ge.s32.totalorder %s16_s25, 18   ;;  %s2743_s22 = smov %s2255_s24 }
 0x18b   : > { %s2744_s23 = smov %s2747_s26  ;;  %s2745_s24 = smov %s2751_s27 }
 0x18c   :  { %15 = sbr.rel (!%p13_p7) target bundleno = 3 (0x3), region = 88 }

// kernel: resnet_base_embed.13
= control target key start
LH: loop header
LB: loop body
LE: loop exit
PB: predicated region body
PF: predicated region fallthrough
CT: control target
= control target key end

     0   :  { %s2060_s18 = smov 0   ;;  %s2062_s19 = smov 0   ;;  %s2450_s0 = inlined_call_operand.vmem [shape: bf16[2,2,2,5,5,128], index: 0, kind: input, shape index: {}]   ;;  %s2451_s1 = inlined_call_operand.vmem [shape: bf16[3,3,128,128], index: 1, kind: input, shape index: {}]   ;;  %s2452_s2 = inlined_call_operand.vmem [shape: f32[1,128], index: 2, kind: input, shape index: {}]   ;;  %s2453_s3 = inlined_call_operand.vmem [shape: f32[1,128], index: 3, kind: input, shape index: {}]   ;;  %s2454_s4 = inlined_call_operand.vmem [shape: f32[1,128], index: 4, kind: input, shape index: {}]   ;;  %s2455_s5 = inlined_call_operand.vmem [shape: bf16[2,4,4,128], index: 5, kind: output, shape index: {}]  }
   0x1   :  { %s2064_s20 = smov 0   ;;  %s2066_s21 = smov 0  }
   0x2   :  { %s2068_s22 = smov 0  }
   0x3 LB: > { %s24_s23 = sadd.s32 1, %s2018_s20  ;;  %s27_s24 = sadd.s32 1, %s2022_s21  ;;  %s2026_s22 = sphi %s2068_s22, %s15_s22   ;;  %s2022_s21 = sphi %s2066_s21, %s2459_s21   ;;  %s2018_s20 = sphi %s2064_s20, %s2458_s20   ;;  %s2014_s19 = sphi %s2062_s19, %s2457_s19   ;;  %s2010_s18 = sphi %s2060_s18, %s2456_s18  }
   0x4   : > { %p25_p0 = scmp.ge.s32.totalorder %s24_s23, 4  ;;  %p1384_p1 = scmp.ge.s32.totalorder %s2026_s22, 1 }
   0x5   : > { %p201_p2 = scmp.lt.s32.totalorder %s2026_s22, 9 }
   0x6   : > { %s2461_s23 = smov (%p25_p0, %s24_s23), 0  ;;  %s2463_s24 = smov (!%p25_p0, %s27_s24), %s2022_s21 }
   0x7   : > { %p202_p3 = pnand %p1384_p1, %p201_p2  ;;  %p29_p4 = scmp.ge.s32.totalorder %s2463_s24, 2 }
   0x8   : > { %v1913_v0 = vld [vmem:[%s2451_s1 + $0x40] sm:$0xff] (!%p202_p3)   ;;  %v2028_v1 = vmov (!%p202_p3), 0.0   ;;  %v1915_v3 = vld [vmem:[%s2451_s1 + $0x48] sm:$0xff] (!%p202_p3)   ;;  %vm2029_vm0 = vmmov (!%p202_p3), 0   ;;  %v1917_v5 = vld [vmem:[%s2451_s1 + $0x50] sm:$0xff] (!%p202_p3)   ;;  %p232_p5 = scmp.lt.s32.totalorder (!%p202_p3), %s2014_s19, 1 }
   0x9   : > { %s2465_s24 = smov (%p29_p4, %s2463_s24), 0  ;;  %205 = sbr.rel (%p202_p3) target bundleno = 395 (0x18b), region = 40 }
   0xa   : > { %1690 = vmatprep.subr.bf16.mxu0 (!%p202_p3), %v2028_v1  ;;  %1710 = vmatprep.subr.bf16.mxu1 (!%p202_p3), %v2028_v1  ;;  %v1914_v2 = vld [vmem:[%s2451_s1] sm:$0xff] (!%p202_p3)   ;;  %v1916_v4 = vld [vmem:[%s2451_s1 + $0x8] sm:$0xff] (!%p202_p3)   ;;  %v1918_v6 = vld [vmem:[%s2451_s1 + $0x10] sm:$0xff] (!%p202_p3)   ;;  %s1388_s12 = sshll.u32 (!%p202_p3), %s2010_s18, 2  ;;  %p239_p6 = scmp.lt.s32.totalorder (!%p202_p3), %s2010_s18, 3 }
   0xb   : > { %1691 = vmatpush3.bf16.msra.mxu0 (!%p202_p3), %v1913_v0  ;;  %1706 = vmatprep.mubr.msk.bf16.mxu0 (!%p202_p3), %vm2029_vm0, %v2028_v1  ;;  %v1919_v7 = vld [vmem:[%s2451_s1 + $0x58] sm:$0xff] (!%p202_p3)   ;;  %v1921_v9 = vld [vmem:[%s2451_s1 + $0x60] sm:$0xff] (!%p202_p3)   ;;  %v1923_v11 = vld [vmem:[%s2451_s1 + $0x68] sm:$0xff] (!%p202_p3)  }
   0xc   : > { %1711 = vmatpush3.bf16.msra.mxu1 (!%p202_p3), %v1914_v2  ;;  %1692 = vmatprep.subr.bf16.mxu0 (!%p202_p3), %v2028_v1  ;;  %v1920_v8 = vld [vmem:[%s2451_s1 + $0x18] sm:$0xff] (!%p202_p3)   ;;  %v1922_v10 = vld [vmem:[%s2451_s1 + $0x20] sm:$0xff] (!%p202_p3)   ;;  %v1924_v12 = vld [vmem:[%s2451_s1 + $0x28] sm:$0xff] (!%p202_p3)  }
   0xd   : > { %1712 = vmatprep.subr.bf16.mxu1 (!%p202_p3), %v2028_v1  ;;  %1726 = vmatprep.mubr.msk.bf16.mxu1 (!%p202_p3), %vm2029_vm0, %v2028_v1  ;;  %v1925_v13 = vld [vmem:[%s2451_s1 + $0x70] sm:$0xff] (!%p202_p3)   ;;  %v1927_v15 = vld [vmem:[%s2451_s1 + $0x78] sm:$0xff] (!%p202_p3)   ;;  %v1929_v19 = vld [vmem:[%s2451_s1 + $0x80] sm:$0xff] (!%p202_p3)  }
   0xe   : > { %v1926_v14 = vld [vmem:[%s2451_s1 + $0x30] sm:$0xff] (!%p202_p3)   ;;  %v1928_v16 = vld [vmem:[%s2451_s1 + $0x38] sm:$0xff] (!%p202_p3)   ;;  %v1930_v20 = vld [vmem:[%s2451_s1 + $0xc0] sm:$0xff] (!%p202_p3)  }
   0xf   : > { %1693 = vmatpush3.bf16.msra.mxu0 (!%p202_p3), %v1915_v3  ;;  %v1931_v21 = vld [vmem:[%s2451_s1 + $0x88] sm:$0xff] (!%p202_p3)   ;;  %v1933_v23 = vld [vmem:[%s2451_s1 + $0x90] sm:$0xff] (!%p202_p3)   ;;  %v1935_v25 = vld [vmem:[%s2451_s1 + $0x98] sm:$0xff] (!%p202_p3)  }
  0x10   : > { %1713 = vmatpush3.bf16.msra.mxu1 %v1916_v4  ;;  %1694 = vmatprep.subr.bf16.mxu0 %v2028_v1  ;;  %s2467_s19 = smov (!%p232_p5, %s2014_s19), 1  ;;  %v1932_v22 = vld [vmem:[%s2451_s1 + $0xc8] sm:$0xff]   ;;  %v1934_v24 = vld [vmem:[%s2451_s1 + $0xd0] sm:$0xff]   ;;  %v1936_v26 = vld [vmem:[%s2451_s1 + $0xd8] sm:$0xff]   ;;  %s2469_s18 = smov (!%p239_p6, %s2010_s18), 3 }
  0x11   : > { %1714 = vmatprep.subr.bf16.mxu1 %v2028_v1  ;;  %s1870_s29 = smul.u32 80, %s2467_s19  ;;  %v1937_v27 = vld [vmem:[%s2451_s1 + $0xa0] sm:$0xff]   ;;  %v1939_v30 = vld [vmem:[%s2451_s1 + $0xa8] sm:$0xff]   ;;  %v1941_v32 = vld [vmem:[%s2451_s1 + $0xb0] sm:$0xff]   ;;  %s1386_s13 = sshll.u32 %s2467_s19, 2 }
  0x12   : > { %v1938_v28 = vld [vmem:[%s2451_s1 + $0xe0] sm:$0xff]   ;;  %v1940_v31 = vld [vmem:[%s2451_s1 + $0xe8] sm:$0xff]   ;;  %v1942_v34 = vld [vmem:[%s2451_s1 + $0xf0] sm:$0xff]   ;;  %s242_s17 = sadd.s32 %s1386_s13, %s2469_s18 }
  0x13   : > { %1695 = vmatpush3.bf16.msra.mxu0 %v1917_v5  ;;  %s236_s11 = scalar_lea.vmem %s2450_s0, %s1870_s29  ;;  %v1943_v37 = vld [vmem:[%s2451_s1 + $0xb8] sm:$0xff]   ;;  %v1946_v40 = vld [vmem:[%s2451_s1 + $0x100] sm:$0xff]   ;;  %v1948_v43 = vld [vmem:[%s2451_s1 + $0x108] sm:$0xff]   ;;  %s1387_s27 = sshll.u32 %s242_s17, 1 }
  0x14   : > { %1715 = vmatpush3.bf16.msra.mxu1 %v1918_v6  ;;  %1696 = vmatprep.subr.bf16.mxu0 %v2028_v1  ;;  %s2163_s15 = scalar_lea.vmem %s236_s11, %s1388_s12  ;;  %v1944_v38 = vld [vmem:[%s2451_s1 + $0xf8] sm:$0xff]   ;;  %v1947_v42 = vld [vmem:[%s2451_s1 + $0x140] sm:$0xff]   ;;  %v1949_v44 = vld [vmem:[%s2451_s1 + $0x148] sm:$0xff]   ;;  %s244_s29 = scalar_lea.vmem %s2455_s5, %s1387_s27 }
  0x15   : > { %1716 = vmatprep.subr.bf16.mxu1 %v2028_v1  ;;  %v1390_v17 = vld [vmem:[%s2163_s15 + $0x14] sm:$0x3]  ;;  %v248_v18 = vld [vmem:[%s2163_s15] sm:$0x3]  ;;  %v1449_v41 = vld [vmem:[%s2163_s15 + $0x28] sm:$0x3] }
  0x16   : > { %v1945_v29 = vld [vmem:[%s2163_s15] ss:$0 sps:$4 sm:$0x77]   ;;  %v1950_v45 = vld [vmem:[%s2451_s1 + $0x110] sm:$0xff]   ;;  %v1952_v47 = vld [vmem:[%s2451_s1 + $0x118] sm:$0xff]  }
  0x17   : > { %1697 = vmatpush3.bf16.msra.mxu0 %v1919_v7  ;;  %v486_v33 = vshll.u32 %v1945_v29, 16  ;;  %v484_v35 = vshrl.u32 %v1945_v29, 16  ;;  %v1951_v46 = vld [vmem:[%s2451_s1 + $0x150] sm:$0xff]   ;;  %v1953_v48 = vld [vmem:[%s2451_s1 + $0x158] sm:$0xff]   ;;  %v1954_v49 = vld [vmem:[%s2451_s1 + $0x120] sm:$0xff]  }
  0x18   : > { %1717 = vmatpush3.bf16.msra.mxu1 %v1920_v8  ;;  %1698 = vmatprep.subr.bf16.mxu0 %v2028_v1  ;;  %v1955_v50 = vld [vmem:[%s2451_s1 + $0x160] sm:$0xff]   ;;  %v1956_v51 = vld [vmem:[%s2451_s1 + $0x128] sm:$0xff]   ;;  %v1958_v54 = vld [vmem:[%s2451_s1 + $0x130] sm:$0xff]  }
  0x19   : > { %1718 = vmatprep.subr.bf16.mxu1 %v2028_v1  ;;  %v488_v36 = vrot.slane %v486_v33, 1  ;;  %v1963_v52 = vld [vmem:[%s2163_s15 + $0x28] ss:$0 sps:$4 sm:$0x77]   ;;  %v1959_v56 = vld [vmem:[%s2451_s1 + $0x170] sm:$0xff]   ;;  %v1960_v57 = vld [vmem:[%s2451_s1 + $0x138] sm:$0xff]  }
  0x1a   : > { %v1957_v53 = vld [vmem:[%s2451_s1 + $0x168] sm:$0xff]   ;;  %v824_v55 = vshll.u32 %v1963_v52, 16  ;;  %v822_v58 = vshrl.u32 %v1963_v52, 16  ;;  %v1961_v60 = vld [vmem:[%s2451_s1 + $0x178] sm:$0xff]   ;;  %v1962_v62 = vld [vmem:[%s2451_s1 + $0x180] sm:$0xff]  }
  0x1b   : > { %1699 = vmatpush3.bf16.msra.mxu0 %v1921_v9  ;;  %v489_v39 = vor.u32 %v488_v36, %v484_v35  ;;  %v1475_v61 = vld [vmem:[%s2163_s15 + $0x3c] sm:$0x3]  ;;  %v1964_v0 = vld [vmem:[%s2451_s1 + $0x1c0] sm:$0xff]   ;;  %v1965_v2 = vld [vmem:[%s2451_s1 + $0x188] sm:$0xff]  }
  0x1c   : > { %1719 = vmatpush3.bf16.msra.mxu1 %v1922_v10  ;;  %1700 = vmatprep.subr.bf16.mxu0 %v2028_v1  ;;  %v826_v59 = vrot.slane %v824_v55, 1  ;;  %v1966_v3 = vld [vmem:[%s2451_s1 + $0x1c8] sm:$0xff]   ;;  %v1967_v4 = vld [vmem:[%s2451_s1 + $0x190] sm:$0xff]   ;;  %v1969_v6 = vld [vmem:[%s2451_s1 + $0x198] sm:$0xff]  }
  0x1d   : > { %1720 = vmatprep.subr.bf16.mxu1 %v2028_v1  ;;  %v1968_v5 = vld [vmem:[%s2451_s1 + $0x1d0] sm:$0xff]   ;;  %v1970_v7 = vld [vmem:[%s2451_s1 + $0x1d8] sm:$0xff]   ;;  %v1971_v8 = vld [vmem:[%s2451_s1 + $0x1a0] sm:$0xff]  }
  0x1e   : > { %v827_v63 = vor.u32 %v826_v59, %v822_v58  ;;  %v1972_v9 = vld [vmem:[%s2451_s1 + $0x1e0] sm:$0xff]   ;;  %v1973_v10 = vld [vmem:[%s2451_s1 + $0x1a8] sm:$0xff]   ;;  %v1986_v29 = vld [vmem:[%s2451_s1 + $0x238] sm:$0xff]  }
  0x1f   : > { %1701 = vmatpush3.bf16.msra.mxu0 %v1923_v11  ;;  %v1974_v11 = vld [vmem:[%s2451_s1 + $0x1e8] sm:$0xff]  }
  0x20   : > { %1721 = vmatpush3.bf16.msra.mxu1 %v1924_v12  ;;  %1702 = vmatprep.subr.bf16.mxu0 %v2028_v1  ;;  %v1975_v12 = vld [vmem:[%s2451_s1 + $0x1b0] sm:$0xff]  }
  0x21   : > { %1722 = vmatprep.subr.bf16.mxu1 %v2028_v1 }
  0x23   : > { %1703 = vmatpush3.bf16.msra.mxu0 %v1925_v13  ;;  %v1976_v13 = vld [vmem:[%s2451_s1 + $0x1f0] sm:$0xff]  }
  0x24   : > { %1723 = vmatpush3.bf16.msra.mxu1 %v1926_v14  ;;  %1704 = vmatprep.subr.bf16.mxu0 %v2028_v1  ;;  %v1977_v14 = vld [vmem:[%s2451_s1 + $0x1b8] sm:$0xff]  }
  0x25   : > { %1724 = vmatprep.subr.bf16.mxu1 %v2028_v1 }
  0x27   : > { %1705 = vmatpush3.bf16.msra.mxu0 %v1927_v15  ;;  %v1978_v15 = vld [vmem:[%s2451_s1 + $0x1f8] sm:$0xff]  }
  0x28   : > { %1725 = vmatpush3.bf16.msra.mxu1 %v1928_v16  ;;  %1730 = vmatprep.subr.bf16.mxu0 %v2028_v1  ;;  %v1527_v16 = vld [vmem:[%s2163_s15 + $0x4] sm:$0x3] }
  0x29   : > { %1750 = vmatprep.subr.bf16.mxu1 %v2028_v1 }
  0x2a   : > { %1707 = vmatmul.mubr.bf16.vlgmr.msra.gmra.mrb[0].mxu0 %v1390_v17  ;;  %v1979_v17 = vld [vmem:[%s2451_s1 + $0x200] sm:$0xff]  }
  0x2b   : > { %1727 = vmatmul.mubr.bf16.vlgmr.msra.gmra.mrb[0].mxu1 %v248_v18  ;;  %1731 = vmatpush3.bf16.msra.mxu0 %v1929_v19  ;;  %v1553_v18 = vld [vmem:[%s2163_s15 + $0x18] sm:$0x3]  ;;  %v1980_v19 = vld [vmem:[%s2451_s1 + $0x208] sm:$0xff]  }
  0x2c   : > { %1751 = vmatpush3.bf16.msra.mxu1 %v1930_v20  ;;  %1732 = vmatprep.subr.bf16.mxu0 %v2028_v1  ;;  %v1981_v20 = vld [vmem:[%s2451_s1 + $0x210] sm:$0xff]  }
  0x2d   : > { %1752 = vmatprep.subr.bf16.mxu1 %v2028_v1  ;;  %1746 = vmatprep.mubr.msk.bf16.mxu0 %vm2029_vm0, %v2028_v1 }
  0x2e   : > { %1766 = vmatprep.mubr.msk.bf16.mxu1 %vm2029_vm0, %v2028_v1 }
  0x2f   : > { %1733 = vmatpush3.bf16.msra.mxu0 %v1931_v21  ;;  %v1982_v21 = vld [vmem:[%s2451_s1 + $0x218] sm:$0xff]  }
  0x30   : > { %1753 = vmatpush3.bf16.msra.mxu1 %v1932_v22  ;;  %1734 = vmatprep.subr.bf16.mxu0 %v2028_v1  ;;  %v1983_v22 = vld [vmem:[%s2451_s1 + $0x220] sm:$0xff]  }
  0x31   : > { %1754 = vmatprep.subr.bf16.mxu1 %v2028_v1 }
  0x33   : > { %1735 = vmatpush3.bf16.msra.mxu0 %v1933_v23  ;;  %v1987_v23 = vld [vmem:[%s2163_s15 + $0x4] ss:$0 sps:$4 sm:$0x77]  }
  0x34   : > { %1755 = vmatpush3.bf16.msra.mxu1 %v1934_v24  ;;  %1736 = vmatprep.subr.bf16.mxu0 %v2028_v1  ;;  %v1984_v24 = vld [vmem:[%s2451_s1 + $0x228] sm:$0xff]  }
  0x35   : > { %1756 = vmatprep.subr.bf16.mxu1 %v2028_v1 }
  0x37   : > { %1737 = vmatpush3.bf16.msra.mxu0 %v1935_v25  ;;  %v1162_v25 = vshll.u32 %v1987_v23, 16 }
  0x38   : > { %1757 = vmatpush3.bf16.msra.mxu1 %v1936_v26  ;;  %1738 = vmatprep.subr.bf16.mxu0 %v2028_v1  ;;  %v1985_v26 = vld [vmem:[%s2451_s1 + $0x230] sm:$0xff]  }
  0x39   : > { %1758 = vmatprep.subr.bf16.mxu1 %v2028_v1 }
  0x3b   : > { %1739 = vmatpush3.bf16.msra.mxu0 %v1937_v27  ;;  %v1160_v27 = vshrl.u32 %v1987_v23, 16 }
  0x3c   : > { %1759 = vmatpush3.bf16.msra.mxu1 %v1938_v28  ;;  %1740 = vmatprep.subr.bf16.mxu0 %v2028_v1  ;;  %v1164_v28 = vrot.slane %v1162_v25, 1 }
  0x3d   : > { %1760 = vmatprep.subr.bf16.mxu1 %v2028_v1 }
  0x3f   : > { %1741 = vmatpush3.bf16.msra.mxu0 %v1939_v30  ;;  %v1165_v30 = vor.u32 %v1164_v28, %v1160_v27 }
  0x40   : > { %1761 = vmatpush3.bf16.msra.mxu1 %v1940_v31  ;;  %1742 = vmatprep.subr.bf16.mxu0 %v2028_v1 }
  0x41   : > { %1762 = vmatprep.subr.bf16.mxu1 %v2028_v1 }
  0x43   : > { %1743 = vmatpush3.bf16.msra.mxu0 %v1941_v32 }
  0x44   : > { %1763 = vmatpush3.bf16.msra.mxu1 %v1942_v34  ;;  %1744 = vmatprep.subr.bf16.mxu0 %v2028_v1 }
  0x45   : > { %1764 = vmatprep.subr.bf16.mxu1 %v2028_v1 }
  0x47   : > { %1745 = vmatpush3.bf16.msra.mxu0 %v1943_v37 }
  0x48   : > { %1765 = vmatpush3.bf16.msra.mxu1 %v1944_v38  ;;  %1770 = vmatprep.subr.bf16.mxu0 %v2028_v1 }
  0x49   : > { %1790 = vmatprep.subr.bf16.mxu1 %v2028_v1 }
  0x4a   : > { %1747 = vmatmul.mubr.bf16.vlgmr.msra.gmra.mrb[4].mxu0 %v489_v39 }
  0x4b   : > { %1771 = vmatpush3.bf16.msra.mxu0 %v1946_v40  ;;  %1767 = vmatmul.mubr.bf16.vlgmr.msra.gmra.mrb[4].mxu1 %v1449_v41 }
  0x4c   : > { %1791 = vmatpush3.bf16.msra.mxu1 %v1947_v42  ;;  %1772 = vmatprep.subr.bf16.mxu0 %v2028_v1 }
  0x4d   : > { %1792 = vmatprep.subr.bf16.mxu1 %v2028_v1  ;;  %1786 = vmatprep.mubr.msk.bf16.mxu0 %vm2029_vm0, %v2028_v1 }
  0x4e   : > { %1806 = vmatprep.mubr.msk.bf16.mxu1 %vm2029_vm0, %v2028_v1 }
  0x4f   : > { %1773 = vmatpush3.bf16.msra.mxu0 %v1948_v43 }
  0x50   : > { %1793 = vmatpush3.bf16.msra.mxu1 %v1949_v44  ;;  %1774 = vmatprep.subr.bf16.mxu0 %v2028_v1 }
  0x51   : > { %1794 = vmatprep.subr.bf16.mxu1 %v2028_v1 }
  0x53   : > { %1775 = vmatpush3.bf16.msra.mxu0 %v1950_v45 }
  0x54   : > { %1795 = vmatpush3.bf16.msra.mxu1 %v1951_v46  ;;  %1776 = vmatprep.subr.bf16.mxu0 %v2028_v1 }
  0x55   : > { %1796 = vmatprep.subr.bf16.mxu1 %v2028_v1 }
  0x57   : > { %1777 = vmatpush3.bf16.msra.mxu0 %v1952_v47 }
  0x58   : > { %1797 = vmatpush3.bf16.msra.mxu1 %v1953_v48  ;;  %1778 = vmatprep.subr.bf16.mxu0 %v2028_v1 }
  0x59   : > { %1798 = vmatprep.subr.bf16.mxu1 %v2028_v1 }
  0x5b   : > { %1779 = vmatpush3.bf16.msra.mxu0 %v1954_v49 }
  0x5c   : > { %1799 = vmatpush3.bf16.msra.mxu1 %v1955_v50  ;;  %1780 = vmatprep.subr.bf16.mxu0 %v2028_v1 }
  0x5d   : > { %1800 = vmatprep.subr.bf16.mxu1 %v2028_v1 }
  0x5f   : > { %1781 = vmatpush3.bf16.msra.mxu0 %v1956_v51 }
  0x60   : > { %1801 = vmatpush3.bf16.msra.mxu1 %v1957_v53  ;;  %1782 = vmatprep.subr.bf16.mxu0 %v2028_v1 }
  0x61   : > { %1802 = vmatprep.subr.bf16.mxu1 %v2028_v1 }
  0x63   : > { %1783 = vmatpush3.bf16.msra.mxu0 %v1958_v54 }
  0x64   : > { %1803 = vmatpush3.bf16.msra.mxu1 %v1959_v56  ;;  %1784 = vmatprep.subr.bf16.mxu0 %v2028_v1 }
  0x65   : > { %1804 = vmatprep.subr.bf16.mxu1 %v2028_v1 }
  0x67   : > { %1785 = vmatpush3.bf16.msra.mxu0 %v1960_v57 }
  0x68   : > { %1805 = vmatpush3.bf16.msra.mxu1 %v1961_v60  ;;  %1810 = vmatprep.subr.bf16.mxu0 %v2028_v1 }
  0x69   : > { %1830 = vmatprep.subr.bf16.mxu1 %v2028_v1 }
  0x6a   : > { %1787 = vmatmul.mubr.bf16.vlgmr.msra.gmra.mrb[8].mxu0 %v1475_v61 }
  0x6b   : > { %1811 = vmatpush3.bf16.msra.mxu0 %v1962_v62  ;;  %1807 = vmatmul.mubr.bf16.vlgmr.msra.gmra.mrb[8].mxu1 %v827_v63 }
  0x6c   : > { %1831 = vmatpush3.bf16.msra.mxu1 %v1964_v0  ;;  %1812 = vmatprep.subr.bf16.mxu0 %v2028_v1 }
  0x6d   : > { %1832 = vmatprep.subr.bf16.mxu1 %v2028_v1  ;;  %1826 = vmatprep.mubr.msk.bf16.mxu0 %vm2029_vm0, %v2028_v1 }
  0x6e   : > { %1846 = vmatprep.mubr.msk.bf16.mxu1 %vm2029_vm0, %v2028_v1 }
  0x6f   : > { %1813 = vmatpush3.bf16.msra.mxu0 %v1965_v2 }
  0x70   : > { %1833 = vmatpush3.bf16.msra.mxu1 %v1966_v3  ;;  %1814 = vmatprep.subr.bf16.mxu0 %v2028_v1 }
  0x71   : > { %1834 = vmatprep.subr.bf16.mxu1 %v2028_v1 }
  0x73   : > { %1815 = vmatpush3.bf16.msra.mxu0 %v1967_v4 }
  0x74   : > { %1835 = vmatpush3.bf16.msra.mxu1 %v1968_v5  ;;  %1816 = vmatprep.subr.bf16.mxu0 %v2028_v1 }
  0x75   : > { %1836 = vmatprep.subr.bf16.mxu1 %v2028_v1 }
  0x77   : > { %1817 = vmatpush3.bf16.msra.mxu0 %v1969_v6 }
  0x78   : > { %1837 = vmatpush3.bf16.msra.mxu1 %v1970_v7  ;;  %1818 = vmatprep.subr.bf16.mxu0 %v2028_v1  ;;  %v1604_v7 = vld [vmem:[%s2452_s2] ss:$0 sm:$0xff] }
  0x79   : > { %1838 = vmatprep.subr.bf16.mxu1 %v2028_v1 }
  0x7b   : > { %1819 = vmatpush3.bf16.msra.mxu0 %v1971_v8 }
  0x7c   : > { %1839 = vmatpush3.bf16.msra.mxu1 %v1972_v9  ;;  %1820 = vmatprep.subr.bf16.mxu0 %v2028_v1 }
  0x7d   : > { %1840 = vmatprep.subr.bf16.mxu1 %v2028_v1 }
  0x7f   : > { %1821 = vmatpush3.bf16.msra.mxu0 %v1973_v10  ;;  %v1605_v10 = vld [vmem:[%s2453_s3] ss:$0 sm:$0xff] }
  0x80   : > { %1841 = vmatpush3.bf16.msra.mxu1 %v1974_v11  ;;  %1822 = vmatprep.subr.bf16.mxu0 %v2028_v1 }
  0x81   : > { %1842 = vmatprep.subr.bf16.mxu1 %v2028_v1 }
  0x83   : > { %1823 = vmatpush3.bf16.msra.mxu0 %v1975_v12 }
  0x84   : > { %1843 = vmatpush3.bf16.msra.mxu1 %v1976_v13  ;;  %1824 = vmatprep.subr.bf16.mxu0 %v2028_v1 }
  0x85   : > { %1844 = vmatprep.subr.bf16.mxu1 %v2028_v1 }
  0x87   : > { %1825 = vmatpush3.bf16.msra.mxu0 %v1977_v14  ;;  %v1606_v14 = vld [vmem:[%s2454_s4] ss:$0 sm:$0xff] }
  0x88   : > { %1845 = vmatpush3.bf16.msra.mxu1 %v1978_v15  ;;  %1850 = vmatprep.subr.bf16.mxu0 %v2028_v1 }
  0x8a   : > { %1827 = vmatmul.mubr.bf16.vlgmr.msra.gmra.mrb[12].mxu0 %v1527_v16 }
  0x8b   : > { %1851 = vmatpush3.bf16.msra.mxu0 %v1979_v17  ;;  %1847 = vmatmul.mubr.bf16.vlgmr.msra.gmra.mrb[12].mxu1 %v1553_v18 }
  0x8c   : > { %1852 = vmatprep.subr.bf16.mxu0 %v2028_v1  ;;  %1866 = vmatprep.mubr.msk.bf16.mxu0 %vm2029_vm0, %v2028_v1 }
  0x8f   : > { %1853 = vmatpush3.bf16.msra.mxu0 %v1980_v19 }
  0x90   : > { %1854 = vmatprep.subr.bf16.mxu0 %v2028_v1 }
  0x93   : > { %1855 = vmatpush3.bf16.msra.mxu0 %v1981_v20 }
  0x94   : > { %1856 = vmatprep.subr.bf16.mxu0 %v2028_v1 }
  0x97   : > { %1857 = vmatpush3.bf16.msra.mxu0 %v1982_v21 }
  0x98   : > { %1858 = vmatprep.subr.bf16.mxu0 %v2028_v1 }
  0x9b   : > { %1859 = vmatpush3.bf16.msra.mxu0 %v1983_v22 }
  0x9c   : > { %1860 = vmatprep.subr.bf16.mxu0 %v2028_v1 }
  0x9f   : > { %1861 = vmatpush3.bf16.msra.mxu0 %v1984_v24 }
  0xa0   : > { %1862 = vmatprep.subr.bf16.mxu0 %v2028_v1 }
  0xa3   : > { %1863 = vmatpush3.bf16.msra.mxu0 %v1985_v26 }
  0xa4   : > { %1864 = vmatprep.subr.bf16.mxu0 %v2028_v1 }
  0xa7   : > { %1865 = vmatpush3.bf16.msra.mxu0 %v1986_v29 }
  0xaa   : > { %1867 = vmatmul.mubr.bf16.vlgmr.msra.gmra.mrb[16].mxu0 %v1165_v30 }
  0xfd   : > { %v368_v31 = vpop.f32.mrb[0].mxu0 }
  0xfe   : > { %v1708_v32 = vpop.f32.mrb[1].mxu0  ;;  %v456_v33 = vpop.f32.mrb[0].mxu1 }
  0xff   : > { %v457_v34 = vadd.f32 %v456_v33, %v368_v31  ;;  %v371_v35 = vpop.f32.mrb[2].mxu0  ;;  %v1728_v36 = vpop.f32.mrb[1].mxu1 }
 0x100   : > { %v1709_v37 = vpop.f32.mrb[3].mxu0  ;;  %v459_v38 = vpop.f32.mrb[2].mxu1 }
 0x101   : > { %v1729_v39 = vpop.f32.mrb[3].mxu1 }
 0x11d   : > { %v573_v40 = vpop.f32.mrb[4].mxu0 }
 0x11e   : > { %v579_v41 = vadd.f32 %v573_v40, %v457_v34  ;;  %v1748_v42 = vpop.f32.mrb[5].mxu0  ;;  %v683_v43 = vpop.f32.mrb[4].mxu1 }
 0x11f   : > { %v576_v44 = vpop.f32.mrb[6].mxu0  ;;  %v1768_v45 = vpop.f32.mrb[5].mxu1 }
 0x120   : > { %v689_v46 = vadd.f32 %v683_v43, %v579_v41  ;;  %v1749_v1 = vpop.f32.mrb[7].mxu0  ;;  %v686_v47 = vpop.f32.mrb[6].mxu1 }
 0x121   : > { %v1769_v48 = vpop.f32.mrb[7].mxu1 }
 0x13d   : > { %v793_v49 = vpop.f32.mrb[8].mxu0 }
 0x13e   : > { %v799_v50 = vadd.f32 %v793_v49, %v689_v46  ;;  %v1788_v51 = vpop.f32.mrb[9].mxu0  ;;  %v911_v52 = vpop.f32.mrb[8].mxu1 }
 0x13f   : > { %v796_v53 = vpop.f32.mrb[10].mxu0  ;;  %v1808_v54 = vpop.f32.mrb[9].mxu1 }
 0x140   : > { %v917_v55 = vadd.f32 %v911_v52, %v799_v50  ;;  %v1789_v56 = vpop.f32.mrb[11].mxu0  ;;  %v914_v57 = vpop.f32.mrb[10].mxu1 }
 0x141   : > { %v1809_v58 = vpop.f32.mrb[11].mxu1 }
 0x15d   : > { %v1021_v59 = vpop.f32.mrb[12].mxu0 }
 0x15e   : > { %v1027_v60 = vadd.f32 %v1021_v59, %v917_v55  ;;  %v1828_v61 = vpop.f32.mrb[13].mxu0  ;;  %v1131_v62 = vpop.f32.mrb[12].mxu1 }
 0x15f   : > { %v1024_v63 = vpop.f32.mrb[14].mxu0  ;;  %v1848_v0 = vpop.f32.mrb[13].mxu1 }
 0x160   : > { %v1137_v2 = vadd.f32 %v1131_v62, %v1027_v60  ;;  %v1829_v3 = vpop.f32.mrb[15].mxu0  ;;  %v1134_v4 = vpop.f32.mrb[14].mxu1 }
 0x161   : > { %v1849_v5 = vpop.f32.mrb[15].mxu1 }
 0x17d   : > { %v1249_v6 = vpop.f32.mrb[16].mxu0 }
 0x17e   : > { %v1255_v8 = vadd.f32 %v1249_v6, %v1137_v2  ;;  %v1868_v9 = vpop.f32.mrb[17].mxu0 }
 0x17f   : > { %v1252_v11 = vpop.f32.mrb[18].mxu0 }
 0x180   : > { %v1263_v12 = vadd.f32 %v1604_v7, %v1255_v8  ;;  %v1869_v13 = vpop.f32.mrb[19].mxu0 }
 0x182   : > { %v1271_v15 = vmul.f32 %v1605_v10, %v1263_v12 }
 0x184   : > { %v1279_v16 = vadd.f32 %v1606_v14, %v1271_v15 }
 0x186   : > { %v1280_v17 = vmax.f32 %v1279_v16, 0.0 }
 0x188   : > { %v1281_v18 = vpack.c.bf16 %v1280_v17, %v1280_v17 }
 0x18a   : > { %1282 = vst [vmem:[%s244_s29] sm:$0x3] %v1281_v18 }
 0x18b PF: > { %s15_s22 = sadd.s32 1, %s2026_s22   ;;  %s2456_s18 = smov %s2018_s20 }
 0x18c   : > { %p12_p7 = scmp.ge.s32.totalorder %s15_s22, 10   ;;  %s2457_s19 = smov %s2022_s21 }
 0x18d   : > { %s2458_s20 = smov %s2461_s23  ;;  %s2459_s21 = smov %s2465_s24 }
 0x18e   :  { %14 = sbr.rel (!%p12_p7) target bundleno = 3 (0x3), region = 84 }

// kernel: resnet_base_embed.14
= control target key start
LH: loop header
LB: loop body
LE: loop exit
PB: predicated region body
PF: predicated region fallthrough
CT: control target
= control target key end

     0   :  { %s2283_s21 = smov 0   ;;  %s2285_s22 = smov 0   ;;  %s2710_s0 = inlined_call_operand.vmem [shape: bf16[2,1,1,6,6,128], index: 0, kind: input, shape index: {}]   ;;  %s2711_s1 = inlined_call_operand.vmem [shape: bf16[3,3,128,128], index: 1, kind: input, shape index: {}]   ;;  %s2712_s2 = inlined_call_operand.vmem [shape: f32[1,128], index: 2, kind: input, shape index: {}]   ;;  %s2713_s3 = inlined_call_operand.vmem [shape: bf16[2,4,4,128], index: 3, kind: input, shape index: {}]   ;;  %s2714_s4 = inlined_call_operand.vmem [shape: bf16[128,128], index: 4, kind: input, shape index: {}]   ;;  %s2715_s5 = inlined_call_operand.vmem [shape: f32[1,128], index: 5, kind: input, shape index: {}]   ;;  %s2716_s6 = inlined_call_operand.vmem [shape: bf16[2,4,4,128], index: 6, kind: output, shape index: {}]  }
   0x1   :  { %s2287_s23 = smov 0   ;;  %s2289_s24 = smov 0  }
   0x2   :  { %s2291_s25 = smov 0  }
   0x3 LB: > { %s25_s26 = sadd.s32 1, %s2236_s23  ;;  %s28_s27 = sadd.s32 1, %s2240_s24  ;;  %s2244_s25 = sphi %s2291_s25, %s16_s25   ;;  %s2240_s24 = sphi %s2289_s24, %s2720_s24   ;;  %s2236_s23 = sphi %s2287_s23, %s2719_s23   ;;  %s2232_s22 = sphi %s2285_s22, %s2718_s22   ;;  %s2228_s21 = sphi %s2283_s21, %s2717_s21  }
   0x4   : > { %p26_p0 = scmp.ge.s32.totalorder %s25_s26, 4  ;;  %p1554_p1 = scmp.ge.s32.totalorder %s2244_s25, 1 }
   0x5   : > { %p241_p2 = scmp.lt.s32.totalorder %s2244_s25, 9 }
   0x6   : > { %s2722_s26 = smov (%p26_p0, %s25_s26), 0  ;;  %s2724_s27 = smov (!%p26_p0, %s28_s27), %s2240_s24 }
   0x7   : > { %p242_p3 = pnand %p1554_p1, %p241_p2  ;;  %p30_p4 = scmp.ge.s32.totalorder %s2724_s27, 2 }
   0x8   : > { %v2120_v0 = vld [vmem:[%s2711_s1 + $0x40] sm:$0xff] (!%p242_p3)   ;;  %v2246_v1 = vmov (!%p242_p3), 0.0   ;;  %v2122_v3 = vld [vmem:[%s2711_s1 + $0x48] sm:$0xff] (!%p242_p3)   ;;  %vm2247_vm0 = vmmov (!%p242_p3), 0   ;;  %p282_p5 = scmp.lt.s32.totalorder (!%p242_p3), %s2232_s22, 1  ;;  %v2124_v5 = vld [vmem:[%s2711_s1 + $0x50] sm:$0xff] (!%p242_p3)  }
   0x9   : > { %s2726_s27 = smov (%p30_p4, %s2724_s27), 0  ;;  %245 = sbr.rel (%p242_p3) target bundleno = 393 (0x189), region = 44 }
   0xa   : > { %1877 = vmatprep.subr.bf16.mxu0 (!%p242_p3), %v2246_v1  ;;  %1897 = vmatprep.subr.bf16.mxu1 (!%p242_p3), %v2246_v1  ;;  %v2121_v2 = vld [vmem:[%s2711_s1] sm:$0xff] (!%p242_p3)   ;;  %v2123_v4 = vld [vmem:[%s2711_s1 + $0x8] sm:$0xff] (!%p242_p3)   ;;  %v2125_v6 = vld [vmem:[%s2711_s1 + $0x10] sm:$0xff] (!%p242_p3)   ;;  %s1560_s29 = sshll.u32 (!%p242_p3), %s2228_s21, 2  ;;  %p289_p6 = scmp.lt.s32.totalorder (!%p242_p3), %s2228_s21, 3 }
   0xb   : > { %1878 = vmatpush3.bf16.msra.mxu0 (!%p242_p3), %v2120_v0  ;;  %1893 = vmatprep.mubr.msk.bf16.mxu0 (!%p242_p3), %vm2247_vm0, %v2246_v1  ;;  %v2126_v7 = vld [vmem:[%s2711_s1 + $0x58] sm:$0xff] (!%p242_p3)   ;;  %v2128_v9 = vld [vmem:[%s2711_s1 + $0x60] sm:$0xff] (!%p242_p3)   ;;  %v2130_v12 = vld [vmem:[%s2711_s1 + $0x68] sm:$0xff] (!%p242_p3)  }
   0xc   : > { %1898 = vmatpush3.bf16.msra.mxu1 (!%p242_p3), %v2121_v2  ;;  %1879 = vmatprep.subr.bf16.mxu0 (!%p242_p3), %v2246_v1  ;;  %v2127_v8 = vld [vmem:[%s2711_s1 + $0x18] sm:$0xff] (!%p242_p3)   ;;  %v2129_v10 = vld [vmem:[%s2711_s1 + $0x20] sm:$0xff] (!%p242_p3)   ;;  %v2131_v13 = vld [vmem:[%s2711_s1 + $0x28] sm:$0xff] (!%p242_p3)  }
   0xd   : > { %1899 = vmatprep.subr.bf16.mxu1 (!%p242_p3), %v2246_v1  ;;  %1913 = vmatprep.mubr.msk.bf16.mxu1 (!%p242_p3), %vm2247_vm0, %v2246_v1  ;;  %v2132_v15 = vld [vmem:[%s2711_s1 + $0x70] sm:$0xff] (!%p242_p3)   ;;  %v2134_v19 = vld [vmem:[%s2711_s1 + $0x78] sm:$0xff] (!%p242_p3)   ;;  %v2137_v22 = vld [vmem:[%s2711_s1 + $0x80] sm:$0xff] (!%p242_p3)  }
   0xe   : > { %v2133_v16 = vld [vmem:[%s2711_s1 + $0x30] sm:$0xff] (!%p242_p3)   ;;  %v2135_v20 = vld [vmem:[%s2711_s1 + $0x38] sm:$0xff] (!%p242_p3)   ;;  %v2138_v24 = vld [vmem:[%s2711_s1 + $0xc0] sm:$0xff] (!%p242_p3)  }
   0xf   : > { %1880 = vmatpush3.bf16.msra.mxu0 (!%p242_p3), %v2122_v3  ;;  %v2139_v25 = vld [vmem:[%s2711_s1 + $0x88] sm:$0xff] (!%p242_p3)   ;;  %v2141_v27 = vld [vmem:[%s2711_s1 + $0x90] sm:$0xff] (!%p242_p3)   ;;  %v2143_v29 = vld [vmem:[%s2711_s1 + $0x98] sm:$0xff] (!%p242_p3)  }
  0x10   : > { %s2728_s22 = smov (!%p282_p5, %s2232_s22), 1  ;;  %1900 = vmatpush3.bf16.msra.mxu1 %v2123_v4  ;;  %1881 = vmatprep.subr.bf16.mxu0 %v2246_v1  ;;  %v2140_v26 = vld [vmem:[%s2711_s1 + $0xc8] sm:$0xff]   ;;  %v2142_v28 = vld [vmem:[%s2711_s1 + $0xd0] sm:$0xff]   ;;  %v2144_v30 = vld [vmem:[%s2711_s1 + $0xd8] sm:$0xff]   ;;  %s2730_s21 = smov (!%p289_p6, %s2228_s21), 3 }
  0x11   : > { %s2077_s14 = smul.u32 24, %s2728_s22  ;;  %1901 = vmatprep.subr.bf16.mxu1 %v2246_v1  ;;  %v2145_v31 = vld [vmem:[%s2711_s1 + $0xa0] sm:$0xff]   ;;  %v2147_v33 = vld [vmem:[%s2711_s1 + $0xa8] sm:$0xff]   ;;  %v2149_v35 = vld [vmem:[%s2711_s1 + $0xb0] sm:$0xff]   ;;  %s1556_s17 = sshll.u32 %s2728_s22, 2 }
  0x12   : > { %v2146_v32 = vld [vmem:[%s2711_s1 + $0xe0] sm:$0xff]   ;;  %v2148_v34 = vld [vmem:[%s2711_s1 + $0xe8] sm:$0xff]   ;;  %v2150_v36 = vld [vmem:[%s2711_s1 + $0xf0] sm:$0xff]   ;;  %s2662_s20 = sadd.s32 %s1556_s17, %s2730_s21 }
  0x13   : > { %1882 = vmatpush3.bf16.msra.mxu0 %v2124_v5  ;;  %s286_s28 = scalar_lea.vmem %s2710_s0, %s2077_s14  ;;  %v2151_v38 = vld [vmem:[%s2711_s1 + $0xb8] sm:$0xff]   ;;  %v2154_v41 = vld [vmem:[%s2711_s1 + $0x100] sm:$0xff]   ;;  %v2156_v44 = vld [vmem:[%s2711_s1 + $0x108] sm:$0xff]   ;;  %s1557_s22 = sshll.u32 %s2662_s20, 1 }
  0x14   : > { %1902 = vmatpush3.bf16.msra.mxu1 %v2125_v6  ;;  %1883 = vmatprep.subr.bf16.mxu0 %v2246_v1  ;;  %s2358_s8 = scalar_lea.vmem %s286_s28, %s1560_s29  ;;  %v2152_v39 = vld [vmem:[%s2711_s1 + $0xf8] sm:$0xff]   ;;  %v2155_v43 = vld [vmem:[%s2711_s1 + $0x140] sm:$0xff]   ;;  %v2157_v45 = vld [vmem:[%s2711_s1 + $0x148] sm:$0xff]   ;;  %s302_s18 = scalar_lea.vmem %s2716_s6, %s1557_s22 }
  0x15   : > { %1903 = vmatprep.subr.bf16.mxu1 %v2246_v1  ;;  %v2136_v11 = vld [vmem:[%s2358_s8] ss:$0 sps:$4 sm:$0x77]   ;;  %v1620_v42 = vld [vmem:[%s2358_s8 + $0x4] sm:$0x3]  ;;  %v2158_v46 = vld [vmem:[%s2711_s1 + $0x110] sm:$0xff]  }
  0x16   : > { %v347_v14 = vshll.u32 %v2136_v11, 16  ;;  %v345_v17 = vshrl.u32 %v2136_v11, 16  ;;  %v306_v23 = vld [vmem:[%s2358_s8] sm:$0x3]  ;;  %v2159_v47 = vld [vmem:[%s2711_s1 + $0x150] sm:$0xff]   ;;  %v2160_v48 = vld [vmem:[%s2711_s1 + $0x118] sm:$0xff]  }
  0x17   : > { %1884 = vmatpush3.bf16.msra.mxu0 %v2126_v7  ;;  %v2153_v37 = vld [vmem:[%s2358_s8] ss:$0 sps:$4 sm:$0x66]   ;;  %v2161_v49 = vld [vmem:[%s2711_s1 + $0x158] sm:$0xff]   ;;  %v2164_v53 = vld [vmem:[%s2711_s1 + $0x128] sm:$0xff]  }
  0x18   : > { %1904 = vmatpush3.bf16.msra.mxu1 %v2127_v8  ;;  %1885 = vmatprep.subr.bf16.mxu0 %v2246_v1  ;;  %v349_v18 = vrot.slane %v347_v14, 1  ;;  %v549_v40 = vrot.slane %v2153_v37, 1  ;;  %v2162_v50 = vld [vmem:[%s2711_s1 + $0x120] sm:$0xff]   ;;  %v2165_v54 = vld [vmem:[%s2711_s1 + $0x168] sm:$0xff]   ;;  %v2166_v56 = vld [vmem:[%s2711_s1 + $0x130] sm:$0xff]  }
  0x19   : > { %1905 = vmatprep.subr.bf16.mxu1 %v2246_v1  ;;  %v2163_v51 = vld [vmem:[%s2711_s1 + $0x160] sm:$0xff]   ;;  %v2167_v57 = vld [vmem:[%s2711_s1 + $0x170] sm:$0xff]   ;;  %v2168_v60 = vld [vmem:[%s2711_s1 + $0x138] sm:$0xff]  }
  0x1a   : > { %v350_v21 = vor.u32 %v349_v18, %v345_v17  ;;  %v2170_v52 = vld [vmem:[%s2358_s8 + $0x4] ss:$0 sps:$4 sm:$0x77]   ;;  %v2169_v62 = vld [vmem:[%s2711_s1 + $0x178] sm:$0xff]   ;;  %v2174_v4 = vld [vmem:[%s2711_s1 + $0x188] sm:$0xff]  }
  0x1b   : > { %1886 = vmatpush3.bf16.msra.mxu0 %v2128_v9  ;;  %v774_v55 = vshll.u32 %v2170_v52, 16  ;;  %v772_v58 = vshrl.u32 %v2170_v52, 16  ;;  %v2172_v61 = vld [vmem:[%s2358_s8 + $0x4] ss:$0 sps:$4 sm:$0x66]   ;;  %v2175_v5 = vld [vmem:[%s2711_s1 + $0x1c8] sm:$0xff]  }
  0x1c   : > { %1906 = vmatpush3.bf16.msra.mxu1 %v2129_v10  ;;  %1887 = vmatprep.subr.bf16.mxu0 %v2246_v1  ;;  %v2171_v0 = vld [vmem:[%s2711_s1 + $0x180] sm:$0xff]   ;;  %v889_v2 = vrot.slane %v2172_v61, 1  ;;  %v2176_v6 = vld [vmem:[%s2711_s1 + $0x190] sm:$0xff]   ;;  %v2178_v8 = vld [vmem:[%s2711_s1 + $0x198] sm:$0xff]  }
  0x1d   : > { %1907 = vmatprep.subr.bf16.mxu1 %v2246_v1  ;;  %v776_v59 = vrot.slane %v774_v55, 1  ;;  %v2173_v3 = vld [vmem:[%s2711_s1 + $0x1c0] sm:$0xff]   ;;  %v2177_v7 = vld [vmem:[%s2711_s1 + $0x1d0] sm:$0xff]   ;;  %v2179_v9 = vld [vmem:[%s2711_s1 + $0x1d8] sm:$0xff]  }
  0x1e   : > { %v2180_v10 = vld [vmem:[%s2711_s1 + $0x1a0] sm:$0xff]   ;;  %v2183_v14 = vld [vmem:[%s2711_s1 + $0x1e8] sm:$0xff]   ;;  %v2185_v17 = vld [vmem:[%s2711_s1 + $0x1f0] sm:$0xff]  }
  0x1f   : > { %1888 = vmatpush3.bf16.msra.mxu0 %v2130_v12  ;;  %v777_v63 = vor.u32 %v776_v59, %v772_v58  ;;  %v2181_v11 = vld [vmem:[%s2711_s1 + $0x1e0] sm:$0xff]   ;;  %v2182_v12 = vld [vmem:[%s2711_s1 + $0x1a8] sm:$0xff]   ;;  %v2186_v18 = vld [vmem:[%s2711_s1 + $0x1b8] sm:$0xff]  }
  0x20   : > { %1908 = vmatpush3.bf16.msra.mxu1 %v2131_v13  ;;  %1889 = vmatprep.subr.bf16.mxu0 %v2246_v1  ;;  %v2189_v13 = vld [vmem:[%s2358_s8 + $0x8] ss:$0 sps:$4 sm:$0x77]   ;;  %v2202_v37 = vld [vmem:[%s2714_s4 + $0x30] sm:$0xff]  }
  0x21   : > { %1909 = vmatprep.subr.bf16.mxu1 %v2246_v1 }
  0x23   : > { %1890 = vmatpush3.bf16.msra.mxu0 %v2132_v15  ;;  %v2184_v15 = vld [vmem:[%s2711_s1 + $0x1b0] sm:$0xff]  }
  0x24   : > { %1910 = vmatpush3.bf16.msra.mxu1 %v2133_v16  ;;  %1891 = vmatprep.subr.bf16.mxu0 %v2246_v1  ;;  %v1114_v16 = vshll.u32 %v2189_v13, 16 }
  0x25   : > { %1911 = vmatprep.subr.bf16.mxu1 %v2246_v1 }
  0x27   : > { %1892 = vmatpush3.bf16.msra.mxu0 %v2134_v19  ;;  %v1112_v19 = vshrl.u32 %v2189_v13, 16 }
  0x28   : > { %1912 = vmatpush3.bf16.msra.mxu1 %v2135_v20  ;;  %1917 = vmatprep.subr.bf16.mxu0 %v2246_v1  ;;  %v1116_v20 = vrot.slane %v1114_v16, 1 }
  0x29   : > { %1937 = vmatprep.subr.bf16.mxu1 %v2246_v1 }
  0x2a   : > { %1894 = vmatmul.mubr.bf16.vlgmr.msra.gmra.mrb[0].mxu0 %v350_v21  ;;  %v2187_v21 = vld [vmem:[%s2711_s1 + $0x1f8] sm:$0xff]  }
  0x2b   : > { %1914 = vmatmul.mubr.bf16.vlgmr.msra.gmra.mrb[0].mxu1 %v306_v23  ;;  %1918 = vmatpush3.bf16.msra.mxu0 %v2137_v22  ;;  %v1698_v22 = vld [vmem:[%s2358_s8 + $0x8] sm:$0x3]  ;;  %v2188_v23 = vld [vmem:[%s2711_s1 + $0x200] sm:$0xff]  }
  0x2c   : > { %1938 = vmatpush3.bf16.msra.mxu1 %v2138_v24  ;;  %1919 = vmatprep.subr.bf16.mxu0 %v2246_v1  ;;  %v1117_v24 = vor.u32 %v1116_v20, %v1112_v19  ;;  %v1775_v19 = vld [vmem:[%s2712_s2] ss:$0 sm:$0xff] }
  0x2d   : > { %1939 = vmatprep.subr.bf16.mxu1 %v2246_v1  ;;  %1933 = vmatprep.mubr.msk.bf16.mxu0 %vm2247_vm0, %v2246_v1 }
  0x2e   : > { %1953 = vmatprep.mubr.msk.bf16.mxu1 %vm2247_vm0, %v2246_v1 }
  0x2f   : > { %1920 = vmatpush3.bf16.msra.mxu0 %v2139_v25  ;;  %v2190_v25 = vld [vmem:[%s2714_s4] sm:$0xff]  }
  0x30   : > { %1940 = vmatpush3.bf16.msra.mxu1 %v2140_v26  ;;  %1921 = vmatprep.subr.bf16.mxu0 %v2246_v1  ;;  %v2191_v26 = vld [vmem:[%s2711_s1 + $0x208] sm:$0xff]  }
  0x31   : > { %1941 = vmatprep.subr.bf16.mxu1 %v2246_v1 }
  0x33   : > { %1922 = vmatpush3.bf16.msra.mxu0 %v2141_v27  ;;  %v2192_v27 = vld [vmem:[%s2714_s4 + $0x8] sm:$0xff]  }
  0x34   : > { %1942 = vmatpush3.bf16.msra.mxu1 %v2142_v28  ;;  %1923 = vmatprep.subr.bf16.mxu0 %v2246_v1  ;;  %v2193_v28 = vld [vmem:[%s2711_s1 + $0x210] sm:$0xff]  }
  0x35   : > { %1943 = vmatprep.subr.bf16.mxu1 %v2246_v1 }
  0x37   : > { %1924 = vmatpush3.bf16.msra.mxu0 %v2143_v29  ;;  %v2194_v29 = vld [vmem:[%s2714_s4 + $0x10] sm:$0xff]  }
  0x38   : > { %1944 = vmatpush3.bf16.msra.mxu1 %v2144_v30  ;;  %1925 = vmatprep.subr.bf16.mxu0 %v2246_v1  ;;  %v2195_v30 = vld [vmem:[%s2711_s1 + $0x218] sm:$0xff]  }
  0x39   : > { %1945 = vmatprep.subr.bf16.mxu1 %v2246_v1 }
  0x3b   : > { %1926 = vmatpush3.bf16.msra.mxu0 %v2145_v31  ;;  %v2196_v31 = vld [vmem:[%s2714_s4 + $0x18] sm:$0xff]  }
  0x3c   : > { %1946 = vmatpush3.bf16.msra.mxu1 %v2146_v32  ;;  %1927 = vmatprep.subr.bf16.mxu0 %v2246_v1  ;;  %v2197_v32 = vld [vmem:[%s2711_s1 + $0x220] sm:$0xff]  }
  0x3d   : > { %1947 = vmatprep.subr.bf16.mxu1 %v2246_v1 }
  0x3f   : > { %1928 = vmatpush3.bf16.msra.mxu0 %v2147_v33  ;;  %v2198_v33 = vld [vmem:[%s2714_s4 + $0x20] sm:$0xff]  }
  0x40   : > { %1948 = vmatpush3.bf16.msra.mxu1 %v2148_v34  ;;  %1929 = vmatprep.subr.bf16.mxu0 %v2246_v1  ;;  %v2199_v34 = vld [vmem:[%s2711_s1 + $0x228] sm:$0xff]  }
  0x41   : > { %1949 = vmatprep.subr.bf16.mxu1 %v2246_v1 }
  0x43   : > { %1930 = vmatpush3.bf16.msra.mxu0 %v2149_v35  ;;  %v2200_v35 = vld [vmem:[%s2714_s4 + $0x28] sm:$0xff]  }
  0x44   : > { %1950 = vmatpush3.bf16.msra.mxu1 %v2150_v36  ;;  %1931 = vmatprep.subr.bf16.mxu0 %v2246_v1  ;;  %v2201_v36 = vld [vmem:[%s2711_s1 + $0x230] sm:$0xff]  }
  0x45   : > { %1951 = vmatprep.subr.bf16.mxu1 %v2246_v1 }
  0x47   : > { %1932 = vmatpush3.bf16.msra.mxu0 %v2151_v38  ;;  %v2205_v38 = vld [vmem:[%s2358_s8 + $0x8] ss:$0 sps:$4 sm:$0x66]   ;;  %s294_s8 = scalar_lea.vmem %s2713_s3, %s1557_s22 }
  0x48   : > { %1952 = vmatpush3.bf16.msra.mxu1 %v2152_v39  ;;  %1957 = vmatprep.subr.bf16.mxu0 %v2246_v1  ;;  %v2203_v39 = vld [vmem:[%s2711_s1 + $0x238] sm:$0xff]  }
  0x49   : > { %1977 = vmatprep.subr.bf16.mxu1 %v2246_v1 }
  0x4a   : > { %1934 = vmatmul.mubr.bf16.vlgmr.msra.gmra.mrb[4].mxu0 %v549_v40  ;;  %v2204_v40 = vld [vmem:[%s2714_s4 + $0x38] sm:$0xff]  }
  0x4b   : > { %1958 = vmatpush3.bf16.msra.mxu0 %v2154_v41  ;;  %1954 = vmatmul.mubr.bf16.vlgmr.msra.gmra.mrb[4].mxu1 %v1620_v42  ;;  %v1229_v41 = vrot.slane %v2205_v38, 1  ;;  %v1328_v42 = vld [vmem:[%s294_s8] sm:$0x3] }
  0x4c   : > { %1978 = vmatpush3.bf16.msra.mxu1 %v2155_v43  ;;  %1959 = vmatprep.subr.bf16.mxu0 %v2246_v1 }
  0x4d   : > { %1979 = vmatprep.subr.bf16.mxu1 %v2246_v1  ;;  %1973 = vmatprep.mubr.msk.bf16.mxu0 %vm2247_vm0, %v2246_v1 }
  0x4e   : > { %1993 = vmatprep.mubr.msk.bf16.mxu1 %vm2247_vm0, %v2246_v1 }
  0x4f   : > { %1960 = vmatpush3.bf16.msra.mxu0 %v2156_v44 }
  0x50   : > { %1980 = vmatpush3.bf16.msra.mxu1 %v2157_v45  ;;  %1961 = vmatprep.subr.bf16.mxu0 %v2246_v1 }
  0x51   : > { %1981 = vmatprep.subr.bf16.mxu1 %v2246_v1 }
  0x53   : > { %1962 = vmatpush3.bf16.msra.mxu0 %v2158_v46 }
  0x54   : > { %1982 = vmatpush3.bf16.msra.mxu1 %v2159_v47  ;;  %1963 = vmatprep.subr.bf16.mxu0 %v2246_v1 }
  0x55   : > { %1983 = vmatprep.subr.bf16.mxu1 %v2246_v1 }
  0x57   : > { %1964 = vmatpush3.bf16.msra.mxu0 %v2160_v48 }
  0x58   : > { %1984 = vmatpush3.bf16.msra.mxu1 %v2161_v49  ;;  %1965 = vmatprep.subr.bf16.mxu0 %v2246_v1 }
  0x59   : > { %1985 = vmatprep.subr.bf16.mxu1 %v2246_v1 }
  0x5b   : > { %1966 = vmatpush3.bf16.msra.mxu0 %v2162_v50 }
  0x5c   : > { %1986 = vmatpush3.bf16.msra.mxu1 %v2163_v51  ;;  %1967 = vmatprep.subr.bf16.mxu0 %v2246_v1 }
  0x5d   : > { %1987 = vmatprep.subr.bf16.mxu1 %v2246_v1 }
  0x5f   : > { %1968 = vmatpush3.bf16.msra.mxu0 %v2164_v53 }
  0x60   : > { %1988 = vmatpush3.bf16.msra.mxu1 %v2165_v54  ;;  %1969 = vmatprep.subr.bf16.mxu0 %v2246_v1 }
  0x61   : > { %1989 = vmatprep.subr.bf16.mxu1 %v2246_v1 }
  0x63   : > { %1970 = vmatpush3.bf16.msra.mxu0 %v2166_v56 }
  0x64   : > { %1990 = vmatpush3.bf16.msra.mxu1 %v2167_v57  ;;  %1971 = vmatprep.subr.bf16.mxu0 %v2246_v1 }
  0x65   : > { %1991 = vmatprep.subr.bf16.mxu1 %v2246_v1 }
  0x67   : > { %1972 = vmatpush3.bf16.msra.mxu0 %v2168_v60 }
  0x68   : > { %1992 = vmatpush3.bf16.msra.mxu1 %v2169_v62  ;;  %1997 = vmatprep.subr.bf16.mxu0 %v2246_v1 }
  0x69   : > { %2017 = vmatprep.subr.bf16.mxu1 %v2246_v1 }
  0x6a   : > { %1974 = vmatmul.mubr.bf16.vlgmr.msra.gmra.mrb[8].mxu0 %v777_v63 }
  0x6b   : > { %1998 = vmatpush3.bf16.msra.mxu0 %v2171_v0  ;;  %1994 = vmatmul.mubr.bf16.vlgmr.msra.gmra.mrb[8].mxu1 %v889_v2 }
  0x6c   : > { %2018 = vmatpush3.bf16.msra.mxu1 %v2173_v3  ;;  %1999 = vmatprep.subr.bf16.mxu0 %v2246_v1 }
  0x6d   : > { %2019 = vmatprep.subr.bf16.mxu1 %v2246_v1  ;;  %2013 = vmatprep.mubr.msk.bf16.mxu0 %vm2247_vm0, %v2246_v1 }
  0x6e   : > { %2033 = vmatprep.mubr.msk.bf16.mxu1 %vm2247_vm0, %v2246_v1 }
  0x6f   : > { %2000 = vmatpush3.bf16.msra.mxu0 %v2174_v4 }
  0x70   : > { %2020 = vmatpush3.bf16.msra.mxu1 %v2175_v5  ;;  %2001 = vmatprep.subr.bf16.mxu0 %v2246_v1 }
  0x71   : > { %2021 = vmatprep.subr.bf16.mxu1 %v2246_v1 }
  0x73   : > { %2002 = vmatpush3.bf16.msra.mxu0 %v2176_v6 }
  0x74   : > { %2022 = vmatpush3.bf16.msra.mxu1 %v2177_v7  ;;  %2003 = vmatprep.subr.bf16.mxu0 %v2246_v1 }
  0x75   : > { %2023 = vmatprep.subr.bf16.mxu1 %v2246_v1 }
  0x77   : > { %2004 = vmatpush3.bf16.msra.mxu0 %v2178_v8 }
  0x78   : > { %2024 = vmatpush3.bf16.msra.mxu1 %v2179_v9  ;;  %2005 = vmatprep.subr.bf16.mxu0 %v2246_v1 }
  0x79   : > { %2025 = vmatprep.subr.bf16.mxu1 %v2246_v1 }
  0x7b   : > { %2006 = vmatpush3.bf16.msra.mxu0 %v2180_v10 }
  0x7c   : > { %2026 = vmatpush3.bf16.msra.mxu1 %v2181_v11  ;;  %2007 = vmatprep.subr.bf16.mxu0 %v2246_v1 }
  0x7d   : > { %2027 = vmatprep.subr.bf16.mxu1 %v2246_v1 }
  0x7f   : > { %2008 = vmatpush3.bf16.msra.mxu0 %v2182_v12 }
  0x80   : > { %2028 = vmatpush3.bf16.msra.mxu1 %v2183_v14  ;;  %2009 = vmatprep.subr.bf16.mxu0 %v2246_v1 }
  0x81   : > { %2029 = vmatprep.subr.bf16.mxu1 %v2246_v1 }
  0x83   : > { %2010 = vmatpush3.bf16.msra.mxu0 %v2184_v15 }
  0x84   : > { %2030 = vmatpush3.bf16.msra.mxu1 %v2185_v17  ;;  %2011 = vmatprep.subr.bf16.mxu0 %v2246_v1 }
  0x85   : > { %2031 = vmatprep.subr.bf16.mxu1 %v2246_v1 }
  0x87   : > { %2012 = vmatpush3.bf16.msra.mxu0 %v2186_v18 }
  0x88   : > { %2032 = vmatpush3.bf16.msra.mxu1 %v2187_v21  ;;  %2037 = vmatprep.subr.bf16.mxu0 %v2246_v1 }
  0x89   : > { %2057 = vmatprep.subr.bf16.mxu1 %v2246_v1 }
  0x8a   : > { %2014 = vmatmul.mubr.bf16.vlgmr.msra.gmra.mrb[12].mxu0 %v1698_v22 }
  0x8b   : > { %2038 = vmatpush3.bf16.msra.mxu0 %v2188_v23  ;;  %2034 = vmatmul.mubr.bf16.vlgmr.msra.gmra.mrb[12].mxu1 %v1117_v24 }
  0x8c   : > { %2058 = vmatpush3.bf16.msra.mxu1 %v2190_v25  ;;  %2039 = vmatprep.subr.bf16.mxu0 %v2246_v1 }
  0x8d   : > { %2059 = vmatprep.subr.bf16.mxu1 %v2246_v1  ;;  %2053 = vmatprep.mubr.msk.bf16.mxu0 %vm2247_vm0, %v2246_v1 }
  0x8e   : > { %2073 = vmatprep.mubr.msk.bf16.mxu1 %vm2247_vm0, %v2246_v1 }
  0x8f   : > { %2040 = vmatpush3.bf16.msra.mxu0 %v2191_v26 }
  0x90   : > { %2060 = vmatpush3.bf16.msra.mxu1 %v2192_v27  ;;  %2041 = vmatprep.subr.bf16.mxu0 %v2246_v1 }
  0x91   : > { %2061 = vmatprep.subr.bf16.mxu1 %v2246_v1 }
  0x93   : > { %2042 = vmatpush3.bf16.msra.mxu0 %v2193_v28  ;;  %v1784_v28 = vld [vmem:[%s2715_s5] ss:$0 sm:$0xff] }
  0x94   : > { %2062 = vmatpush3.bf16.msra.mxu1 %v2194_v29  ;;  %2043 = vmatprep.subr.bf16.mxu0 %v2246_v1 }
  0x95   : > { %2063 = vmatprep.subr.bf16.mxu1 %v2246_v1 }
  0x97   : > { %2044 = vmatpush3.bf16.msra.mxu0 %v2195_v30 }
  0x98   : > { %2064 = vmatpush3.bf16.msra.mxu1 %v2196_v31  ;;  %2045 = vmatprep.subr.bf16.mxu0 %v2246_v1 }
  0x99   : > { %2065 = vmatprep.subr.bf16.mxu1 %v2246_v1 }
  0x9b   : > { %2046 = vmatpush3.bf16.msra.mxu0 %v2197_v32 }
  0x9c   : > { %2066 = vmatpush3.bf16.msra.mxu1 %v2198_v33  ;;  %2047 = vmatprep.subr.bf16.mxu0 %v2246_v1 }
  0x9d   : > { %2067 = vmatprep.subr.bf16.mxu1 %v2246_v1 }
  0x9f   : > { %2048 = vmatpush3.bf16.msra.mxu0 %v2199_v34 }
  0xa0   : > { %2068 = vmatpush3.bf16.msra.mxu1 %v2200_v35  ;;  %2049 = vmatprep.subr.bf16.mxu0 %v2246_v1 }
  0xa1   : > { %2069 = vmatprep.subr.bf16.mxu1 %v2246_v1 }
  0xa3   : > { %2050 = vmatpush3.bf16.msra.mxu0 %v2201_v36 }
  0xa4   : > { %2070 = vmatpush3.bf16.msra.mxu1 %v2202_v37  ;;  %2051 = vmatprep.subr.bf16.mxu0 %v2246_v1 }
  0xa5   : > { %2071 = vmatprep.subr.bf16.mxu1 %v2246_v1 }
  0xa7   : > { %2052 = vmatpush3.bf16.msra.mxu0 %v2203_v39 }
  0xa8   : > { %2072 = vmatpush3.bf16.msra.mxu1 %v2204_v40 }
  0xaa   : > { %2054 = vmatmul.mubr.bf16.vlgmr.msra.gmra.mrb[16].mxu0 %v1229_v41 }
  0xab   : > { %2074 = vmatmul.mubr.bf16.vlgmr.msra.gmra.mrb[16].mxu1 %v1328_v42 }
  0xfd   : > { %v434_v43 = vpop.f32.mrb[0].mxu0 }
  0xfe   : > { %v1895_v44 = vpop.f32.mrb[1].mxu0  ;;  %v522_v45 = vpop.f32.mrb[0].mxu1 }
  0xff   : > { %v523_v46 = vadd.f32 %v522_v45, %v434_v43  ;;  %v437_v47 = vpop.f32.mrb[2].mxu0  ;;  %v1915_v48 = vpop.f32.mrb[1].mxu1 }
 0x100   : > { %v1896_v49 = vpop.f32.mrb[3].mxu0  ;;  %v525_v50 = vpop.f32.mrb[2].mxu1 }
 0x101   : > { %v1916_v1 = vpop.f32.mrb[3].mxu1 }
 0x11d   : > { %v633_v51 = vpop.f32.mrb[4].mxu0 }
 0x11e   : > { %v639_v52 = vadd.f32 %v633_v51, %v523_v46  ;;  %v1935_v53 = vpop.f32.mrb[5].mxu0  ;;  %v743_v54 = vpop.f32.mrb[4].mxu1 }
 0x11f   : > { %v636_v55 = vpop.f32.mrb[6].mxu0  ;;  %v1955_v56 = vpop.f32.mrb[5].mxu1 }
 0x120   : > { %v749_v57 = vadd.f32 %v743_v54, %v639_v52  ;;  %v1936_v58 = vpop.f32.mrb[7].mxu0  ;;  %v746_v59 = vpop.f32.mrb[6].mxu1 }
 0x121   : > { %v1956_v60 = vpop.f32.mrb[7].mxu1 }
 0x13d   : > { %v861_v61 = vpop.f32.mrb[8].mxu0 }
 0x13e   : > { %v867_v62 = vadd.f32 %v861_v61, %v749_v57  ;;  %v1975_v63 = vpop.f32.mrb[9].mxu0  ;;  %v973_v0 = vpop.f32.mrb[8].mxu1 }
 0x13f   : > { %v864_v2 = vpop.f32.mrb[10].mxu0  ;;  %v1995_v3 = vpop.f32.mrb[9].mxu1 }
 0x140   : > { %v979_v4 = vadd.f32 %v973_v0, %v867_v62  ;;  %v1976_v5 = vpop.f32.mrb[11].mxu0  ;;  %v976_v6 = vpop.f32.mrb[10].mxu1 }
 0x141   : > { %v1996_v7 = vpop.f32.mrb[11].mxu1 }
 0x15d   : > { %v1083_v8 = vpop.f32.mrb[12].mxu0 }
 0x15e   : > { %v1089_v9 = vadd.f32 %v1083_v8, %v979_v4  ;;  %v2015_v10 = vpop.f32.mrb[13].mxu0  ;;  %v1201_v11 = vpop.f32.mrb[12].mxu1 }
 0x15f   : > { %v1086_v12 = vpop.f32.mrb[14].mxu0  ;;  %v2035_v13 = vpop.f32.mrb[13].mxu1 }
 0x160   : > { %v1207_v14 = vadd.f32 %v1201_v11, %v1089_v9  ;;  %v2016_v15 = vpop.f32.mrb[15].mxu0  ;;  %v1204_v16 = vpop.f32.mrb[14].mxu1 }
 0x161   : > { %v2036_v17 = vpop.f32.mrb[15].mxu1 }
 0x17d   : > { %v1313_v18 = vpop.f32.mrb[16].mxu0 }
 0x17e   : > { %v1319_v20 = vadd.f32 %v1313_v18, %v1207_v14  ;;  %v2055_v21 = vpop.f32.mrb[17].mxu0  ;;  %v1427_v22 = vpop.f32.mrb[16].mxu1 }
 0x17f   : > { %v1316_v23 = vpop.f32.mrb[18].mxu0  ;;  %v2075_v24 = vpop.f32.mrb[17].mxu1 }
 0x180   : > { %v1327_v25 = vadd.f32 %v1775_v19, %v1319_v20  ;;  %v2056_v26 = vpop.f32.mrb[19].mxu0  ;;  %v1430_v27 = vpop.f32.mrb[18].mxu1 }
 0x181   : > { %v2076_v29 = vpop.f32.mrb[19].mxu1 }
 0x182   : > { %v1433_v30 = vadd.f32 %v1427_v22, %v1327_v25 }
 0x184   : > { %v1441_v31 = vadd.f32 %v1784_v28, %v1433_v30 }
 0x186   : > { %v1442_v32 = vpack.c.bf16 %v1441_v31, %v1441_v31 }
 0x188   : > { %1443 = vst [vmem:[%s302_s18] sm:$0x3] %v1442_v32 }
 0x189 PF: > { %s16_s25 = sadd.s32 1, %s2244_s25   ;;  %s2717_s21 = smov %s2236_s23 }
 0x18a   : > { %p13_p7 = scmp.ge.s32.totalorder %s16_s25, 10   ;;  %s2718_s22 = smov %s2240_s24 }
 0x18b   : > { %s2719_s23 = smov %s2722_s26  ;;  %s2720_s24 = smov %s2726_s27 }
 0x18c   :  { %15 = sbr.rel (!%p13_p7) target bundleno = 3 (0x3), region = 88 }

// kernel: resnet_base_embed.15
= control target key start
LH: loop header
LB: loop body
LE: loop exit
PB: predicated region body
PF: predicated region fallthrough
CT: control target
= control target key end

     0   :  { %s2063_s18 = smov 0   ;;  %s2065_s19 = smov 0   ;;  %s2453_s0 = inlined_call_operand.vmem [shape: bf16[2,2,2,3,3,128], index: 0, kind: input, shape index: {}]   ;;  %s2454_s1 = inlined_call_operand.vmem [shape: bf16[3,3,128,128], index: 1, kind: input, shape index: {}]   ;;  %s2455_s2 = inlined_call_operand.vmem [shape: f32[1,128], index: 2, kind: input, shape index: {}]   ;;  %s2456_s3 = inlined_call_operand.vmem [shape: f32[1,128], index: 3, kind: input, shape index: {}]   ;;  %s2457_s4 = inlined_call_operand.vmem [shape: f32[1,128], index: 4, kind: input, shape index: {}]   ;;  %s2458_s5 = inlined_call_operand.vmem [shape: bf16[2,2,2,128], index: 5, kind: output, shape index: {}]  }
   0x1   :  { %s2067_s20 = smov 0   ;;  %s2069_s21 = smov 0  }
   0x2   :  { %s2071_s22 = smov 0  }
   0x3 LB: > { %s24_s23 = sadd.s32 1, %s2021_s20  ;;  %s27_s24 = sadd.s32 1, %s2025_s21  ;;  %s2029_s22 = sphi %s2071_s22, %s15_s22   ;;  %s2025_s21 = sphi %s2069_s21, %s2462_s21   ;;  %s2021_s20 = sphi %s2067_s20, %s2461_s20   ;;  %s2017_s19 = sphi %s2065_s19, %s2460_s19   ;;  %s2013_s18 = sphi %s2063_s18, %s2459_s18  }
   0x4   : > { %p25_p0 = scmp.ge.s32.totalorder %s24_s23, 2  ;;  %p1391_p1 = scmp.ge.s32.totalorder %s2029_s22, 1 }
   0x5   : > { %p201_p2 = scmp.lt.s32.totalorder %s2029_s22, 5 }
   0x6   : > { %s2464_s23 = smov (%p25_p0, %s24_s23), 0  ;;  %s2466_s24 = smov (!%p25_p0, %s27_s24), %s2025_s21 }
   0x7   : > { %p202_p3 = pnand %p1391_p1, %p201_p2  ;;  %p29_p4 = scmp.ge.s32.totalorder %s2466_s24, 2 }
   0x8   : > { %v1919_v0 = vld [vmem:[%s2454_s1 + $0x40] sm:$0xff] (!%p202_p3)   ;;  %v2031_v1 = vmov (!%p202_p3), 0.0   ;;  %v1921_v3 = vld [vmem:[%s2454_s1 + $0x48] sm:$0xff] (!%p202_p3)   ;;  %vm2032_vm0 = vmmov (!%p202_p3), 0   ;;  %v1923_v5 = vld [vmem:[%s2454_s1 + $0x50] sm:$0xff] (!%p202_p3)   ;;  %p231_p5 = scmp.lt.s32.totalorder (!%p202_p3), %s2017_s19, 1 }
   0x9   : > { %s2468_s24 = smov (%p29_p4, %s2466_s24), 0  ;;  %205 = sbr.rel (%p202_p3) target bundleno = 395 (0x18b), region = 40 }
   0xa   : > { %1696 = vmatprep.subr.bf16.mxu0 (!%p202_p3), %v2031_v1  ;;  %1716 = vmatprep.subr.bf16.mxu1 (!%p202_p3), %v2031_v1  ;;  %v1920_v2 = vld [vmem:[%s2454_s1] sm:$0xff] (!%p202_p3)   ;;  %v1922_v4 = vld [vmem:[%s2454_s1 + $0x8] sm:$0xff] (!%p202_p3)   ;;  %v1924_v6 = vld [vmem:[%s2454_s1 + $0x10] sm:$0xff] (!%p202_p3)   ;;  %s1394_s12 = sshll.u32 (!%p202_p3), %s2013_s18, 1  ;;  %p238_p6 = scmp.lt.s32.totalorder (!%p202_p3), %s2013_s18, 1 }
   0xb   : > { %1697 = vmatpush3.bf16.msra.mxu0 (!%p202_p3), %v1919_v0  ;;  %1712 = vmatprep.mubr.msk.bf16.mxu0 (!%p202_p3), %vm2032_vm0, %v2031_v1  ;;  %v1925_v7 = vld [vmem:[%s2454_s1 + $0x58] sm:$0xff] (!%p202_p3)   ;;  %v1927_v9 = vld [vmem:[%s2454_s1 + $0x60] sm:$0xff] (!%p202_p3)   ;;  %v1929_v11 = vld [vmem:[%s2454_s1 + $0x68] sm:$0xff] (!%p202_p3)  }
   0xc   : > { %1717 = vmatpush3.bf16.msra.mxu1 (!%p202_p3), %v1920_v2  ;;  %1698 = vmatprep.subr.bf16.mxu0 (!%p202_p3), %v2031_v1  ;;  %v1926_v8 = vld [vmem:[%s2454_s1 + $0x18] sm:$0xff] (!%p202_p3)   ;;  %v1928_v10 = vld [vmem:[%s2454_s1 + $0x20] sm:$0xff] (!%p202_p3)   ;;  %v1930_v12 = vld [vmem:[%s2454_s1 + $0x28] sm:$0xff] (!%p202_p3)  }
   0xd   : > { %1718 = vmatprep.subr.bf16.mxu1 (!%p202_p3), %v2031_v1  ;;  %1732 = vmatprep.mubr.msk.bf16.mxu1 (!%p202_p3), %vm2032_vm0, %v2031_v1  ;;  %v1931_v13 = vld [vmem:[%s2454_s1 + $0x70] sm:$0xff] (!%p202_p3)   ;;  %v1933_v15 = vld [vmem:[%s2454_s1 + $0x78] sm:$0xff] (!%p202_p3)   ;;  %v1935_v19 = vld [vmem:[%s2454_s1 + $0x80] sm:$0xff] (!%p202_p3)  }
   0xe   : > { %v1932_v14 = vld [vmem:[%s2454_s1 + $0x30] sm:$0xff] (!%p202_p3)   ;;  %v1934_v16 = vld [vmem:[%s2454_s1 + $0x38] sm:$0xff] (!%p202_p3)   ;;  %v1936_v20 = vld [vmem:[%s2454_s1 + $0xc0] sm:$0xff] (!%p202_p3)  }
   0xf   : > { %1699 = vmatpush3.bf16.msra.mxu0 (!%p202_p3), %v1921_v3  ;;  %v1937_v21 = vld [vmem:[%s2454_s1 + $0x88] sm:$0xff] (!%p202_p3)   ;;  %v1939_v23 = vld [vmem:[%s2454_s1 + $0x90] sm:$0xff] (!%p202_p3)   ;;  %v1941_v25 = vld [vmem:[%s2454_s1 + $0x98] sm:$0xff] (!%p202_p3)  }
  0x10   : > { %1719 = vmatpush3.bf16.msra.mxu1 %v1922_v4  ;;  %1700 = vmatprep.subr.bf16.mxu0 %v2031_v1  ;;  %s2470_s19 = smov (!%p231_p5, %s2017_s19), 1  ;;  %v1938_v22 = vld [vmem:[%s2454_s1 + $0xc8] sm:$0xff]   ;;  %v1940_v24 = vld [vmem:[%s2454_s1 + $0xd0] sm:$0xff]   ;;  %v1942_v26 = vld [vmem:[%s2454_s1 + $0xd8] sm:$0xff]   ;;  %s2472_s18 = smov (!%p238_p6, %s2013_s18), 1 }
  0x11   : > { %1720 = vmatprep.subr.bf16.mxu1 %v2031_v1  ;;  %s1876_s29 = smul.u32 24, %s2470_s19  ;;  %v1943_v27 = vld [vmem:[%s2454_s1 + $0xa0] sm:$0xff]   ;;  %v1945_v30 = vld [vmem:[%s2454_s1 + $0xa8] sm:$0xff]   ;;  %v1947_v33 = vld [vmem:[%s2454_s1 + $0xb0] sm:$0xff]   ;;  %s1393_s16 = sshll.u32 %s2470_s19, 1 }
  0x12   : > { %v1944_v28 = vld [vmem:[%s2454_s1 + $0xe0] sm:$0xff]   ;;  %v1946_v31 = vld [vmem:[%s2454_s1 + $0xe8] sm:$0xff]   ;;  %v1948_v34 = vld [vmem:[%s2454_s1 + $0xf0] sm:$0xff]   ;;  %s241_s26 = sadd.s32 %s1393_s16, %s2472_s18 }
  0x13   : > { %1701 = vmatpush3.bf16.msra.mxu0 %v1923_v5  ;;  %s235_s11 = scalar_lea.vmem %s2453_s0, %s1876_s29  ;;  %v1949_v37 = vld [vmem:[%s2454_s1 + $0xb8] sm:$0xff]   ;;  %v1951_v40 = vld [vmem:[%s2454_s1 + $0x100] sm:$0xff]   ;;  %v1953_v43 = vld [vmem:[%s2454_s1 + $0x108] sm:$0xff]   ;;  %s242_s29 = scalar_lea.vmem %s2458_s5, %s241_s26 }
  0x14   : > { %1721 = vmatpush3.bf16.msra.mxu1 %v1924_v6  ;;  %1702 = vmatprep.subr.bf16.mxu0 %v2031_v1  ;;  %s2166_s15 = scalar_lea.vmem %s235_s11, %s1394_s12  ;;  %v1950_v38 = vld [vmem:[%s2454_s1 + $0xf8] sm:$0xff]   ;;  %v1952_v42 = vld [vmem:[%s2454_s1 + $0x140] sm:$0xff]   ;;  %v1954_v44 = vld [vmem:[%s2454_s1 + $0x148] sm:$0xff]  }
  0x15   : > { %1722 = vmatprep.subr.bf16.mxu1 %v2031_v1  ;;  %v1396_v17 = vld [vmem:[%s2166_s15 + $0x6] sm:$0x1]  ;;  %v246_v18 = vld [vmem:[%s2166_s15] sm:$0x1]  ;;  %v1455_v41 = vld [vmem:[%s2166_s15 + $0xc] sm:$0x1] }
  0x16   : > { %v1445_v29 = vld.sshfl [vmem:[%s2166_s15] sm:$0x3 pattern:$0x76325410]  ;;  %v1955_v45 = vld [vmem:[%s2454_s1 + $0x110] sm:$0xff]   ;;  %v1957_v47 = vld [vmem:[%s2454_s1 + $0x118] sm:$0xff]  }
  0x17   : > { %1703 = vmatpush3.bf16.msra.mxu0 %v1925_v7  ;;  %v489_v32 = vshll.u32 %v1445_v29, 16  ;;  %v487_v35 = vshrl.u32 %v1445_v29, 16  ;;  %v1956_v46 = vld [vmem:[%s2454_s1 + $0x150] sm:$0xff]   ;;  %v1958_v48 = vld [vmem:[%s2454_s1 + $0x158] sm:$0xff]   ;;  %v1959_v49 = vld [vmem:[%s2454_s1 + $0x120] sm:$0xff]  }
  0x18   : > { %1723 = vmatpush3.bf16.msra.mxu1 %v1926_v8  ;;  %1704 = vmatprep.subr.bf16.mxu0 %v2031_v1  ;;  %v1960_v50 = vld [vmem:[%s2454_s1 + $0x160] sm:$0xff]   ;;  %v1961_v51 = vld [vmem:[%s2454_s1 + $0x128] sm:$0xff]   ;;  %v1963_v54 = vld [vmem:[%s2454_s1 + $0x130] sm:$0xff]  }
  0x19   : > { %1724 = vmatprep.subr.bf16.mxu1 %v2031_v1  ;;  %v491_v36 = vrot.slane %v489_v32, 1  ;;  %v1962_v52 = vld [vmem:[%s2454_s1 + $0x168] sm:$0xff]   ;;  %v1964_v56 = vld [vmem:[%s2454_s1 + $0x170] sm:$0xff]   ;;  %v1965_v57 = vld [vmem:[%s2454_s1 + $0x138] sm:$0xff]  }
  0x1a   : > { %v1523_v53 = vld.sshfl [vmem:[%s2166_s15 + $0xc] sm:$0x3 pattern:$0x76325410]  ;;  %v1966_v60 = vld [vmem:[%s2454_s1 + $0x178] sm:$0xff]   ;;  %v1967_v62 = vld [vmem:[%s2454_s1 + $0x180] sm:$0xff]  }
  0x1b   : > { %1705 = vmatpush3.bf16.msra.mxu0 %v1927_v9  ;;  %v492_v39 = vor.u32 %v491_v36, %v487_v35  ;;  %v832_v55 = vshll.u32 %v1523_v53, 16  ;;  %v830_v58 = vshrl.u32 %v1523_v53, 16  ;;  %v1481_v61 = vld [vmem:[%s2166_s15 + $0x12] sm:$0x1]  ;;  %v1968_v0 = vld [vmem:[%s2454_s1 + $0x1c0] sm:$0xff]   ;;  %v1969_v2 = vld [vmem:[%s2454_s1 + $0x188] sm:$0xff]  }
  0x1c   : > { %1725 = vmatpush3.bf16.msra.mxu1 %v1928_v10  ;;  %1706 = vmatprep.subr.bf16.mxu0 %v2031_v1  ;;  %v1970_v3 = vld [vmem:[%s2454_s1 + $0x1c8] sm:$0xff]   ;;  %v1971_v4 = vld [vmem:[%s2454_s1 + $0x190] sm:$0xff]   ;;  %v1973_v6 = vld [vmem:[%s2454_s1 + $0x198] sm:$0xff]  }
  0x1d   : > { %1726 = vmatprep.subr.bf16.mxu1 %v2031_v1  ;;  %v834_v59 = vrot.slane %v832_v55, 1  ;;  %v1972_v5 = vld [vmem:[%s2454_s1 + $0x1d0] sm:$0xff]   ;;  %v1974_v7 = vld [vmem:[%s2454_s1 + $0x1d8] sm:$0xff]   ;;  %v1975_v8 = vld [vmem:[%s2454_s1 + $0x1a0] sm:$0xff]  }
  0x1e   : > { %v1976_v9 = vld [vmem:[%s2454_s1 + $0x1e0] sm:$0xff]   ;;  %v1977_v10 = vld [vmem:[%s2454_s1 + $0x1a8] sm:$0xff]   ;;  %v1990_v29 = vld [vmem:[%s2454_s1 + $0x238] sm:$0xff]  }
  0x1f   : > { %1707 = vmatpush3.bf16.msra.mxu0 %v1929_v11  ;;  %v835_v63 = vor.u32 %v834_v59, %v830_v58  ;;  %v1978_v11 = vld [vmem:[%s2454_s1 + $0x1e8] sm:$0xff]  }
  0x20   : > { %1727 = vmatpush3.bf16.msra.mxu1 %v1930_v12  ;;  %1708 = vmatprep.subr.bf16.mxu0 %v2031_v1  ;;  %v1979_v12 = vld [vmem:[%s2454_s1 + $0x1b0] sm:$0xff]  }
  0x21   : > { %1728 = vmatprep.subr.bf16.mxu1 %v2031_v1 }
  0x23   : > { %1709 = vmatpush3.bf16.msra.mxu0 %v1931_v13  ;;  %v1980_v13 = vld [vmem:[%s2454_s1 + $0x1f0] sm:$0xff]  }
  0x24   : > { %1729 = vmatpush3.bf16.msra.mxu1 %v1932_v14  ;;  %1710 = vmatprep.subr.bf16.mxu0 %v2031_v1  ;;  %v1981_v14 = vld [vmem:[%s2454_s1 + $0x1b8] sm:$0xff]  }
  0x25   : > { %1730 = vmatprep.subr.bf16.mxu1 %v2031_v1 }
  0x27   : > { %1711 = vmatpush3.bf16.msra.mxu0 %v1933_v15  ;;  %v1982_v15 = vld [vmem:[%s2454_s1 + $0x1f8] sm:$0xff]  }
  0x28   : > { %1731 = vmatpush3.bf16.msra.mxu1 %v1934_v16  ;;  %1736 = vmatprep.subr.bf16.mxu0 %v2031_v1  ;;  %v1533_v16 = vld [vmem:[%s2166_s15 + $0x2] sm:$0x1] }
  0x29   : > { %1756 = vmatprep.subr.bf16.mxu1 %v2031_v1 }
  0x2a   : > { %1713 = vmatmul.mubr.bf16.vlgmr.msra.gmra.mrb[0].mxu0 %v1396_v17  ;;  %v1983_v17 = vld [vmem:[%s2454_s1 + $0x200] sm:$0xff]  }
  0x2b   : > { %1733 = vmatmul.mubr.bf16.vlgmr.msra.gmra.mrb[0].mxu1 %v246_v18  ;;  %1737 = vmatpush3.bf16.msra.mxu0 %v1935_v19  ;;  %v1559_v18 = vld [vmem:[%s2166_s15 + $0x8] sm:$0x1] }
  0x2c   : > { %1757 = vmatpush3.bf16.msra.mxu1 %v1936_v20  ;;  %1738 = vmatprep.subr.bf16.mxu0 %v2031_v1  ;;  %v1984_v19 = vld [vmem:[%s2454_s1 + $0x208] sm:$0xff]   ;;  %v1985_v20 = vld [vmem:[%s2454_s1 + $0x210] sm:$0xff]  }
  0x2d   : > { %1758 = vmatprep.subr.bf16.mxu1 %v2031_v1  ;;  %1752 = vmatprep.mubr.msk.bf16.mxu0 %vm2032_vm0, %v2031_v1 }
  0x2e   : > { %1772 = vmatprep.mubr.msk.bf16.mxu1 %vm2032_vm0, %v2031_v1 }
  0x2f   : > { %1739 = vmatpush3.bf16.msra.mxu0 %v1937_v21  ;;  %v1986_v21 = vld [vmem:[%s2454_s1 + $0x218] sm:$0xff]  }
  0x30   : > { %1759 = vmatpush3.bf16.msra.mxu1 %v1938_v22  ;;  %1740 = vmatprep.subr.bf16.mxu0 %v2031_v1  ;;  %v1987_v22 = vld [vmem:[%s2454_s1 + $0x220] sm:$0xff]  }
  0x31   : > { %1760 = vmatprep.subr.bf16.mxu1 %v2031_v1 }
  0x33   : > { %1741 = vmatpush3.bf16.msra.mxu0 %v1939_v23  ;;  %v1988_v23 = vld [vmem:[%s2454_s1 + $0x228] sm:$0xff]  }
  0x34   : > { %1761 = vmatpush3.bf16.msra.mxu1 %v1940_v24  ;;  %1742 = vmatprep.subr.bf16.mxu0 %v2031_v1  ;;  %v1601_v24 = vld.sshfl [vmem:[%s2166_s15 + $0x2] sm:$0x3 pattern:$0x76325410] }
  0x35   : > { %1762 = vmatprep.subr.bf16.mxu1 %v2031_v1 }
  0x37   : > { %1743 = vmatpush3.bf16.msra.mxu0 %v1941_v25  ;;  %v1175_v25 = vshll.u32 %v1601_v24, 16 }
  0x38   : > { %1763 = vmatpush3.bf16.msra.mxu1 %v1942_v26  ;;  %1744 = vmatprep.subr.bf16.mxu0 %v2031_v1  ;;  %v1989_v26 = vld [vmem:[%s2454_s1 + $0x230] sm:$0xff]  }
  0x39   : > { %1764 = vmatprep.subr.bf16.mxu1 %v2031_v1 }
  0x3b   : > { %1745 = vmatpush3.bf16.msra.mxu0 %v1943_v27  ;;  %v1173_v27 = vshrl.u32 %v1601_v24, 16 }
  0x3c   : > { %1765 = vmatpush3.bf16.msra.mxu1 %v1944_v28  ;;  %1746 = vmatprep.subr.bf16.mxu0 %v2031_v1  ;;  %v1177_v28 = vrot.slane %v1175_v25, 1 }
  0x3d   : > { %1766 = vmatprep.subr.bf16.mxu1 %v2031_v1 }
  0x3f   : > { %1747 = vmatpush3.bf16.msra.mxu0 %v1945_v30  ;;  %v1178_v30 = vor.u32 %v1177_v28, %v1173_v27 }
  0x40   : > { %1767 = vmatpush3.bf16.msra.mxu1 %v1946_v31  ;;  %1748 = vmatprep.subr.bf16.mxu0 %v2031_v1 }
  0x41   : > { %1768 = vmatprep.subr.bf16.mxu1 %v2031_v1 }
  0x43   : > { %1749 = vmatpush3.bf16.msra.mxu0 %v1947_v33 }
  0x44   : > { %1769 = vmatpush3.bf16.msra.mxu1 %v1948_v34  ;;  %1750 = vmatprep.subr.bf16.mxu0 %v2031_v1 }
  0x45   : > { %1770 = vmatprep.subr.bf16.mxu1 %v2031_v1 }
  0x47   : > { %1751 = vmatpush3.bf16.msra.mxu0 %v1949_v37 }
  0x48   : > { %1771 = vmatpush3.bf16.msra.mxu1 %v1950_v38  ;;  %1776 = vmatprep.subr.bf16.mxu0 %v2031_v1 }
  0x49   : > { %1796 = vmatprep.subr.bf16.mxu1 %v2031_v1 }
  0x4a   : > { %1753 = vmatmul.mubr.bf16.vlgmr.msra.gmra.mrb[4].mxu0 %v492_v39 }
  0x4b   : > { %1777 = vmatpush3.bf16.msra.mxu0 %v1951_v40  ;;  %1773 = vmatmul.mubr.bf16.vlgmr.msra.gmra.mrb[4].mxu1 %v1455_v41 }
  0x4c   : > { %1797 = vmatpush3.bf16.msra.mxu1 %v1952_v42  ;;  %1778 = vmatprep.subr.bf16.mxu0 %v2031_v1 }
  0x4d   : > { %1798 = vmatprep.subr.bf16.mxu1 %v2031_v1  ;;  %1792 = vmatprep.mubr.msk.bf16.mxu0 %vm2032_vm0, %v2031_v1 }
  0x4e   : > { %1812 = vmatprep.mubr.msk.bf16.mxu1 %vm2032_vm0, %v2031_v1 }
  0x4f   : > { %1779 = vmatpush3.bf16.msra.mxu0 %v1953_v43 }
  0x50   : > { %1799 = vmatpush3.bf16.msra.mxu1 %v1954_v44  ;;  %1780 = vmatprep.subr.bf16.mxu0 %v2031_v1 }
  0x51   : > { %1800 = vmatprep.subr.bf16.mxu1 %v2031_v1 }
  0x53   : > { %1781 = vmatpush3.bf16.msra.mxu0 %v1955_v45 }
  0x54   : > { %1801 = vmatpush3.bf16.msra.mxu1 %v1956_v46  ;;  %1782 = vmatprep.subr.bf16.mxu0 %v2031_v1 }
  0x55   : > { %1802 = vmatprep.subr.bf16.mxu1 %v2031_v1 }
  0x57   : > { %1783 = vmatpush3.bf16.msra.mxu0 %v1957_v47 }
  0x58   : > { %1803 = vmatpush3.bf16.msra.mxu1 %v1958_v48  ;;  %1784 = vmatprep.subr.bf16.mxu0 %v2031_v1 }
  0x59   : > { %1804 = vmatprep.subr.bf16.mxu1 %v2031_v1 }
  0x5b   : > { %1785 = vmatpush3.bf16.msra.mxu0 %v1959_v49 }
  0x5c   : > { %1805 = vmatpush3.bf16.msra.mxu1 %v1960_v50  ;;  %1786 = vmatprep.subr.bf16.mxu0 %v2031_v1 }
  0x5d   : > { %1806 = vmatprep.subr.bf16.mxu1 %v2031_v1 }
  0x5f   : > { %1787 = vmatpush3.bf16.msra.mxu0 %v1961_v51 }
  0x60   : > { %1807 = vmatpush3.bf16.msra.mxu1 %v1962_v52  ;;  %1788 = vmatprep.subr.bf16.mxu0 %v2031_v1 }
  0x61   : > { %1808 = vmatprep.subr.bf16.mxu1 %v2031_v1 }
  0x63   : > { %1789 = vmatpush3.bf16.msra.mxu0 %v1963_v54 }
  0x64   : > { %1809 = vmatpush3.bf16.msra.mxu1 %v1964_v56  ;;  %1790 = vmatprep.subr.bf16.mxu0 %v2031_v1 }
  0x65   : > { %1810 = vmatprep.subr.bf16.mxu1 %v2031_v1 }
  0x67   : > { %1791 = vmatpush3.bf16.msra.mxu0 %v1965_v57 }
  0x68   : > { %1811 = vmatpush3.bf16.msra.mxu1 %v1966_v60  ;;  %1816 = vmatprep.subr.bf16.mxu0 %v2031_v1 }
  0x69   : > { %1836 = vmatprep.subr.bf16.mxu1 %v2031_v1 }
  0x6a   : > { %1793 = vmatmul.mubr.bf16.vlgmr.msra.gmra.mrb[8].mxu0 %v1481_v61 }
  0x6b   : > { %1817 = vmatpush3.bf16.msra.mxu0 %v1967_v62  ;;  %1813 = vmatmul.mubr.bf16.vlgmr.msra.gmra.mrb[8].mxu1 %v835_v63 }
  0x6c   : > { %1837 = vmatpush3.bf16.msra.mxu1 %v1968_v0  ;;  %1818 = vmatprep.subr.bf16.mxu0 %v2031_v1 }
  0x6d   : > { %1838 = vmatprep.subr.bf16.mxu1 %v2031_v1  ;;  %1832 = vmatprep.mubr.msk.bf16.mxu0 %vm2032_vm0, %v2031_v1 }
  0x6e   : > { %1852 = vmatprep.mubr.msk.bf16.mxu1 %vm2032_vm0, %v2031_v1 }
  0x6f   : > { %1819 = vmatpush3.bf16.msra.mxu0 %v1969_v2 }
  0x70   : > { %1839 = vmatpush3.bf16.msra.mxu1 %v1970_v3  ;;  %1820 = vmatprep.subr.bf16.mxu0 %v2031_v1 }
  0x71   : > { %1840 = vmatprep.subr.bf16.mxu1 %v2031_v1 }
  0x73   : > { %1821 = vmatpush3.bf16.msra.mxu0 %v1971_v4 }
  0x74   : > { %1841 = vmatpush3.bf16.msra.mxu1 %v1972_v5  ;;  %1822 = vmatprep.subr.bf16.mxu0 %v2031_v1 }
  0x75   : > { %1842 = vmatprep.subr.bf16.mxu1 %v2031_v1 }
  0x77   : > { %1823 = vmatpush3.bf16.msra.mxu0 %v1973_v6 }
  0x78   : > { %1843 = vmatpush3.bf16.msra.mxu1 %v1974_v7  ;;  %1824 = vmatprep.subr.bf16.mxu0 %v2031_v1  ;;  %v1610_v7 = vld [vmem:[%s2455_s2] ss:$0 sm:$0xff] }
  0x79   : > { %1844 = vmatprep.subr.bf16.mxu1 %v2031_v1 }
  0x7b   : > { %1825 = vmatpush3.bf16.msra.mxu0 %v1975_v8 }
  0x7c   : > { %1845 = vmatpush3.bf16.msra.mxu1 %v1976_v9  ;;  %1826 = vmatprep.subr.bf16.mxu0 %v2031_v1 }
  0x7d   : > { %1846 = vmatprep.subr.bf16.mxu1 %v2031_v1 }
  0x7f   : > { %1827 = vmatpush3.bf16.msra.mxu0 %v1977_v10  ;;  %v1611_v10 = vld [vmem:[%s2456_s3] ss:$0 sm:$0xff] }
  0x80   : > { %1847 = vmatpush3.bf16.msra.mxu1 %v1978_v11  ;;  %1828 = vmatprep.subr.bf16.mxu0 %v2031_v1 }
  0x81   : > { %1848 = vmatprep.subr.bf16.mxu1 %v2031_v1 }
  0x83   : > { %1829 = vmatpush3.bf16.msra.mxu0 %v1979_v12 }
  0x84   : > { %1849 = vmatpush3.bf16.msra.mxu1 %v1980_v13  ;;  %1830 = vmatprep.subr.bf16.mxu0 %v2031_v1 }
  0x85   : > { %1850 = vmatprep.subr.bf16.mxu1 %v2031_v1 }
  0x87   : > { %1831 = vmatpush3.bf16.msra.mxu0 %v1981_v14  ;;  %v1612_v14 = vld [vmem:[%s2457_s4] ss:$0 sm:$0xff] }
  0x88   : > { %1851 = vmatpush3.bf16.msra.mxu1 %v1982_v15  ;;  %1856 = vmatprep.subr.bf16.mxu0 %v2031_v1 }
  0x8a   : > { %1833 = vmatmul.mubr.bf16.vlgmr.msra.gmra.mrb[12].mxu0 %v1533_v16 }
  0x8b   : > { %1857 = vmatpush3.bf16.msra.mxu0 %v1983_v17  ;;  %1853 = vmatmul.mubr.bf16.vlgmr.msra.gmra.mrb[12].mxu1 %v1559_v18 }
  0x8c   : > { %1858 = vmatprep.subr.bf16.mxu0 %v2031_v1  ;;  %1872 = vmatprep.mubr.msk.bf16.mxu0 %vm2032_vm0, %v2031_v1 }
  0x8f   : > { %1859 = vmatpush3.bf16.msra.mxu0 %v1984_v19 }
  0x90   : > { %1860 = vmatprep.subr.bf16.mxu0 %v2031_v1 }
  0x93   : > { %1861 = vmatpush3.bf16.msra.mxu0 %v1985_v20 }
  0x94   : > { %1862 = vmatprep.subr.bf16.mxu0 %v2031_v1 }
  0x97   : > { %1863 = vmatpush3.bf16.msra.mxu0 %v1986_v21 }
  0x98   : > { %1864 = vmatprep.subr.bf16.mxu0 %v2031_v1 }
  0x9b   : > { %1865 = vmatpush3.bf16.msra.mxu0 %v1987_v22 }
  0x9c   : > { %1866 = vmatprep.subr.bf16.mxu0 %v2031_v1 }
  0x9f   : > { %1867 = vmatpush3.bf16.msra.mxu0 %v1988_v23 }
  0xa0   : > { %1868 = vmatprep.subr.bf16.mxu0 %v2031_v1 }
  0xa3   : > { %1869 = vmatpush3.bf16.msra.mxu0 %v1989_v26 }
  0xa4   : > { %1870 = vmatprep.subr.bf16.mxu0 %v2031_v1 }
  0xa7   : > { %1871 = vmatpush3.bf16.msra.mxu0 %v1990_v29 }
  0xaa   : > { %1873 = vmatmul.mubr.bf16.vlgmr.msra.gmra.mrb[16].mxu0 %v1178_v30 }
  0xfd   : > { %v366_v31 = vpop.f32.mrb[0].mxu0 }
  0xfe   : > { %v1714_v32 = vpop.f32.mrb[1].mxu0  ;;  %v454_v33 = vpop.f32.mrb[0].mxu1 }
  0xff   : > { %v455_v34 = vadd.f32 %v454_v33, %v366_v31  ;;  %v369_v35 = vpop.f32.mrb[2].mxu0  ;;  %v1734_v36 = vpop.f32.mrb[1].mxu1 }
 0x100   : > { %v1715_v37 = vpop.f32.mrb[3].mxu0  ;;  %v457_v38 = vpop.f32.mrb[2].mxu1 }
 0x101   : > { %v1735_v39 = vpop.f32.mrb[3].mxu1 }
 0x11d   : > { %v576_v40 = vpop.f32.mrb[4].mxu0 }
 0x11e   : > { %v582_v41 = vadd.f32 %v576_v40, %v455_v34  ;;  %v1754_v42 = vpop.f32.mrb[5].mxu0  ;;  %v686_v43 = vpop.f32.mrb[4].mxu1 }
 0x11f   : > { %v579_v44 = vpop.f32.mrb[6].mxu0  ;;  %v1774_v45 = vpop.f32.mrb[5].mxu1 }
 0x120   : > { %v692_v46 = vadd.f32 %v686_v43, %v582_v41  ;;  %v1755_v1 = vpop.f32.mrb[7].mxu0  ;;  %v689_v47 = vpop.f32.mrb[6].mxu1 }
 0x121   : > { %v1775_v48 = vpop.f32.mrb[7].mxu1 }
 0x13d   : > { %v796_v49 = vpop.f32.mrb[8].mxu0 }
 0x13e   : > { %v802_v50 = vadd.f32 %v796_v49, %v692_v46  ;;  %v1794_v51 = vpop.f32.mrb[9].mxu0  ;;  %v919_v52 = vpop.f32.mrb[8].mxu1 }
 0x13f   : > { %v799_v53 = vpop.f32.mrb[10].mxu0  ;;  %v1814_v54 = vpop.f32.mrb[9].mxu1 }
 0x140   : > { %v925_v55 = vadd.f32 %v919_v52, %v802_v50  ;;  %v1795_v56 = vpop.f32.mrb[11].mxu0  ;;  %v922_v57 = vpop.f32.mrb[10].mxu1 }
 0x141   : > { %v1815_v58 = vpop.f32.mrb[11].mxu1 }
 0x15d   : > { %v1029_v59 = vpop.f32.mrb[12].mxu0 }
 0x15e   : > { %v1035_v60 = vadd.f32 %v1029_v59, %v925_v55  ;;  %v1834_v61 = vpop.f32.mrb[13].mxu0  ;;  %v1139_v62 = vpop.f32.mrb[12].mxu1 }
 0x15f   : > { %v1032_v63 = vpop.f32.mrb[14].mxu0  ;;  %v1854_v0 = vpop.f32.mrb[13].mxu1 }
 0x160   : > { %v1145_v2 = vadd.f32 %v1139_v62, %v1035_v60  ;;  %v1835_v3 = vpop.f32.mrb[15].mxu0  ;;  %v1142_v4 = vpop.f32.mrb[14].mxu1 }
 0x161   : > { %v1855_v5 = vpop.f32.mrb[15].mxu1 }
 0x17d   : > { %v1262_v6 = vpop.f32.mrb[16].mxu0 }
 0x17e   : > { %v1268_v8 = vadd.f32 %v1262_v6, %v1145_v2  ;;  %v1874_v9 = vpop.f32.mrb[17].mxu0 }
 0x17f   : > { %v1265_v11 = vpop.f32.mrb[18].mxu0 }
 0x180   : > { %v1276_v12 = vadd.f32 %v1610_v7, %v1268_v8  ;;  %v1875_v13 = vpop.f32.mrb[19].mxu0 }
 0x182   : > { %v1284_v15 = vmul.f32 %v1611_v10, %v1276_v12 }
 0x184   : > { %v1292_v16 = vadd.f32 %v1612_v14, %v1284_v15 }
 0x186   : > { %v1293_v17 = vmax.f32 %v1292_v16, 0.0 }
 0x188   : > { %v1294_v18 = vpack.c.bf16 %v1293_v17, %v1293_v17 }
 0x18a   : > { %1295 = vst [vmem:[%s242_s29] sm:$0x1] %v1294_v18 }
 0x18b PF: > { %s15_s22 = sadd.s32 1, %s2029_s22   ;;  %s2459_s18 = smov %s2021_s20 }
 0x18c   : > { %p12_p7 = scmp.ge.s32.totalorder %s15_s22, 6   ;;  %s2460_s19 = smov %s2025_s21 }
 0x18d   : > { %s2461_s20 = smov %s2464_s23  ;;  %s2462_s21 = smov %s2468_s24 }
 0x18e   :  { %14 = sbr.rel (!%p12_p7) target bundleno = 3 (0x3), region = 84 }

// kernel: resnet_base_embed.16
= control target key start
LH: loop header
LB: loop body
LE: loop exit
PB: predicated region body
PF: predicated region fallthrough
CT: control target
= control target key end

     0   :  { %s2292_s21 = smov 0   ;;  %s2294_s22 = smov 0   ;;  %s2716_s0 = inlined_call_operand.vmem [shape: bf16[2,1,1,4,4,128], index: 0, kind: input, shape index: {}]   ;;  %s2717_s1 = inlined_call_operand.vmem [shape: bf16[3,3,128,128], index: 1, kind: input, shape index: {}]   ;;  %s2718_s2 = inlined_call_operand.vmem [shape: f32[1,128], index: 2, kind: input, shape index: {}]   ;;  %s2719_s3 = inlined_call_operand.vmem [shape: bf16[2,2,2,128], index: 3, kind: input, shape index: {}]   ;;  %s2720_s4 = inlined_call_operand.vmem [shape: bf16[128,128], index: 4, kind: input, shape index: {}]   ;;  %s2721_s5 = inlined_call_operand.vmem [shape: f32[1,128], index: 5, kind: input, shape index: {}]   ;;  %s2722_s6 = inlined_call_operand.vmem [shape: bf16[2,2,2,128], index: 6, kind: output, shape index: {}]  }
   0x1   :  { %s2296_s23 = smov 0   ;;  %s2298_s24 = smov 0  }
   0x2   :  { %s2300_s25 = smov 0  }
   0x3 LB: > { %s25_s26 = sadd.s32 1, %s2245_s23  ;;  %s28_s27 = sadd.s32 1, %s2249_s24  ;;  %s2253_s25 = sphi %s2300_s25, %s16_s25   ;;  %s2249_s24 = sphi %s2298_s24, %s2726_s24   ;;  %s2245_s23 = sphi %s2296_s23, %s2725_s23   ;;  %s2241_s22 = sphi %s2294_s22, %s2724_s22   ;;  %s2237_s21 = sphi %s2292_s21, %s2723_s21  }
   0x4   : > { %p26_p0 = scmp.ge.s32.totalorder %s25_s26, 2  ;;  %p1570_p1 = scmp.ge.s32.totalorder %s2253_s25, 1 }
   0x5   : > { %p240_p2 = scmp.lt.s32.totalorder %s2253_s25, 5 }
   0x6   : > { %s2728_s26 = smov (%p26_p0, %s25_s26), 0  ;;  %s2730_s27 = smov (!%p26_p0, %s28_s27), %s2249_s24 }
   0x7   : > { %p241_p3 = pnand %p1570_p1, %p240_p2  ;;  %p30_p4 = scmp.ge.s32.totalorder %s2730_s27, 2 }
   0x8   : > { %v2135_v0 = vld [vmem:[%s2717_s1 + $0x40] sm:$0xff] (!%p241_p3)   ;;  %v2255_v1 = vmov (!%p241_p3), 0.0   ;;  %v2137_v3 = vld [vmem:[%s2717_s1 + $0x48] sm:$0xff] (!%p241_p3)   ;;  %vm2256_vm0 = vmmov (!%p241_p3), 0   ;;  %p279_p5 = scmp.lt.s32.totalorder (!%p241_p3), %s2241_s22, 1  ;;  %v2139_v5 = vld [vmem:[%s2717_s1 + $0x50] sm:$0xff] (!%p241_p3)  }
   0x9   : > { %s2732_s27 = smov (%p30_p4, %s2730_s27), 0  ;;  %244 = sbr.rel (%p241_p3) target bundleno = 393 (0x189), region = 44 }
   0xa   : > { %1893 = vmatprep.subr.bf16.mxu0 (!%p241_p3), %v2255_v1  ;;  %1913 = vmatprep.subr.bf16.mxu1 (!%p241_p3), %v2255_v1  ;;  %v2136_v2 = vld [vmem:[%s2717_s1] sm:$0xff] (!%p241_p3)   ;;  %v2138_v4 = vld [vmem:[%s2717_s1 + $0x8] sm:$0xff] (!%p241_p3)   ;;  %v2140_v6 = vld [vmem:[%s2717_s1 + $0x10] sm:$0xff] (!%p241_p3)   ;;  %s1575_s29 = sshll.u32 (!%p241_p3), %s2237_s21, 1  ;;  %p286_p6 = scmp.lt.s32.totalorder (!%p241_p3), %s2237_s21, 1 }
   0xb   : > { %1894 = vmatpush3.bf16.msra.mxu0 (!%p241_p3), %v2135_v0  ;;  %1909 = vmatprep.mubr.msk.bf16.mxu0 (!%p241_p3), %vm2256_vm0, %v2255_v1  ;;  %v2141_v7 = vld [vmem:[%s2717_s1 + $0x58] sm:$0xff] (!%p241_p3)   ;;  %v2143_v9 = vld [vmem:[%s2717_s1 + $0x60] sm:$0xff] (!%p241_p3)   ;;  %v2145_v12 = vld [vmem:[%s2717_s1 + $0x68] sm:$0xff] (!%p241_p3)  }
   0xc   : > { %1914 = vmatpush3.bf16.msra.mxu1 (!%p241_p3), %v2136_v2  ;;  %1895 = vmatprep.subr.bf16.mxu0 (!%p241_p3), %v2255_v1  ;;  %v2142_v8 = vld [vmem:[%s2717_s1 + $0x18] sm:$0xff] (!%p241_p3)   ;;  %v2144_v10 = vld [vmem:[%s2717_s1 + $0x20] sm:$0xff] (!%p241_p3)   ;;  %v2146_v13 = vld [vmem:[%s2717_s1 + $0x28] sm:$0xff] (!%p241_p3)  }
   0xd   : > { %1915 = vmatprep.subr.bf16.mxu1 (!%p241_p3), %v2255_v1  ;;  %1929 = vmatprep.mubr.msk.bf16.mxu1 (!%p241_p3), %vm2256_vm0, %v2255_v1  ;;  %v2147_v15 = vld [vmem:[%s2717_s1 + $0x70] sm:$0xff] (!%p241_p3)   ;;  %v2149_v19 = vld [vmem:[%s2717_s1 + $0x78] sm:$0xff] (!%p241_p3)   ;;  %v2151_v23 = vld [vmem:[%s2717_s1 + $0x80] sm:$0xff] (!%p241_p3)  }
   0xe   : > { %v2148_v16 = vld [vmem:[%s2717_s1 + $0x30] sm:$0xff] (!%p241_p3)   ;;  %v2150_v20 = vld [vmem:[%s2717_s1 + $0x38] sm:$0xff] (!%p241_p3)   ;;  %v2152_v24 = vld [vmem:[%s2717_s1 + $0xc0] sm:$0xff] (!%p241_p3)  }
   0xf   : > { %1896 = vmatpush3.bf16.msra.mxu0 (!%p241_p3), %v2137_v3  ;;  %v2153_v25 = vld [vmem:[%s2717_s1 + $0x88] sm:$0xff] (!%p241_p3)   ;;  %v2155_v27 = vld [vmem:[%s2717_s1 + $0x90] sm:$0xff] (!%p241_p3)   ;;  %v2157_v29 = vld [vmem:[%s2717_s1 + $0x98] sm:$0xff] (!%p241_p3)  }
  0x10   : > { %s2734_s22 = smov (!%p279_p5, %s2241_s22), 1  ;;  %1916 = vmatpush3.bf16.msra.mxu1 %v2138_v4  ;;  %1897 = vmatprep.subr.bf16.mxu0 %v2255_v1  ;;  %v2154_v26 = vld [vmem:[%s2717_s1 + $0xc8] sm:$0xff]   ;;  %v2156_v28 = vld [vmem:[%s2717_s1 + $0xd0] sm:$0xff]   ;;  %v2158_v30 = vld [vmem:[%s2717_s1 + $0xd8] sm:$0xff]   ;;  %s2736_s21 = smov (!%p286_p6, %s2237_s21), 1 }
  0x11   : > { %s1802_s16 = sshll.u32 %s2734_s22, 3  ;;  %1917 = vmatprep.subr.bf16.mxu1 %v2255_v1  ;;  %v2159_v31 = vld [vmem:[%s2717_s1 + $0xa0] sm:$0xff]   ;;  %v2161_v33 = vld [vmem:[%s2717_s1 + $0xa8] sm:$0xff]   ;;  %v2163_v35 = vld [vmem:[%s2717_s1 + $0xb0] sm:$0xff]   ;;  %s1573_s19 = sshll.u32 %s2734_s22, 1 }
  0x12   : > { %s283_s28 = scalar_lea.vmem %s2716_s0, %s1802_s16  ;;  %v2160_v32 = vld [vmem:[%s2717_s1 + $0xe0] sm:$0xff]   ;;  %v2162_v34 = vld [vmem:[%s2717_s1 + $0xe8] sm:$0xff]   ;;  %v2164_v36 = vld [vmem:[%s2717_s1 + $0xf0] sm:$0xff]  }
  0x13   : > { %1898 = vmatpush3.bf16.msra.mxu0 %v2139_v5  ;;  %s2367_s8 = scalar_lea.vmem %s283_s28, %s1575_s29  ;;  %v2165_v38 = vld [vmem:[%s2717_s1 + $0xb8] sm:$0xff]   ;;  %v2167_v41 = vld [vmem:[%s2717_s1 + $0x100] sm:$0xff]   ;;  %v2169_v44 = vld [vmem:[%s2717_s1 + $0x108] sm:$0xff]   ;;  %s2676_s29 = sadd.s32 %s1573_s19, %s2736_s21 }
  0x14   : > { %1918 = vmatpush3.bf16.msra.mxu1 %v2140_v6  ;;  %1899 = vmatprep.subr.bf16.mxu0 %v2255_v1  ;;  %v1592_v11 = vld.sshfl [vmem:[%s2367_s8] sm:$0x3 pattern:$0x76325410]  ;;  %v2166_v39 = vld [vmem:[%s2717_s1 + $0xf8] sm:$0xff]   ;;  %v2170_v45 = vld [vmem:[%s2717_s1 + $0x148] sm:$0xff]   ;;  %s290_s21 = scalar_lea.vmem %s2719_s3, %s2676_s29  ;;  %s297_s17 = scalar_lea.vmem %s2722_s6, %s2676_s29 }
  0x15   : > { %1919 = vmatprep.subr.bf16.mxu1 %v2255_v1  ;;  %v347_v14 = vshll.u32 %v1592_v11, 16  ;;  %v345_v17 = vshrl.u32 %v1592_v11, 16  ;;  %v301_v22 = vld [vmem:[%s2367_s8] sm:$0x1]  ;;  %v1635_v43 = vld [vmem:[%s2367_s8 + $0x2] sm:$0x1] }
  0x16   : > { %v1625_v37 = vld.sshfl [vmem:[%s2367_s8] sm:$0x2 pattern:$0x76325410]  ;;  %v2171_v46 = vld [vmem:[%s2717_s1 + $0x110] sm:$0xff]   ;;  %v2173_v48 = vld [vmem:[%s2717_s1 + $0x118] sm:$0xff]  }
  0x17   : > { %1900 = vmatpush3.bf16.msra.mxu0 %v2141_v7  ;;  %v349_v18 = vrot.slane %v347_v14, 1  ;;  %v554_v40 = vrot.slane %v1625_v37, 1  ;;  %v2168_v42 = vld [vmem:[%s2717_s1 + $0x140] sm:$0xff]   ;;  %v2172_v47 = vld [vmem:[%s2717_s1 + $0x150] sm:$0xff]   ;;  %v2174_v49 = vld [vmem:[%s2717_s1 + $0x158] sm:$0xff]  }
  0x18   : > { %1920 = vmatpush3.bf16.msra.mxu1 %v2142_v8  ;;  %1901 = vmatprep.subr.bf16.mxu0 %v2255_v1  ;;  %v2175_v50 = vld [vmem:[%s2717_s1 + $0x120] sm:$0xff]   ;;  %v2177_v53 = vld [vmem:[%s2717_s1 + $0x128] sm:$0xff]   ;;  %v2179_v56 = vld [vmem:[%s2717_s1 + $0x130] sm:$0xff]  }
  0x19   : > { %1921 = vmatprep.subr.bf16.mxu1 %v2255_v1  ;;  %v350_v21 = vor.u32 %v349_v18, %v345_v17  ;;  %v2176_v51 = vld [vmem:[%s2717_s1 + $0x160] sm:$0xff]   ;;  %v2178_v54 = vld [vmem:[%s2717_s1 + $0x168] sm:$0xff]   ;;  %v2180_v57 = vld [vmem:[%s2717_s1 + $0x170] sm:$0xff]  }
  0x1a   : > { %v1677_v52 = vld.sshfl [vmem:[%s2367_s8 + $0x2] sm:$0x3 pattern:$0x76325410]  ;;  %v2181_v60 = vld [vmem:[%s2717_s1 + $0x138] sm:$0xff]   ;;  %v2185_v4 = vld [vmem:[%s2717_s1 + $0x188] sm:$0xff]  }
  0x1b   : > { %1902 = vmatpush3.bf16.msra.mxu0 %v2143_v9  ;;  %v784_v55 = vshll.u32 %v1677_v52, 16  ;;  %v782_v58 = vshrl.u32 %v1677_v52, 16  ;;  %v2182_v61 = vld [vmem:[%s2717_s1 + $0x178] sm:$0xff]   ;;  %v2183_v0 = vld [vmem:[%s2717_s1 + $0x180] sm:$0xff]   ;;  %v2186_v5 = vld [vmem:[%s2717_s1 + $0x1c8] sm:$0xff]  }
  0x1c   : > { %1922 = vmatpush3.bf16.msra.mxu1 %v2144_v10  ;;  %1903 = vmatprep.subr.bf16.mxu0 %v2255_v1  ;;  %v1703_v62 = vld.sshfl [vmem:[%s2367_s8 + $0x2] sm:$0x2 pattern:$0x76325410]  ;;  %v2187_v6 = vld [vmem:[%s2717_s1 + $0x190] sm:$0xff]   ;;  %v2189_v8 = vld [vmem:[%s2717_s1 + $0x198] sm:$0xff]  }
  0x1d   : > { %1923 = vmatprep.subr.bf16.mxu1 %v2255_v1  ;;  %v786_v59 = vrot.slane %v784_v55, 1  ;;  %v904_v2 = vrot.slane %v1703_v62, 1  ;;  %v2184_v3 = vld [vmem:[%s2717_s1 + $0x1c0] sm:$0xff]   ;;  %v2188_v7 = vld [vmem:[%s2717_s1 + $0x1d0] sm:$0xff]   ;;  %v2190_v9 = vld [vmem:[%s2717_s1 + $0x1d8] sm:$0xff]  }
  0x1e   : > { %v2191_v10 = vld [vmem:[%s2717_s1 + $0x1a0] sm:$0xff]   ;;  %v2196_v17 = vld [vmem:[%s2717_s1 + $0x1f0] sm:$0xff]   ;;  %v2197_v18 = vld [vmem:[%s2717_s1 + $0x1b8] sm:$0xff]  }
  0x1f   : > { %1904 = vmatpush3.bf16.msra.mxu0 %v2145_v12  ;;  %v787_v63 = vor.u32 %v786_v59, %v782_v58  ;;  %v2192_v11 = vld [vmem:[%s2717_s1 + $0x1e0] sm:$0xff]   ;;  %v2193_v12 = vld [vmem:[%s2717_s1 + $0x1a8] sm:$0xff]   ;;  %v2212_v37 = vld [vmem:[%s2720_s4 + $0x30] sm:$0xff]  }
  0x20   : > { %1924 = vmatpush3.bf16.msra.mxu1 %v2146_v13  ;;  %1905 = vmatprep.subr.bf16.mxu0 %v2255_v1  ;;  %v2194_v13 = vld [vmem:[%s2717_s1 + $0x1e8] sm:$0xff]   ;;  %v1755_v14 = vld.sshfl [vmem:[%s2367_s8 + $0x4] sm:$0x3 pattern:$0x76325410] }
  0x21   : > { %1925 = vmatprep.subr.bf16.mxu1 %v2255_v1 }
  0x23   : > { %1906 = vmatpush3.bf16.msra.mxu0 %v2147_v15  ;;  %v2195_v15 = vld [vmem:[%s2717_s1 + $0x1b0] sm:$0xff]  }
  0x24   : > { %1926 = vmatpush3.bf16.msra.mxu1 %v2148_v16  ;;  %1907 = vmatprep.subr.bf16.mxu0 %v2255_v1  ;;  %v1134_v16 = vshll.u32 %v1755_v14, 16 }
  0x25   : > { %1927 = vmatprep.subr.bf16.mxu1 %v2255_v1 }
  0x27   : > { %1908 = vmatpush3.bf16.msra.mxu0 %v2149_v19  ;;  %v1132_v19 = vshrl.u32 %v1755_v14, 16 }
  0x28   : > { %1928 = vmatpush3.bf16.msra.mxu1 %v2150_v20  ;;  %1933 = vmatprep.subr.bf16.mxu0 %v2255_v1  ;;  %v1136_v20 = vrot.slane %v1134_v16, 1 }
  0x29   : > { %1953 = vmatprep.subr.bf16.mxu1 %v2255_v1 }
  0x2a   : > { %1910 = vmatmul.mubr.bf16.vlgmr.msra.gmra.mrb[0].mxu0 %v350_v21  ;;  %v2198_v21 = vld [vmem:[%s2717_s1 + $0x1f8] sm:$0xff]  }
  0x2b   : > { %1930 = vmatmul.mubr.bf16.vlgmr.msra.gmra.mrb[0].mxu1 %v301_v22  ;;  %1934 = vmatpush3.bf16.msra.mxu0 %v2151_v23  ;;  %v1713_v22 = vld [vmem:[%s2367_s8 + $0x4] sm:$0x1] }
  0x2c   : > { %1954 = vmatpush3.bf16.msra.mxu1 %v2152_v24  ;;  %1935 = vmatprep.subr.bf16.mxu0 %v2255_v1  ;;  %v2199_v23 = vld [vmem:[%s2717_s1 + $0x200] sm:$0xff]   ;;  %v1137_v24 = vor.u32 %v1136_v20, %v1132_v19 }
  0x2d   : > { %1955 = vmatprep.subr.bf16.mxu1 %v2255_v1  ;;  %1949 = vmatprep.mubr.msk.bf16.mxu0 %vm2256_vm0, %v2255_v1  ;;  %v1790_v19 = vld [vmem:[%s2718_s2] ss:$0 sm:$0xff] }
  0x2e   : > { %1969 = vmatprep.mubr.msk.bf16.mxu1 %vm2256_vm0, %v2255_v1 }
  0x2f   : > { %1936 = vmatpush3.bf16.msra.mxu0 %v2153_v25  ;;  %v2200_v25 = vld [vmem:[%s2720_s4] sm:$0xff]  }
  0x30   : > { %1956 = vmatpush3.bf16.msra.mxu1 %v2154_v26  ;;  %1937 = vmatprep.subr.bf16.mxu0 %v2255_v1  ;;  %v2201_v26 = vld [vmem:[%s2717_s1 + $0x208] sm:$0xff]  }
  0x31   : > { %1957 = vmatprep.subr.bf16.mxu1 %v2255_v1 }
  0x33   : > { %1938 = vmatpush3.bf16.msra.mxu0 %v2155_v27  ;;  %v2202_v27 = vld [vmem:[%s2720_s4 + $0x8] sm:$0xff]  }
  0x34   : > { %1958 = vmatpush3.bf16.msra.mxu1 %v2156_v28  ;;  %1939 = vmatprep.subr.bf16.mxu0 %v2255_v1  ;;  %v2203_v28 = vld [vmem:[%s2717_s1 + $0x210] sm:$0xff]  }
  0x35   : > { %1959 = vmatprep.subr.bf16.mxu1 %v2255_v1 }
  0x37   : > { %1940 = vmatpush3.bf16.msra.mxu0 %v2157_v29  ;;  %v2204_v29 = vld [vmem:[%s2720_s4 + $0x10] sm:$0xff]  }
  0x38   : > { %1960 = vmatpush3.bf16.msra.mxu1 %v2158_v30  ;;  %1941 = vmatprep.subr.bf16.mxu0 %v2255_v1  ;;  %v2205_v30 = vld [vmem:[%s2717_s1 + $0x218] sm:$0xff]  }
  0x39   : > { %1961 = vmatprep.subr.bf16.mxu1 %v2255_v1 }
  0x3b   : > { %1942 = vmatpush3.bf16.msra.mxu0 %v2159_v31  ;;  %v2206_v31 = vld [vmem:[%s2720_s4 + $0x18] sm:$0xff]  }
  0x3c   : > { %1962 = vmatpush3.bf16.msra.mxu1 %v2160_v32  ;;  %1943 = vmatprep.subr.bf16.mxu0 %v2255_v1  ;;  %v2207_v32 = vld [vmem:[%s2717_s1 + $0x220] sm:$0xff]  }
  0x3d   : > { %1963 = vmatprep.subr.bf16.mxu1 %v2255_v1 }
  0x3f   : > { %1944 = vmatpush3.bf16.msra.mxu0 %v2161_v33  ;;  %v2208_v33 = vld [vmem:[%s2720_s4 + $0x20] sm:$0xff]  }
  0x40   : > { %1964 = vmatpush3.bf16.msra.mxu1 %v2162_v34  ;;  %1945 = vmatprep.subr.bf16.mxu0 %v2255_v1  ;;  %v2209_v34 = vld [vmem:[%s2717_s1 + $0x228] sm:$0xff]  }
  0x41   : > { %1965 = vmatprep.subr.bf16.mxu1 %v2255_v1 }
  0x43   : > { %1946 = vmatpush3.bf16.msra.mxu0 %v2163_v35  ;;  %v2210_v35 = vld [vmem:[%s2720_s4 + $0x28] sm:$0xff]  }
  0x44   : > { %1966 = vmatpush3.bf16.msra.mxu1 %v2164_v36  ;;  %1947 = vmatprep.subr.bf16.mxu0 %v2255_v1  ;;  %v2211_v36 = vld [vmem:[%s2717_s1 + $0x230] sm:$0xff]  }
  0x45   : > { %1967 = vmatprep.subr.bf16.mxu1 %v2255_v1 }
  0x47   : > { %1948 = vmatpush3.bf16.msra.mxu0 %v2165_v38  ;;  %v2213_v38 = vld [vmem:[%s2717_s1 + $0x238] sm:$0xff]  }
  0x48   : > { %1968 = vmatpush3.bf16.msra.mxu1 %v2166_v39  ;;  %1973 = vmatprep.subr.bf16.mxu0 %v2255_v1  ;;  %v1781_v39 = vld.sshfl [vmem:[%s2367_s8 + $0x4] sm:$0x2 pattern:$0x76325410] }
  0x49   : > { %1993 = vmatprep.subr.bf16.mxu1 %v2255_v1 }
  0x4a   : > { %1950 = vmatmul.mubr.bf16.vlgmr.msra.gmra.mrb[4].mxu0 %v554_v40  ;;  %v2214_v40 = vld [vmem:[%s2720_s4 + $0x38] sm:$0xff]  }
  0x4b   : > { %1974 = vmatpush3.bf16.msra.mxu0 %v2167_v41  ;;  %1970 = vmatmul.mubr.bf16.vlgmr.msra.gmra.mrb[4].mxu1 %v1635_v43  ;;  %v1254_v41 = vrot.slane %v1781_v39, 1 }
  0x4c   : > { %1994 = vmatpush3.bf16.msra.mxu1 %v2168_v42  ;;  %1975 = vmatprep.subr.bf16.mxu0 %v2255_v1  ;;  %v1353_v42 = vld [vmem:[%s290_s21] sm:$0x1] }
  0x4d   : > { %1995 = vmatprep.subr.bf16.mxu1 %v2255_v1  ;;  %1989 = vmatprep.mubr.msk.bf16.mxu0 %vm2256_vm0, %v2255_v1 }
  0x4e   : > { %2009 = vmatprep.mubr.msk.bf16.mxu1 %vm2256_vm0, %v2255_v1 }
  0x4f   : > { %1976 = vmatpush3.bf16.msra.mxu0 %v2169_v44 }
  0x50   : > { %1996 = vmatpush3.bf16.msra.mxu1 %v2170_v45  ;;  %1977 = vmatprep.subr.bf16.mxu0 %v2255_v1 }
  0x51   : > { %1997 = vmatprep.subr.bf16.mxu1 %v2255_v1 }
  0x53   : > { %1978 = vmatpush3.bf16.msra.mxu0 %v2171_v46 }
  0x54   : > { %1998 = vmatpush3.bf16.msra.mxu1 %v2172_v47  ;;  %1979 = vmatprep.subr.bf16.mxu0 %v2255_v1 }
  0x55   : > { %1999 = vmatprep.subr.bf16.mxu1 %v2255_v1 }
  0x57   : > { %1980 = vmatpush3.bf16.msra.mxu0 %v2173_v48 }
  0x58   : > { %2000 = vmatpush3.bf16.msra.mxu1 %v2174_v49  ;;  %1981 = vmatprep.subr.bf16.mxu0 %v2255_v1 }
  0x59   : > { %2001 = vmatprep.subr.bf16.mxu1 %v2255_v1 }
  0x5b   : > { %1982 = vmatpush3.bf16.msra.mxu0 %v2175_v50 }
  0x5c   : > { %2002 = vmatpush3.bf16.msra.mxu1 %v2176_v51  ;;  %1983 = vmatprep.subr.bf16.mxu0 %v2255_v1 }
  0x5d   : > { %2003 = vmatprep.subr.bf16.mxu1 %v2255_v1 }
  0x5f   : > { %1984 = vmatpush3.bf16.msra.mxu0 %v2177_v53 }
  0x60   : > { %2004 = vmatpush3.bf16.msra.mxu1 %v2178_v54  ;;  %1985 = vmatprep.subr.bf16.mxu0 %v2255_v1 }
  0x61   : > { %2005 = vmatprep.subr.bf16.mxu1 %v2255_v1 }
  0x63   : > { %1986 = vmatpush3.bf16.msra.mxu0 %v2179_v56 }
  0x64   : > { %2006 = vmatpush3.bf16.msra.mxu1 %v2180_v57  ;;  %1987 = vmatprep.subr.bf16.mxu0 %v2255_v1 }
  0x65   : > { %2007 = vmatprep.subr.bf16.mxu1 %v2255_v1 }
  0x67   : > { %1988 = vmatpush3.bf16.msra.mxu0 %v2181_v60 }
  0x68   : > { %2008 = vmatpush3.bf16.msra.mxu1 %v2182_v61  ;;  %2013 = vmatprep.subr.bf16.mxu0 %v2255_v1 }
  0x69   : > { %2033 = vmatprep.subr.bf16.mxu1 %v2255_v1 }
  0x6a   : > { %1990 = vmatmul.mubr.bf16.vlgmr.msra.gmra.mrb[8].mxu0 %v787_v63 }
  0x6b   : > { %2014 = vmatpush3.bf16.msra.mxu0 %v2183_v0  ;;  %2010 = vmatmul.mubr.bf16.vlgmr.msra.gmra.mrb[8].mxu1 %v904_v2 }
  0x6c   : > { %2034 = vmatpush3.bf16.msra.mxu1 %v2184_v3  ;;  %2015 = vmatprep.subr.bf16.mxu0 %v2255_v1 }
  0x6d   : > { %2035 = vmatprep.subr.bf16.mxu1 %v2255_v1  ;;  %2029 = vmatprep.mubr.msk.bf16.mxu0 %vm2256_vm0, %v2255_v1 }
  0x6e   : > { %2049 = vmatprep.mubr.msk.bf16.mxu1 %vm2256_vm0, %v2255_v1 }
  0x6f   : > { %2016 = vmatpush3.bf16.msra.mxu0 %v2185_v4 }
  0x70   : > { %2036 = vmatpush3.bf16.msra.mxu1 %v2186_v5  ;;  %2017 = vmatprep.subr.bf16.mxu0 %v2255_v1 }
  0x71   : > { %2037 = vmatprep.subr.bf16.mxu1 %v2255_v1 }
  0x73   : > { %2018 = vmatpush3.bf16.msra.mxu0 %v2187_v6 }
  0x74   : > { %2038 = vmatpush3.bf16.msra.mxu1 %v2188_v7  ;;  %2019 = vmatprep.subr.bf16.mxu0 %v2255_v1 }
  0x75   : > { %2039 = vmatprep.subr.bf16.mxu1 %v2255_v1 }
  0x77   : > { %2020 = vmatpush3.bf16.msra.mxu0 %v2189_v8 }
  0x78   : > { %2040 = vmatpush3.bf16.msra.mxu1 %v2190_v9  ;;  %2021 = vmatprep.subr.bf16.mxu0 %v2255_v1 }
  0x79   : > { %2041 = vmatprep.subr.bf16.mxu1 %v2255_v1 }
  0x7b   : > { %2022 = vmatpush3.bf16.msra.mxu0 %v2191_v10 }
  0x7c   : > { %2042 = vmatpush3.bf16.msra.mxu1 %v2192_v11  ;;  %2023 = vmatprep.subr.bf16.mxu0 %v2255_v1 }
  0x7d   : > { %2043 = vmatprep.subr.bf16.mxu1 %v2255_v1 }
  0x7f   : > { %2024 = vmatpush3.bf16.msra.mxu0 %v2193_v12 }
  0x80   : > { %2044 = vmatpush3.bf16.msra.mxu1 %v2194_v13  ;;  %2025 = vmatprep.subr.bf16.mxu0 %v2255_v1 }
  0x81   : > { %2045 = vmatprep.subr.bf16.mxu1 %v2255_v1 }
  0x83   : > { %2026 = vmatpush3.bf16.msra.mxu0 %v2195_v15 }
  0x84   : > { %2046 = vmatpush3.bf16.msra.mxu1 %v2196_v17  ;;  %2027 = vmatprep.subr.bf16.mxu0 %v2255_v1 }
  0x85   : > { %2047 = vmatprep.subr.bf16.mxu1 %v2255_v1 }
  0x87   : > { %2028 = vmatpush3.bf16.msra.mxu0 %v2197_v18 }
  0x88   : > { %2048 = vmatpush3.bf16.msra.mxu1 %v2198_v21  ;;  %2053 = vmatprep.subr.bf16.mxu0 %v2255_v1 }
  0x89   : > { %2073 = vmatprep.subr.bf16.mxu1 %v2255_v1 }
  0x8a   : > { %2030 = vmatmul.mubr.bf16.vlgmr.msra.gmra.mrb[12].mxu0 %v1713_v22 }
  0x8b   : > { %2054 = vmatpush3.bf16.msra.mxu0 %v2199_v23  ;;  %2050 = vmatmul.mubr.bf16.vlgmr.msra.gmra.mrb[12].mxu1 %v1137_v24 }
  0x8c   : > { %2074 = vmatpush3.bf16.msra.mxu1 %v2200_v25  ;;  %2055 = vmatprep.subr.bf16.mxu0 %v2255_v1 }
  0x8d   : > { %2075 = vmatprep.subr.bf16.mxu1 %v2255_v1  ;;  %2069 = vmatprep.mubr.msk.bf16.mxu0 %vm2256_vm0, %v2255_v1 }
  0x8e   : > { %2089 = vmatprep.mubr.msk.bf16.mxu1 %vm2256_vm0, %v2255_v1 }
  0x8f   : > { %2056 = vmatpush3.bf16.msra.mxu0 %v2201_v26 }
  0x90   : > { %2076 = vmatpush3.bf16.msra.mxu1 %v2202_v27  ;;  %2057 = vmatprep.subr.bf16.mxu0 %v2255_v1 }
  0x91   : > { %2077 = vmatprep.subr.bf16.mxu1 %v2255_v1 }
  0x93   : > { %2058 = vmatpush3.bf16.msra.mxu0 %v2203_v28  ;;  %v1799_v28 = vld [vmem:[%s2721_s5] ss:$0 sm:$0xff] }
  0x94   : > { %2078 = vmatpush3.bf16.msra.mxu1 %v2204_v29  ;;  %2059 = vmatprep.subr.bf16.mxu0 %v2255_v1 }
  0x95   : > { %2079 = vmatprep.subr.bf16.mxu1 %v2255_v1 }
  0x97   : > { %2060 = vmatpush3.bf16.msra.mxu0 %v2205_v30 }
  0x98   : > { %2080 = vmatpush3.bf16.msra.mxu1 %v2206_v31  ;;  %2061 = vmatprep.subr.bf16.mxu0 %v2255_v1 }
  0x99   : > { %2081 = vmatprep.subr.bf16.mxu1 %v2255_v1 }
  0x9b   : > { %2062 = vmatpush3.bf16.msra.mxu0 %v2207_v32 }
  0x9c   : > { %2082 = vmatpush3.bf16.msra.mxu1 %v2208_v33  ;;  %2063 = vmatprep.subr.bf16.mxu0 %v2255_v1 }
  0x9d   : > { %2083 = vmatprep.subr.bf16.mxu1 %v2255_v1 }
  0x9f   : > { %2064 = vmatpush3.bf16.msra.mxu0 %v2209_v34 }
  0xa0   : > { %2084 = vmatpush3.bf16.msra.mxu1 %v2210_v35  ;;  %2065 = vmatprep.subr.bf16.mxu0 %v2255_v1 }
  0xa1   : > { %2085 = vmatprep.subr.bf16.mxu1 %v2255_v1 }
  0xa3   : > { %2066 = vmatpush3.bf16.msra.mxu0 %v2211_v36 }
  0xa4   : > { %2086 = vmatpush3.bf16.msra.mxu1 %v2212_v37  ;;  %2067 = vmatprep.subr.bf16.mxu0 %v2255_v1 }
  0xa5   : > { %2087 = vmatprep.subr.bf16.mxu1 %v2255_v1 }
  0xa7   : > { %2068 = vmatpush3.bf16.msra.mxu0 %v2213_v38 }
  0xa8   : > { %2088 = vmatpush3.bf16.msra.mxu1 %v2214_v40 }
  0xaa   : > { %2070 = vmatmul.mubr.bf16.vlgmr.msra.gmra.mrb[16].mxu0 %v1254_v41 }
  0xab   : > { %2090 = vmatmul.mubr.bf16.vlgmr.msra.gmra.mrb[16].mxu1 %v1353_v42 }
  0xfd   : > { %v434_v43 = vpop.f32.mrb[0].mxu0 }
  0xfe   : > { %v1911_v44 = vpop.f32.mrb[1].mxu0  ;;  %v522_v45 = vpop.f32.mrb[0].mxu1 }
  0xff   : > { %v523_v46 = vadd.f32 %v522_v45, %v434_v43  ;;  %v437_v47 = vpop.f32.mrb[2].mxu0  ;;  %v1931_v48 = vpop.f32.mrb[1].mxu1 }
 0x100   : > { %v1912_v49 = vpop.f32.mrb[3].mxu0  ;;  %v525_v50 = vpop.f32.mrb[2].mxu1 }
 0x101   : > { %v1932_v51 = vpop.f32.mrb[3].mxu1 }
 0x11d   : > { %v638_v1 = vpop.f32.mrb[4].mxu0 }
 0x11e   : > { %v644_v52 = vadd.f32 %v638_v1, %v523_v46  ;;  %v1951_v53 = vpop.f32.mrb[5].mxu0  ;;  %v748_v54 = vpop.f32.mrb[4].mxu1 }
 0x11f   : > { %v641_v55 = vpop.f32.mrb[6].mxu0  ;;  %v1971_v56 = vpop.f32.mrb[5].mxu1 }
 0x120   : > { %v754_v57 = vadd.f32 %v748_v54, %v644_v52  ;;  %v1952_v58 = vpop.f32.mrb[7].mxu0  ;;  %v751_v59 = vpop.f32.mrb[6].mxu1 }
 0x121   : > { %v1972_v60 = vpop.f32.mrb[7].mxu1 }
 0x13d   : > { %v871_v61 = vpop.f32.mrb[8].mxu0 }
 0x13e   : > { %v877_v62 = vadd.f32 %v871_v61, %v754_v57  ;;  %v1991_v63 = vpop.f32.mrb[9].mxu0  ;;  %v988_v0 = vpop.f32.mrb[8].mxu1 }
 0x13f   : > { %v874_v2 = vpop.f32.mrb[10].mxu0  ;;  %v2011_v3 = vpop.f32.mrb[9].mxu1 }
 0x140   : > { %v994_v4 = vadd.f32 %v988_v0, %v877_v62  ;;  %v1992_v5 = vpop.f32.mrb[11].mxu0  ;;  %v991_v6 = vpop.f32.mrb[10].mxu1 }
 0x141   : > { %v2012_v7 = vpop.f32.mrb[11].mxu1 }
 0x15d   : > { %v1098_v8 = vpop.f32.mrb[12].mxu0 }
 0x15e   : > { %v1104_v9 = vadd.f32 %v1098_v8, %v994_v4  ;;  %v2031_v10 = vpop.f32.mrb[13].mxu0  ;;  %v1221_v11 = vpop.f32.mrb[12].mxu1 }
 0x15f   : > { %v1101_v12 = vpop.f32.mrb[14].mxu0  ;;  %v2051_v13 = vpop.f32.mrb[13].mxu1 }
 0x160   : > { %v1227_v14 = vadd.f32 %v1221_v11, %v1104_v9  ;;  %v2032_v15 = vpop.f32.mrb[15].mxu0  ;;  %v1224_v16 = vpop.f32.mrb[14].mxu1 }
 0x161   : > { %v2052_v17 = vpop.f32.mrb[15].mxu1 }
 0x17d   : > { %v1338_v18 = vpop.f32.mrb[16].mxu0 }
 0x17e   : > { %v1344_v20 = vadd.f32 %v1338_v18, %v1227_v14  ;;  %v2071_v21 = vpop.f32.mrb[17].mxu0  ;;  %v1452_v22 = vpop.f32.mrb[16].mxu1 }
 0x17f   : > { %v1341_v23 = vpop.f32.mrb[18].mxu0  ;;  %v2091_v24 = vpop.f32.mrb[17].mxu1 }
 0x180   : > { %v1352_v25 = vadd.f32 %v1790_v19, %v1344_v20  ;;  %v2072_v26 = vpop.f32.mrb[19].mxu0  ;;  %v1455_v27 = vpop.f32.mrb[18].mxu1 }
 0x181   : > { %v2092_v29 = vpop.f32.mrb[19].mxu1 }
 0x182   : > { %v1458_v30 = vadd.f32 %v1452_v22, %v1352_v25 }
 0x184   : > { %v1466_v31 = vadd.f32 %v1799_v28, %v1458_v30 }
 0x186   : > { %v1467_v32 = vpack.c.bf16 %v1466_v31, %v1466_v31 }
 0x188   : > { %1468 = vst [vmem:[%s297_s17] sm:$0x1] %v1467_v32 }
 0x189 PF: > { %s16_s25 = sadd.s32 1, %s2253_s25   ;;  %s2723_s21 = smov %s2245_s23 }
 0x18a   : > { %p13_p7 = scmp.ge.s32.totalorder %s16_s25, 6   ;;  %s2724_s22 = smov %s2249_s24 }
 0x18b   : > { %s2725_s23 = smov %s2728_s26  ;;  %s2726_s24 = smov %s2732_s27 }
 0x18c   :  { %15 = sbr.rel (!%p13_p7) target bundleno = 3 (0x3), region = 88 }

// kernel: resnet_base_embed.17
= control target key start
LH: loop header
LB: loop body
LE: loop exit
PB: predicated region body
PF: predicated region fallthrough
CT: control target
= control target key end

     0   :  { %s1984_s18 = smov 0   ;;  %s1986_s19 = smov 0   ;;  %s2363_s0 = inlined_call_operand.vmem [shape: bf16[2,2,2,2,2,128], index: 0, kind: input, shape index: {}]   ;;  %s2364_s1 = inlined_call_operand.vmem [shape: bf16[3,3,128,128], index: 1, kind: input, shape index: {}]   ;;  %s2365_s2 = inlined_call_operand.vmem [shape: f32[1,128], index: 2, kind: input, shape index: {}]   ;;  %s2366_s3 = inlined_call_operand.vmem [shape: f32[1,128], index: 3, kind: input, shape index: {}]   ;;  %s2367_s4 = inlined_call_operand.vmem [shape: f32[1,128], index: 4, kind: input, shape index: {}]   ;;  %s2368_s5 = inlined_call_operand.vmem [shape: bf16[2,1,1,128], index: 5, kind: output, shape index: {}]  }
   0x1   :  { %s1988_s20 = smov 0  }
   0x2 LB: > { %s27_s21 = sadd.s32 1, %s1945_s19  ;;  %p1358_p0 = scmp.ge.s32.totalorder %s1949_s20, 1  ;;  %s1949_s20 = sphi %s1988_s20, %s15_s20   ;;  %s1945_s19 = sphi %s1986_s19, %s2370_s19   ;;  %s1941_s18 = sphi %s1984_s18, %s2369_s18  }
   0x3   : > { %p29_p1 = scmp.ge.s32.totalorder %s27_s21, 2  ;;  %p200_p2 = scmp.lt.s32.totalorder %s1949_s20, 3 }
   0x5   : > { %s2372_s21 = smov (%p29_p1, %s27_s21), 0  ;;  %p201_p3 = pnand %p1358_p0, %p200_p2 }
   0x6   : > { %v1855_v0 = vld [vmem:[%s2364_s1 + $0x40] sm:$0xff] (!%p201_p3)   ;;  %v1951_v1 = vmov (!%p201_p3), 0.0   ;;  %v1857_v3 = vld [vmem:[%s2364_s1 + $0x48] sm:$0xff] (!%p201_p3)   ;;  %vm1952_vm0 = vmmov (!%p201_p3), 0   ;;  %v1859_v5 = vld [vmem:[%s2364_s1 + $0x50] sm:$0xff] (!%p201_p3)   ;;  %p228_p4 = scmp.lt.s32.totalorder (!%p201_p3), %s1941_s18, 1  ;;  %v474_v27 = vlaneseq (!%p201_p3) }
   0x7   : > { %204 = sbr.rel (%p201_p3) target bundleno = 393 (0x189), region = 40  ;;  %1648 = vmatprep.subr.bf16.mxu0 (!%p201_p3), %v1951_v1  ;;  %1668 = vmatprep.subr.bf16.mxu1 (!%p201_p3), %v1951_v1  ;;  %v1856_v2 = vld [vmem:[%s2364_s1] sm:$0xff] (!%p201_p3)   ;;  %v1858_v4 = vld [vmem:[%s2364_s1 + $0x8] sm:$0xff] (!%p201_p3)   ;;  %v1860_v6 = vld [vmem:[%s2364_s1 + $0x10] sm:$0xff] (!%p201_p3)   ;;  %v1953_v25 = vmov (!%p201_p3), 1966171168  }
   0x8   : > { %1649 = vmatpush3.bf16.msra.mxu0 (!%p201_p3), %v1855_v0  ;;  %1664 = vmatprep.mubr.msk.bf16.mxu0 (!%p201_p3), %vm1952_vm0, %v1951_v1  ;;  %v1861_v7 = vld [vmem:[%s2364_s1 + $0x58] sm:$0xff] (!%p201_p3)   ;;  %v1863_v9 = vld [vmem:[%s2364_s1 + $0x60] sm:$0xff] (!%p201_p3)   ;;  %v1865_v11 = vld [vmem:[%s2364_s1 + $0x68] sm:$0xff] (!%p201_p3)   ;;  %v472_v26 = vunpack.c.l.s4 (!%p201_p3), %v1953_v25  ;;  %v475_v31 = vshrl.u32 (!%p201_p3), %v474_v27, 7  ;;  %vm1272_vm1 = vcmask (!%p201_p3), 1040384  }
   0x9   : > { %1669 = vmatpush3.bf16.msra.mxu1 (!%p201_p3), %v1856_v2  ;;  %1650 = vmatprep.subr.bf16.mxu0 (!%p201_p3), %v1951_v1  ;;  %v1862_v8 = vld [vmem:[%s2364_s1 + $0x18] sm:$0xff] (!%p201_p3)   ;;  %v1864_v10 = vld [vmem:[%s2364_s1 + $0x20] sm:$0xff] (!%p201_p3)   ;;  %v1866_v12 = vld [vmem:[%s2364_s1 + $0x28] sm:$0xff] (!%p201_p3)   ;;  %vm1273_vm2 = vsmask.f32 (!%p201_p3), 256 }
   0xa   : > { %1670 = vmatprep.subr.bf16.mxu1 (!%p201_p3), %v1951_v1  ;;  %1684 = vmatprep.mubr.msk.bf16.mxu1 (!%p201_p3), %vm1952_vm0, %v1951_v1  ;;  %v1867_v13 = vld [vmem:[%s2364_s1 + $0x70] sm:$0xff] (!%p201_p3)   ;;  %v1869_v15 = vld [vmem:[%s2364_s1 + $0x78] sm:$0xff] (!%p201_p3)   ;;  %v1871_v19 = vld [vmem:[%s2364_s1 + $0x80] sm:$0xff] (!%p201_p3)   ;;  %v473_v30 = vunpack.c.0.s8 (!%p201_p3), %v472_v26 }
   0xb   : > { %v1868_v14 = vld [vmem:[%s2364_s1 + $0x30] sm:$0xff] (!%p201_p3)   ;;  %v1870_v16 = vld [vmem:[%s2364_s1 + $0x38] sm:$0xff] (!%p201_p3)   ;;  %v1872_v20 = vld [vmem:[%s2364_s1 + $0xc0] sm:$0xff] (!%p201_p3)  }
   0xc   : > { %1651 = vmatpush3.bf16.msra.mxu0 (!%p201_p3), %v1857_v3  ;;  %v1873_v21 = vld [vmem:[%s2364_s1 + $0x88] sm:$0xff] (!%p201_p3)   ;;  %v1875_v23 = vld [vmem:[%s2364_s1 + $0x90] sm:$0xff] (!%p201_p3)   ;;  %v1877_v28 = vld [vmem:[%s2364_s1 + $0x98] sm:$0xff] (!%p201_p3)   ;;  %v2128_v34 = vsub.s32 (!%p201_p3), %v473_v30, %v475_v31 }
   0xd   : > { %1671 = vmatpush3.bf16.msra.mxu1 (!%p201_p3), %v1858_v4  ;;  %1652 = vmatprep.subr.bf16.mxu0 (!%p201_p3), %v1951_v1  ;;  %v1874_v22 = vld [vmem:[%s2364_s1 + $0xc8] sm:$0xff] (!%p201_p3)   ;;  %v1876_v24 = vld [vmem:[%s2364_s1 + $0xd0] sm:$0xff] (!%p201_p3)   ;;  %v1878_v29 = vld [vmem:[%s2364_s1 + $0xd8] sm:$0xff] (!%p201_p3)  }
   0xe   : > { %1672 = vmatprep.subr.bf16.mxu1 %v1951_v1  ;;  %s2374_s18 = smov (!%p228_p4, %s1941_s18), 1  ;;  %v1879_v32 = vld [vmem:[%s2364_s1 + $0xa0] sm:$0xff]   ;;  %v1881_v35 = vld [vmem:[%s2364_s1 + $0xa8] sm:$0xff]   ;;  %v1883_v38 = vld [vmem:[%s2364_s1 + $0xb0] sm:$0xff]  }
   0xf   : > { %s1359_s27 = sshll.u32 %s2374_s18, 3  ;;  %v1880_v33 = vld [vmem:[%s2364_s1 + $0xe0] sm:$0xff]   ;;  %v1882_v36 = vld [vmem:[%s2364_s1 + $0xe8] sm:$0xff]   ;;  %v1884_v39 = vld [vmem:[%s2364_s1 + $0xf0] sm:$0xff]   ;;  %s237_s11 = scalar_lea.vmem %s2368_s5, %s2374_s18 }
  0x10   : > { %1653 = vmatpush3.bf16.msra.mxu0 %v1859_v5  ;;  %s2072_s7 = scalar_lea.vmem %s2363_s0, %s1359_s27  ;;  %v1885_v41 = vld [vmem:[%s2364_s1 + $0xb8] sm:$0xff]   ;;  %v1887_v44 = vld [vmem:[%s2364_s1 + $0x100] sm:$0xff]   ;;  %v1889_v48 = vld [vmem:[%s2364_s1 + $0x108] sm:$0xff]  }
  0x11   : > { %1673 = vmatpush3.bf16.msra.mxu1 %v1860_v6  ;;  %1654 = vmatprep.subr.bf16.mxu0 %v1951_v1  ;;  %v1360_v17 = vld [vmem:[%s2072_s7 + $0x2] sm:$0x1]  ;;  %v240_v18 = vld [vmem:[%s2072_s7] sm:$0x1]  ;;  %v1886_v42 = vld [vmem:[%s2364_s1 + $0xf8] sm:$0xff]  }
  0x12   : > { %1674 = vmatprep.subr.bf16.mxu1 %v1951_v1  ;;  %v477_v37 = vrot.slane %v240_v18, %v2128_v34  ;;  %v1417_v45 = vld [vmem:[%s2072_s7 + $0x4] sm:$0x1]  ;;  %v2166_v47 = vld [vmem:[%s2072_s7 + $0x1] sm:$0x1]  ;;  %v1890_v50 = vld [vmem:[%s2364_s1 + $0x148] sm:$0xff]  }
  0x13   : > { %v1888_v46 = vld [vmem:[%s2364_s1 + $0x140] sm:$0xff]   ;;  %v1163_v49 = vrot.slane %v2166_v47, %v2128_v34  ;;  %v1891_v52 = vld [vmem:[%s2364_s1 + $0x110] sm:$0xff]   ;;  %v1893_v54 = vld [vmem:[%s2364_s1 + $0x118] sm:$0xff]   ;;  %v820_v60 = vrot.slane %v1417_v45, %v2128_v34 }
  0x14   : > { %1655 = vmatpush3.bf16.msra.mxu0 %v1861_v7  ;;  %v484_v40 = vrot.slane %v477_v37, %v2128_v34  ;;  %v1892_v53 = vld [vmem:[%s2364_s1 + $0x150] sm:$0xff]   ;;  %v1894_v55 = vld [vmem:[%s2364_s1 + $0x158] sm:$0xff]   ;;  %v1895_v56 = vld [vmem:[%s2364_s1 + $0x120] sm:$0xff]  }
  0x15   : > { %1675 = vmatpush3.bf16.msra.mxu1 %v1862_v8  ;;  %1656 = vmatprep.subr.bf16.mxu0 %v1951_v1  ;;  %v2181_v51 = vrot.slane %v1163_v49, %v2128_v34  ;;  %v1896_v57 = vld [vmem:[%s2364_s1 + $0x160] sm:$0xff]   ;;  %v1897_v58 = vld [vmem:[%s2364_s1 + $0x128] sm:$0xff]   ;;  %v1899_v61 = vld [vmem:[%s2364_s1 + $0x130] sm:$0xff]   ;;  %v827_v63 = vrot.slane %v820_v60, %v2128_v34 }
  0x16   : > { %1676 = vmatprep.subr.bf16.mxu1 %v1951_v1  ;;  %v486_v43 = vshrl.u32 %v484_v40, 16  ;;  %v1898_v59 = vld [vmem:[%s2364_s1 + $0x168] sm:$0xff]   ;;  %v1900_v62 = vld [vmem:[%s2364_s1 + $0x170] sm:$0xff]   ;;  %v1901_v0 = vld [vmem:[%s2364_s1 + $0x138] sm:$0xff]  }
  0x17   : > { %v1902_v2 = vld [vmem:[%s2364_s1 + $0x178] sm:$0xff]   ;;  %v829_v3 = vshrl.u32 %v827_v63, 16  ;;  %v1442_v4 = vld [vmem:[%s2072_s7 + $0x6] sm:$0x1]  ;;  %v1905_v7 = vld [vmem:[%s2364_s1 + $0x188] sm:$0xff]   ;;  %v1172_v30 = vshrl.u32 %v2181_v51, 16 }
  0x18   : > { %1657 = vmatpush3.bf16.msra.mxu0 %v1863_v9  ;;  %v1903_v5 = vld [vmem:[%s2364_s1 + $0x180] sm:$0xff]   ;;  %v1906_v8 = vld [vmem:[%s2364_s1 + $0x1c8] sm:$0xff]   ;;  %v1907_v9 = vld [vmem:[%s2364_s1 + $0x190] sm:$0xff]  }
  0x19   : > { %1677 = vmatpush3.bf16.msra.mxu1 %v1864_v10  ;;  %1658 = vmatprep.subr.bf16.mxu0 %v1951_v1  ;;  %v1904_v6 = vld [vmem:[%s2364_s1 + $0x1c0] sm:$0xff]   ;;  %v1908_v10 = vld [vmem:[%s2364_s1 + $0x1d0] sm:$0xff]   ;;  %v1922_v25 = vld [vmem:[%s2364_s1 + $0x218] sm:$0xff]  }
  0x1a   : > { %1678 = vmatprep.subr.bf16.mxu1 %v1951_v1  ;;  %v1923_v26 = vld [vmem:[%s2364_s1 + $0x220] sm:$0xff]   ;;  %v1924_v27 = vld [vmem:[%s2364_s1 + $0x228] sm:$0xff]   ;;  %vm1274_vm3 = vmand %vm1272_vm1, %vm1273_vm2 }
  0x1c   : > { %1659 = vmatpush3.bf16.msra.mxu0 %v1865_v11  ;;  %v1909_v11 = vld [vmem:[%s2364_s1 + $0x198] sm:$0xff]  }
  0x1d   : > { %1679 = vmatpush3.bf16.msra.mxu1 %v1866_v12  ;;  %1660 = vmatprep.subr.bf16.mxu0 %v1951_v1  ;;  %v1910_v12 = vld [vmem:[%s2364_s1 + $0x1d8] sm:$0xff]  }
  0x1e   : > { %1680 = vmatprep.subr.bf16.mxu1 %v1951_v1 }
  0x20   : > { %1661 = vmatpush3.bf16.msra.mxu0 %v1867_v13  ;;  %v1911_v13 = vld [vmem:[%s2364_s1 + $0x1a0] sm:$0xff]  }
  0x21   : > { %1681 = vmatpush3.bf16.msra.mxu1 %v1868_v14  ;;  %1662 = vmatprep.subr.bf16.mxu0 %v1951_v1  ;;  %v1912_v14 = vld [vmem:[%s2364_s1 + $0x1e0] sm:$0xff]  }
  0x22   : > { %1682 = vmatprep.subr.bf16.mxu1 %v1951_v1 }
  0x24   : > { %1663 = vmatpush3.bf16.msra.mxu0 %v1869_v15  ;;  %v1913_v15 = vld [vmem:[%s2364_s1 + $0x1a8] sm:$0xff]  }
  0x25   : > { %1683 = vmatpush3.bf16.msra.mxu1 %v1870_v16  ;;  %1688 = vmatprep.subr.bf16.mxu0 %v1951_v1  ;;  %v1914_v16 = vld [vmem:[%s2364_s1 + $0x1e8] sm:$0xff]  }
  0x26   : > { %1708 = vmatprep.subr.bf16.mxu1 %v1951_v1 }
  0x27   : > { %1665 = vmatmul.mubr.bf16.vlgmr.msra.gmra.mrb[0].mxu0 %v1360_v17  ;;  %v1915_v17 = vld [vmem:[%s2364_s1 + $0x1b0] sm:$0xff]  }
  0x28   : > { %1685 = vmatmul.mubr.bf16.vlgmr.msra.gmra.mrb[0].mxu1 %v240_v18  ;;  %1689 = vmatpush3.bf16.msra.mxu0 %v1871_v19  ;;  %v1916_v18 = vld [vmem:[%s2364_s1 + $0x1f0] sm:$0xff]   ;;  %v1917_v19 = vld [vmem:[%s2364_s1 + $0x1b8] sm:$0xff]  }
  0x29   : > { %1709 = vmatpush3.bf16.msra.mxu1 %v1872_v20  ;;  %1690 = vmatprep.subr.bf16.mxu0 %v1951_v1  ;;  %v1918_v20 = vld [vmem:[%s2364_s1 + $0x1f8] sm:$0xff]  }
  0x2a   : > { %1710 = vmatprep.subr.bf16.mxu1 %v1951_v1  ;;  %1704 = vmatprep.mubr.msk.bf16.mxu0 %vm1952_vm0, %v1951_v1 }
  0x2b   : > { %1724 = vmatprep.mubr.msk.bf16.mxu1 %vm1952_vm0, %v1951_v1 }
  0x2c   : > { %1691 = vmatpush3.bf16.msra.mxu0 %v1873_v21  ;;  %v1919_v21 = vld [vmem:[%s2364_s1 + $0x200] sm:$0xff]  }
  0x2d   : > { %1711 = vmatpush3.bf16.msra.mxu1 %v1874_v22  ;;  %1692 = vmatprep.subr.bf16.mxu0 %v1951_v1  ;;  %v1516_v22 = vld [vmem:[%s2072_s7 + $0x3] sm:$0x1] }
  0x2e   : > { %1712 = vmatprep.subr.bf16.mxu1 %v1951_v1 }
  0x30   : > { %1693 = vmatpush3.bf16.msra.mxu0 %v1875_v23  ;;  %v1920_v23 = vld [vmem:[%s2364_s1 + $0x208] sm:$0xff]  }
  0x31   : > { %1713 = vmatpush3.bf16.msra.mxu1 %v1876_v24  ;;  %1694 = vmatprep.subr.bf16.mxu0 %v1951_v1  ;;  %v1921_v24 = vld [vmem:[%s2364_s1 + $0x210] sm:$0xff]  }
  0x32   : > { %1714 = vmatprep.subr.bf16.mxu1 %v1951_v1 }
  0x34   : > { %1695 = vmatpush3.bf16.msra.mxu0 %v1877_v28  ;;  %v1925_v28 = vld [vmem:[%s2364_s1 + $0x230] sm:$0xff]  }
  0x35   : > { %1715 = vmatpush3.bf16.msra.mxu1 %v1878_v29  ;;  %1696 = vmatprep.subr.bf16.mxu0 %v1951_v1  ;;  %v1926_v29 = vld [vmem:[%s2364_s1 + $0x238] sm:$0xff]  }
  0x36   : > { %1716 = vmatprep.subr.bf16.mxu1 %v1951_v1 }
  0x38   : > { %1697 = vmatpush3.bf16.msra.mxu0 %v1879_v32 }
  0x39   : > { %1717 = vmatpush3.bf16.msra.mxu1 %v1880_v33  ;;  %1698 = vmatprep.subr.bf16.mxu0 %v1951_v1 }
  0x3a   : > { %1718 = vmatprep.subr.bf16.mxu1 %v1951_v1 }
  0x3c   : > { %1699 = vmatpush3.bf16.msra.mxu0 %v1881_v35 }
  0x3d   : > { %1719 = vmatpush3.bf16.msra.mxu1 %v1882_v36  ;;  %1700 = vmatprep.subr.bf16.mxu0 %v1951_v1 }
  0x3e   : > { %1720 = vmatprep.subr.bf16.mxu1 %v1951_v1 }
  0x40   : > { %1701 = vmatpush3.bf16.msra.mxu0 %v1883_v38 }
  0x41   : > { %1721 = vmatpush3.bf16.msra.mxu1 %v1884_v39  ;;  %1702 = vmatprep.subr.bf16.mxu0 %v1951_v1 }
  0x42   : > { %1722 = vmatprep.subr.bf16.mxu1 %v1951_v1 }
  0x44   : > { %1703 = vmatpush3.bf16.msra.mxu0 %v1885_v41 }
  0x45   : > { %1723 = vmatpush3.bf16.msra.mxu1 %v1886_v42  ;;  %1728 = vmatprep.subr.bf16.mxu0 %v1951_v1 }
  0x46   : > { %1748 = vmatprep.subr.bf16.mxu1 %v1951_v1 }
  0x47   : > { %1705 = vmatmul.mubr.bf16.vlgmr.msra.gmra.mrb[4].mxu0 %v486_v43 }
  0x48   : > { %1729 = vmatpush3.bf16.msra.mxu0 %v1887_v44  ;;  %1725 = vmatmul.mubr.bf16.vlgmr.msra.gmra.mrb[4].mxu1 %v1417_v45 }
  0x49   : > { %1749 = vmatpush3.bf16.msra.mxu1 %v1888_v46  ;;  %1730 = vmatprep.subr.bf16.mxu0 %v1951_v1 }
  0x4a   : > { %1750 = vmatprep.subr.bf16.mxu1 %v1951_v1  ;;  %1744 = vmatprep.mubr.msk.bf16.mxu0 %vm1952_vm0, %v1951_v1 }
  0x4b   : > { %1764 = vmatprep.mubr.msk.bf16.mxu1 %vm1952_vm0, %v1951_v1 }
  0x4c   : > { %1731 = vmatpush3.bf16.msra.mxu0 %v1889_v48 }
  0x4d   : > { %1751 = vmatpush3.bf16.msra.mxu1 %v1890_v50  ;;  %1732 = vmatprep.subr.bf16.mxu0 %v1951_v1 }
  0x4e   : > { %1752 = vmatprep.subr.bf16.mxu1 %v1951_v1 }
  0x50   : > { %1733 = vmatpush3.bf16.msra.mxu0 %v1891_v52 }
  0x51   : > { %1753 = vmatpush3.bf16.msra.mxu1 %v1892_v53  ;;  %1734 = vmatprep.subr.bf16.mxu0 %v1951_v1 }
  0x52   : > { %1754 = vmatprep.subr.bf16.mxu1 %v1951_v1 }
  0x54   : > { %1735 = vmatpush3.bf16.msra.mxu0 %v1893_v54 }
  0x55   : > { %1755 = vmatpush3.bf16.msra.mxu1 %v1894_v55  ;;  %1736 = vmatprep.subr.bf16.mxu0 %v1951_v1 }
  0x56   : > { %1756 = vmatprep.subr.bf16.mxu1 %v1951_v1 }
  0x58   : > { %1737 = vmatpush3.bf16.msra.mxu0 %v1895_v56 }
  0x59   : > { %1757 = vmatpush3.bf16.msra.mxu1 %v1896_v57  ;;  %1738 = vmatprep.subr.bf16.mxu0 %v1951_v1 }
  0x5a   : > { %1758 = vmatprep.subr.bf16.mxu1 %v1951_v1 }
  0x5c   : > { %1739 = vmatpush3.bf16.msra.mxu0 %v1897_v58 }
  0x5d   : > { %1759 = vmatpush3.bf16.msra.mxu1 %v1898_v59  ;;  %1740 = vmatprep.subr.bf16.mxu0 %v1951_v1 }
  0x5e   : > { %1760 = vmatprep.subr.bf16.mxu1 %v1951_v1 }
  0x60   : > { %1741 = vmatpush3.bf16.msra.mxu0 %v1899_v61 }
  0x61   : > { %1761 = vmatpush3.bf16.msra.mxu1 %v1900_v62  ;;  %1742 = vmatprep.subr.bf16.mxu0 %v1951_v1 }
  0x62   : > { %1762 = vmatprep.subr.bf16.mxu1 %v1951_v1 }
  0x64   : > { %1743 = vmatpush3.bf16.msra.mxu0 %v1901_v0 }
  0x65   : > { %1763 = vmatpush3.bf16.msra.mxu1 %v1902_v2  ;;  %1768 = vmatprep.subr.bf16.mxu0 %v1951_v1 }
  0x66   : > { %1788 = vmatprep.subr.bf16.mxu1 %v1951_v1 }
  0x67   : > { %1745 = vmatmul.mubr.bf16.vlgmr.msra.gmra.mrb[8].mxu0 %v1442_v4 }
  0x68   : > { %1769 = vmatpush3.bf16.msra.mxu0 %v1903_v5  ;;  %1765 = vmatmul.mubr.bf16.vlgmr.msra.gmra.mrb[8].mxu1 %v829_v3 }
  0x69   : > { %1789 = vmatpush3.bf16.msra.mxu1 %v1904_v6  ;;  %1770 = vmatprep.subr.bf16.mxu0 %v1951_v1 }
  0x6a   : > { %1790 = vmatprep.subr.bf16.mxu1 %v1951_v1  ;;  %1784 = vmatprep.mubr.msk.bf16.mxu0 %vm1952_vm0, %v1951_v1 }
  0x6b   : > { %1804 = vmatprep.mubr.msk.bf16.mxu1 %vm1952_vm0, %v1951_v1 }
  0x6c   : > { %1771 = vmatpush3.bf16.msra.mxu0 %v1905_v7  ;;  %v1264_v7 = vld [vmem:[%s2365_s2] sm:$0x1] }
  0x6d   : > { %1791 = vmatpush3.bf16.msra.mxu1 %v1906_v8  ;;  %1772 = vmatprep.subr.bf16.mxu0 %v1951_v1 }
  0x6e   : > { %1792 = vmatprep.subr.bf16.mxu1 %v1951_v1 }
  0x70   : > { %1773 = vmatpush3.bf16.msra.mxu0 %v1907_v9 }
  0x71   : > { %1793 = vmatpush3.bf16.msra.mxu1 %v1908_v10  ;;  %1774 = vmatprep.subr.bf16.mxu0 %v1951_v1  ;;  %v1266_v10 = vld [vmem:[%s2366_s3] sm:$0x1] }
  0x72   : > { %1794 = vmatprep.subr.bf16.mxu1 %v1951_v1 }
  0x74   : > { %1775 = vmatpush3.bf16.msra.mxu0 %v1909_v11 }
  0x75   : > { %1795 = vmatpush3.bf16.msra.mxu1 %v1910_v12  ;;  %1776 = vmatprep.subr.bf16.mxu0 %v1951_v1 }
  0x76   : > { %1796 = vmatprep.subr.bf16.mxu1 %v1951_v1 }
  0x78   : > { %1777 = vmatpush3.bf16.msra.mxu0 %v1911_v13 }
  0x79   : > { %1797 = vmatpush3.bf16.msra.mxu1 %v1912_v14  ;;  %1778 = vmatprep.subr.bf16.mxu0 %v1951_v1  ;;  %v1268_v14 = vld [vmem:[%s2367_s4] sm:$0x1] }
  0x7a   : > { %1798 = vmatprep.subr.bf16.mxu1 %v1951_v1 }
  0x7c   : > { %1779 = vmatpush3.bf16.msra.mxu0 %v1913_v15 }
  0x7d   : > { %1799 = vmatpush3.bf16.msra.mxu1 %v1914_v16  ;;  %1780 = vmatprep.subr.bf16.mxu0 %v1951_v1 }
  0x7e   : > { %1800 = vmatprep.subr.bf16.mxu1 %v1951_v1 }
  0x80   : > { %1781 = vmatpush3.bf16.msra.mxu0 %v1915_v17 }
  0x81   : > { %1801 = vmatpush3.bf16.msra.mxu1 %v1916_v18  ;;  %1782 = vmatprep.subr.bf16.mxu0 %v1951_v1  ;;  %v1275_v18 = vld [vmem:[%s237_s11] sm:$0x1] }
  0x82   : > { %1802 = vmatprep.subr.bf16.mxu1 %v1951_v1 }
  0x84   : > { %1783 = vmatpush3.bf16.msra.mxu0 %v1917_v19 }
  0x85   : > { %1803 = vmatpush3.bf16.msra.mxu1 %v1918_v20  ;;  %1808 = vmatprep.subr.bf16.mxu0 %v1951_v1 }
  0x87   : > { %1785 = vmatmul.mubr.bf16.vlgmr.msra.gmra.mrb[12].mxu0 %v2166_v47 }
  0x88   : > { %1809 = vmatpush3.bf16.msra.mxu0 %v1919_v21  ;;  %1805 = vmatmul.mubr.bf16.vlgmr.msra.gmra.mrb[12].mxu1 %v1516_v22 }
  0x89   : > { %1810 = vmatprep.subr.bf16.mxu0 %v1951_v1  ;;  %1824 = vmatprep.mubr.msk.bf16.mxu0 %vm1952_vm0, %v1951_v1 }
  0x8c   : > { %1811 = vmatpush3.bf16.msra.mxu0 %v1920_v23 }
  0x8d   : > { %1812 = vmatprep.subr.bf16.mxu0 %v1951_v1 }
  0x90   : > { %1813 = vmatpush3.bf16.msra.mxu0 %v1921_v24 }
  0x91   : > { %1814 = vmatprep.subr.bf16.mxu0 %v1951_v1 }
  0x94   : > { %1815 = vmatpush3.bf16.msra.mxu0 %v1922_v25 }
  0x95   : > { %1816 = vmatprep.subr.bf16.mxu0 %v1951_v1 }
  0x98   : > { %1817 = vmatpush3.bf16.msra.mxu0 %v1923_v26 }
  0x99   : > { %1818 = vmatprep.subr.bf16.mxu0 %v1951_v1 }
  0x9c   : > { %1819 = vmatpush3.bf16.msra.mxu0 %v1924_v27 }
  0x9d   : > { %1820 = vmatprep.subr.bf16.mxu0 %v1951_v1 }
  0xa0   : > { %1821 = vmatpush3.bf16.msra.mxu0 %v1925_v28 }
  0xa1   : > { %1822 = vmatprep.subr.bf16.mxu0 %v1951_v1 }
  0xa4   : > { %1823 = vmatpush3.bf16.msra.mxu0 %v1926_v29 }
  0xa7   : > { %1825 = vmatmul.mubr.bf16.vlgmr.msra.gmra.mrb[16].mxu0 %v1172_v30 }
  0xfa   : > { %v359_v31 = vpop.f32.mrb[0].mxu0 }
  0xfb   : > { %v1666_v32 = vpop.f32.mrb[1].mxu0  ;;  %v447_v33 = vpop.f32.mrb[0].mxu1 }
  0xfc   : > { %v448_v34 = vadd.f32 %v447_v33, %v359_v31  ;;  %v362_v35 = vpop.f32.mrb[2].mxu0  ;;  %v1686_v36 = vpop.f32.mrb[1].mxu1 }
  0xfd   : > { %v1667_v37 = vpop.f32.mrb[3].mxu0  ;;  %v450_v38 = vpop.f32.mrb[2].mxu1 }
  0xfe   : > { %v1687_v39 = vpop.f32.mrb[3].mxu1 }
 0x11a   : > { %v571_v40 = vpop.f32.mrb[4].mxu0 }
 0x11b   : > { %v577_v41 = vadd.f32 %v571_v40, %v448_v34  ;;  %v1706_v42 = vpop.f32.mrb[5].mxu0  ;;  %v680_v43 = vpop.f32.mrb[4].mxu1 }
 0x11c   : > { %v574_v44 = vpop.f32.mrb[6].mxu0  ;;  %v1726_v45 = vpop.f32.mrb[5].mxu1 }
 0x11d   : > { %v686_v1 = vadd.f32 %v680_v43, %v577_v41  ;;  %v1707_v46 = vpop.f32.mrb[7].mxu0  ;;  %v683_v47 = vpop.f32.mrb[6].mxu1 }
 0x11e   : > { %v1727_v48 = vpop.f32.mrb[7].mxu1 }
 0x13a   : > { %v789_v49 = vpop.f32.mrb[8].mxu0 }
 0x13b   : > { %v795_v50 = vadd.f32 %v789_v49, %v686_v1  ;;  %v1746_v51 = vpop.f32.mrb[9].mxu0  ;;  %v914_v52 = vpop.f32.mrb[8].mxu1 }
 0x13c   : > { %v792_v53 = vpop.f32.mrb[10].mxu0  ;;  %v1766_v54 = vpop.f32.mrb[9].mxu1 }
 0x13d   : > { %v920_v55 = vadd.f32 %v914_v52, %v795_v50  ;;  %v1747_v56 = vpop.f32.mrb[11].mxu0  ;;  %v917_v57 = vpop.f32.mrb[10].mxu1 }
 0x13e   : > { %v1767_v58 = vpop.f32.mrb[11].mxu1 }
 0x15a   : > { %v1023_v59 = vpop.f32.mrb[12].mxu0 }
 0x15b   : > { %v1029_v60 = vadd.f32 %v1023_v59, %v920_v55  ;;  %v1786_v61 = vpop.f32.mrb[13].mxu0  ;;  %v1132_v62 = vpop.f32.mrb[12].mxu1 }
 0x15c   : > { %v1026_v63 = vpop.f32.mrb[14].mxu0  ;;  %v1806_v0 = vpop.f32.mrb[13].mxu1 }
 0x15d   : > { %v1138_v2 = vadd.f32 %v1132_v62, %v1029_v60  ;;  %v1787_v3 = vpop.f32.mrb[15].mxu0  ;;  %v1135_v4 = vpop.f32.mrb[14].mxu1 }
 0x15e   : > { %v1807_v5 = vpop.f32.mrb[15].mxu1 }
 0x17a   : > { %v1257_v6 = vpop.f32.mrb[16].mxu0 }
 0x17b   : > { %v1263_v8 = vadd.f32 %v1257_v6, %v1138_v2  ;;  %v1826_v9 = vpop.f32.mrb[17].mxu0 }
 0x17c   : > { %v1260_v11 = vpop.f32.mrb[18].mxu0 }
 0x17d   : > { %v1265_v12 = vadd.f32 %v1264_v7, %v1263_v8  ;;  %v1827_v13 = vpop.f32.mrb[19].mxu0 }
 0x17f   : > { %v1267_v15 = vmul.f32 %v1266_v10, %v1265_v12 }
 0x181   : > { %v1269_v16 = vadd.f32 %v1268_v14, %v1267_v15 }
 0x183   : > { %v1270_v17 = vmax.f32 %v1269_v16, 0.0 }
 0x185   : > { %v1271_v19 = vpack.c.bf16 %v1270_v17, %v1270_v17 }
 0x187   : > { %v1276_v20 = vsel %vm1274_vm3, %v1271_v19, %v1275_v18 }
 0x188   : > { %1277 = vst [vmem:[%s237_s11] sm:$0x1] %v1276_v20 }
 0x189 PF: > { %s15_s20 = sadd.s32 1, %s1949_s20   ;;  %s2369_s18 = smov %s1945_s19 }
 0x18a   : > { %p12_p5 = scmp.ge.s32.totalorder %s15_s20, 4   ;;  %s2370_s19 = smov %s2372_s21 }
 0x18c   :  { %14 = sbr.rel (!%p12_p5) target bundleno = 2 (0x2), region = 84 }

// kernel: resnet_base_embed.18
= control target key start
LH: loop header
LB: loop body
LE: loop exit
PB: predicated region body
PF: predicated region fallthrough
CT: control target
= control target key end

     0   :  { %s2210_s21 = smov 0   ;;  %s2212_s22 = smov 0   ;;  %s2614_s0 = inlined_call_operand.vmem [shape: bf16[2,1,1,3,3,128], index: 0, kind: input, shape index: {}]   ;;  %s2615_s1 = inlined_call_operand.vmem [shape: bf16[3,3,128,128], index: 1, kind: input, shape index: {}]   ;;  %s2616_s2 = inlined_call_operand.vmem [shape: f32[1,128], index: 2, kind: input, shape index: {}]   ;;  %s2617_s3 = inlined_call_operand.vmem [shape: bf16[2,1,1,128], index: 3, kind: input, shape index: {}]   ;;  %s2618_s4 = inlined_call_operand.vmem [shape: bf16[128,128], index: 4, kind: input, shape index: {}]   ;;  %s2619_s5 = inlined_call_operand.vmem [shape: f32[1,128], index: 5, kind: input, shape index: {}]   ;;  %s2620_s6 = inlined_call_operand.vmem [shape: bf16[2,1,1,128], index: 6, kind: output, shape index: {}]  }
   0x1   :  { %s2214_s23 = smov 0  }
   0x2 LB: > { %s28_s24 = sadd.s32 1, %s2166_s22  ;;  %p1531_p0 = scmp.ge.s32.totalorder %s2170_s23, 1  ;;  %s2170_s23 = sphi %s2214_s23, %s16_s23   ;;  %s2166_s22 = sphi %s2212_s22, %s2622_s22   ;;  %s2162_s21 = sphi %s2210_s21, %s2621_s21  }
   0x3   : > { %p30_p1 = scmp.ge.s32.totalorder %s28_s24, 2  ;;  %p239_p2 = scmp.lt.s32.totalorder %s2170_s23, 3 }
   0x5   : > { %s2624_s24 = smov (%p30_p1, %s28_s24), 0  ;;  %p240_p3 = pnand %p1531_p0, %p239_p2 }
   0x6   : > { %v2068_v0 = vld [vmem:[%s2615_s1 + $0x40] sm:$0xff] (!%p240_p3)   ;;  %v2172_v1 = vmov (!%p240_p3), 0.0   ;;  %v2070_v3 = vld [vmem:[%s2615_s1 + $0x48] sm:$0xff] (!%p240_p3)   ;;  %vm2173_vm0 = vmmov (!%p240_p3), 0   ;;  %v2072_v5 = vld [vmem:[%s2615_s1 + $0x50] sm:$0xff] (!%p240_p3)   ;;  %p276_p4 = scmp.lt.s32.totalorder (!%p240_p3), %s2162_s21, 1  ;;  %v334_v9 = vlaneseq (!%p240_p3) }
   0x7   : > { %243 = sbr.rel (%p240_p3) target bundleno = 391 (0x187), region = 44  ;;  %1840 = vmatprep.subr.bf16.mxu0 (!%p240_p3), %v2172_v1  ;;  %1860 = vmatprep.subr.bf16.mxu1 (!%p240_p3), %v2172_v1  ;;  %v2069_v2 = vld [vmem:[%s2615_s1] sm:$0xff] (!%p240_p3)   ;;  %v2071_v4 = vld [vmem:[%s2615_s1 + $0x8] sm:$0xff] (!%p240_p3)   ;;  %v2073_v6 = vld [vmem:[%s2615_s1 + $0x10] sm:$0xff] (!%p240_p3)   ;;  %v2174_v12 = vmov (!%p240_p3), 1983009808  }
   0x8   : > { %1841 = vmatpush3.bf16.msra.mxu0 (!%p240_p3), %v2068_v0  ;;  %1856 = vmatprep.mubr.msk.bf16.mxu0 (!%p240_p3), %vm2173_vm0, %v2172_v1  ;;  %v2074_v7 = vld [vmem:[%s2615_s1 + $0x58] sm:$0xff] (!%p240_p3)   ;;  %v2076_v10 = vld [vmem:[%s2615_s1 + $0x60] sm:$0xff] (!%p240_p3)   ;;  %v332_v13 = vunpack.c.l.s4 (!%p240_p3), %v2174_v12  ;;  %v335_v14 = vshrl.u32 (!%p240_p3), %v334_v9, 7  ;;  %v2078_v15 = vld [vmem:[%s2615_s1 + $0x68] sm:$0xff] (!%p240_p3)   ;;  %vm1436_vm1 = vcmask (!%p240_p3), 1040384  }
   0x9   : > { %1861 = vmatpush3.bf16.msra.mxu1 (!%p240_p3), %v2069_v2  ;;  %1842 = vmatprep.subr.bf16.mxu0 (!%p240_p3), %v2172_v1  ;;  %v2075_v8 = vld [vmem:[%s2615_s1 + $0x18] sm:$0xff] (!%p240_p3)   ;;  %v2077_v11 = vld [vmem:[%s2615_s1 + $0x20] sm:$0xff] (!%p240_p3)   ;;  %v2079_v16 = vld [vmem:[%s2615_s1 + $0x28] sm:$0xff] (!%p240_p3)   ;;  %vm1437_vm2 = vsmask.f32 (!%p240_p3), 256 }
   0xa   : > { %1862 = vmatprep.subr.bf16.mxu1 (!%p240_p3), %v2172_v1  ;;  %1876 = vmatprep.mubr.msk.bf16.mxu1 (!%p240_p3), %vm2173_vm0, %v2172_v1  ;;  %v333_v17 = vunpack.c.0.s8 (!%p240_p3), %v332_v13  ;;  %v2080_v18 = vld [vmem:[%s2615_s1 + $0x70] sm:$0xff] (!%p240_p3)   ;;  %v2082_v23 = vld [vmem:[%s2615_s1 + $0x78] sm:$0xff] (!%p240_p3)   ;;  %v2084_v26 = vld [vmem:[%s2615_s1 + $0x80] sm:$0xff] (!%p240_p3)  }
   0xb   : > { %v2081_v21 = vld [vmem:[%s2615_s1 + $0x30] sm:$0xff] (!%p240_p3)   ;;  %v2083_v24 = vld [vmem:[%s2615_s1 + $0x38] sm:$0xff] (!%p240_p3)   ;;  %v2085_v27 = vld [vmem:[%s2615_s1 + $0xc0] sm:$0xff] (!%p240_p3)  }
   0xc   : > { %1843 = vmatpush3.bf16.msra.mxu0 (!%p240_p3), %v2070_v3  ;;  %v2295_v19 = vsub.s32 (!%p240_p3), %v333_v17, %v335_v14  ;;  %v2086_v28 = vld [vmem:[%s2615_s1 + $0x88] sm:$0xff] (!%p240_p3)   ;;  %v2088_v30 = vld [vmem:[%s2615_s1 + $0x90] sm:$0xff] (!%p240_p3)   ;;  %v2090_v32 = vld [vmem:[%s2615_s1 + $0x98] sm:$0xff] (!%p240_p3)  }
   0xd   : > { %1863 = vmatpush3.bf16.msra.mxu1 (!%p240_p3), %v2071_v4  ;;  %1844 = vmatprep.subr.bf16.mxu0 (!%p240_p3), %v2172_v1  ;;  %v2087_v29 = vld [vmem:[%s2615_s1 + $0xc8] sm:$0xff] (!%p240_p3)   ;;  %v2089_v31 = vld [vmem:[%s2615_s1 + $0xd0] sm:$0xff] (!%p240_p3)   ;;  %v2091_v33 = vld [vmem:[%s2615_s1 + $0xd8] sm:$0xff] (!%p240_p3)  }
   0xe   : > { %1864 = vmatprep.subr.bf16.mxu1 %v2172_v1  ;;  %s2626_s21 = smov (!%p276_p4, %s2162_s21), 1  ;;  %v2092_v34 = vld [vmem:[%s2615_s1 + $0xa0] sm:$0xff]   ;;  %v2094_v36 = vld [vmem:[%s2615_s1 + $0xa8] sm:$0xff]   ;;  %v2096_v38 = vld [vmem:[%s2615_s1 + $0xb0] sm:$0xff]  }
   0xf   : > { %s2040_s25 = smul.u32 6, %s2626_s21  ;;  %v2093_v35 = vld [vmem:[%s2615_s1 + $0xe0] sm:$0xff]   ;;  %v2095_v37 = vld [vmem:[%s2615_s1 + $0xe8] sm:$0xff]   ;;  %v2097_v39 = vld [vmem:[%s2615_s1 + $0xf0] sm:$0xff]   ;;  %s286_s14 = scalar_lea.vmem %s2617_s3, %s2626_s21 }
  0x10   : > { %1845 = vmatpush3.bf16.msra.mxu0 %v2072_v5  ;;  %v2098_v41 = vld [vmem:[%s2615_s1 + $0xb8] sm:$0xff]   ;;  %v2100_v44 = vld [vmem:[%s2615_s1 + $0x100] sm:$0xff]   ;;  %v2102_v47 = vld [vmem:[%s2615_s1 + $0x108] sm:$0xff]   ;;  %s292_s20 = scalar_lea.vmem %s2620_s6, %s2626_s21 }
  0x11   : > { %1865 = vmatpush3.bf16.msra.mxu1 %v2073_v6  ;;  %1846 = vmatprep.subr.bf16.mxu0 %v2172_v1  ;;  %s2289_s8 = scalar_lea.vmem %s2614_s0, %s2040_s25  ;;  %v2099_v42 = vld [vmem:[%s2615_s1 + $0xf8] sm:$0xff]   ;;  %v2101_v46 = vld [vmem:[%s2615_s1 + $0x140] sm:$0xff]   ;;  %v2103_v48 = vld [vmem:[%s2615_s1 + $0x148] sm:$0xff]  }
  0x12   : > { %1866 = vmatprep.subr.bf16.mxu1 %v2172_v1  ;;  %v296_v20 = vld [vmem:[%s2289_s8] sm:$0x1]  ;;  %v1581_v40 = vld.sshfl [vmem:[%s2289_s8] sm:$0x2 pattern:$0x76325410]  ;;  %vm1438_vm3 = vmand %vm1436_vm1, %vm1437_vm2 }
  0x13   : > { %v337_v22 = vrot.slane %v296_v20, %v2295_v19  ;;  %v544_v43 = vrot.slane %v1581_v40, 1  ;;  %v1590_v45 = vld [vmem:[%s2289_s8 + $0x2] sm:$0x1]  ;;  %v2104_v49 = vld [vmem:[%s2615_s1 + $0x110] sm:$0xff]   ;;  %v2106_v51 = vld [vmem:[%s2615_s1 + $0x118] sm:$0xff]  }
  0x14   : > { %1847 = vmatpush3.bf16.msra.mxu0 %v2074_v7  ;;  %v2105_v50 = vld [vmem:[%s2615_s1 + $0x150] sm:$0xff]   ;;  %v2107_v52 = vld [vmem:[%s2615_s1 + $0x158] sm:$0xff]   ;;  %v2108_v53 = vld [vmem:[%s2615_s1 + $0x120] sm:$0xff]   ;;  %v769_v59 = vrot.slane %v1590_v45, %v2295_v19 }
  0x15   : > { %1867 = vmatpush3.bf16.msra.mxu1 %v2075_v8  ;;  %1848 = vmatprep.subr.bf16.mxu0 %v2172_v1  ;;  %v339_v25 = vshrl.u32 %v337_v22, 16  ;;  %v2109_v54 = vld [vmem:[%s2615_s1 + $0x160] sm:$0xff]   ;;  %v2110_v55 = vld [vmem:[%s2615_s1 + $0x128] sm:$0xff]   ;;  %v2112_v57 = vld [vmem:[%s2615_s1 + $0x130] sm:$0xff]  }
  0x16   : > { %1868 = vmatprep.subr.bf16.mxu1 %v2172_v1  ;;  %v2111_v56 = vld [vmem:[%s2615_s1 + $0x168] sm:$0xff]   ;;  %v2113_v58 = vld [vmem:[%s2615_s1 + $0x170] sm:$0xff]   ;;  %v2114_v60 = vld [vmem:[%s2615_s1 + $0x138] sm:$0xff]   ;;  %v771_v63 = vshrl.u32 %v769_v59, 16 }
  0x17   : > { %v2115_v61 = vld [vmem:[%s2615_s1 + $0x178] sm:$0xff]   ;;  %v1656_v62 = vld.sshfl [vmem:[%s2289_s8 + $0x2] sm:$0x2 pattern:$0x76325410]  ;;  %v2118_v4 = vld [vmem:[%s2615_s1 + $0x188] sm:$0xff]  }
  0x18   : > { %1849 = vmatpush3.bf16.msra.mxu0 %v2076_v10  ;;  %v2116_v0 = vld [vmem:[%s2615_s1 + $0x180] sm:$0xff]   ;;  %v889_v2 = vrot.slane %v1656_v62, 1  ;;  %v2119_v5 = vld [vmem:[%s2615_s1 + $0x1c8] sm:$0xff]   ;;  %v2120_v6 = vld [vmem:[%s2615_s1 + $0x190] sm:$0xff]  }
  0x19   : > { %1869 = vmatpush3.bf16.msra.mxu1 %v2077_v11  ;;  %1850 = vmatprep.subr.bf16.mxu0 %v2172_v1  ;;  %v2117_v3 = vld [vmem:[%s2615_s1 + $0x1c0] sm:$0xff]   ;;  %v2121_v7 = vld [vmem:[%s2615_s1 + $0x1d0] sm:$0xff]   ;;  %v2122_v8 = vld [vmem:[%s2615_s1 + $0x198] sm:$0xff]  }
  0x1a   : > { %1870 = vmatprep.subr.bf16.mxu1 %v2172_v1  ;;  %v2123_v9 = vld [vmem:[%s2615_s1 + $0x1d8] sm:$0xff]   ;;  %v2124_v10 = vld [vmem:[%s2615_s1 + $0x1a0] sm:$0xff]   ;;  %v2126_v12 = vld [vmem:[%s2615_s1 + $0x1a8] sm:$0xff]  }
  0x1b   : > { %v2125_v11 = vld [vmem:[%s2615_s1 + $0x1e0] sm:$0xff]   ;;  %v2127_v13 = vld [vmem:[%s2615_s1 + $0x1e8] sm:$0xff]   ;;  %v2128_v14 = vld [vmem:[%s2615_s1 + $0x1b0] sm:$0xff]  }
  0x1c   : > { %1851 = vmatpush3.bf16.msra.mxu0 %v2078_v15  ;;  %v2129_v15 = vld [vmem:[%s2615_s1 + $0x1f0] sm:$0xff]   ;;  %v2130_v17 = vld [vmem:[%s2615_s1 + $0x1b8] sm:$0xff]   ;;  %v2132_v22 = vld [vmem:[%s2615_s1 + $0x200] sm:$0xff]  }
  0x1d   : > { %1871 = vmatpush3.bf16.msra.mxu1 %v2079_v16  ;;  %1852 = vmatprep.subr.bf16.mxu0 %v2172_v1  ;;  %v1665_v16 = vld [vmem:[%s2289_s8 + $0x4] sm:$0x1] }
  0x1e   : > { %1872 = vmatprep.subr.bf16.mxu1 %v2172_v1 }
  0x20   : > { %1853 = vmatpush3.bf16.msra.mxu0 %v2080_v18  ;;  %v1114_v18 = vrot.slane %v1665_v16, %v2295_v19  ;;  %v2133_v19 = vld [vmem:[%s2618_s4] sm:$0xff]  }
  0x21   : > { %1873 = vmatpush3.bf16.msra.mxu1 %v2081_v21  ;;  %1854 = vmatprep.subr.bf16.mxu0 %v2172_v1 }
  0x22   : > { %1874 = vmatprep.subr.bf16.mxu1 %v2172_v1  ;;  %v1116_v21 = vshrl.u32 %v1114_v18, 16 }
  0x24   : > { %1855 = vmatpush3.bf16.msra.mxu0 %v2082_v23  ;;  %v2134_v23 = vld [vmem:[%s2615_s1 + $0x208] sm:$0xff]  }
  0x25   : > { %1875 = vmatpush3.bf16.msra.mxu1 %v2083_v24  ;;  %1880 = vmatprep.subr.bf16.mxu0 %v2172_v1  ;;  %v2135_v24 = vld [vmem:[%s2618_s4 + $0x8] sm:$0xff]  }
  0x26   : > { %1900 = vmatprep.subr.bf16.mxu1 %v2172_v1 }
  0x27   : > { %1857 = vmatmul.mubr.bf16.vlgmr.msra.gmra.mrb[0].mxu0 %v339_v25  ;;  %v2136_v25 = vld [vmem:[%s2615_s1 + $0x210] sm:$0xff]  }
  0x28   : > { %1877 = vmatmul.mubr.bf16.vlgmr.msra.gmra.mrb[0].mxu1 %v296_v20  ;;  %1881 = vmatpush3.bf16.msra.mxu0 %v2084_v26  ;;  %v2131_v20 = vld [vmem:[%s2615_s1 + $0x1f8] sm:$0xff]   ;;  %v2137_v26 = vld [vmem:[%s2618_s4 + $0x10] sm:$0xff]  }
  0x29   : > { %1901 = vmatpush3.bf16.msra.mxu1 %v2085_v27  ;;  %1882 = vmatprep.subr.bf16.mxu0 %v2172_v1  ;;  %v2138_v27 = vld [vmem:[%s2615_s1 + $0x218] sm:$0xff]  }
  0x2a   : > { %1902 = vmatprep.subr.bf16.mxu1 %v2172_v1  ;;  %1896 = vmatprep.mubr.msk.bf16.mxu0 %vm2173_vm0, %v2172_v1 }
  0x2b   : > { %1916 = vmatprep.mubr.msk.bf16.mxu1 %vm2173_vm0, %v2172_v1 }
  0x2c   : > { %1883 = vmatpush3.bf16.msra.mxu0 %v2086_v28  ;;  %v2139_v28 = vld [vmem:[%s2618_s4 + $0x18] sm:$0xff]  }
  0x2d   : > { %1903 = vmatpush3.bf16.msra.mxu1 %v2087_v29  ;;  %1884 = vmatprep.subr.bf16.mxu0 %v2172_v1  ;;  %v2140_v29 = vld [vmem:[%s2615_s1 + $0x220] sm:$0xff]  }
  0x2e   : > { %1904 = vmatprep.subr.bf16.mxu1 %v2172_v1 }
  0x30   : > { %1885 = vmatpush3.bf16.msra.mxu0 %v2088_v30  ;;  %v2141_v30 = vld [vmem:[%s2618_s4 + $0x20] sm:$0xff]  }
  0x31   : > { %1905 = vmatpush3.bf16.msra.mxu1 %v2089_v31  ;;  %1886 = vmatprep.subr.bf16.mxu0 %v2172_v1  ;;  %v2142_v31 = vld [vmem:[%s2615_s1 + $0x228] sm:$0xff]  }
  0x32   : > { %1906 = vmatprep.subr.bf16.mxu1 %v2172_v1 }
  0x34   : > { %1887 = vmatpush3.bf16.msra.mxu0 %v2090_v32  ;;  %v2143_v32 = vld [vmem:[%s2618_s4 + $0x28] sm:$0xff]  }
  0x35   : > { %1907 = vmatpush3.bf16.msra.mxu1 %v2091_v33  ;;  %1888 = vmatprep.subr.bf16.mxu0 %v2172_v1  ;;  %v2144_v33 = vld [vmem:[%s2615_s1 + $0x230] sm:$0xff]  }
  0x36   : > { %1908 = vmatprep.subr.bf16.mxu1 %v2172_v1 }
  0x38   : > { %1889 = vmatpush3.bf16.msra.mxu0 %v2092_v34  ;;  %v2145_v34 = vld [vmem:[%s2618_s4 + $0x30] sm:$0xff]  }
  0x39   : > { %1909 = vmatpush3.bf16.msra.mxu1 %v2093_v35  ;;  %1890 = vmatprep.subr.bf16.mxu0 %v2172_v1  ;;  %v2146_v35 = vld [vmem:[%s2615_s1 + $0x238] sm:$0xff]  }
  0x3a   : > { %1910 = vmatprep.subr.bf16.mxu1 %v2172_v1 }
  0x3c   : > { %1891 = vmatpush3.bf16.msra.mxu0 %v2094_v36  ;;  %v1731_v36 = vld.sshfl [vmem:[%s2289_s8 + $0x4] sm:$0x2 pattern:$0x76325410] }
  0x3d   : > { %1911 = vmatpush3.bf16.msra.mxu1 %v2095_v37  ;;  %1892 = vmatprep.subr.bf16.mxu0 %v2172_v1  ;;  %v2147_v37 = vld [vmem:[%s2618_s4 + $0x38] sm:$0xff]  }
  0x3e   : > { %1912 = vmatprep.subr.bf16.mxu1 %v2172_v1 }
  0x40   : > { %1893 = vmatpush3.bf16.msra.mxu0 %v2096_v38  ;;  %v1234_v38 = vrot.slane %v1731_v36, 1 }
  0x41   : > { %1913 = vmatpush3.bf16.msra.mxu1 %v2097_v39  ;;  %1894 = vmatprep.subr.bf16.mxu0 %v2172_v1  ;;  %v1327_v39 = vld [vmem:[%s286_s14] sm:$0x1] }
  0x42   : > { %1914 = vmatprep.subr.bf16.mxu1 %v2172_v1 }
  0x44   : > { %1895 = vmatpush3.bf16.msra.mxu0 %v2098_v41 }
  0x45   : > { %1915 = vmatpush3.bf16.msra.mxu1 %v2099_v42  ;;  %1920 = vmatprep.subr.bf16.mxu0 %v2172_v1 }
  0x46   : > { %1940 = vmatprep.subr.bf16.mxu1 %v2172_v1 }
  0x47   : > { %1897 = vmatmul.mubr.bf16.vlgmr.msra.gmra.mrb[4].mxu0 %v544_v43 }
  0x48   : > { %1921 = vmatpush3.bf16.msra.mxu0 %v2100_v44  ;;  %1917 = vmatmul.mubr.bf16.vlgmr.msra.gmra.mrb[4].mxu1 %v1590_v45 }
  0x49   : > { %1941 = vmatpush3.bf16.msra.mxu1 %v2101_v46  ;;  %1922 = vmatprep.subr.bf16.mxu0 %v2172_v1 }
  0x4a   : > { %1942 = vmatprep.subr.bf16.mxu1 %v2172_v1  ;;  %1936 = vmatprep.mubr.msk.bf16.mxu0 %vm2173_vm0, %v2172_v1 }
  0x4b   : > { %1956 = vmatprep.mubr.msk.bf16.mxu1 %vm2173_vm0, %v2172_v1 }
  0x4c   : > { %1923 = vmatpush3.bf16.msra.mxu0 %v2102_v47 }
  0x4d   : > { %1943 = vmatpush3.bf16.msra.mxu1 %v2103_v48  ;;  %1924 = vmatprep.subr.bf16.mxu0 %v2172_v1 }
  0x4e   : > { %1944 = vmatprep.subr.bf16.mxu1 %v2172_v1 }
  0x50   : > { %1925 = vmatpush3.bf16.msra.mxu0 %v2104_v49 }
  0x51   : > { %1945 = vmatpush3.bf16.msra.mxu1 %v2105_v50  ;;  %1926 = vmatprep.subr.bf16.mxu0 %v2172_v1 }
  0x52   : > { %1946 = vmatprep.subr.bf16.mxu1 %v2172_v1 }
  0x54   : > { %1927 = vmatpush3.bf16.msra.mxu0 %v2106_v51 }
  0x55   : > { %1947 = vmatpush3.bf16.msra.mxu1 %v2107_v52  ;;  %1928 = vmatprep.subr.bf16.mxu0 %v2172_v1 }
  0x56   : > { %1948 = vmatprep.subr.bf16.mxu1 %v2172_v1 }
  0x58   : > { %1929 = vmatpush3.bf16.msra.mxu0 %v2108_v53 }
  0x59   : > { %1949 = vmatpush3.bf16.msra.mxu1 %v2109_v54  ;;  %1930 = vmatprep.subr.bf16.mxu0 %v2172_v1 }
  0x5a   : > { %1950 = vmatprep.subr.bf16.mxu1 %v2172_v1 }
  0x5c   : > { %1931 = vmatpush3.bf16.msra.mxu0 %v2110_v55 }
  0x5d   : > { %1951 = vmatpush3.bf16.msra.mxu1 %v2111_v56  ;;  %1932 = vmatprep.subr.bf16.mxu0 %v2172_v1 }
  0x5e   : > { %1952 = vmatprep.subr.bf16.mxu1 %v2172_v1 }
  0x60   : > { %1933 = vmatpush3.bf16.msra.mxu0 %v2112_v57 }
  0x61   : > { %1953 = vmatpush3.bf16.msra.mxu1 %v2113_v58  ;;  %1934 = vmatprep.subr.bf16.mxu0 %v2172_v1 }
  0x62   : > { %1954 = vmatprep.subr.bf16.mxu1 %v2172_v1 }
  0x64   : > { %1935 = vmatpush3.bf16.msra.mxu0 %v2114_v60 }
  0x65   : > { %1955 = vmatpush3.bf16.msra.mxu1 %v2115_v61  ;;  %1960 = vmatprep.subr.bf16.mxu0 %v2172_v1 }
  0x66   : > { %1980 = vmatprep.subr.bf16.mxu1 %v2172_v1 }
  0x67   : > { %1937 = vmatmul.mubr.bf16.vlgmr.msra.gmra.mrb[8].mxu0 %v771_v63 }
  0x68   : > { %1961 = vmatpush3.bf16.msra.mxu0 %v2116_v0  ;;  %1957 = vmatmul.mubr.bf16.vlgmr.msra.gmra.mrb[8].mxu1 %v889_v2 }
  0x69   : > { %1981 = vmatpush3.bf16.msra.mxu1 %v2117_v3  ;;  %1962 = vmatprep.subr.bf16.mxu0 %v2172_v1 }
  0x6a   : > { %1982 = vmatprep.subr.bf16.mxu1 %v2172_v1  ;;  %1976 = vmatprep.mubr.msk.bf16.mxu0 %vm2173_vm0, %v2172_v1 }
  0x6b   : > { %1996 = vmatprep.mubr.msk.bf16.mxu1 %vm2173_vm0, %v2172_v1 }
  0x6c   : > { %1963 = vmatpush3.bf16.msra.mxu0 %v2118_v4 }
  0x6d   : > { %1983 = vmatpush3.bf16.msra.mxu1 %v2119_v5  ;;  %1964 = vmatprep.subr.bf16.mxu0 %v2172_v1 }
  0x6e   : > { %1984 = vmatprep.subr.bf16.mxu1 %v2172_v1 }
  0x70   : > { %1965 = vmatpush3.bf16.msra.mxu0 %v2120_v6 }
  0x71   : > { %1985 = vmatpush3.bf16.msra.mxu1 %v2121_v7  ;;  %1966 = vmatprep.subr.bf16.mxu0 %v2172_v1 }
  0x72   : > { %1986 = vmatprep.subr.bf16.mxu1 %v2172_v1 }
  0x74   : > { %1967 = vmatpush3.bf16.msra.mxu0 %v2122_v8 }
  0x75   : > { %1987 = vmatpush3.bf16.msra.mxu1 %v2123_v9  ;;  %1968 = vmatprep.subr.bf16.mxu0 %v2172_v1 }
  0x76   : > { %1988 = vmatprep.subr.bf16.mxu1 %v2172_v1 }
  0x78   : > { %1969 = vmatpush3.bf16.msra.mxu0 %v2124_v10 }
  0x79   : > { %1989 = vmatpush3.bf16.msra.mxu1 %v2125_v11  ;;  %1970 = vmatprep.subr.bf16.mxu0 %v2172_v1 }
  0x7a   : > { %1990 = vmatprep.subr.bf16.mxu1 %v2172_v1 }
  0x7c   : > { %1971 = vmatpush3.bf16.msra.mxu0 %v2126_v12 }
  0x7d   : > { %1991 = vmatpush3.bf16.msra.mxu1 %v2127_v13  ;;  %1972 = vmatprep.subr.bf16.mxu0 %v2172_v1 }
  0x7e   : > { %1992 = vmatprep.subr.bf16.mxu1 %v2172_v1 }
  0x80   : > { %1973 = vmatpush3.bf16.msra.mxu0 %v2128_v14 }
  0x81   : > { %1993 = vmatpush3.bf16.msra.mxu1 %v2129_v15  ;;  %1974 = vmatprep.subr.bf16.mxu0 %v2172_v1 }
  0x82   : > { %1994 = vmatprep.subr.bf16.mxu1 %v2172_v1 }
  0x84   : > { %1975 = vmatpush3.bf16.msra.mxu0 %v2130_v17 }
  0x85   : > { %1995 = vmatpush3.bf16.msra.mxu1 %v2131_v20  ;;  %2000 = vmatprep.subr.bf16.mxu0 %v2172_v1 }
  0x86   : > { %2020 = vmatprep.subr.bf16.mxu1 %v2172_v1 }
  0x87   : > { %1977 = vmatmul.mubr.bf16.vlgmr.msra.gmra.mrb[12].mxu0 %v1665_v16  ;;  %v1325_v16 = vld [vmem:[%s2616_s2] sm:$0x1] }
  0x88   : > { %2001 = vmatpush3.bf16.msra.mxu0 %v2132_v22  ;;  %1997 = vmatmul.mubr.bf16.vlgmr.msra.gmra.mrb[12].mxu1 %v1116_v21 }
  0x89   : > { %2021 = vmatpush3.bf16.msra.mxu1 %v2133_v19  ;;  %2002 = vmatprep.subr.bf16.mxu0 %v2172_v1 }
  0x8a   : > { %2022 = vmatprep.subr.bf16.mxu1 %v2172_v1  ;;  %2016 = vmatprep.mubr.msk.bf16.mxu0 %vm2173_vm0, %v2172_v1 }
  0x8b   : > { %2036 = vmatprep.mubr.msk.bf16.mxu1 %vm2173_vm0, %v2172_v1 }
  0x8c   : > { %2003 = vmatpush3.bf16.msra.mxu0 %v2134_v23 }
  0x8d   : > { %2023 = vmatpush3.bf16.msra.mxu1 %v2135_v24  ;;  %2004 = vmatprep.subr.bf16.mxu0 %v2172_v1 }
  0x8e   : > { %2024 = vmatprep.subr.bf16.mxu1 %v2172_v1 }
  0x90   : > { %2005 = vmatpush3.bf16.msra.mxu0 %v2136_v25  ;;  %v1433_v25 = vld [vmem:[%s2619_s5] sm:$0x1] }
  0x91   : > { %2025 = vmatpush3.bf16.msra.mxu1 %v2137_v26  ;;  %2006 = vmatprep.subr.bf16.mxu0 %v2172_v1 }
  0x92   : > { %2026 = vmatprep.subr.bf16.mxu1 %v2172_v1 }
  0x94   : > { %2007 = vmatpush3.bf16.msra.mxu0 %v2138_v27 }
  0x95   : > { %2027 = vmatpush3.bf16.msra.mxu1 %v2139_v28  ;;  %2008 = vmatprep.subr.bf16.mxu0 %v2172_v1 }
  0x96   : > { %2028 = vmatprep.subr.bf16.mxu1 %v2172_v1 }
  0x98   : > { %2009 = vmatpush3.bf16.msra.mxu0 %v2140_v29  ;;  %v1439_v29 = vld [vmem:[%s292_s20] sm:$0x1] }
  0x99   : > { %2029 = vmatpush3.bf16.msra.mxu1 %v2141_v30  ;;  %2010 = vmatprep.subr.bf16.mxu0 %v2172_v1 }
  0x9a   : > { %2030 = vmatprep.subr.bf16.mxu1 %v2172_v1 }
  0x9c   : > { %2011 = vmatpush3.bf16.msra.mxu0 %v2142_v31 }
  0x9d   : > { %2031 = vmatpush3.bf16.msra.mxu1 %v2143_v32  ;;  %2012 = vmatprep.subr.bf16.mxu0 %v2172_v1 }
  0x9e   : > { %2032 = vmatprep.subr.bf16.mxu1 %v2172_v1 }
  0xa0   : > { %2013 = vmatpush3.bf16.msra.mxu0 %v2144_v33 }
  0xa1   : > { %2033 = vmatpush3.bf16.msra.mxu1 %v2145_v34  ;;  %2014 = vmatprep.subr.bf16.mxu0 %v2172_v1 }
  0xa2   : > { %2034 = vmatprep.subr.bf16.mxu1 %v2172_v1 }
  0xa4   : > { %2015 = vmatpush3.bf16.msra.mxu0 %v2146_v35 }
  0xa5   : > { %2035 = vmatpush3.bf16.msra.mxu1 %v2147_v37 }
  0xa7   : > { %2017 = vmatmul.mubr.bf16.vlgmr.msra.gmra.mrb[16].mxu0 %v1234_v38 }
  0xa8   : > { %2037 = vmatmul.mubr.bf16.vlgmr.msra.gmra.mrb[16].mxu1 %v1327_v39 }
  0xfa   : > { %v424_v40 = vpop.f32.mrb[0].mxu0 }
  0xfb   : > { %v1858_v41 = vpop.f32.mrb[1].mxu0  ;;  %v512_v42 = vpop.f32.mrb[0].mxu1 }
  0xfc   : > { %v513_v43 = vadd.f32 %v512_v42, %v424_v40  ;;  %v427_v44 = vpop.f32.mrb[2].mxu0  ;;  %v1878_v45 = vpop.f32.mrb[1].mxu1 }
  0xfd   : > { %v1859_v46 = vpop.f32.mrb[3].mxu0  ;;  %v515_v47 = vpop.f32.mrb[2].mxu1 }
  0xfe   : > { %v1879_v48 = vpop.f32.mrb[3].mxu1 }
 0x11a   : > { %v628_v1 = vpop.f32.mrb[4].mxu0 }
 0x11b   : > { %v634_v49 = vadd.f32 %v628_v1, %v513_v43  ;;  %v1898_v50 = vpop.f32.mrb[5].mxu0  ;;  %v738_v51 = vpop.f32.mrb[4].mxu1 }
 0x11c   : > { %v631_v52 = vpop.f32.mrb[6].mxu0  ;;  %v1918_v53 = vpop.f32.mrb[5].mxu1 }
 0x11d   : > { %v744_v54 = vadd.f32 %v738_v51, %v634_v49  ;;  %v1899_v55 = vpop.f32.mrb[7].mxu0  ;;  %v741_v56 = vpop.f32.mrb[6].mxu1 }
 0x11e   : > { %v1919_v57 = vpop.f32.mrb[7].mxu1 }
 0x13a   : > { %v856_v58 = vpop.f32.mrb[8].mxu0 }
 0x13b   : > { %v862_v59 = vadd.f32 %v856_v58, %v744_v54  ;;  %v1938_v60 = vpop.f32.mrb[9].mxu0  ;;  %v973_v61 = vpop.f32.mrb[8].mxu1 }
 0x13c   : > { %v859_v62 = vpop.f32.mrb[10].mxu0  ;;  %v1958_v63 = vpop.f32.mrb[9].mxu1 }
 0x13d   : > { %v979_v0 = vadd.f32 %v973_v61, %v862_v59  ;;  %v1939_v2 = vpop.f32.mrb[11].mxu0  ;;  %v976_v3 = vpop.f32.mrb[10].mxu1 }
 0x13e   : > { %v1959_v4 = vpop.f32.mrb[11].mxu1 }
 0x15a   : > { %v1083_v5 = vpop.f32.mrb[12].mxu0 }
 0x15b   : > { %v1089_v6 = vadd.f32 %v1083_v5, %v979_v0  ;;  %v1978_v7 = vpop.f32.mrb[13].mxu0  ;;  %v1201_v8 = vpop.f32.mrb[12].mxu1 }
 0x15c   : > { %v1086_v9 = vpop.f32.mrb[14].mxu0  ;;  %v1998_v10 = vpop.f32.mrb[13].mxu1 }
 0x15d   : > { %v1207_v11 = vadd.f32 %v1201_v8, %v1089_v6  ;;  %v1979_v12 = vpop.f32.mrb[15].mxu0  ;;  %v1204_v13 = vpop.f32.mrb[14].mxu1 }
 0x15e   : > { %v1999_v14 = vpop.f32.mrb[15].mxu1 }
 0x17a   : > { %v1318_v15 = vpop.f32.mrb[16].mxu0 }
 0x17b   : > { %v1324_v17 = vadd.f32 %v1318_v15, %v1207_v11  ;;  %v2018_v18 = vpop.f32.mrb[17].mxu0  ;;  %v1426_v20 = vpop.f32.mrb[16].mxu1 }
 0x17c   : > { %v1321_v21 = vpop.f32.mrb[18].mxu0  ;;  %v2038_v22 = vpop.f32.mrb[17].mxu1 }
 0x17d   : > { %v1326_v19 = vadd.f32 %v1325_v16, %v1324_v17  ;;  %v2019_v23 = vpop.f32.mrb[19].mxu0  ;;  %v1429_v24 = vpop.f32.mrb[18].mxu1 }
 0x17e   : > { %v2039_v26 = vpop.f32.mrb[19].mxu1 }
 0x17f   : > { %v1432_v27 = vadd.f32 %v1426_v20, %v1326_v19 }
 0x181   : > { %v1434_v28 = vadd.f32 %v1433_v25, %v1432_v27 }
 0x183   : > { %v1435_v30 = vpack.c.bf16 %v1434_v28, %v1434_v28 }
 0x185   : > { %v1440_v31 = vsel %vm1438_vm3, %v1435_v30, %v1439_v29 }
 0x186   : > { %1441 = vst [vmem:[%s292_s20] sm:$0x1] %v1440_v31 }
 0x187 PF: > { %s16_s23 = sadd.s32 1, %s2170_s23   ;;  %s2621_s21 = smov %s2166_s22 }
 0x188   : > { %p13_p5 = scmp.ge.s32.totalorder %s16_s23, 4   ;;  %s2622_s22 = smov %s2624_s24 }
 0x18a   :  { %15 = sbr.rel (!%p13_p5) target bundleno = 2 (0x2), region = 88 }

// kernel: resnet_base_embed.21
= control target key start
LH: loop header
LB: loop body
LE: loop exit
PB: predicated region body
PF: predicated region fallthrough
CT: control target
= control target key end

     0   :  { %6 = vsyncpa [#allocation3], 0  ;;  %s392_s0 = inlined_call_operand.vmem [shape: bf16[2,1,128], index: 0, kind: input, shape index: {}]   ;;  %s393_s1 = inlined_call_operand.hbm [shape: f32[2,1,128], index: 1, kind: output, shape index: {}]  }
   0x1   :  { %8 = vsyncpa [#allocation3 + $0x1], 0  ;;  %s298_s6 = smov 0   ;;  %s300_s7 = smov 0  }
   0x2   :  { %s302_s8 = smov 0   ;;  %s304_s9 = smov 0  }
   0x3 LB: > { %s176_s10 = sadd.s32 4294967295, %s285_s9   ;;  %s177_s11 = sadd.s32 4294967294, %s285_s9   ;;  %s285_s9 = sphi %s304_s9, %s399_s9   ;;  %s281_s8 = sphi %s302_s8, %s398_s8   ;;  %s277_s7 = sphi %s300_s7, %s397_s7   ;;  %s273_s6 = sphi %s298_s6, %s396_s6  }
   0x4   : > { %s321_s12 = sadd.s32 1, %s285_s9   ;;  %s47_s13 = sadd.s32 1, %s281_s8 }
   0x5   : > { %s44_s14 = ssub.s32 %s285_s9, %s321_s12  ;;  %p57_p0 = scmp.ne.s32.totalorder %s281_s8, %s277_s7 }
   0x6   : > { %p45_p1 = scmp.eq.s32.totalorder %s44_s14, 0  ;;  %p58_p2 = scmp.eq.s32.totalorder %s176_s10, 1 }
   0x7   : > { %p63_p3 = scmp.ne.s32.totalorder %s277_s7, %s273_s6  ;;  %p64_p4 = scmp.eq.s32.totalorder %s177_s11, 1 }
   0x8   : > { %s331_s15 = scalar_select %p45_p1, %s281_s8, %s47_s13  }
   0x9   : > { %p333_p5 = por %p58_p2, %p57_p0  ;;  %p337_p6 = por %p64_p4, %p63_p3 }
   0xa   : > { %p180_p7 = scmp.ge.s32.totalorder %s285_s9, 1  ;;  %p88_p8 = scmp.lt.s32.totalorder %s285_s9, 3 }
   0xc   : > { %p89_p9 = pnand %p180_p7, %p88_p8 }
   0xd   : > { %s103_s18 = sand.u32 (!%p89_p9), 1, %s277_s7   ;;  %p105_p10 = scmp.lt.s32.totalorder (!%p89_p9), %s176_s10, 1 }
   0xe   : > { %92 = sbr.rel (%p89_p9) target bundleno = 41 (0x29), region = 24  ;;  %s104_s20 = scalar_lea.vmem (!%p89_p9), [#allocation2], %s103_s18 }
   0xf   : > { %s125_s21 = sshll.u32 (!%p89_p9), %s104_s20, 4  ;;  %s181_s22 = sshll.u32 (!%p89_p9), %s176_s10, 4  ;;  %s347_s21 = int_to_ptr.vmem [resolvable:$true] %s125_s21 }
  0x10   : > { %s352_s28 = scalar_lea.hbm (!%p89_p9), %s393_s1, %s181_s22  ;;  %s113_s29 = scalar_lea.sflag (!%p89_p9), [#allocation3], %s103_s18 }
  0x11   : > { %s223_s30 = scalar_lea.vmem (!%p89_p9), %s347_s21, 16  ;;  %s287_s2 = smov (!%p89_p9), [#allocation2]  }
  0x12   : > { %p224_p11 = scmp.ne.s32.totalorder (!%p89_p9), %s347_s21, %s223_s30  ;;  %s227_s3 = sshll.u32 (!%p89_p9), %s287_s2, 4  ;;  %s228_s3 = int_to_ptr.vmem [resolvable:$false] %s227_s3 }
  0x13   : > { %s229_s4 = scalar_lea.vmem (!%p89_p9), %s228_s3, 32  ;;  %p230_p0 = scmp.lt.s32.totalorder (!%p89_p9), %s347_s21, %s228_s3 }
  0x14   : > { %p225_p12 = pnand (!%p89_p9), %p224_p11, %p333_p5  ;;  %p231_p1 = scmp.lt.s32.totalorder (!%p89_p9), %s229_s4, %s223_s30 }
  0x15   : > { %s106_s19 = scalar_select %p105_p10, %s176_s10, 1 }
  0x16   : > { %p226_p13 = pneg %p225_p12  ;;  %p232_p2 = por %p231_p1, %p230_p0 }
  0x17   : > { %s107_s25 = scalar_lea.vmem %s392_s0, %s106_s19 }
  0x18   : > { %v108_v0 = vld [vmem:[%s107_s25] sm:$0x1]  ;;  %p233_p3 = pnand %p232_p2, %p226_p13 }
  0x19   : > { %v109_v1 = vunpack.c.l.bf16 %v108_v0 }
  0x1b   : > { %111 = vst [vmem:[%s104_s20] sm:$0x1] %v109_v1 }
  0x1c   : > { %236 = shalt.err (!%p233_p3)
}
  0x1d   : > { %s237_s5 = scalar_lea.hbm %s352_s28, 16  ;;  %s241_s13 = scalar_lea.hbm %s393_s1, 32 }
  0x1e   : > { %p238_p4 = scmp.ne.s32.totalorder %s352_s28, %s237_s5  ;;  %p242_p9 = scmp.lt.u32.totalorder %s352_s28, %s393_s1 }
  0x1f   : > { %p243_p10 = scmp.lt.u32.totalorder %s241_s13, %s237_s5  ;;  %p245_p12 = scmp.lt.u32.totalorder %s237_s5, %s352_s28 }
  0x20   : > { %p239_p7 = pnand %p238_p4, %p333_p5 }
  0x21   : > { %p244_p11 = por %p243_p10, %p242_p9 }
  0x22   : > { %p240_p8 = pneg %p239_p7 }
  0x23   : > { %p246_p13 = por %p245_p12, %p244_p11 }
  0x25   : > { %p247_p0 = pnand %p246_p13, %p240_p8 }
  0x27   : > { %250 = shalt.err (!%p247_p0)
}
  0x28   : > { %184 = dma.vmem_to_hbm [thread:$0]  (%p333_p5), %s347_s21, 16, %s352_s28, %s113_s29  }
  0x29 PF: > { %p190_p1 = scmp.ge.s32.totalorder %s285_s9, 2  ;;  %s137_s19 = sand.u32 1, %s273_s6  }
  0x2a   : > { %s138_s20 = scalar_lea.sflag [#allocation3], %s137_s19 }
  0x2b   : > { %p187_p2 = pnand %p190_p1, %p337_p6 }
  0x2d   : > { %268 = dma.done.wait (!%p187_p2), %s138_s20, 16  }
  0x2e   : > { %270 = vsyncadd (!%p187_p2), %s138_s20, 4294967280  ;;  %p11_p3 = scmp.ge.s32.totalorder %s321_s12, 4   ;;  %s396_s6 = smov %s277_s7 }
  0x2f   : > { %s397_s7 = smov %s281_s8  ;;  %s398_s8 = smov %s331_s15 }
  0x30   : > { %s399_s9 = smov %s321_s12  ;;  %13 = sbr.rel (!%p11_p3) target bundleno = 3 (0x3), region = 59 }
  0x37   :  { %142 = vsyncpa [#allocation3], 1 }
  0x38   :  { %144 = vsyncpa [#allocation3 + $0x1], 1 }

// kernel: resnet_base_embed.19
= control target key start
LH: loop header
LB: loop body
LE: loop exit
PB: predicated region body
PF: predicated region fallthrough
CT: control target
= control target key end

     0   :  { %s1993_s18 = smov 0   ;;  %s1995_s19 = smov 0   ;;  %s2369_s0 = inlined_call_operand.vmem [shape: bf16[2,1,1,3,3,128], index: 0, kind: input, shape index: {}]   ;;  %s2370_s1 = inlined_call_operand.vmem [shape: bf16[3,3,128,128], index: 1, kind: input, shape index: {}]   ;;  %s2371_s2 = inlined_call_operand.vmem [shape: f32[1,128], index: 2, kind: input, shape index: {}]   ;;  %s2372_s3 = inlined_call_operand.vmem [shape: f32[1,128], index: 3, kind: input, shape index: {}]   ;;  %s2373_s4 = inlined_call_operand.vmem [shape: f32[1,128], index: 4, kind: input, shape index: {}]   ;;  %s2374_s5 = inlined_call_operand.vmem [shape: bf16[2,1,1,128], index: 5, kind: output, shape index: {}]  }
   0x1   :  { %s1997_s20 = smov 0  }
   0x2 LB: > { %s27_s21 = sadd.s32 1, %s1954_s19  ;;  %p1364_p0 = scmp.ge.s32.totalorder %s1958_s20, 1  ;;  %s1958_s20 = sphi %s1997_s20, %s15_s20   ;;  %s1954_s19 = sphi %s1995_s19, %s2376_s19   ;;  %s1950_s18 = sphi %s1993_s18, %s2375_s18  }
   0x3   : > { %p29_p1 = scmp.ge.s32.totalorder %s27_s21, 2  ;;  %p201_p2 = scmp.lt.s32.totalorder %s1958_s20, 3 }
   0x5   : > { %s2378_s21 = smov (%p29_p1, %s27_s21), 0  ;;  %p202_p3 = pnand %p1364_p0, %p201_p2 }
   0x6   : > { %v1864_v0 = vld [vmem:[%s2370_s1 + $0x40] sm:$0xff] (!%p202_p3)   ;;  %v1960_v1 = vmov (!%p202_p3), 0.0   ;;  %v1866_v3 = vld [vmem:[%s2370_s1 + $0x48] sm:$0xff] (!%p202_p3)   ;;  %vm1961_vm0 = vmmov (!%p202_p3), 0   ;;  %v1868_v5 = vld [vmem:[%s2370_s1 + $0x50] sm:$0xff] (!%p202_p3)   ;;  %p230_p4 = scmp.lt.s32.totalorder (!%p202_p3), %s1950_s18, 1  ;;  %v282_v9 = vlaneseq (!%p202_p3) }
   0x7   : > { %205 = sbr.rel (%p202_p3) target bundleno = 393 (0x189), region = 40  ;;  %1656 = vmatprep.subr.bf16.mxu0 (!%p202_p3), %v1960_v1  ;;  %1676 = vmatprep.subr.bf16.mxu1 (!%p202_p3), %v1960_v1  ;;  %v1865_v2 = vld [vmem:[%s2370_s1] sm:$0xff] (!%p202_p3)   ;;  %v1867_v4 = vld [vmem:[%s2370_s1 + $0x8] sm:$0xff] (!%p202_p3)   ;;  %v1869_v6 = vld [vmem:[%s2370_s1 + $0x10] sm:$0xff] (!%p202_p3)   ;;  %v1962_v12 = vmov (!%p202_p3), 1983009808  }
   0x8   : > { %1657 = vmatpush3.bf16.msra.mxu0 (!%p202_p3), %v1864_v0  ;;  %1672 = vmatprep.mubr.msk.bf16.mxu0 (!%p202_p3), %vm1961_vm0, %v1960_v1  ;;  %v1870_v7 = vld [vmem:[%s2370_s1 + $0x58] sm:$0xff] (!%p202_p3)   ;;  %v1872_v10 = vld [vmem:[%s2370_s1 + $0x60] sm:$0xff] (!%p202_p3)   ;;  %v280_v13 = vunpack.c.l.s4 (!%p202_p3), %v1962_v12  ;;  %v283_v14 = vshrl.u32 (!%p202_p3), %v282_v9, 7  ;;  %v1874_v15 = vld [vmem:[%s2370_s1 + $0x68] sm:$0xff] (!%p202_p3)   ;;  %vm1281_vm1 = vcmask (!%p202_p3), 1040384  }
   0x9   : > { %1677 = vmatpush3.bf16.msra.mxu1 (!%p202_p3), %v1865_v2  ;;  %1658 = vmatprep.subr.bf16.mxu0 (!%p202_p3), %v1960_v1  ;;  %v1871_v8 = vld [vmem:[%s2370_s1 + $0x18] sm:$0xff] (!%p202_p3)   ;;  %v1873_v11 = vld [vmem:[%s2370_s1 + $0x20] sm:$0xff] (!%p202_p3)   ;;  %v1875_v16 = vld [vmem:[%s2370_s1 + $0x28] sm:$0xff] (!%p202_p3)   ;;  %vm1282_vm2 = vsmask.f32 (!%p202_p3), 256 }
   0xa   : > { %1678 = vmatprep.subr.bf16.mxu1 (!%p202_p3), %v1960_v1  ;;  %1692 = vmatprep.mubr.msk.bf16.mxu1 (!%p202_p3), %vm1961_vm0, %v1960_v1  ;;  %v281_v17 = vunpack.c.0.s8 (!%p202_p3), %v280_v13  ;;  %v1876_v18 = vld [vmem:[%s2370_s1 + $0x70] sm:$0xff] (!%p202_p3)   ;;  %v1878_v23 = vld [vmem:[%s2370_s1 + $0x78] sm:$0xff] (!%p202_p3)   ;;  %v1880_v26 = vld [vmem:[%s2370_s1 + $0x80] sm:$0xff] (!%p202_p3)  }
   0xb   : > { %v1877_v21 = vld [vmem:[%s2370_s1 + $0x30] sm:$0xff] (!%p202_p3)   ;;  %v1879_v24 = vld [vmem:[%s2370_s1 + $0x38] sm:$0xff] (!%p202_p3)   ;;  %v1881_v27 = vld [vmem:[%s2370_s1 + $0xc0] sm:$0xff] (!%p202_p3)  }
   0xc   : > { %1659 = vmatpush3.bf16.msra.mxu0 (!%p202_p3), %v1866_v3  ;;  %v2078_v19 = vsub.s32 (!%p202_p3), %v281_v17, %v283_v14  ;;  %v1882_v28 = vld [vmem:[%s2370_s1 + $0x88] sm:$0xff] (!%p202_p3)   ;;  %v1884_v30 = vld [vmem:[%s2370_s1 + $0x90] sm:$0xff] (!%p202_p3)   ;;  %v1886_v32 = vld [vmem:[%s2370_s1 + $0x98] sm:$0xff] (!%p202_p3)  }
   0xd   : > { %1679 = vmatpush3.bf16.msra.mxu1 (!%p202_p3), %v1867_v4  ;;  %1660 = vmatprep.subr.bf16.mxu0 (!%p202_p3), %v1960_v1  ;;  %v1883_v29 = vld [vmem:[%s2370_s1 + $0xc8] sm:$0xff] (!%p202_p3)   ;;  %v1885_v31 = vld [vmem:[%s2370_s1 + $0xd0] sm:$0xff] (!%p202_p3)   ;;  %v1887_v33 = vld [vmem:[%s2370_s1 + $0xd8] sm:$0xff] (!%p202_p3)  }
   0xe   : > { %1680 = vmatprep.subr.bf16.mxu1 %v1960_v1  ;;  %s2380_s18 = smov (!%p230_p4, %s1950_s18), 1  ;;  %v1888_v34 = vld [vmem:[%s2370_s1 + $0xa0] sm:$0xff]   ;;  %v1890_v36 = vld [vmem:[%s2370_s1 + $0xa8] sm:$0xff]   ;;  %v1892_v38 = vld [vmem:[%s2370_s1 + $0xb0] sm:$0xff]  }
   0xf   : > { %s1836_s17 = smul.u32 6, %s2380_s18  ;;  %v1889_v35 = vld [vmem:[%s2370_s1 + $0xe0] sm:$0xff]   ;;  %v1891_v37 = vld [vmem:[%s2370_s1 + $0xe8] sm:$0xff]   ;;  %v1893_v39 = vld [vmem:[%s2370_s1 + $0xf0] sm:$0xff]   ;;  %s240_s11 = scalar_lea.vmem %s2374_s5, %s2380_s18 }
  0x10   : > { %1661 = vmatpush3.bf16.msra.mxu0 %v1868_v5  ;;  %v1894_v41 = vld [vmem:[%s2370_s1 + $0xb8] sm:$0xff]   ;;  %v1896_v44 = vld [vmem:[%s2370_s1 + $0x100] sm:$0xff]   ;;  %v1898_v47 = vld [vmem:[%s2370_s1 + $0x108] sm:$0xff]  }
  0x11   : > { %1681 = vmatpush3.bf16.msra.mxu1 %v1869_v6  ;;  %1662 = vmatprep.subr.bf16.mxu0 %v1960_v1  ;;  %s2072_s28 = scalar_lea.vmem %s2369_s0, %s1836_s17  ;;  %v1895_v42 = vld [vmem:[%s2370_s1 + $0xf8] sm:$0xff]   ;;  %v1897_v46 = vld [vmem:[%s2370_s1 + $0x140] sm:$0xff]   ;;  %v1899_v49 = vld [vmem:[%s2370_s1 + $0x148] sm:$0xff]  }
  0x12   : > { %1682 = vmatprep.subr.bf16.mxu1 %v1960_v1  ;;  %v244_v20 = vld [vmem:[%s2072_s28] sm:$0x1]  ;;  %v1414_v40 = vld.sshfl [vmem:[%s2072_s28] sm:$0x2 pattern:$0x76325410]  ;;  %vm1283_vm3 = vmand %vm1281_vm1, %vm1282_vm2 }
  0x13   : > { %v285_v22 = vrot.slane %v244_v20, %v2078_v19  ;;  %v492_v43 = vrot.slane %v1414_v40, 1  ;;  %v1423_v45 = vld [vmem:[%s2072_s28 + $0x2] sm:$0x1]  ;;  %v2177_v48 = vld [vmem:[%s2072_s28 + $0x4] sm:$0x1]  ;;  %v1900_v51 = vld [vmem:[%s2370_s1 + $0x110] sm:$0xff]  }
  0x14   : > { %1663 = vmatpush3.bf16.msra.mxu0 %v1870_v7  ;;  %v1062_v50 = vrot.slane %v2177_v48, %v2078_v19  ;;  %v1901_v52 = vld [vmem:[%s2370_s1 + $0x150] sm:$0xff]   ;;  %v1902_v53 = vld [vmem:[%s2370_s1 + $0x118] sm:$0xff]   ;;  %v1904_v55 = vld [vmem:[%s2370_s1 + $0x120] sm:$0xff]   ;;  %v717_v61 = vrot.slane %v1423_v45, %v2078_v19 }
  0x15   : > { %1683 = vmatpush3.bf16.msra.mxu1 %v1871_v8  ;;  %1664 = vmatprep.subr.bf16.mxu0 %v1960_v1  ;;  %v287_v25 = vshrl.u32 %v285_v22, 16  ;;  %v1903_v54 = vld [vmem:[%s2370_s1 + $0x158] sm:$0xff]   ;;  %v1905_v56 = vld [vmem:[%s2370_s1 + $0x160] sm:$0xff]   ;;  %v1906_v57 = vld [vmem:[%s2370_s1 + $0x128] sm:$0xff]  }
  0x16   : > { %1684 = vmatprep.subr.bf16.mxu1 %v1960_v1  ;;  %v1907_v58 = vld [vmem:[%s2370_s1 + $0x168] sm:$0xff]   ;;  %v1908_v59 = vld [vmem:[%s2370_s1 + $0x130] sm:$0xff]   ;;  %v1910_v62 = vld [vmem:[%s2370_s1 + $0x138] sm:$0xff]   ;;  %v719_v2 = vshrl.u32 %v717_v61, 16 }
  0x17   : > { %v1909_v60 = vld [vmem:[%s2370_s1 + $0x170] sm:$0xff]   ;;  %v1911_v63 = vld [vmem:[%s2370_s1 + $0x178] sm:$0xff]   ;;  %v1489_v0 = vld.sshfl [vmem:[%s2072_s28 + $0x2] sm:$0x2 pattern:$0x76325410] }
  0x18   : > { %1665 = vmatpush3.bf16.msra.mxu0 %v1872_v10  ;;  %v1912_v3 = vld [vmem:[%s2370_s1 + $0x180] sm:$0xff]   ;;  %v837_v4 = vrot.slane %v1489_v0, 1  ;;  %v1914_v6 = vld [vmem:[%s2370_s1 + $0x188] sm:$0xff]   ;;  %v1916_v8 = vld [vmem:[%s2370_s1 + $0x190] sm:$0xff]  }
  0x19   : > { %1685 = vmatpush3.bf16.msra.mxu1 %v1873_v11  ;;  %1666 = vmatprep.subr.bf16.mxu0 %v1960_v1  ;;  %v1913_v5 = vld [vmem:[%s2370_s1 + $0x1c0] sm:$0xff]   ;;  %v1915_v7 = vld [vmem:[%s2370_s1 + $0x1c8] sm:$0xff]   ;;  %v1917_v9 = vld [vmem:[%s2370_s1 + $0x1d0] sm:$0xff]  }
  0x1a   : > { %1686 = vmatprep.subr.bf16.mxu1 %v1960_v1  ;;  %v1918_v10 = vld [vmem:[%s2370_s1 + $0x198] sm:$0xff]   ;;  %v1920_v12 = vld [vmem:[%s2370_s1 + $0x1a0] sm:$0xff]   ;;  %v1922_v14 = vld [vmem:[%s2370_s1 + $0x1a8] sm:$0xff]  }
  0x1b   : > { %v1919_v11 = vld [vmem:[%s2370_s1 + $0x1d8] sm:$0xff]   ;;  %v1921_v13 = vld [vmem:[%s2370_s1 + $0x1e0] sm:$0xff]   ;;  %v1925_v17 = vld [vmem:[%s2370_s1 + $0x1f0] sm:$0xff]  }
  0x1c   : > { %1667 = vmatpush3.bf16.msra.mxu0 %v1874_v15  ;;  %v1923_v15 = vld [vmem:[%s2370_s1 + $0x1e8] sm:$0xff]   ;;  %v1928_v22 = vld [vmem:[%s2370_s1 + $0x200] sm:$0xff]   ;;  %v1930_v19 = vld [vmem:[%s2370_s1 + $0x210] sm:$0xff]  }
  0x1d   : > { %1687 = vmatpush3.bf16.msra.mxu1 %v1875_v16  ;;  %1668 = vmatprep.subr.bf16.mxu0 %v1960_v1  ;;  %v1924_v16 = vld [vmem:[%s2370_s1 + $0x1b0] sm:$0xff]  }
  0x1e   : > { %1688 = vmatprep.subr.bf16.mxu1 %v1960_v1 }
  0x20   : > { %1669 = vmatpush3.bf16.msra.mxu0 %v1876_v18  ;;  %v1926_v18 = vld [vmem:[%s2370_s1 + $0x1b8] sm:$0xff]  }
  0x21   : > { %1689 = vmatpush3.bf16.msra.mxu1 %v1877_v21  ;;  %1670 = vmatprep.subr.bf16.mxu0 %v1960_v1  ;;  %v1064_v21 = vshrl.u32 %v1062_v50, 16 }
  0x22   : > { %1690 = vmatprep.subr.bf16.mxu1 %v1960_v1 }
  0x24   : > { %1671 = vmatpush3.bf16.msra.mxu0 %v1878_v23  ;;  %v1929_v23 = vld [vmem:[%s2370_s1 + $0x208] sm:$0xff]  }
  0x25   : > { %1691 = vmatpush3.bf16.msra.mxu1 %v1879_v24  ;;  %1696 = vmatprep.subr.bf16.mxu0 %v1960_v1  ;;  %v1931_v24 = vld [vmem:[%s2370_s1 + $0x218] sm:$0xff]  }
  0x26   : > { %1716 = vmatprep.subr.bf16.mxu1 %v1960_v1 }
  0x27   : > { %1673 = vmatmul.mubr.bf16.vlgmr.msra.gmra.mrb[0].mxu0 %v287_v25  ;;  %v1932_v25 = vld [vmem:[%s2370_s1 + $0x220] sm:$0xff]  }
  0x28   : > { %1693 = vmatmul.mubr.bf16.vlgmr.msra.gmra.mrb[0].mxu1 %v244_v20  ;;  %1697 = vmatpush3.bf16.msra.mxu0 %v1880_v26  ;;  %v1927_v20 = vld [vmem:[%s2370_s1 + $0x1f8] sm:$0xff]   ;;  %v1933_v26 = vld [vmem:[%s2370_s1 + $0x228] sm:$0xff]  }
  0x29   : > { %1717 = vmatpush3.bf16.msra.mxu1 %v1881_v27  ;;  %1698 = vmatprep.subr.bf16.mxu0 %v1960_v1  ;;  %v1934_v27 = vld [vmem:[%s2370_s1 + $0x230] sm:$0xff]  }
  0x2a   : > { %1718 = vmatprep.subr.bf16.mxu1 %v1960_v1  ;;  %1712 = vmatprep.mubr.msk.bf16.mxu0 %vm1961_vm0, %v1960_v1 }
  0x2b   : > { %1732 = vmatprep.mubr.msk.bf16.mxu1 %vm1961_vm0, %v1960_v1 }
  0x2c   : > { %1699 = vmatpush3.bf16.msra.mxu0 %v1882_v28  ;;  %v1935_v28 = vld [vmem:[%s2370_s1 + $0x238] sm:$0xff]  }
  0x2d   : > { %1719 = vmatpush3.bf16.msra.mxu1 %v1883_v29  ;;  %1700 = vmatprep.subr.bf16.mxu0 %v1960_v1  ;;  %v1564_v29 = vld.sshfl [vmem:[%s2072_s28 + $0x4] sm:$0x2 pattern:$0x76325410] }
  0x2e   : > { %1720 = vmatprep.subr.bf16.mxu1 %v1960_v1 }
  0x30   : > { %1701 = vmatpush3.bf16.msra.mxu0 %v1884_v30  ;;  %v1182_v30 = vrot.slane %v1564_v29, 1 }
  0x31   : > { %1721 = vmatpush3.bf16.msra.mxu1 %v1885_v31  ;;  %1702 = vmatprep.subr.bf16.mxu0 %v1960_v1 }
  0x32   : > { %1722 = vmatprep.subr.bf16.mxu1 %v1960_v1 }
  0x34   : > { %1703 = vmatpush3.bf16.msra.mxu0 %v1886_v32 }
  0x35   : > { %1723 = vmatpush3.bf16.msra.mxu1 %v1887_v33  ;;  %1704 = vmatprep.subr.bf16.mxu0 %v1960_v1 }
  0x36   : > { %1724 = vmatprep.subr.bf16.mxu1 %v1960_v1 }
  0x38   : > { %1705 = vmatpush3.bf16.msra.mxu0 %v1888_v34 }
  0x39   : > { %1725 = vmatpush3.bf16.msra.mxu1 %v1889_v35  ;;  %1706 = vmatprep.subr.bf16.mxu0 %v1960_v1 }
  0x3a   : > { %1726 = vmatprep.subr.bf16.mxu1 %v1960_v1 }
  0x3c   : > { %1707 = vmatpush3.bf16.msra.mxu0 %v1890_v36 }
  0x3d   : > { %1727 = vmatpush3.bf16.msra.mxu1 %v1891_v37  ;;  %1708 = vmatprep.subr.bf16.mxu0 %v1960_v1 }
  0x3e   : > { %1728 = vmatprep.subr.bf16.mxu1 %v1960_v1 }
  0x40   : > { %1709 = vmatpush3.bf16.msra.mxu0 %v1892_v38 }
  0x41   : > { %1729 = vmatpush3.bf16.msra.mxu1 %v1893_v39  ;;  %1710 = vmatprep.subr.bf16.mxu0 %v1960_v1 }
  0x42   : > { %1730 = vmatprep.subr.bf16.mxu1 %v1960_v1 }
  0x44   : > { %1711 = vmatpush3.bf16.msra.mxu0 %v1894_v41 }
  0x45   : > { %1731 = vmatpush3.bf16.msra.mxu1 %v1895_v42  ;;  %1736 = vmatprep.subr.bf16.mxu0 %v1960_v1 }
  0x46   : > { %1756 = vmatprep.subr.bf16.mxu1 %v1960_v1 }
  0x47   : > { %1713 = vmatmul.mubr.bf16.vlgmr.msra.gmra.mrb[4].mxu0 %v492_v43 }
  0x48   : > { %1737 = vmatpush3.bf16.msra.mxu0 %v1896_v44  ;;  %1733 = vmatmul.mubr.bf16.vlgmr.msra.gmra.mrb[4].mxu1 %v1423_v45 }
  0x49   : > { %1757 = vmatpush3.bf16.msra.mxu1 %v1897_v46  ;;  %1738 = vmatprep.subr.bf16.mxu0 %v1960_v1 }
  0x4a   : > { %1758 = vmatprep.subr.bf16.mxu1 %v1960_v1  ;;  %1752 = vmatprep.mubr.msk.bf16.mxu0 %vm1961_vm0, %v1960_v1 }
  0x4b   : > { %1772 = vmatprep.mubr.msk.bf16.mxu1 %vm1961_vm0, %v1960_v1 }
  0x4c   : > { %1739 = vmatpush3.bf16.msra.mxu0 %v1898_v47 }
  0x4d   : > { %1759 = vmatpush3.bf16.msra.mxu1 %v1899_v49  ;;  %1740 = vmatprep.subr.bf16.mxu0 %v1960_v1 }
  0x4e   : > { %1760 = vmatprep.subr.bf16.mxu1 %v1960_v1 }
  0x50   : > { %1741 = vmatpush3.bf16.msra.mxu0 %v1900_v51 }
  0x51   : > { %1761 = vmatpush3.bf16.msra.mxu1 %v1901_v52  ;;  %1742 = vmatprep.subr.bf16.mxu0 %v1960_v1 }
  0x52   : > { %1762 = vmatprep.subr.bf16.mxu1 %v1960_v1 }
  0x54   : > { %1743 = vmatpush3.bf16.msra.mxu0 %v1902_v53 }
  0x55   : > { %1763 = vmatpush3.bf16.msra.mxu1 %v1903_v54  ;;  %1744 = vmatprep.subr.bf16.mxu0 %v1960_v1 }
  0x56   : > { %1764 = vmatprep.subr.bf16.mxu1 %v1960_v1 }
  0x58   : > { %1745 = vmatpush3.bf16.msra.mxu0 %v1904_v55 }
  0x59   : > { %1765 = vmatpush3.bf16.msra.mxu1 %v1905_v56  ;;  %1746 = vmatprep.subr.bf16.mxu0 %v1960_v1 }
  0x5a   : > { %1766 = vmatprep.subr.bf16.mxu1 %v1960_v1 }
  0x5c   : > { %1747 = vmatpush3.bf16.msra.mxu0 %v1906_v57 }
  0x5d   : > { %1767 = vmatpush3.bf16.msra.mxu1 %v1907_v58  ;;  %1748 = vmatprep.subr.bf16.mxu0 %v1960_v1 }
  0x5e   : > { %1768 = vmatprep.subr.bf16.mxu1 %v1960_v1 }
  0x60   : > { %1749 = vmatpush3.bf16.msra.mxu0 %v1908_v59 }
  0x61   : > { %1769 = vmatpush3.bf16.msra.mxu1 %v1909_v60  ;;  %1750 = vmatprep.subr.bf16.mxu0 %v1960_v1 }
  0x62   : > { %1770 = vmatprep.subr.bf16.mxu1 %v1960_v1 }
  0x64   : > { %1751 = vmatpush3.bf16.msra.mxu0 %v1910_v62 }
  0x65   : > { %1771 = vmatpush3.bf16.msra.mxu1 %v1911_v63  ;;  %1776 = vmatprep.subr.bf16.mxu0 %v1960_v1 }
  0x66   : > { %1796 = vmatprep.subr.bf16.mxu1 %v1960_v1 }
  0x67   : > { %1753 = vmatmul.mubr.bf16.vlgmr.msra.gmra.mrb[8].mxu0 %v719_v2 }
  0x68   : > { %1777 = vmatpush3.bf16.msra.mxu0 %v1912_v3  ;;  %1773 = vmatmul.mubr.bf16.vlgmr.msra.gmra.mrb[8].mxu1 %v837_v4 }
  0x69   : > { %1797 = vmatpush3.bf16.msra.mxu1 %v1913_v5  ;;  %1778 = vmatprep.subr.bf16.mxu0 %v1960_v1 }
  0x6a   : > { %1798 = vmatprep.subr.bf16.mxu1 %v1960_v1  ;;  %1792 = vmatprep.mubr.msk.bf16.mxu0 %vm1961_vm0, %v1960_v1 }
  0x6b   : > { %1812 = vmatprep.mubr.msk.bf16.mxu1 %vm1961_vm0, %v1960_v1 }
  0x6c   : > { %1779 = vmatpush3.bf16.msra.mxu0 %v1914_v6 }
  0x6d   : > { %1799 = vmatpush3.bf16.msra.mxu1 %v1915_v7  ;;  %1780 = vmatprep.subr.bf16.mxu0 %v1960_v1  ;;  %v1273_v7 = vld [vmem:[%s2371_s2] sm:$0x1] }
  0x6e   : > { %1800 = vmatprep.subr.bf16.mxu1 %v1960_v1 }
  0x70   : > { %1781 = vmatpush3.bf16.msra.mxu0 %v1916_v8 }
  0x71   : > { %1801 = vmatpush3.bf16.msra.mxu1 %v1917_v9  ;;  %1782 = vmatprep.subr.bf16.mxu0 %v1960_v1 }
  0x72   : > { %1802 = vmatprep.subr.bf16.mxu1 %v1960_v1 }
  0x74   : > { %1783 = vmatpush3.bf16.msra.mxu0 %v1918_v10  ;;  %v1275_v10 = vld [vmem:[%s2372_s3] sm:$0x1] }
  0x75   : > { %1803 = vmatpush3.bf16.msra.mxu1 %v1919_v11  ;;  %1784 = vmatprep.subr.bf16.mxu0 %v1960_v1 }
  0x76   : > { %1804 = vmatprep.subr.bf16.mxu1 %v1960_v1 }
  0x78   : > { %1785 = vmatpush3.bf16.msra.mxu0 %v1920_v12 }
  0x79   : > { %1805 = vmatpush3.bf16.msra.mxu1 %v1921_v13  ;;  %1786 = vmatprep.subr.bf16.mxu0 %v1960_v1 }
  0x7a   : > { %1806 = vmatprep.subr.bf16.mxu1 %v1960_v1 }
  0x7c   : > { %1787 = vmatpush3.bf16.msra.mxu0 %v1922_v14  ;;  %v1277_v14 = vld [vmem:[%s2373_s4] sm:$0x1] }
  0x7d   : > { %1807 = vmatpush3.bf16.msra.mxu1 %v1923_v15  ;;  %1788 = vmatprep.subr.bf16.mxu0 %v1960_v1 }
  0x7e   : > { %1808 = vmatprep.subr.bf16.mxu1 %v1960_v1 }
  0x80   : > { %1789 = vmatpush3.bf16.msra.mxu0 %v1924_v16 }
  0x81   : > { %1809 = vmatpush3.bf16.msra.mxu1 %v1925_v17  ;;  %1790 = vmatprep.subr.bf16.mxu0 %v1960_v1 }
  0x82   : > { %1810 = vmatprep.subr.bf16.mxu1 %v1960_v1 }
  0x84   : > { %1791 = vmatpush3.bf16.msra.mxu0 %v1926_v18  ;;  %v1284_v18 = vld [vmem:[%s240_s11] sm:$0x1] }
  0x85   : > { %1811 = vmatpush3.bf16.msra.mxu1 %v1927_v20  ;;  %1816 = vmatprep.subr.bf16.mxu0 %v1960_v1 }
  0x87   : > { %1793 = vmatmul.mubr.bf16.vlgmr.msra.gmra.mrb[12].mxu0 %v2177_v48 }
  0x88   : > { %1817 = vmatpush3.bf16.msra.mxu0 %v1928_v22  ;;  %1813 = vmatmul.mubr.bf16.vlgmr.msra.gmra.mrb[12].mxu1 %v1064_v21 }
  0x89   : > { %1818 = vmatprep.subr.bf16.mxu0 %v1960_v1  ;;  %1832 = vmatprep.mubr.msk.bf16.mxu0 %vm1961_vm0, %v1960_v1 }
  0x8c   : > { %1819 = vmatpush3.bf16.msra.mxu0 %v1929_v23 }
  0x8d   : > { %1820 = vmatprep.subr.bf16.mxu0 %v1960_v1 }
  0x90   : > { %1821 = vmatpush3.bf16.msra.mxu0 %v1930_v19 }
  0x91   : > { %1822 = vmatprep.subr.bf16.mxu0 %v1960_v1 }
  0x94   : > { %1823 = vmatpush3.bf16.msra.mxu0 %v1931_v24 }
  0x95   : > { %1824 = vmatprep.subr.bf16.mxu0 %v1960_v1 }
  0x98   : > { %1825 = vmatpush3.bf16.msra.mxu0 %v1932_v25 }
  0x99   : > { %1826 = vmatprep.subr.bf16.mxu0 %v1960_v1 }
  0x9c   : > { %1827 = vmatpush3.bf16.msra.mxu0 %v1933_v26 }
  0x9d   : > { %1828 = vmatprep.subr.bf16.mxu0 %v1960_v1 }
  0xa0   : > { %1829 = vmatpush3.bf16.msra.mxu0 %v1934_v27 }
  0xa1   : > { %1830 = vmatprep.subr.bf16.mxu0 %v1960_v1 }
  0xa4   : > { %1831 = vmatpush3.bf16.msra.mxu0 %v1935_v28 }
  0xa7   : > { %1833 = vmatmul.mubr.bf16.vlgmr.msra.gmra.mrb[16].mxu0 %v1182_v30 }
  0xfa   : > { %v372_v31 = vpop.f32.mrb[0].mxu0 }
  0xfb   : > { %v1674_v32 = vpop.f32.mrb[1].mxu0  ;;  %v460_v33 = vpop.f32.mrb[0].mxu1 }
  0xfc   : > { %v461_v34 = vadd.f32 %v460_v33, %v372_v31  ;;  %v375_v35 = vpop.f32.mrb[2].mxu0  ;;  %v1694_v36 = vpop.f32.mrb[1].mxu1 }
  0xfd   : > { %v1675_v37 = vpop.f32.mrb[3].mxu0  ;;  %v463_v38 = vpop.f32.mrb[2].mxu1 }
  0xfe   : > { %v1695_v39 = vpop.f32.mrb[3].mxu1 }
 0x11a   : > { %v576_v40 = vpop.f32.mrb[4].mxu0 }
 0x11b   : > { %v582_v41 = vadd.f32 %v576_v40, %v461_v34  ;;  %v1714_v42 = vpop.f32.mrb[5].mxu0  ;;  %v686_v43 = vpop.f32.mrb[4].mxu1 }
 0x11c   : > { %v579_v44 = vpop.f32.mrb[6].mxu0  ;;  %v1734_v45 = vpop.f32.mrb[5].mxu1 }
 0x11d   : > { %v692_v46 = vadd.f32 %v686_v43, %v582_v41  ;;  %v1715_v1 = vpop.f32.mrb[7].mxu0  ;;  %v689_v47 = vpop.f32.mrb[6].mxu1 }
 0x11e   : > { %v1735_v48 = vpop.f32.mrb[7].mxu1 }
 0x13a   : > { %v804_v49 = vpop.f32.mrb[8].mxu0 }
 0x13b   : > { %v810_v50 = vadd.f32 %v804_v49, %v692_v46  ;;  %v1754_v51 = vpop.f32.mrb[9].mxu0  ;;  %v921_v52 = vpop.f32.mrb[8].mxu1 }
 0x13c   : > { %v807_v53 = vpop.f32.mrb[10].mxu0  ;;  %v1774_v54 = vpop.f32.mrb[9].mxu1 }
 0x13d   : > { %v927_v55 = vadd.f32 %v921_v52, %v810_v50  ;;  %v1755_v56 = vpop.f32.mrb[11].mxu0  ;;  %v924_v57 = vpop.f32.mrb[10].mxu1 }
 0x13e   : > { %v1775_v58 = vpop.f32.mrb[11].mxu1 }
 0x15a   : > { %v1031_v59 = vpop.f32.mrb[12].mxu0 }
 0x15b   : > { %v1037_v60 = vadd.f32 %v1031_v59, %v927_v55  ;;  %v1794_v61 = vpop.f32.mrb[13].mxu0  ;;  %v1149_v62 = vpop.f32.mrb[12].mxu1 }
 0x15c   : > { %v1034_v63 = vpop.f32.mrb[14].mxu0  ;;  %v1814_v0 = vpop.f32.mrb[13].mxu1 }
 0x15d   : > { %v1155_v2 = vadd.f32 %v1149_v62, %v1037_v60  ;;  %v1795_v3 = vpop.f32.mrb[15].mxu0  ;;  %v1152_v4 = vpop.f32.mrb[14].mxu1 }
 0x15e   : > { %v1815_v5 = vpop.f32.mrb[15].mxu1 }
 0x17a   : > { %v1266_v6 = vpop.f32.mrb[16].mxu0 }
 0x17b   : > { %v1272_v8 = vadd.f32 %v1266_v6, %v1155_v2  ;;  %v1834_v9 = vpop.f32.mrb[17].mxu0 }
 0x17c   : > { %v1269_v11 = vpop.f32.mrb[18].mxu0 }
 0x17d   : > { %v1274_v12 = vadd.f32 %v1273_v7, %v1272_v8  ;;  %v1835_v13 = vpop.f32.mrb[19].mxu0 }
 0x17f   : > { %v1276_v15 = vmul.f32 %v1275_v10, %v1274_v12 }
 0x181   : > { %v1278_v16 = vadd.f32 %v1277_v14, %v1276_v15 }
 0x183   : > { %v1279_v17 = vmax.f32 %v1278_v16, 0.0 }
 0x185   : > { %v1280_v20 = vpack.c.bf16 %v1279_v17, %v1279_v17 }
 0x187   : > { %v1285_v21 = vsel %vm1283_vm3, %v1280_v20, %v1284_v18 }
 0x188   : > { %1286 = vst [vmem:[%s240_s11] sm:$0x1] %v1285_v21 }
 0x189 PF: > { %s15_s20 = sadd.s32 1, %s1958_s20   ;;  %s2375_s18 = smov %s1954_s19 }
 0x18a   : > { %p12_p5 = scmp.ge.s32.totalorder %s15_s20, 4   ;;  %s2376_s19 = smov %s2378_s21 }
 0x18c   :  { %14 = sbr.rel (!%p12_p5) target bundleno = 2 (0x2), region = 81 }

// kernel: resnet_base_embed.20
= control target key start
LH: loop header
LB: loop body
LE: loop exit
PB: predicated region body
PF: predicated region fallthrough
CT: control target
= control target key end

     0   :  { %s1997_s15 = smov 0   ;;  %s1999_s16 = smov 0   ;;  %s2371_s0 = inlined_call_operand.vmem [shape: bf16[2,1,1,3,3,128], index: 0, kind: input, shape index: {}]   ;;  %s2372_s1 = inlined_call_operand.vmem [shape: bf16[3,3,128,128], index: 1, kind: input, shape index: {}]   ;;  %s2373_s2 = inlined_call_operand.vmem [shape: f32[1,128], index: 2, kind: input, shape index: {}]   ;;  %s2374_s3 = inlined_call_operand.vmem [shape: bf16[2,1,1,128], index: 3, kind: input, shape index: {}]   ;;  %s2375_s4 = inlined_call_operand.vmem [shape: bf16[2,1,1,128], index: 4, kind: output, shape index: {}]  }
   0x1   :  { %s2001_s17 = smov 0  }
   0x2 LB: > { %s26_s18 = sadd.s32 1, %s1963_s16  ;;  %p1373_p0 = scmp.ge.s32.totalorder %s1967_s17, 1  ;;  %s1967_s17 = sphi %s2001_s17, %s14_s17   ;;  %s1963_s16 = sphi %s1999_s16, %s2377_s16   ;;  %s1959_s15 = sphi %s1997_s15, %s2376_s15  }
   0x3   : > { %p28_p1 = scmp.ge.s32.totalorder %s26_s18, 2  ;;  %p189_p2 = scmp.lt.s32.totalorder %s1967_s17, 3 }
   0x5   : > { %s2379_s18 = smov (%p28_p1, %s26_s18), 0  ;;  %p190_p3 = pnand %p1373_p0, %p189_p2 }
   0x6   : > { %v1873_v0 = vld [vmem:[%s2372_s1 + $0x40] sm:$0xff] (!%p190_p3)   ;;  %v1969_v1 = vmov (!%p190_p3), 0.0   ;;  %v1875_v3 = vld [vmem:[%s2372_s1 + $0x48] sm:$0xff] (!%p190_p3)   ;;  %vm1970_vm0 = vmmov (!%p190_p3), 0   ;;  %v1877_v5 = vld [vmem:[%s2372_s1 + $0x50] sm:$0xff] (!%p190_p3)   ;;  %p222_p4 = scmp.lt.s32.totalorder (!%p190_p3), %s1959_s15, 1  ;;  %v280_v9 = vlaneseq (!%p190_p3) }
   0x7   : > { %193 = sbr.rel (%p190_p3) target bundleno = 391 (0x187), region = 36  ;;  %1665 = vmatprep.subr.bf16.mxu0 (!%p190_p3), %v1969_v1  ;;  %1685 = vmatprep.subr.bf16.mxu1 (!%p190_p3), %v1969_v1  ;;  %v1874_v2 = vld [vmem:[%s2372_s1] sm:$0xff] (!%p190_p3)   ;;  %v1876_v4 = vld [vmem:[%s2372_s1 + $0x8] sm:$0xff] (!%p190_p3)   ;;  %v1878_v6 = vld [vmem:[%s2372_s1 + $0x10] sm:$0xff] (!%p190_p3)   ;;  %v1971_v12 = vmov (!%p190_p3), 1983009808  }
   0x8   : > { %1666 = vmatpush3.bf16.msra.mxu0 (!%p190_p3), %v1873_v0  ;;  %1681 = vmatprep.mubr.msk.bf16.mxu0 (!%p190_p3), %vm1970_vm0, %v1969_v1  ;;  %v1879_v7 = vld [vmem:[%s2372_s1 + $0x58] sm:$0xff] (!%p190_p3)   ;;  %v1881_v10 = vld [vmem:[%s2372_s1 + $0x60] sm:$0xff] (!%p190_p3)   ;;  %v278_v13 = vunpack.c.l.s4 (!%p190_p3), %v1971_v12  ;;  %v281_v14 = vshrl.u32 (!%p190_p3), %v280_v9, 7  ;;  %v1883_v15 = vld [vmem:[%s2372_s1 + $0x68] sm:$0xff] (!%p190_p3)   ;;  %vm1278_vm1 = vcmask (!%p190_p3), 1040384  }
   0x9   : > { %1686 = vmatpush3.bf16.msra.mxu1 (!%p190_p3), %v1874_v2  ;;  %1667 = vmatprep.subr.bf16.mxu0 (!%p190_p3), %v1969_v1  ;;  %v1880_v8 = vld [vmem:[%s2372_s1 + $0x18] sm:$0xff] (!%p190_p3)   ;;  %v1882_v11 = vld [vmem:[%s2372_s1 + $0x20] sm:$0xff] (!%p190_p3)   ;;  %v1884_v16 = vld [vmem:[%s2372_s1 + $0x28] sm:$0xff] (!%p190_p3)   ;;  %vm1279_vm2 = vsmask.f32 (!%p190_p3), 256 }
   0xa   : > { %1687 = vmatprep.subr.bf16.mxu1 (!%p190_p3), %v1969_v1  ;;  %1701 = vmatprep.mubr.msk.bf16.mxu1 (!%p190_p3), %vm1970_vm0, %v1969_v1  ;;  %v279_v17 = vunpack.c.0.s8 (!%p190_p3), %v278_v13  ;;  %v1885_v18 = vld [vmem:[%s2372_s1 + $0x70] sm:$0xff] (!%p190_p3)   ;;  %v1887_v23 = vld [vmem:[%s2372_s1 + $0x78] sm:$0xff] (!%p190_p3)   ;;  %v1889_v26 = vld [vmem:[%s2372_s1 + $0x80] sm:$0xff] (!%p190_p3)  }
   0xb   : > { %v1886_v21 = vld [vmem:[%s2372_s1 + $0x30] sm:$0xff] (!%p190_p3)   ;;  %v1888_v24 = vld [vmem:[%s2372_s1 + $0x38] sm:$0xff] (!%p190_p3)   ;;  %v1890_v27 = vld [vmem:[%s2372_s1 + $0xc0] sm:$0xff] (!%p190_p3)  }
   0xc   : > { %1668 = vmatpush3.bf16.msra.mxu0 (!%p190_p3), %v1875_v3  ;;  %v2082_v19 = vsub.s32 (!%p190_p3), %v279_v17, %v281_v14  ;;  %v1891_v28 = vld [vmem:[%s2372_s1 + $0x88] sm:$0xff] (!%p190_p3)   ;;  %v1893_v30 = vld [vmem:[%s2372_s1 + $0x90] sm:$0xff] (!%p190_p3)   ;;  %v1895_v32 = vld [vmem:[%s2372_s1 + $0x98] sm:$0xff] (!%p190_p3)  }
   0xd   : > { %1688 = vmatpush3.bf16.msra.mxu1 (!%p190_p3), %v1876_v4  ;;  %1669 = vmatprep.subr.bf16.mxu0 (!%p190_p3), %v1969_v1  ;;  %v1892_v29 = vld [vmem:[%s2372_s1 + $0xc8] sm:$0xff] (!%p190_p3)   ;;  %v1894_v31 = vld [vmem:[%s2372_s1 + $0xd0] sm:$0xff] (!%p190_p3)   ;;  %v1896_v33 = vld [vmem:[%s2372_s1 + $0xd8] sm:$0xff] (!%p190_p3)  }
   0xe   : > { %1689 = vmatprep.subr.bf16.mxu1 %v1969_v1  ;;  %s2381_s15 = smov (!%p222_p4, %s1959_s15), 1  ;;  %v1897_v34 = vld [vmem:[%s2372_s1 + $0xa0] sm:$0xff]   ;;  %v1899_v36 = vld [vmem:[%s2372_s1 + $0xa8] sm:$0xff]   ;;  %v1901_v38 = vld [vmem:[%s2372_s1 + $0xb0] sm:$0xff]  }
   0xf   : > { %s1845_s13 = smul.u32 6, %s2381_s15  ;;  %v1898_v35 = vld [vmem:[%s2372_s1 + $0xe0] sm:$0xff]   ;;  %v1900_v37 = vld [vmem:[%s2372_s1 + $0xe8] sm:$0xff]   ;;  %v1902_v39 = vld [vmem:[%s2372_s1 + $0xf0] sm:$0xff]   ;;  %s232_s19 = scalar_lea.vmem %s2374_s3, %s2381_s15 }
  0x10   : > { %1670 = vmatpush3.bf16.msra.mxu0 %v1877_v5  ;;  %v1903_v41 = vld [vmem:[%s2372_s1 + $0xb8] sm:$0xff]   ;;  %v1905_v44 = vld [vmem:[%s2372_s1 + $0x100] sm:$0xff]   ;;  %v1907_v47 = vld [vmem:[%s2372_s1 + $0x108] sm:$0xff]   ;;  %s238_s25 = scalar_lea.vmem %s2375_s4, %s2381_s15 }
  0x11   : > { %1690 = vmatpush3.bf16.msra.mxu1 %v1878_v6  ;;  %1671 = vmatprep.subr.bf16.mxu0 %v1969_v1  ;;  %s2076_s24 = scalar_lea.vmem %s2371_s0, %s1845_s13  ;;  %v1904_v42 = vld [vmem:[%s2372_s1 + $0xf8] sm:$0xff]   ;;  %v1906_v46 = vld [vmem:[%s2372_s1 + $0x140] sm:$0xff]   ;;  %v1908_v49 = vld [vmem:[%s2372_s1 + $0x148] sm:$0xff]  }
  0x12   : > { %1691 = vmatprep.subr.bf16.mxu1 %v1969_v1  ;;  %v242_v20 = vld [vmem:[%s2076_s24] sm:$0x1]  ;;  %v1423_v40 = vld.sshfl [vmem:[%s2076_s24] sm:$0x2 pattern:$0x76325410]  ;;  %vm1280_vm3 = vmand %vm1278_vm1, %vm1279_vm2 }
  0x13   : > { %v283_v22 = vrot.slane %v242_v20, %v2082_v19  ;;  %v490_v43 = vrot.slane %v1423_v40, 1  ;;  %v1432_v45 = vld [vmem:[%s2076_s24 + $0x2] sm:$0x1]  ;;  %v2181_v48 = vld [vmem:[%s2076_s24 + $0x4] sm:$0x1]  ;;  %v1909_v51 = vld [vmem:[%s2372_s1 + $0x110] sm:$0xff]  }
  0x14   : > { %1672 = vmatpush3.bf16.msra.mxu0 %v1879_v7  ;;  %v1060_v50 = vrot.slane %v2181_v48, %v2082_v19  ;;  %v1910_v52 = vld [vmem:[%s2372_s1 + $0x150] sm:$0xff]   ;;  %v1911_v53 = vld [vmem:[%s2372_s1 + $0x118] sm:$0xff]   ;;  %v1913_v55 = vld [vmem:[%s2372_s1 + $0x120] sm:$0xff]   ;;  %v715_v61 = vrot.slane %v1432_v45, %v2082_v19 }
  0x15   : > { %1692 = vmatpush3.bf16.msra.mxu1 %v1880_v8  ;;  %1673 = vmatprep.subr.bf16.mxu0 %v1969_v1  ;;  %v285_v25 = vshrl.u32 %v283_v22, 16  ;;  %v1912_v54 = vld [vmem:[%s2372_s1 + $0x158] sm:$0xff]   ;;  %v1914_v56 = vld [vmem:[%s2372_s1 + $0x160] sm:$0xff]   ;;  %v1915_v57 = vld [vmem:[%s2372_s1 + $0x128] sm:$0xff]  }
  0x16   : > { %1693 = vmatprep.subr.bf16.mxu1 %v1969_v1  ;;  %v1916_v58 = vld [vmem:[%s2372_s1 + $0x168] sm:$0xff]   ;;  %v1917_v59 = vld [vmem:[%s2372_s1 + $0x130] sm:$0xff]   ;;  %v1919_v62 = vld [vmem:[%s2372_s1 + $0x138] sm:$0xff]   ;;  %v717_v2 = vshrl.u32 %v715_v61, 16 }
  0x17   : > { %v1918_v60 = vld [vmem:[%s2372_s1 + $0x170] sm:$0xff]   ;;  %v1920_v63 = vld [vmem:[%s2372_s1 + $0x178] sm:$0xff]   ;;  %v1498_v0 = vld.sshfl [vmem:[%s2076_s24 + $0x2] sm:$0x2 pattern:$0x76325410] }
  0x18   : > { %1674 = vmatpush3.bf16.msra.mxu0 %v1881_v10  ;;  %v1921_v3 = vld [vmem:[%s2372_s1 + $0x180] sm:$0xff]   ;;  %v835_v4 = vrot.slane %v1498_v0, 1  ;;  %v1923_v6 = vld [vmem:[%s2372_s1 + $0x188] sm:$0xff]   ;;  %v1925_v8 = vld [vmem:[%s2372_s1 + $0x190] sm:$0xff]  }
  0x19   : > { %1694 = vmatpush3.bf16.msra.mxu1 %v1882_v11  ;;  %1675 = vmatprep.subr.bf16.mxu0 %v1969_v1  ;;  %v1922_v5 = vld [vmem:[%s2372_s1 + $0x1c0] sm:$0xff]   ;;  %v1924_v7 = vld [vmem:[%s2372_s1 + $0x1c8] sm:$0xff]   ;;  %v1926_v9 = vld [vmem:[%s2372_s1 + $0x1d0] sm:$0xff]  }
  0x1a   : > { %1695 = vmatprep.subr.bf16.mxu1 %v1969_v1  ;;  %v1927_v10 = vld [vmem:[%s2372_s1 + $0x198] sm:$0xff]   ;;  %v1929_v12 = vld [vmem:[%s2372_s1 + $0x1a0] sm:$0xff]   ;;  %v1931_v14 = vld [vmem:[%s2372_s1 + $0x1a8] sm:$0xff]  }
  0x1b   : > { %v1928_v11 = vld [vmem:[%s2372_s1 + $0x1d8] sm:$0xff]   ;;  %v1930_v13 = vld [vmem:[%s2372_s1 + $0x1e0] sm:$0xff]   ;;  %v1934_v17 = vld [vmem:[%s2372_s1 + $0x1f0] sm:$0xff]  }
  0x1c   : > { %1676 = vmatpush3.bf16.msra.mxu0 %v1883_v15  ;;  %v1932_v15 = vld [vmem:[%s2372_s1 + $0x1e8] sm:$0xff]   ;;  %v1937_v22 = vld [vmem:[%s2372_s1 + $0x200] sm:$0xff]   ;;  %v1939_v19 = vld [vmem:[%s2372_s1 + $0x210] sm:$0xff]  }
  0x1d   : > { %1696 = vmatpush3.bf16.msra.mxu1 %v1884_v16  ;;  %1677 = vmatprep.subr.bf16.mxu0 %v1969_v1  ;;  %v1933_v16 = vld [vmem:[%s2372_s1 + $0x1b0] sm:$0xff]  }
  0x1e   : > { %1697 = vmatprep.subr.bf16.mxu1 %v1969_v1 }
  0x20   : > { %1678 = vmatpush3.bf16.msra.mxu0 %v1885_v18  ;;  %v1935_v18 = vld [vmem:[%s2372_s1 + $0x1b8] sm:$0xff]  }
  0x21   : > { %1698 = vmatpush3.bf16.msra.mxu1 %v1886_v21  ;;  %1679 = vmatprep.subr.bf16.mxu0 %v1969_v1  ;;  %v1062_v21 = vshrl.u32 %v1060_v50, 16 }
  0x22   : > { %1699 = vmatprep.subr.bf16.mxu1 %v1969_v1 }
  0x24   : > { %1680 = vmatpush3.bf16.msra.mxu0 %v1887_v23  ;;  %v1938_v23 = vld [vmem:[%s2372_s1 + $0x208] sm:$0xff]  }
  0x25   : > { %1700 = vmatpush3.bf16.msra.mxu1 %v1888_v24  ;;  %1705 = vmatprep.subr.bf16.mxu0 %v1969_v1  ;;  %v1940_v24 = vld [vmem:[%s2372_s1 + $0x218] sm:$0xff]  }
  0x26   : > { %1725 = vmatprep.subr.bf16.mxu1 %v1969_v1 }
  0x27   : > { %1682 = vmatmul.mubr.bf16.vlgmr.msra.gmra.mrb[0].mxu0 %v285_v25  ;;  %v1941_v25 = vld [vmem:[%s2372_s1 + $0x220] sm:$0xff]  }
  0x28   : > { %1702 = vmatmul.mubr.bf16.vlgmr.msra.gmra.mrb[0].mxu1 %v242_v20  ;;  %1706 = vmatpush3.bf16.msra.mxu0 %v1889_v26  ;;  %v1936_v20 = vld [vmem:[%s2372_s1 + $0x1f8] sm:$0xff]   ;;  %v1942_v26 = vld [vmem:[%s2372_s1 + $0x228] sm:$0xff]  }
  0x29   : > { %1726 = vmatpush3.bf16.msra.mxu1 %v1890_v27  ;;  %1707 = vmatprep.subr.bf16.mxu0 %v1969_v1  ;;  %v1943_v27 = vld [vmem:[%s2372_s1 + $0x230] sm:$0xff]  }
  0x2a   : > { %1727 = vmatprep.subr.bf16.mxu1 %v1969_v1  ;;  %1721 = vmatprep.mubr.msk.bf16.mxu0 %vm1970_vm0, %v1969_v1 }
  0x2b   : > { %1741 = vmatprep.mubr.msk.bf16.mxu1 %vm1970_vm0, %v1969_v1 }
  0x2c   : > { %1708 = vmatpush3.bf16.msra.mxu0 %v1891_v28  ;;  %v1944_v28 = vld [vmem:[%s2372_s1 + $0x238] sm:$0xff]  }
  0x2d   : > { %1728 = vmatpush3.bf16.msra.mxu1 %v1892_v29  ;;  %1709 = vmatprep.subr.bf16.mxu0 %v1969_v1  ;;  %v1573_v29 = vld.sshfl [vmem:[%s2076_s24 + $0x4] sm:$0x2 pattern:$0x76325410] }
  0x2e   : > { %1729 = vmatprep.subr.bf16.mxu1 %v1969_v1 }
  0x30   : > { %1710 = vmatpush3.bf16.msra.mxu0 %v1893_v30  ;;  %v1180_v30 = vrot.slane %v1573_v29, 1 }
  0x31   : > { %1730 = vmatpush3.bf16.msra.mxu1 %v1894_v31  ;;  %1711 = vmatprep.subr.bf16.mxu0 %v1969_v1 }
  0x32   : > { %1731 = vmatprep.subr.bf16.mxu1 %v1969_v1 }
  0x34   : > { %1712 = vmatpush3.bf16.msra.mxu0 %v1895_v32 }
  0x35   : > { %1732 = vmatpush3.bf16.msra.mxu1 %v1896_v33  ;;  %1713 = vmatprep.subr.bf16.mxu0 %v1969_v1 }
  0x36   : > { %1733 = vmatprep.subr.bf16.mxu1 %v1969_v1 }
  0x38   : > { %1714 = vmatpush3.bf16.msra.mxu0 %v1897_v34 }
  0x39   : > { %1734 = vmatpush3.bf16.msra.mxu1 %v1898_v35  ;;  %1715 = vmatprep.subr.bf16.mxu0 %v1969_v1 }
  0x3a   : > { %1735 = vmatprep.subr.bf16.mxu1 %v1969_v1 }
  0x3c   : > { %1716 = vmatpush3.bf16.msra.mxu0 %v1899_v36 }
  0x3d   : > { %1736 = vmatpush3.bf16.msra.mxu1 %v1900_v37  ;;  %1717 = vmatprep.subr.bf16.mxu0 %v1969_v1 }
  0x3e   : > { %1737 = vmatprep.subr.bf16.mxu1 %v1969_v1 }
  0x40   : > { %1718 = vmatpush3.bf16.msra.mxu0 %v1901_v38 }
  0x41   : > { %1738 = vmatpush3.bf16.msra.mxu1 %v1902_v39  ;;  %1719 = vmatprep.subr.bf16.mxu0 %v1969_v1 }
  0x42   : > { %1739 = vmatprep.subr.bf16.mxu1 %v1969_v1 }
  0x44   : > { %1720 = vmatpush3.bf16.msra.mxu0 %v1903_v41 }
  0x45   : > { %1740 = vmatpush3.bf16.msra.mxu1 %v1904_v42  ;;  %1745 = vmatprep.subr.bf16.mxu0 %v1969_v1 }
  0x46   : > { %1765 = vmatprep.subr.bf16.mxu1 %v1969_v1 }
  0x47   : > { %1722 = vmatmul.mubr.bf16.vlgmr.msra.gmra.mrb[4].mxu0 %v490_v43 }
  0x48   : > { %1746 = vmatpush3.bf16.msra.mxu0 %v1905_v44  ;;  %1742 = vmatmul.mubr.bf16.vlgmr.msra.gmra.mrb[4].mxu1 %v1432_v45 }
  0x49   : > { %1766 = vmatpush3.bf16.msra.mxu1 %v1906_v46  ;;  %1747 = vmatprep.subr.bf16.mxu0 %v1969_v1 }
  0x4a   : > { %1767 = vmatprep.subr.bf16.mxu1 %v1969_v1  ;;  %1761 = vmatprep.mubr.msk.bf16.mxu0 %vm1970_vm0, %v1969_v1 }
  0x4b   : > { %1781 = vmatprep.mubr.msk.bf16.mxu1 %vm1970_vm0, %v1969_v1 }
  0x4c   : > { %1748 = vmatpush3.bf16.msra.mxu0 %v1907_v47 }
  0x4d   : > { %1768 = vmatpush3.bf16.msra.mxu1 %v1908_v49  ;;  %1749 = vmatprep.subr.bf16.mxu0 %v1969_v1 }
  0x4e   : > { %1769 = vmatprep.subr.bf16.mxu1 %v1969_v1 }
  0x50   : > { %1750 = vmatpush3.bf16.msra.mxu0 %v1909_v51 }
  0x51   : > { %1770 = vmatpush3.bf16.msra.mxu1 %v1910_v52  ;;  %1751 = vmatprep.subr.bf16.mxu0 %v1969_v1 }
  0x52   : > { %1771 = vmatprep.subr.bf16.mxu1 %v1969_v1 }
  0x54   : > { %1752 = vmatpush3.bf16.msra.mxu0 %v1911_v53 }
  0x55   : > { %1772 = vmatpush3.bf16.msra.mxu1 %v1912_v54  ;;  %1753 = vmatprep.subr.bf16.mxu0 %v1969_v1 }
  0x56   : > { %1773 = vmatprep.subr.bf16.mxu1 %v1969_v1 }
  0x58   : > { %1754 = vmatpush3.bf16.msra.mxu0 %v1913_v55 }
  0x59   : > { %1774 = vmatpush3.bf16.msra.mxu1 %v1914_v56  ;;  %1755 = vmatprep.subr.bf16.mxu0 %v1969_v1 }
  0x5a   : > { %1775 = vmatprep.subr.bf16.mxu1 %v1969_v1 }
  0x5c   : > { %1756 = vmatpush3.bf16.msra.mxu0 %v1915_v57 }
  0x5d   : > { %1776 = vmatpush3.bf16.msra.mxu1 %v1916_v58  ;;  %1757 = vmatprep.subr.bf16.mxu0 %v1969_v1 }
  0x5e   : > { %1777 = vmatprep.subr.bf16.mxu1 %v1969_v1 }
  0x60   : > { %1758 = vmatpush3.bf16.msra.mxu0 %v1917_v59 }
  0x61   : > { %1778 = vmatpush3.bf16.msra.mxu1 %v1918_v60  ;;  %1759 = vmatprep.subr.bf16.mxu0 %v1969_v1 }
  0x62   : > { %1779 = vmatprep.subr.bf16.mxu1 %v1969_v1 }
  0x64   : > { %1760 = vmatpush3.bf16.msra.mxu0 %v1919_v62 }
  0x65   : > { %1780 = vmatpush3.bf16.msra.mxu1 %v1920_v63  ;;  %1785 = vmatprep.subr.bf16.mxu0 %v1969_v1 }
  0x66   : > { %1805 = vmatprep.subr.bf16.mxu1 %v1969_v1 }
  0x67   : > { %1762 = vmatmul.mubr.bf16.vlgmr.msra.gmra.mrb[8].mxu0 %v717_v2 }
  0x68   : > { %1786 = vmatpush3.bf16.msra.mxu0 %v1921_v3  ;;  %1782 = vmatmul.mubr.bf16.vlgmr.msra.gmra.mrb[8].mxu1 %v835_v4 }
  0x69   : > { %1806 = vmatpush3.bf16.msra.mxu1 %v1922_v5  ;;  %1787 = vmatprep.subr.bf16.mxu0 %v1969_v1 }
  0x6a   : > { %1807 = vmatprep.subr.bf16.mxu1 %v1969_v1  ;;  %1801 = vmatprep.mubr.msk.bf16.mxu0 %vm1970_vm0, %v1969_v1 }
  0x6b   : > { %1821 = vmatprep.mubr.msk.bf16.mxu1 %vm1970_vm0, %v1969_v1 }
  0x6c   : > { %1788 = vmatpush3.bf16.msra.mxu0 %v1923_v6  ;;  %v1273_v6 = vld [vmem:[%s232_s19] sm:$0x1] }
  0x6d   : > { %1808 = vmatpush3.bf16.msra.mxu1 %v1924_v7  ;;  %1789 = vmatprep.subr.bf16.mxu0 %v1969_v1 }
  0x6e   : > { %1809 = vmatprep.subr.bf16.mxu1 %v1969_v1 }
  0x70   : > { %1790 = vmatpush3.bf16.msra.mxu0 %v1925_v8  ;;  %v1271_v8 = vld [vmem:[%s2373_s2] sm:$0x1] }
  0x71   : > { %1810 = vmatpush3.bf16.msra.mxu1 %v1926_v9  ;;  %1791 = vmatprep.subr.bf16.mxu0 %v1969_v1 }
  0x72   : > { %1811 = vmatprep.subr.bf16.mxu1 %v1969_v1 }
  0x74   : > { %1792 = vmatpush3.bf16.msra.mxu0 %v1927_v10  ;;  %v1274_v10 = vunpack.c.l.bf16 %v1273_v6 }
  0x75   : > { %1812 = vmatpush3.bf16.msra.mxu1 %v1928_v11  ;;  %1793 = vmatprep.subr.bf16.mxu0 %v1969_v1 }
  0x76   : > { %1813 = vmatprep.subr.bf16.mxu1 %v1969_v1 }
  0x78   : > { %1794 = vmatpush3.bf16.msra.mxu0 %v1929_v12 }
  0x79   : > { %1814 = vmatpush3.bf16.msra.mxu1 %v1930_v13  ;;  %1795 = vmatprep.subr.bf16.mxu0 %v1969_v1 }
  0x7a   : > { %1815 = vmatprep.subr.bf16.mxu1 %v1969_v1 }
  0x7c   : > { %1796 = vmatpush3.bf16.msra.mxu0 %v1931_v14 }
  0x7d   : > { %1816 = vmatpush3.bf16.msra.mxu1 %v1932_v15  ;;  %1797 = vmatprep.subr.bf16.mxu0 %v1969_v1 }
  0x7e   : > { %1817 = vmatprep.subr.bf16.mxu1 %v1969_v1 }
  0x80   : > { %1798 = vmatpush3.bf16.msra.mxu0 %v1933_v16 }
  0x81   : > { %1818 = vmatpush3.bf16.msra.mxu1 %v1934_v17  ;;  %1799 = vmatprep.subr.bf16.mxu0 %v1969_v1  ;;  %v1281_v17 = vld [vmem:[%s238_s25] sm:$0x1] }
  0x82   : > { %1819 = vmatprep.subr.bf16.mxu1 %v1969_v1 }
  0x84   : > { %1800 = vmatpush3.bf16.msra.mxu0 %v1935_v18 }
  0x85   : > { %1820 = vmatpush3.bf16.msra.mxu1 %v1936_v20  ;;  %1825 = vmatprep.subr.bf16.mxu0 %v1969_v1 }
  0x87   : > { %1802 = vmatmul.mubr.bf16.vlgmr.msra.gmra.mrb[12].mxu0 %v2181_v48 }
  0x88   : > { %1826 = vmatpush3.bf16.msra.mxu0 %v1937_v22  ;;  %1822 = vmatmul.mubr.bf16.vlgmr.msra.gmra.mrb[12].mxu1 %v1062_v21 }
  0x89   : > { %1827 = vmatprep.subr.bf16.mxu0 %v1969_v1  ;;  %1841 = vmatprep.mubr.msk.bf16.mxu0 %vm1970_vm0, %v1969_v1 }
  0x8c   : > { %1828 = vmatpush3.bf16.msra.mxu0 %v1938_v23 }
  0x8d   : > { %1829 = vmatprep.subr.bf16.mxu0 %v1969_v1 }
  0x90   : > { %1830 = vmatpush3.bf16.msra.mxu0 %v1939_v19 }
  0x91   : > { %1831 = vmatprep.subr.bf16.mxu0 %v1969_v1 }
  0x94   : > { %1832 = vmatpush3.bf16.msra.mxu0 %v1940_v24 }
  0x95   : > { %1833 = vmatprep.subr.bf16.mxu0 %v1969_v1 }
  0x98   : > { %1834 = vmatpush3.bf16.msra.mxu0 %v1941_v25 }
  0x99   : > { %1835 = vmatprep.subr.bf16.mxu0 %v1969_v1 }
  0x9c   : > { %1836 = vmatpush3.bf16.msra.mxu0 %v1942_v26 }
  0x9d   : > { %1837 = vmatprep.subr.bf16.mxu0 %v1969_v1 }
  0xa0   : > { %1838 = vmatpush3.bf16.msra.mxu0 %v1943_v27 }
  0xa1   : > { %1839 = vmatprep.subr.bf16.mxu0 %v1969_v1 }
  0xa4   : > { %1840 = vmatpush3.bf16.msra.mxu0 %v1944_v28 }
  0xa7   : > { %1842 = vmatmul.mubr.bf16.vlgmr.msra.gmra.mrb[16].mxu0 %v1180_v30 }
  0xfa   : > { %v370_v31 = vpop.f32.mrb[0].mxu0 }
  0xfb   : > { %v1683_v32 = vpop.f32.mrb[1].mxu0  ;;  %v458_v33 = vpop.f32.mrb[0].mxu1 }
  0xfc   : > { %v459_v34 = vadd.f32 %v458_v33, %v370_v31  ;;  %v373_v35 = vpop.f32.mrb[2].mxu0  ;;  %v1703_v36 = vpop.f32.mrb[1].mxu1 }
  0xfd   : > { %v1684_v37 = vpop.f32.mrb[3].mxu0  ;;  %v461_v38 = vpop.f32.mrb[2].mxu1 }
  0xfe   : > { %v1704_v39 = vpop.f32.mrb[3].mxu1 }
 0x11a   : > { %v574_v40 = vpop.f32.mrb[4].mxu0 }
 0x11b   : > { %v580_v41 = vadd.f32 %v574_v40, %v459_v34  ;;  %v1723_v42 = vpop.f32.mrb[5].mxu0  ;;  %v684_v43 = vpop.f32.mrb[4].mxu1 }
 0x11c   : > { %v577_v44 = vpop.f32.mrb[6].mxu0  ;;  %v1743_v45 = vpop.f32.mrb[5].mxu1 }
 0x11d   : > { %v690_v46 = vadd.f32 %v684_v43, %v580_v41  ;;  %v1724_v1 = vpop.f32.mrb[7].mxu0  ;;  %v687_v47 = vpop.f32.mrb[6].mxu1 }
 0x11e   : > { %v1744_v48 = vpop.f32.mrb[7].mxu1 }
 0x13a   : > { %v802_v49 = vpop.f32.mrb[8].mxu0 }
 0x13b   : > { %v808_v50 = vadd.f32 %v802_v49, %v690_v46  ;;  %v1763_v51 = vpop.f32.mrb[9].mxu0  ;;  %v919_v52 = vpop.f32.mrb[8].mxu1 }
 0x13c   : > { %v805_v53 = vpop.f32.mrb[10].mxu0  ;;  %v1783_v54 = vpop.f32.mrb[9].mxu1 }
 0x13d   : > { %v925_v55 = vadd.f32 %v919_v52, %v808_v50  ;;  %v1764_v56 = vpop.f32.mrb[11].mxu0  ;;  %v922_v57 = vpop.f32.mrb[10].mxu1 }
 0x13e   : > { %v1784_v58 = vpop.f32.mrb[11].mxu1 }
 0x15a   : > { %v1029_v59 = vpop.f32.mrb[12].mxu0 }
 0x15b   : > { %v1035_v60 = vadd.f32 %v1029_v59, %v925_v55  ;;  %v1803_v61 = vpop.f32.mrb[13].mxu0  ;;  %v1147_v62 = vpop.f32.mrb[12].mxu1 }
 0x15c   : > { %v1032_v63 = vpop.f32.mrb[14].mxu0  ;;  %v1823_v0 = vpop.f32.mrb[13].mxu1 }
 0x15d   : > { %v1153_v2 = vadd.f32 %v1147_v62, %v1035_v60  ;;  %v1804_v3 = vpop.f32.mrb[15].mxu0  ;;  %v1150_v4 = vpop.f32.mrb[14].mxu1 }
 0x15e   : > { %v1824_v5 = vpop.f32.mrb[15].mxu1 }
 0x17a   : > { %v1264_v7 = vpop.f32.mrb[16].mxu0 }
 0x17b   : > { %v1270_v9 = vadd.f32 %v1264_v7, %v1153_v2  ;;  %v1843_v11 = vpop.f32.mrb[17].mxu0 }
 0x17c   : > { %v1267_v12 = vpop.f32.mrb[18].mxu0 }
 0x17d   : > { %v1272_v13 = vadd.f32 %v1271_v8, %v1270_v9  ;;  %v1844_v14 = vpop.f32.mrb[19].mxu0 }
 0x17f   : > { %v1275_v15 = vadd.f32 %v1274_v10, %v1272_v13 }
 0x181   : > { %v1276_v16 = vmax.f32 %v1275_v15, 0.0 }
 0x183   : > { %v1277_v18 = vpack.c.bf16 %v1276_v16, %v1276_v16 }
 0x185   : > { %v1282_v20 = vsel %vm1280_vm3, %v1277_v18, %v1281_v17 }
 0x186   : > { %1283 = vst [vmem:[%s238_s25] sm:$0x1] %v1282_v20 }
 0x187 PF: > { %s14_s17 = sadd.s32 1, %s1967_s17   ;;  %s2376_s15 = smov %s1963_s16 }
 0x188   : > { %p11_p5 = scmp.ge.s32.totalorder %s14_s17, 4   ;;  %s2377_s16 = smov %s2379_s18 }
 0x18a   :  { %13 = sbr.rel (!%p11_p5) target bundleno = 2 (0x2), region = 80 }

</bundles_post_ra>
